<compile_context>
chip_gen: v5e
topology: v5e:2x2
jax: 0.10.0
libtpu: 0.0.40
codegen_flags: <defaults>
</compile_context>

<pallas_src>
import functools

import jax
import jax.numpy as jnp
from jax import lax
from jax.experimental import pallas as pl
from jax.experimental.pallas import tpu as pltpu


# ---------------------------------------------------------------------------
# Fused trilinear x2 upsample (align_corners=False) + channel concat
# + fused per-step BatchNorm partial statistics.
# ---------------------------------------------------------------------------
def _upsample_concat_kernel(Cx, Cs, Ctot, xm_ref, x0_ref, xp_ref, sk_ref,
                            out_ref, st_ref):
    f32 = jnp.float32
    xm = xm_ref[0, 0].astype(f32)          # source depth z-1 (clamped)
    x0 = x0_ref[0, 0].astype(f32)          # source depth z
    xp = xp_ref[0, 0].astype(f32)          # source depth z+1 (clamped)
    planes = (0.25 * xm + 0.75 * x0,       # output depth 2z
              0.75 * x0 + 0.25 * xp)       # output depth 2z+1

    xsum = jnp.zeros((1, Cx), f32)
    xsq = jnp.zeros((1, Cx), f32)

    for dz in range(2):
        xz = planes[dz]                                    # (Hin, Win, Cx)
        h_m = jnp.concatenate([xz[:1], xz[:-1]], axis=0)   # clamp-shifted
        h_p = jnp.concatenate([xz[1:], xz[-1:]], axis=0)
        rows = (0.25 * h_m + 0.75 * xz, 0.75 * xz + 0.25 * h_p)
        for ph in range(2):
            v = rows[ph]
            w_m = jnp.concatenate([v[:, :1], v[:, :-1]], axis=1)
            w_p = jnp.concatenate([v[:, 1:], v[:, -1:]], axis=1)
            cols = (0.25 * w_m + 0.75 * v, 0.75 * v + 0.25 * w_p)
            for pw in range(2):
                cv = cols[pw].astype(out_ref.dtype)
                # TODO(synk): a single full-tile store would need a lane
                # interleave of the x/skip channel groups (unaligned minor-dim
                # concat); kept as channel-sliced stores.
                out_ref[dz, :, ph, :, pw * Ctot:pw * Ctot + Cx] = cv
                cf = cv.astype(f32)
                xsum = xsum + jnp.sum(jnp.sum(cf, axis=0), axis=0,
                                      keepdims=True)
                xsq = xsq + jnp.sum(jnp.sum(cf * cf, axis=0), axis=0,
                                    keepdims=True)
        for pw in range(2):
            out_ref[dz, :, :, :, pw * Ctot + Cx:(pw + 1) * Ctot] = (
                sk_ref[dz, :, :, :, pw * Cs:(pw + 1) * Cs].astype(
                    out_ref.dtype))

    # Skip-channel partial stats (parity kept separate; folded in wrapper).
    sk = sk_ref[...].astype(f32)                     # (2, Hin, 2, Win, 2*Cs)
    s3 = jnp.sum(jnp.sum(jnp.sum(sk, axis=0), axis=0), axis=0)   # (Win, 2Cs)
    q3 = jnp.sum(jnp.sum(jnp.sum(sk * sk, axis=0), axis=0), axis=0)
    st_ref[0, 0:1, 0:Cx] = xsum
    st_ref[0, 1:2, 0:Cx] = xsq
    st_ref[0, 0:1, Cx:] = jnp.sum(s3, axis=0, keepdims=True)
    st_ref[0, 1:2, Cx:] = jnp.sum(q3, axis=0, keepdims=True)


def upsample2_concat(x, skip):
    """x: (N, Din, Hin, Win, Cx); skip: (N, 2Din, 2Hin, 2Win, Cs), NDHWC.
    Returns (concat(trilinear_x2(x), skip), per-channel (sum, sumsq))."""
    N, Din, Hin, Win, Cx = x.shape
    Dout, Hout, Wout = 2 * Din, 2 * Hin, 2 * Win
    Cs = skip.shape[-1]
    Ctot = Cx + Cs
    skip_r = skip.reshape(N * Dout, Hin, 2, Win, 2 * Cs)   # free relabel

    out, st = pl.pallas_call(
        functools.partial(_upsample_concat_kernel, Cx, Cs, Ctot),
        out_shape=(
            jax.ShapeDtypeStruct((N * Dout, Hin, 2, Win, 2 * Ctot), x.dtype),
            jax.ShapeDtypeStruct((N * Din, 2, Cx + 2 * Cs), jnp.float32),
        ),
        grid=(N, Din),                    # 2 output depths / step (merged src)
        in_specs=[
            pl.BlockSpec((1, 1, Hin, Win, Cx),
                         lambda n, z: (n, jnp.maximum(z - 1, 0), 0, 0, 0)),
            pl.BlockSpec((1, 1, Hin, Win, Cx),
                         lambda n, z: (n, z, 0, 0, 0)),
            pl.BlockSpec((1, 1, Hin, Win, Cx),
                         lambda n, z: (n, jnp.minimum(z + 1, Din - 1),
                                       0, 0, 0)),
            pl.BlockSpec((2, Hin, 2, Win, 2 * Cs),
                         lambda n, z: (n * Din + z, 0, 0, 0, 0)),
        ],
        out_specs=(
            pl.BlockSpec((2, Hin, 2, Win, 2 * Ctot),
                         lambda n, z: (n * Din + z, 0, 0, 0, 0)),
            pl.BlockSpec((1, 2, Cx + 2 * Cs),
                         lambda n, z: (n * Din + z, 0, 0)),
        ),
        compiler_params=pltpu.CompilerParams(
            dimension_semantics=("parallel", "parallel")),
    )(x, x, x, skip_r)

    u = out.reshape(N, Dout, Hout, Wout, Ctot)
    xs = jnp.sum(st[:, 0, :Cx], axis=0)
    xq = jnp.sum(st[:, 1, :Cx], axis=0)
    ss = jnp.sum(st[:, 0, Cx:], axis=0).reshape(2, Cs).sum(axis=0)
    sq = jnp.sum(st[:, 1, Cx:], axis=0).reshape(2, Cs).sum(axis=0)
    return u, (jnp.concatenate([xs, ss]), jnp.concatenate([xq, sq]))


# ---------------------------------------------------------------------------
# 3x3x3 "same" conv as an implicit GEMM on lane-folded (N, D, H, W*C) data.
# Optional fused BN affine, SiLU, residual (identity / 1x1x1 conv_r) and
# fused per-step BN statistics of the output.
# ---------------------------------------------------------------------------
def _conv_kernel(TD, D, H, WCin, WCout, apply_bn, has_res, silu, want_stats,
                 *refs):
    i = 0
    xm_ref, xlo_ref, xhi_ref = refs[i], refs[i + 1], refs[i + 2]
    i += 3
    if apply_bn:
        sc_ref, sh_ref = refs[i], refs[i + 1]
        i += 2
    if has_res:
        res_ref = refs[i]
        i += 1
    rhs_ref, b_ref = refs[i], refs[i + 1]
    i += 2
    out_ref = refs[i]
    i += 1
    st_ref = refs[i] if want_stats else None

    f32 = jnp.float32
    d0 = pl.program_id(1) * TD
    if apply_bn:
        scale = sc_ref[...]
        shift = sh_ref[...]

    def prep(slab, valid=None):
        s = slab.astype(f32)
        if apply_bn:
            s = s * scale + shift              # affine BEFORE zero padding
        if valid is not None:
            s = jnp.where(valid, s, 0.0)       # D halo outside tensor -> 0
        return s

    # TD + 2 depth slabs (one TD-deep main block + 2 clamped halo slabs).
    slabs = [prep(xlo_ref[0, 0], d0 >= 1)]
    for t in range(TD):
        slabs.append(prep(xm_ref[0, t]))
    slabs.append(prep(xhi_ref[0, 0], d0 + TD <= D - 1))

    # Depth-tap stacks: stack[kd] row (t*H + h) holds input depth d0+t+kd-1.
    stacks = [jnp.concatenate([slabs[t + kd] for t in range(TD)], axis=0)
              for kd in range(3)]                        # each (TD*H, WCin)

    M = TD * H
    hpos = lax.broadcasted_iota(jnp.int32, (M, WCin), 0) % H
    zpad = jnp.zeros((8, WCin), f32)                     # 8-row aligned pad

    kblocks = []
    for kd in range(3):
        s = stacks[kd]
        ext = jnp.concatenate([zpad, s, zpad], axis=0)   # aligned sublane cat
        up = jnp.where(hpos >= 1, ext[7:7 + M], 0.0)     # input row h-1
        dn = jnp.where(hpos <= H - 2, ext[9:9 + M], 0.0)  # input row h+1
        kblocks += [up.astype(jnp.bfloat16), s.astype(jnp.bfloat16),
                    dn.astype(jnp.bfloat16)]
    if has_res:
        r = res_ref[0]                                   # (TD, H, W*Cres)
        kblocks.append(r.reshape(M, r.shape[-1]).astype(jnp.bfloat16))

    # Register-assembled LHS (all block widths are 128-aligned here) + one
    # MXU matmul per grid step; f32 accumulation; lane-dense output.
    lhs = jnp.concatenate(kblocks, axis=-1)              # (TD*H, Ktot) bf16
    acc = jnp.dot(lhs, rhs_ref[...],
                  preferred_element_type=f32) + b_ref[...]
    if silu:
        acc = acc * jax.nn.sigmoid(acc)

    ob = acc.astype(out_ref.dtype)
    out_ref[0] = ob                                      # (TD*H, W*Cout)
    if want_stats:
        of = ob.astype(f32)
        st_ref[0, 0:1, :] = jnp.sum(of, axis=0, keepdims=True)
        st_ref[0, 1:2, :] = jnp.sum(of * of, axis=0, keepdims=True)


def _build_rhs(w, W, Cin, Cout, res_w, res_C):
    """Structured implicit-GEMM RHS: (9*W*Cin [+ W*Cres], W*Cout) bf16.
    Encodes the kw taps + W zero padding; optional residual block."""
    wi = jnp.arange(W)[:, None]
    wo = jnp.arange(W)[None, :]
    kw = wi - wo + 1
    valid = ((kw >= 0) & (kw < 3)).astype(w.dtype)
    kwc = jnp.clip(kw, 0, 2)
    blocks = []
    for kd in range(3):
        for kh in range(3):
            sel = w[kd, kh][kwc]                         # (W, W, Cin, Cout)
            sel = sel * valid[:, :, None, None]
            sel = jnp.transpose(sel, (0, 2, 1, 3)).reshape(W * Cin, W * Cout)
            blocks.append(sel)
    if res_w is not None:
        eye = jnp.eye(W, dtype=w.dtype)
        rblk = (eye[:, None, :, None] * res_w[None, :, None, :]).reshape(
            W * res_C, W * Cout)
        blocks.append(rblk)
    rhs = jnp.concatenate(blocks, axis=0).astype(jnp.bfloat16)
    return rhs, rhs.shape[0]


def conv3x3x3(x_f, w, b, *, W, Cin, Cout, bn_scale=None, bn_shift=None,
              silu=False, res_src_f=None, res_C=None, res_w=None, res_b=None,
              want_stats=False, out_dtype=jnp.bfloat16):
    """x_f: folded (N, D, H, W*Cin).  Returns (folded output, stats or None)."""
    N, D, H, WC = x_f.shape
    assert WC == W * Cin
    WCout = W * Cout
    apply_bn = bn_scale is not None
    has_res = res_src_f is not None

    rhs, Ktot = _build_rhs(w, W, Cin, Cout, res_w if has_res else None,
                           res_C if has_res else 0)
    bias = b.astype(jnp.float32)
    if has_res:
        bias = bias + res_b.astype(jnp.float32)
    bias_row = jnp.tile(bias[None, :], (1, W))           # (1, W*Cout)

    # Depth tile sizing against an explicit VMEM budget (v7x: 64 MiB phys).
    def est_bytes(td):
        m = td * H
        e = 2 * 2 * (td + 2) * H * WC                    # in + halos, dbl buf
        e += 2 * 2 * m * WCout                           # out blocks, dbl buf
        e += 2 * Ktot * WCout * 2                        # rhs (dbl buffered)
        e += m * Ktot * 2 + m * WCout * 4                # lhs + f32 acc
        e += 4 * m * WC * 4                              # f32 slab temporaries
        if has_res:
            e += 2 * 2 * td * H * W * res_C
        return e

    TD = 1
    for cand in (4, 2, 1):
        if D % cand == 0 and est_bytes(cand) <= 40 * 1024 * 1024:
            TD = cand
            break
    vmem_limit = int(min(64 * 1024 * 1024,
                         max(32 * 1024 * 1024, 2 * est_bytes(TD))))
    nD = D // TD

    inputs = [x_f, x_f, x_f]
    in_specs = [
        pl.BlockSpec((1, TD, H, WC), lambda n, d: (n, d, 0, 0)),
        pl.BlockSpec((1, 1, H, WC),
                     lambda n, d: (n, jnp.maximum(d * TD - 1, 0), 0, 0)),
        pl.BlockSpec((1, 1, H, WC),
                     lambda n, d: (n, jnp.minimum(d * TD + TD, D - 1), 0, 0)),
    ]
    if apply_bn:
        inputs += [jnp.tile(bn_scale.astype(jnp.float32)[None, :], (1, W)),
                   jnp.tile(bn_shift.astype(jnp.float32)[None, :], (1, W))]
        in_specs += [pl.BlockSpec((1, WC), lambda n, d: (0, 0))] * 2
    if has_res:
        inputs.append(res_src_f)
        in_specs.append(pl.BlockSpec((1, TD, H, W * res_C),
                                     lambda n, d: (n, d, 0, 0)))
    inputs += [rhs, bias_row]
    in_specs += [pl.BlockSpec((Ktot, WCout), lambda n, d: (0, 0)),
                 pl.BlockSpec((1, WCout), lambda n, d: (0, 0))]

    out_shape = jax.ShapeDtypeStruct((N, D * H, WCout), out_dtype)
    out_spec = pl.BlockSpec((1, TD * H, WCout), lambda n, d: (n, d, 0))
    if want_stats:
        out_shape = (out_shape,
                     jax.ShapeDtypeStruct((N * nD, 2, WCout), jnp.float32))
        out_spec = (out_spec,
                    pl.BlockSpec((1, 2, WCout),
                                 lambda n, d: (n * nD + d, 0, 0)))

    flops = 2 * N * D * H * Ktot * WCout
    bytes_accessed = int(x_f.size * x_f.dtype.itemsize * (TD + 2) // TD
                         + N * D * H * WCout * 2
                         + (res_src_f.size * 2 if has_res else 0)
                         + Ktot * WCout * 2 * N * nD)

    kernel = functools.partial(_conv_kernel, TD, D, H, WC, WCout, apply_bn,
                               has_res, silu, want_stats)
    result = pl.pallas_call(
        kernel,
        out_shape=out_shape,
        grid=(N, nD),
        in_specs=in_specs,
        out_specs=out_spec,
        compiler_params=pltpu.CompilerParams(
            dimension_semantics=("parallel", "parallel"),
            vmem_limit_bytes=vmem_limit),
        cost_estimate=pl.CostEstimate(
            flops=int(flops),
            transcendentals=int(N * D * H * WCout) if silu else 0,
            bytes_accessed=bytes_accessed),
    )(*inputs)

    if want_stats:
        y, st = result
        s = st[:, 0, :].sum(axis=0).reshape(W, Cout).sum(axis=0)
        q = st[:, 1, :].sum(axis=0).reshape(W, Cout).sum(axis=0)
        stats = (s, q)
    else:
        y, stats = result, None
    return y.reshape(N, D, H, WCout), stats


# ---------------------------------------------------------------------------
# Standalone lane-wide channel statistics (used only for skip tensors).
# ---------------------------------------------------------------------------
def _stats_kernel(x_ref, out_ref):
    x = x_ref[...].astype(jnp.float32)
    out_ref[0, 0:1, :] = jnp.sum(x, axis=0, keepdims=True)
    out_ref[0, 1:2, :] = jnp.sum(x * x, axis=0, keepdims=True)


def channel_stats(x):
    """x: (..., C) NDHWC.  Returns per-channel (sum, sumsq) in f32."""
    C = x.shape[-1]
    M = x.size // C
    G = max(1, 128 // C)                        # fold G rows into the lanes
    while G > 1 and M % G:
        G //= 2
    Mr = M // G
    xr = x.reshape(Mr, G * C)
    TM = min(1024, Mr)
    while Mr % TM:
        TM //= 2
    if Mr // TM > 1 and TM % 8 != 0:
        TM = Mr
    nblk = Mr // TM

    part = pl.pallas_call(
        _stats_kernel,
        out_shape=jax.ShapeDtypeStruct((nblk, 2, G * C), jnp.float32),
        grid=(nblk,),
        in_specs=[pl.BlockSpec((TM, G * C), lambda i: (i, 0))],
        out_specs=pl.BlockSpec((1, 2, G * C), lambda i: (i, 0, 0)),
        compiler_params=pltpu.CompilerParams(
            dimension_semantics=("parallel",)),
    )(xr)
    s = part[:, 0, :].sum(axis=0).reshape(G, C).sum(axis=0)
    q = part[:, 1, :].sum(axis=0).reshape(G, C).sum(axis=0)
    return s, q


def bn_scale_shift_from_stats(stats, count, gamma, beta, eps=1e-5):
    """Per-channel (scale, shift) so BN_train(x) == x*scale + shift."""
    # TODO(synk): running_mean/running_var updates of nn.BatchNorm3d are not
    # modelled (forward output only).
    s, q = stats
    mean = s / count
    # NOTE: E[x^2]-E[x]^2 in f32 can cancel for huge M; fine at these sizes.
    var = jnp.maximum(q / count - mean * mean, 0.0)      # biased (train) var
    scale = gamma.astype(jnp.float32) / jnp.sqrt(var + eps)
    shift = beta.astype(jnp.float32) - mean * scale
    return scale, shift


# ---------------------------------------------------------------------------
# Module: parameter init + forward
# ---------------------------------------------------------------------------
def init_residual_block_params(key, input_dim, output_dim):
    keys = jax.random.split(key, 8)
    p = {}
    if input_dim != output_dim:
        p["conv_r_w"] = 0.05 * jax.random.normal(keys[0], (input_dim, output_dim), jnp.float32)
        p["conv_r_b"] = 0.05 * jax.random.normal(keys[1], (output_dim,), jnp.float32)
    else:
        p["conv_r_w"] = None
        p["conv_r_b"] = None
    p["bn_gamma"] = 1.0 + 0.1 * jax.random.normal(keys[2], (input_dim,), jnp.float32)
    p["bn_beta"] = 0.1 * jax.random.normal(keys[3], (input_dim,), jnp.float32)
    p["conv1_w"] = 0.05 * jax.random.normal(keys[4], (3, 3, 3, input_dim, output_dim), jnp.float32)
    p["conv1_b"] = 0.05 * jax.random.normal(keys[5], (output_dim,), jnp.float32)
    p["conv2_w"] = 0.05 * jax.random.normal(keys[6], (3, 3, 3, output_dim, output_dim), jnp.float32)
    p["conv2_b"] = 0.05 * jax.random.normal(keys[7], (output_dim,), jnp.float32)
    return p


def init_upblock_params(key, input_dims, output_dim):
    keys = jax.random.split(key, len(input_dims))
    return {"rbs": [init_residual_block_params(k, c, output_dim)
                    for k, c in zip(keys, input_dims)]}


def residual_block_forward(p, x_f, x_stats, dims, want_stats):
    """x_f: folded (N, D, H, W*Cin) bf16; x_stats: per-channel (sum, sumsq)."""
    N, D, H, W, Cin, Cout = dims
    count = N * D * H * W
    scale, shift = bn_scale_shift_from_stats(x_stats, count,
                                             p["bn_gamma"], p["bn_beta"])
    # conv1 with fused BN affine + SiLU.
    h_f, _ = conv3x3x3(x_f, p["conv1_w"], p["conv1_b"], W=W, Cin=Cin,
                       Cout=Cout, bn_scale=scale, bn_shift=shift, silu=True)
    # conv2 with residual (identity or conv_r) folded into the same matmul.
    if p["conv_r_w"] is not None:
        rw, rb = p["conv_r_w"], p["conv_r_b"]
    else:
        rw = jnp.eye(Cout, dtype=jnp.float32)      # identity residual
        rb = jnp.zeros((Cout,), jnp.float32)
    y_f, y_stats = conv3x3x3(h_f, p["conv2_w"], p["conv2_b"], W=W, Cin=Cout,
                             Cout=Cout, res_src_f=x_f, res_C=Cin, res_w=rw,
                             res_b=rb, want_stats=want_stats)
    return y_f, y_stats


def upblock_forward(params, x_ncdhw, xd_ncdhw, scale=2):
    """PyTorch-equivalent UpBlock.forward. Inputs/outputs are NCDHW."""
    assert scale == 2, "specialized to trilinear scale_factor=2"
    cdt = jnp.bfloat16
    # TODO(synk): boundary NCDHW<->NDHWC transposes left to XLA.
    x = jnp.transpose(x_ncdhw, (0, 2, 3, 4, 1)).astype(cdt)
    skip0 = jnp.transpose(xd_ncdhw[-1], (0, 2, 3, 4, 1)).astype(cdt)

    u, u_stats = upsample2_concat(x, skip0)        # fused upsample+cat+stats
    N, D, H, W, C0 = u.shape
    out_dim = params["rbs"][0]["conv1_w"].shape[-1]

    y_f, cur_stats = residual_block_forward(
        params["rbs"][0], u.reshape(N, D, H, W * C0), u_stats,
        (N, D, H, W, C0, out_dim), want_stats=True)
    cur_C = out_dim

    for i in range(1, len(params["rbs"])):
        skip = jnp.transpose(xd_ncdhw[-i - 1], (0, 2, 3, 4, 1)).astype(cdt)
        Cs = skip.shape[-1]
        Cin = cur_C + Cs
        # TODO(synk): inter-block channel concat left to XLA (single pass).
        x_cat = jnp.concatenate(
            [y_f.reshape(N, D, H, W, cur_C), skip], axis=-1)
        ssum, ssq = channel_stats(skip)            # skip part of BN stats
        stats = (jnp.concatenate([cur_stats[0], ssum]),
                 jnp.concatenate([cur_stats[1], ssq]))
        want = (i + 1) < len(params["rbs"])
        y_f, cur_stats = residual_block_forward(
            params["rbs"][i], x_cat.reshape(N, D, H, W * Cin), stats,
            (N, D, H, W, Cin, out_dim), want_stats=want)
        cur_C = out_dim

    out = y_f.reshape(N, D, H, W, out_dim).astype(jnp.float32)
    return jnp.transpose(out, (0, 4, 1, 2, 3))     # NDHWC -> NCDHW


# ---------------------------------------------------------------------------
# Main
# ---------------------------------------------------------------------------
if __name__ == "__main__":
    key = jax.random.PRNGKey(0)
    k_x, k_xd0, k_xd1, k_p = jax.random.split(key, 4)

    # x : (N=2, C=4, D=4, H=8, W=8) -> upsampled to (2, 4, 8, 16, 16)
    # xd[-1] (4 ch) concat -> input_dims[0] = 8  (== output_dim -> identity)
    # xd[-2] (8 ch) concat -> input_dims[1] = 16 (!= output_dim -> conv_r)
    N, Cx, D, H, W = 2, 4, 4, 8, 8
    output_dim = 8
    input_dims = [Cx + 4, output_dim + 8]                  # [8, 16]

    x = jax.random.normal(k_x, (N, Cx, D, H, W), jnp.float32)
    xd = [
        jax.random.normal(k_xd0, (N, 8, 2 * D, 2 * H, 2 * W), jnp.float32),
        jax.random.normal(k_xd1, (N, 4, 2 * D, 2 * H, 2 * W), jnp.float32),
    ]
    params = init_upblock_params(k_p, input_dims, output_dim)

    fwd = jax.jit(upblock_forward)
    out = jax.block_until_ready(fwd(params, x, xd))

    assert out.shape == (N, output_dim, 2 * D, 2 * H, 2 * W), out.shape
    assert bool(jnp.all(jnp.isfinite(out)))
    print("KERNEL_OK")
</pallas_src>

<mosaic_0001>
module attributes {stable_mosaic.version = 11 : i64} {
  func.func @_upsample_concat_kernel(%arg0: i32, %arg1: i32, %arg2: memref<1x1x8x8x4xbf16, #tpu.memory_space<vmem>>, %arg3: memref<1x1x8x8x4xbf16, #tpu.memory_space<vmem>>, %arg4: memref<1x1x8x8x4xbf16, #tpu.memory_space<vmem>>, %arg5: memref<2x8x2x8x8xbf16, #tpu.memory_space<vmem>>, %arg6: memref<2x8x2x8x16xbf16, #tpu.memory_space<vmem>>, %arg7: memref<1x2x12xf32, #tpu.memory_space<vmem>>) attributes {dimension_semantics = [#tpu.dimension_semantics<parallel>, #tpu.dimension_semantics<parallel>], iteration_bounds = array<i64: 2, 4>, scalar_prefetch = 0 : i64, scratch_operands = 0 : i64, tpu.core_type = #tpu.core_type<tc>, window_params = [{transform_indices = @transform_0, window_bounds = array<i64: 1, 1, 8, 8, 4>}, {transform_indices = @transform_1, window_bounds = array<i64: 1, 1, 8, 8, 4>}, {transform_indices = @transform_2, window_bounds = array<i64: 1, 1, 8, 8, 4>}, {transform_indices = @transform_3, window_bounds = array<i64: 2, 8, 2, 8, 8>}, {transform_indices = @transform_4, window_bounds = array<i64: 2, 8, 2, 8, 16>}, {transform_indices = @transform_5, window_bounds = array<i64: 1, 2, 12>}]} {
    %c0 = arith.constant 0 : index
    %c0_0 = arith.constant 0 : index
    %c0_1 = arith.constant 0 : index
    %c0_2 = arith.constant 0 : index
    %c0_3 = arith.constant 0 : index
    %0 = vector.load %arg2[%c0, %c0_0, %c0_1, %c0_2, %c0_3] : memref<1x1x8x8x4xbf16, #tpu.memory_space<vmem>>, vector<1x1x8x8x4xbf16>
    %1 = vector.shape_cast %0 : vector<1x1x8x8x4xbf16> to vector<8x8x4xbf16>
    %2 = arith.extf %1 : vector<8x8x4xbf16> to vector<8x8x4xf32>
    %c0_4 = arith.constant 0 : index
    %c0_5 = arith.constant 0 : index
    %c0_6 = arith.constant 0 : index
    %c0_7 = arith.constant 0 : index
    %c0_8 = arith.constant 0 : index
    %3 = vector.load %arg3[%c0_4, %c0_5, %c0_6, %c0_7, %c0_8] : memref<1x1x8x8x4xbf16, #tpu.memory_space<vmem>>, vector<1x1x8x8x4xbf16>
    %4 = vector.shape_cast %3 : vector<1x1x8x8x4xbf16> to vector<8x8x4xbf16>
    %5 = arith.extf %4 : vector<8x8x4xbf16> to vector<8x8x4xf32>
    %c0_9 = arith.constant 0 : index
    %c0_10 = arith.constant 0 : index
    %c0_11 = arith.constant 0 : index
    %c0_12 = arith.constant 0 : index
    %c0_13 = arith.constant 0 : index
    %6 = vector.load %arg4[%c0_9, %c0_10, %c0_11, %c0_12, %c0_13] : memref<1x1x8x8x4xbf16, #tpu.memory_space<vmem>>, vector<1x1x8x8x4xbf16>
    %7 = vector.shape_cast %6 : vector<1x1x8x8x4xbf16> to vector<8x8x4xbf16>
    %8 = arith.extf %7 : vector<8x8x4xbf16> to vector<8x8x4xf32>
    %cst = arith.constant 2.500000e-01 : f32
    %9 = vector.broadcast %cst : f32 to vector<8x8x4xf32>
    %10 = arith.mulf %9, %2 : vector<8x8x4xf32>
    %cst_14 = arith.constant 7.500000e-01 : f32
    %11 = vector.broadcast %cst_14 : f32 to vector<8x8x4xf32>
    %12 = arith.mulf %11, %5 : vector<8x8x4xf32>
    %13 = arith.addf %10, %12 : vector<8x8x4xf32>
    %cst_15 = arith.constant 7.500000e-01 : f32
    %14 = vector.broadcast %cst_15 : f32 to vector<8x8x4xf32>
    %15 = arith.mulf %14, %5 : vector<8x8x4xf32>
    %cst_16 = arith.constant 2.500000e-01 : f32
    %16 = vector.broadcast %cst_16 : f32 to vector<8x8x4xf32>
    %17 = arith.mulf %16, %8 : vector<8x8x4xf32>
    %18 = arith.addf %15, %17 : vector<8x8x4xf32>
    %cst_17 = arith.constant 0.000000e+00 : f32
    %19 = vector.broadcast %cst_17 : f32 to vector<1x4xf32>
    %cst_18 = arith.constant 0.000000e+00 : f32
    %20 = vector.broadcast %cst_18 : f32 to vector<1x4xf32>
    %21 = vector.extract_strided_slice %13 {offsets = [0, 0, 0], sizes = [1, 8, 4], strides = [1, 1, 1]} : vector<8x8x4xf32> to vector<1x8x4xf32>
    %22 = vector.extract_strided_slice %13 {offsets = [0, 0, 0], sizes = [7, 8, 4], strides = [1, 1, 1]} : vector<8x8x4xf32> to vector<7x8x4xf32>
    %23 = tpu.concatenate %21, %22 in 0 : vector<1x8x4xf32>, vector<7x8x4xf32> -> vector<8x8x4xf32>
    %24 = vector.extract_strided_slice %13 {offsets = [1, 0, 0], sizes = [7, 8, 4], strides = [1, 1, 1]} : vector<8x8x4xf32> to vector<7x8x4xf32>
    %25 = vector.extract_strided_slice %13 {offsets = [7, 0, 0], sizes = [1, 8, 4], strides = [1, 1, 1]} : vector<8x8x4xf32> to vector<1x8x4xf32>
    %26 = tpu.concatenate %24, %25 in 0 : vector<7x8x4xf32>, vector<1x8x4xf32> -> vector<8x8x4xf32>
    %cst_19 = arith.constant 2.500000e-01 : f32
    %27 = vector.broadcast %cst_19 : f32 to vector<8x8x4xf32>
    %28 = arith.mulf %27, %23 : vector<8x8x4xf32>
    %cst_20 = arith.constant 7.500000e-01 : f32
    %29 = vector.broadcast %cst_20 : f32 to vector<8x8x4xf32>
    %30 = arith.mulf %29, %13 : vector<8x8x4xf32>
    %31 = arith.addf %28, %30 : vector<8x8x4xf32>
    %cst_21 = arith.constant 7.500000e-01 : f32
    %32 = vector.broadcast %cst_21 : f32 to vector<8x8x4xf32>
    %33 = arith.mulf %32, %13 : vector<8x8x4xf32>
    %cst_22 = arith.constant 2.500000e-01 : f32
    %34 = vector.broadcast %cst_22 : f32 to vector<8x8x4xf32>
    %35 = arith.mulf %34, %26 : vector<8x8x4xf32>
    %36 = arith.addf %33, %35 : vector<8x8x4xf32>
    %37 = vector.extract_strided_slice %31 {offsets = [0, 0, 0], sizes = [8, 1, 4], strides = [1, 1, 1]} : vector<8x8x4xf32> to vector<8x1x4xf32>
    %38 = vector.extract_strided_slice %31 {offsets = [0, 0, 0], sizes = [8, 7, 4], strides = [1, 1, 1]} : vector<8x8x4xf32> to vector<8x7x4xf32>
    %39 = tpu.concatenate %37, %38 in 1 : vector<8x1x4xf32>, vector<8x7x4xf32> -> vector<8x8x4xf32>
    %40 = vector.extract_strided_slice %31 {offsets = [0, 1, 0], sizes = [8, 7, 4], strides = [1, 1, 1]} : vector<8x8x4xf32> to vector<8x7x4xf32>
    %41 = vector.extract_strided_slice %31 {offsets = [0, 7, 0], sizes = [8, 1, 4], strides = [1, 1, 1]} : vector<8x8x4xf32> to vector<8x1x4xf32>
    %42 = tpu.concatenate %40, %41 in 1 : vector<8x7x4xf32>, vector<8x1x4xf32> -> vector<8x8x4xf32>
    %cst_23 = arith.constant 2.500000e-01 : f32
    %43 = vector.broadcast %cst_23 : f32 to vector<8x8x4xf32>
    %44 = arith.mulf %43, %39 : vector<8x8x4xf32>
    %cst_24 = arith.constant 7.500000e-01 : f32
    %45 = vector.broadcast %cst_24 : f32 to vector<8x8x4xf32>
    %46 = arith.mulf %45, %31 : vector<8x8x4xf32>
    %47 = arith.addf %44, %46 : vector<8x8x4xf32>
    %cst_25 = arith.constant 7.500000e-01 : f32
    %48 = vector.broadcast %cst_25 : f32 to vector<8x8x4xf32>
    %49 = arith.mulf %48, %31 : vector<8x8x4xf32>
    %cst_26 = arith.constant 2.500000e-01 : f32
    %50 = vector.broadcast %cst_26 : f32 to vector<8x8x4xf32>
    %51 = arith.mulf %50, %42 : vector<8x8x4xf32>
    %52 = arith.addf %49, %51 : vector<8x8x4xf32>
    %53 = arith.truncf %47 : vector<8x8x4xf32> to vector<8x8x4xbf16>
    %c0_27 = arith.constant 0 : index
    %c0_28 = arith.constant 0 : index
    %c0_29 = arith.constant 0 : index
    %c0_30 = arith.constant 0 : index
    %c0_31 = arith.constant 0 : index
    %54 = vector.load %arg6[%c0_27, %c0_28, %c0_29, %c0_30, %c0_31] : memref<2x8x2x8x16xbf16, #tpu.memory_space<vmem>>, vector<1x8x1x8x4xbf16>
    %55 = vector.shape_cast %54 : vector<1x8x1x8x4xbf16> to vector<8x8x4xbf16>
    %56 = vector.shape_cast %53 : vector<8x8x4xbf16> to vector<1x8x1x8x4xbf16>
    tpu.vector_store %arg6[%c0_27, %c0_28, %c0_29, %c0_30, %c0_31], %56 {strides = array<i32>} : memref<2x8x2x8x16xbf16, #tpu.memory_space<vmem>>, vector<1x8x1x8x4xbf16>,
    %57 = arith.extf %53 : vector<8x8x4xbf16> to vector<8x8x4xf32>
    %cst_32 = arith.constant dense<0.000000e+00> : vector<8x4xf32>
    %58 = vector.multi_reduction <add>, %57, %cst_32 [0] : vector<8x8x4xf32> to vector<8x4xf32>
    %cst_33 = arith.constant dense<0.000000e+00> : vector<4xf32>
    %59 = vector.multi_reduction <add>, %58, %cst_33 [0] : vector<8x4xf32> to vector<4xf32>
    %60 = vector.shape_cast %59 : vector<4xf32> to vector<1x4xf32>
    %61 = arith.addf %19, %60 : vector<1x4xf32>
    %62 = arith.mulf %57, %57 : vector<8x8x4xf32>
    %cst_34 = arith.constant dense<0.000000e+00> : vector<8x4xf32>
    %63 = vector.multi_reduction <add>, %62, %cst_34 [0] : vector<8x8x4xf32> to vector<8x4xf32>
    %cst_35 = arith.constant dense<0.000000e+00> : vector<4xf32>
    %64 = vector.multi_reduction <add>, %63, %cst_35 [0] : vector<8x4xf32> to vector<4xf32>
    %65 = vector.shape_cast %64 : vector<4xf32> to vector<1x4xf32>
    %66 = arith.addf %20, %65 : vector<1x4xf32>
    %67 = arith.truncf %52 : vector<8x8x4xf32> to vector<8x8x4xbf16>
    %c0_36 = arith.constant 0 : index
    %c0_37 = arith.constant 0 : index
    %c0_38 = arith.constant 0 : index
    %c0_39 = arith.constant 0 : index
    %c8 = arith.constant 8 : index
    %68 = vector.load %arg6[%c0_36, %c0_37, %c0_38, %c0_39, %c8] : memref<2x8x2x8x16xbf16, #tpu.memory_space<vmem>>, vector<1x8x1x8x4xbf16>
    %69 = vector.shape_cast %68 : vector<1x8x1x8x4xbf16> to vector<8x8x4xbf16>
    %70 = vector.shape_cast %67 : vector<8x8x4xbf16> to vector<1x8x1x8x4xbf16>
    tpu.vector_store %arg6[%c0_36, %c0_37, %c0_38, %c0_39, %c8], %70 {strides = array<i32>} : memref<2x8x2x8x16xbf16, #tpu.memory_space<vmem>>, vector<1x8x1x8x4xbf16>,
    %71 = arith.extf %67 : vector<8x8x4xbf16> to vector<8x8x4xf32>
    %cst_40 = arith.constant dense<0.000000e+00> : vector<8x4xf32>
    %72 = vector.multi_reduction <add>, %71, %cst_40 [0] : vector<8x8x4xf32> to vector<8x4xf32>
    %cst_41 = arith.constant dense<0.000000e+00> : vector<4xf32>
    %73 = vector.multi_reduction <add>, %72, %cst_41 [0] : vector<8x4xf32> to vector<4xf32>
    %74 = vector.shape_cast %73 : vector<4xf32> to vector<1x4xf32>
    %75 = arith.addf %61, %74 : vector<1x4xf32>
    %76 = arith.mulf %71, %71 : vector<8x8x4xf32>
    %cst_42 = arith.constant dense<0.000000e+00> : vector<8x4xf32>
    %77 = vector.multi_reduction <add>, %76, %cst_42 [0] : vector<8x8x4xf32> to vector<8x4xf32>
    %cst_43 = arith.constant dense<0.000000e+00> : vector<4xf32>
    %78 = vector.multi_reduction <add>, %77, %cst_43 [0] : vector<8x4xf32> to vector<4xf32>
    %79 = vector.shape_cast %78 : vector<4xf32> to vector<1x4xf32>
    %80 = arith.addf %66, %79 : vector<1x4xf32>
    %81 = vector.extract_strided_slice %36 {offsets = [0, 0, 0], sizes = [8, 1, 4], strides = [1, 1, 1]} : vector<8x8x4xf32> to vector<8x1x4xf32>
    %82 = vector.extract_strided_slice %36 {offsets = [0, 0, 0], sizes = [8, 7, 4], strides = [1, 1, 1]} : vector<8x8x4xf32> to vector<8x7x4xf32>
    %83 = tpu.concatenate %81, %82 in 1 : vector<8x1x4xf32>, vector<8x7x4xf32> -> vector<8x8x4xf32>
    %84 = vector.extract_strided_slice %36 {offsets = [0, 1, 0], sizes = [8, 7, 4], strides = [1, 1, 1]} : vector<8x8x4xf32> to vector<8x7x4xf32>
    %85 = vector.extract_strided_slice %36 {offsets = [0, 7, 0], sizes = [8, 1, 4], strides = [1, 1, 1]} : vector<8x8x4xf32> to vector<8x1x4xf32>
    %86 = tpu.concatenate %84, %85 in 1 : vector<8x7x4xf32>, vector<8x1x4xf32> -> vector<8x8x4xf32>
    %cst_44 = arith.constant 2.500000e-01 : f32
    %87 = vector.broadcast %cst_44 : f32 to vector<8x8x4xf32>
    %88 = arith.mulf %87, %83 : vector<8x8x4xf32>
    %cst_45 = arith.constant 7.500000e-01 : f32
    %89 = vector.broadcast %cst_45 : f32 to vector<8x8x4xf32>
    %90 = arith.mulf %89, %36 : vector<8x8x4xf32>
    %91 = arith.addf %88, %90 : vector<8x8x4xf32>
    %cst_46 = arith.constant 7.500000e-01 : f32
    %92 = vector.broadcast %cst_46 : f32 to vector<8x8x4xf32>
    %93 = arith.mulf %92, %36 : vector<8x8x4xf32>
    %cst_47 = arith.constant 2.500000e-01 : f32
    %94 = vector.broadcast %cst_47 : f32 to vector<8x8x4xf32>
    %95 = arith.mulf %94, %86 : vector<8x8x4xf32>
    %96 = arith.addf %93, %95 : vector<8x8x4xf32>
    %97 = arith.truncf %91 : vector<8x8x4xf32> to vector<8x8x4xbf16>
    %c0_48 = arith.constant 0 : index
    %c0_49 = arith.constant 0 : index
    %c1 = arith.constant 1 : index
    %c0_50 = arith.constant 0 : index
    %c0_51 = arith.constant 0 : index
    %98 = vector.load %arg6[%c0_48, %c0_49, %c1, %c0_50, %c0_51] : memref<2x8x2x8x16xbf16, #tpu.memory_space<vmem>>, vector<1x8x1x8x4xbf16>
    %99 = vector.shape_cast %98 : vector<1x8x1x8x4xbf16> to vector<8x8x4xbf16>
    %100 = vector.shape_cast %97 : vector<8x8x4xbf16> to vector<1x8x1x8x4xbf16>
    tpu.vector_store %arg6[%c0_48, %c0_49, %c1, %c0_50, %c0_51], %100 {strides = array<i32>} : memref<2x8x2x8x16xbf16, #tpu.memory_space<vmem>>, vector<1x8x1x8x4xbf16>,
    %101 = arith.extf %97 : vector<8x8x4xbf16> to vector<8x8x4xf32>
    %cst_52 = arith.constant dense<0.000000e+00> : vector<8x4xf32>
    %102 = vector.multi_reduction <add>, %101, %cst_52 [0] : vector<8x8x4xf32> to vector<8x4xf32>
    %cst_53 = arith.constant dense<0.000000e+00> : vector<4xf32>
    %103 = vector.multi_reduction <add>, %102, %cst_53 [0] : vector<8x4xf32> to vector<4xf32>
    %104 = vector.shape_cast %103 : vector<4xf32> to vector<1x4xf32>
    %105 = arith.addf %75, %104 : vector<1x4xf32>
    %106 = arith.mulf %101, %101 : vector<8x8x4xf32>
    %cst_54 = arith.constant dense<0.000000e+00> : vector<8x4xf32>
    %107 = vector.multi_reduction <add>, %106, %cst_54 [0] : vector<8x8x4xf32> to vector<8x4xf32>
    %cst_55 = arith.constant dense<0.000000e+00> : vector<4xf32>
    %108 = vector.multi_reduction <add>, %107, %cst_55 [0] : vector<8x4xf32> to vector<4xf32>
    %109 = vector.shape_cast %108 : vector<4xf32> to vector<1x4xf32>
    %110 = arith.addf %80, %109 : vector<1x4xf32>
    %111 = arith.truncf %96 : vector<8x8x4xf32> to vector<8x8x4xbf16>
    %c0_56 = arith.constant 0 : index
    %c0_57 = arith.constant 0 : index
    %c1_58 = arith.constant 1 : index
    %c0_59 = arith.constant 0 : index
    %c8_60 = arith.constant 8 : index
    %112 = vector.load %arg6[%c0_56, %c0_57, %c1_58, %c0_59, %c8_60] : memref<2x8x2x8x16xbf16, #tpu.memory_space<vmem>>, vector<1x8x1x8x4xbf16>
    %113 = vector.shape_cast %112 : vector<1x8x1x8x4xbf16> to vector<8x8x4xbf16>
    %114 = vector.shape_cast %111 : vector<8x8x4xbf16> to vector<1x8x1x8x4xbf16>
    tpu.vector_store %arg6[%c0_56, %c0_57, %c1_58, %c0_59, %c8_60], %114 {strides = array<i32>} : memref<2x8x2x8x16xbf16, #tpu.memory_space<vmem>>, vector<1x8x1x8x4xbf16>,
    %115 = arith.extf %111 : vector<8x8x4xbf16> to vector<8x8x4xf32>
    %cst_61 = arith.constant dense<0.000000e+00> : vector<8x4xf32>
    %116 = vector.multi_reduction <add>, %115, %cst_61 [0] : vector<8x8x4xf32> to vector<8x4xf32>
    %cst_62 = arith.constant dense<0.000000e+00> : vector<4xf32>
    %117 = vector.multi_reduction <add>, %116, %cst_62 [0] : vector<8x4xf32> to vector<4xf32>
    %118 = vector.shape_cast %117 : vector<4xf32> to vector<1x4xf32>
    %119 = arith.addf %105, %118 : vector<1x4xf32>
    %120 = arith.mulf %115, %115 : vector<8x8x4xf32>
    %cst_63 = arith.constant dense<0.000000e+00> : vector<8x4xf32>
    %121 = vector.multi_reduction <add>, %120, %cst_63 [0] : vector<8x8x4xf32> to vector<8x4xf32>
    %cst_64 = arith.constant dense<0.000000e+00> : vector<4xf32>
    %122 = vector.multi_reduction <add>, %121, %cst_64 [0] : vector<8x4xf32> to vector<4xf32>
    %123 = vector.shape_cast %122 : vector<4xf32> to vector<1x4xf32>
    %124 = arith.addf %110, %123 : vector<1x4xf32>
    %c0_65 = arith.constant 0 : index
    %c0_66 = arith.constant 0 : index
    %c0_67 = arith.constant 0 : index
    %c0_68 = arith.constant 0 : index
    %c0_69 = arith.constant 0 : index
    %125 = vector.load %arg5[%c0_65, %c0_66, %c0_67, %c0_68, %c0_69] : memref<2x8x2x8x8xbf16, #tpu.memory_space<vmem>>, vector<1x8x2x8x4xbf16>
    %126 = vector.shape_cast %125 : vector<1x8x2x8x4xbf16> to vector<8x2x8x4xbf16>
    %c0_70 = arith.constant 0 : index
    %c0_71 = arith.constant 0 : index
    %c0_72 = arith.constant 0 : index
    %c0_73 = arith.constant 0 : index
    %c4 = arith.constant 4 : index
    %127 = vector.load %arg6[%c0_70, %c0_71, %c0_72, %c0_73, %c4] : memref<2x8x2x8x16xbf16, #tpu.memory_space<vmem>>, vector<1x8x2x8x4xbf16>
    %128 = vector.shape_cast %127 : vector<1x8x2x8x4xbf16> to vector<8x2x8x4xbf16>
    %129 = vector.shape_cast %126 : vector<8x2x8x4xbf16> to vector<1x8x2x8x4xbf16>
    tpu.vector_store %arg6[%c0_70, %c0_71, %c0_72, %c0_73, %c4], %129 {strides = array<i32>} : memref<2x8x2x8x16xbf16, #tpu.memory_space<vmem>>, vector<1x8x2x8x4xbf16>,
    %c0_74 = arith.constant 0 : index
    %c0_75 = arith.constant 0 : index
    %c0_76 = arith.constant 0 : index
    %c0_77 = arith.constant 0 : index
    %c4_78 = arith.constant 4 : index
    %130 = vector.load %arg5[%c0_74, %c0_75, %c0_76, %c0_77, %c4_78] : memref<2x8x2x8x8xbf16, #tpu.memory_space<vmem>>, vector<1x8x2x8x4xbf16>
    %131 = vector.shape_cast %130 : vector<1x8x2x8x4xbf16> to vector<8x2x8x4xbf16>
    %c0_79 = arith.constant 0 : index
    %c0_80 = arith.constant 0 : index
    %c0_81 = arith.constant 0 : index
    %c0_82 = arith.constant 0 : index
    %c12 = arith.constant 12 : index
    %132 = vector.load %arg6[%c0_79, %c0_80, %c0_81, %c0_82, %c12] : memref<2x8x2x8x16xbf16, #tpu.memory_space<vmem>>, vector<1x8x2x8x4xbf16>
    %133 = vector.shape_cast %132 : vector<1x8x2x8x4xbf16> to vector<8x2x8x4xbf16>
    %134 = vector.shape_cast %131 : vector<8x2x8x4xbf16> to vector<1x8x2x8x4xbf16>
    tpu.vector_store %arg6[%c0_79, %c0_80, %c0_81, %c0_82, %c12], %134 {strides = array<i32>} : memref<2x8x2x8x16xbf16, #tpu.memory_space<vmem>>, vector<1x8x2x8x4xbf16>,
    %135 = vector.extract_strided_slice %18 {offsets = [0, 0, 0], sizes = [1, 8, 4], strides = [1, 1, 1]} : vector<8x8x4xf32> to vector<1x8x4xf32>
    %136 = vector.extract_strided_slice %18 {offsets = [0, 0, 0], sizes = [7, 8, 4], strides = [1, 1, 1]} : vector<8x8x4xf32> to vector<7x8x4xf32>
    %137 = tpu.concatenate %135, %136 in 0 : vector<1x8x4xf32>, vector<7x8x4xf32> -> vector<8x8x4xf32>
    %138 = vector.extract_strided_slice %18 {offsets = [1, 0, 0], sizes = [7, 8, 4], strides = [1, 1, 1]} : vector<8x8x4xf32> to vector<7x8x4xf32>
    %139 = vector.extract_strided_slice %18 {offsets = [7, 0, 0], sizes = [1, 8, 4], strides = [1, 1, 1]} : vector<8x8x4xf32> to vector<1x8x4xf32>
    %140 = tpu.concatenate %138, %139 in 0 : vector<7x8x4xf32>, vector<1x8x4xf32> -> vector<8x8x4xf32>
    %cst_83 = arith.constant 2.500000e-01 : f32
    %141 = vector.broadcast %cst_83 : f32 to vector<8x8x4xf32>
    %142 = arith.mulf %141, %137 : vector<8x8x4xf32>
    %cst_84 = arith.constant 7.500000e-01 : f32
    %143 = vector.broadcast %cst_84 : f32 to vector<8x8x4xf32>
    %144 = arith.mulf %143, %18 : vector<8x8x4xf32>
    %145 = arith.addf %142, %144 : vector<8x8x4xf32>
    %cst_85 = arith.constant 7.500000e-01 : f32
    %146 = vector.broadcast %cst_85 : f32 to vector<8x8x4xf32>
    %147 = arith.mulf %146, %18 : vector<8x8x4xf32>
    %cst_86 = arith.constant 2.500000e-01 : f32
    %148 = vector.broadcast %cst_86 : f32 to vector<8x8x4xf32>
    %149 = arith.mulf %148, %140 : vector<8x8x4xf32>
    %150 = arith.addf %147, %149 : vector<8x8x4xf32>
    %151 = vector.extract_strided_slice %145 {offsets = [0, 0, 0], sizes = [8, 1, 4], strides = [1, 1, 1]} : vector<8x8x4xf32> to vector<8x1x4xf32>
    %152 = vector.extract_strided_slice %145 {offsets = [0, 0, 0], sizes = [8, 7, 4], strides = [1, 1, 1]} : vector<8x8x4xf32> to vector<8x7x4xf32>
    %153 = tpu.concatenate %151, %152 in 1 : vector<8x1x4xf32>, vector<8x7x4xf32> -> vector<8x8x4xf32>
    %154 = vector.extract_strided_slice %145 {offsets = [0, 1, 0], sizes = [8, 7, 4], strides = [1, 1, 1]} : vector<8x8x4xf32> to vector<8x7x4xf32>
    %155 = vector.extract_strided_slice %145 {offsets = [0, 7, 0], sizes = [8, 1, 4], strides = [1, 1, 1]} : vector<8x8x4xf32> to vector<8x1x4xf32>
    %156 = tpu.concatenate %154, %155 in 1 : vector<8x7x4xf32>, vector<8x1x4xf32> -> vector<8x8x4xf32>
    %cst_87 = arith.constant 2.500000e-01 : f32
    %157 = vector.broadcast %cst_87 : f32 to vector<8x8x4xf32>
    %158 = arith.mulf %157, %153 : vector<8x8x4xf32>
    %cst_88 = arith.constant 7.500000e-01 : f32
    %159 = vector.broadcast %cst_88 : f32 to vector<8x8x4xf32>
    %160 = arith.mulf %159, %145 : vector<8x8x4xf32>
    %161 = arith.addf %158, %160 : vector<8x8x4xf32>
    %cst_89 = arith.constant 7.500000e-01 : f32
    %162 = vector.broadcast %cst_89 : f32 to vector<8x8x4xf32>
    %163 = arith.mulf %162, %145 : vector<8x8x4xf32>
    %cst_90 = arith.constant 2.500000e-01 : f32
    %164 = vector.broadcast %cst_90 : f32 to vector<8x8x4xf32>
    %165 = arith.mulf %164, %156 : vector<8x8x4xf32>
    %166 = arith.addf %163, %165 : vector<8x8x4xf32>
    %167 = arith.truncf %161 : vector<8x8x4xf32> to vector<8x8x4xbf16>
    %c1_91 = arith.constant 1 : index
    %c0_92 = arith.constant 0 : index
    %c0_93 = arith.constant 0 : index
    %c0_94 = arith.constant 0 : index
    %c0_95 = arith.constant 0 : index
    %168 = vector.load %arg6[%c1_91, %c0_92, %c0_93, %c0_94, %c0_95] : memref<2x8x2x8x16xbf16, #tpu.memory_space<vmem>>, vector<1x8x1x8x4xbf16>
    %169 = vector.shape_cast %168 : vector<1x8x1x8x4xbf16> to vector<8x8x4xbf16>
    %170 = vector.shape_cast %167 : vector<8x8x4xbf16> to vector<1x8x1x8x4xbf16>
    tpu.vector_store %arg6[%c1_91, %c0_92, %c0_93, %c0_94, %c0_95], %170 {strides = array<i32>} : memref<2x8x2x8x16xbf16, #tpu.memory_space<vmem>>, vector<1x8x1x8x4xbf16>,
    %171 = arith.extf %167 : vector<8x8x4xbf16> to vector<8x8x4xf32>
    %cst_96 = arith.constant dense<0.000000e+00> : vector<8x4xf32>
    %172 = vector.multi_reduction <add>, %171, %cst_96 [0] : vector<8x8x4xf32> to vector<8x4xf32>
    %cst_97 = arith.constant dense<0.000000e+00> : vector<4xf32>
    %173 = vector.multi_reduction <add>, %172, %cst_97 [0] : vector<8x4xf32> to vector<4xf32>
    %174 = vector.shape_cast %173 : vector<4xf32> to vector<1x4xf32>
    %175 = arith.addf %119, %174 : vector<1x4xf32>
    %176 = arith.mulf %171, %171 : vector<8x8x4xf32>
    %cst_98 = arith.constant dense<0.000000e+00> : vector<8x4xf32>
    %177 = vector.multi_reduction <add>, %176, %cst_98 [0] : vector<8x8x4xf32> to vector<8x4xf32>
    %cst_99 = arith.constant dense<0.000000e+00> : vector<4xf32>
    %178 = vector.multi_reduction <add>, %177, %cst_99 [0] : vector<8x4xf32> to vector<4xf32>
    %179 = vector.shape_cast %178 : vector<4xf32> to vector<1x4xf32>
    %180 = arith.addf %124, %179 : vector<1x4xf32>
    %181 = arith.truncf %166 : vector<8x8x4xf32> to vector<8x8x4xbf16>
    %c1_100 = arith.constant 1 : index
    %c0_101 = arith.constant 0 : index
    %c0_102 = arith.constant 0 : index
    %c0_103 = arith.constant 0 : index
    %c8_104 = arith.constant 8 : index
    %182 = vector.load %arg6[%c1_100, %c0_101, %c0_102, %c0_103, %c8_104] : memref<2x8x2x8x16xbf16, #tpu.memory_space<vmem>>, vector<1x8x1x8x4xbf16>
    %183 = vector.shape_cast %182 : vector<1x8x1x8x4xbf16> to vector<8x8x4xbf16>
    %184 = vector.shape_cast %181 : vector<8x8x4xbf16> to vector<1x8x1x8x4xbf16>
    tpu.vector_store %arg6[%c1_100, %c0_101, %c0_102, %c0_103, %c8_104], %184 {strides = array<i32>} : memref<2x8x2x8x16xbf16, #tpu.memory_space<vmem>>, vector<1x8x1x8x4xbf16>,
    %185 = arith.extf %181 : vector<8x8x4xbf16> to vector<8x8x4xf32>
    %cst_105 = arith.constant dense<0.000000e+00> : vector<8x4xf32>
    %186 = vector.multi_reduction <add>, %185, %cst_105 [0] : vector<8x8x4xf32> to vector<8x4xf32>
    %cst_106 = arith.constant dense<0.000000e+00> : vector<4xf32>
    %187 = vector.multi_reduction <add>, %186, %cst_106 [0] : vector<8x4xf32> to vector<4xf32>
    %188 = vector.shape_cast %187 : vector<4xf32> to vector<1x4xf32>
    %189 = arith.addf %175, %188 : vector<1x4xf32>
    %190 = arith.mulf %185, %185 : vector<8x8x4xf32>
    %cst_107 = arith.constant dense<0.000000e+00> : vector<8x4xf32>
    %191 = vector.multi_reduction <add>, %190, %cst_107 [0] : vector<8x8x4xf32> to vector<8x4xf32>
    %cst_108 = arith.constant dense<0.000000e+00> : vector<4xf32>
    %192 = vector.multi_reduction <add>, %191, %cst_108 [0] : vector<8x4xf32> to vector<4xf32>
    %193 = vector.shape_cast %192 : vector<4xf32> to vector<1x4xf32>
    %194 = arith.addf %180, %193 : vector<1x4xf32>
    %195 = vector.extract_strided_slice %150 {offsets = [0, 0, 0], sizes = [8, 1, 4], strides = [1, 1, 1]} : vector<8x8x4xf32> to vector<8x1x4xf32>
    %196 = vector.extract_strided_slice %150 {offsets = [0, 0, 0], sizes = [8, 7, 4], strides = [1, 1, 1]} : vector<8x8x4xf32> to vector<8x7x4xf32>
    %197 = tpu.concatenate %195, %196 in 1 : vector<8x1x4xf32>, vector<8x7x4xf32> -> vector<8x8x4xf32>
    %198 = vector.extract_strided_slice %150 {offsets = [0, 1, 0], sizes = [8, 7, 4], strides = [1, 1, 1]} : vector<8x8x4xf32> to vector<8x7x4xf32>
    %199 = vector.extract_strided_slice %150 {offsets = [0, 7, 0], sizes = [8, 1, 4], strides = [1, 1, 1]} : vector<8x8x4xf32> to vector<8x1x4xf32>
    %200 = tpu.concatenate %198, %199 in 1 : vector<8x7x4xf32>, vector<8x1x4xf32> -> vector<8x8x4xf32>
    %cst_109 = arith.constant 2.500000e-01 : f32
    %201 = vector.broadcast %cst_109 : f32 to vector<8x8x4xf32>
    %202 = arith.mulf %201, %197 : vector<8x8x4xf32>
    %cst_110 = arith.constant 7.500000e-01 : f32
    %203 = vector.broadcast %cst_110 : f32 to vector<8x8x4xf32>
    %204 = arith.mulf %203, %150 : vector<8x8x4xf32>
    %205 = arith.addf %202, %204 : vector<8x8x4xf32>
    %cst_111 = arith.constant 7.500000e-01 : f32
    %206 = vector.broadcast %cst_111 : f32 to vector<8x8x4xf32>
    %207 = arith.mulf %206, %150 : vector<8x8x4xf32>
    %cst_112 = arith.constant 2.500000e-01 : f32
    %208 = vector.broadcast %cst_112 : f32 to vector<8x8x4xf32>
    %209 = arith.mulf %208, %200 : vector<8x8x4xf32>
    %210 = arith.addf %207, %209 : vector<8x8x4xf32>
    %211 = arith.truncf %205 : vector<8x8x4xf32> to vector<8x8x4xbf16>
    %c1_113 = arith.constant 1 : index
    %c0_114 = arith.constant 0 : index
    %c1_115 = arith.constant 1 : index
    %c0_116 = arith.constant 0 : index
    %c0_117 = arith.constant 0 : index
    %212 = vector.load %arg6[%c1_113, %c0_114, %c1_115, %c0_116, %c0_117] : memref<2x8x2x8x16xbf16, #tpu.memory_space<vmem>>, vector<1x8x1x8x4xbf16>
    %213 = vector.shape_cast %212 : vector<1x8x1x8x4xbf16> to vector<8x8x4xbf16>
    %214 = vector.shape_cast %211 : vector<8x8x4xbf16> to vector<1x8x1x8x4xbf16>
    tpu.vector_store %arg6[%c1_113, %c0_114, %c1_115, %c0_116, %c0_117], %214 {strides = array<i32>} : memref<2x8x2x8x16xbf16, #tpu.memory_space<vmem>>, vector<1x8x1x8x4xbf16>,
    %215 = arith.extf %211 : vector<8x8x4xbf16> to vector<8x8x4xf32>
    %cst_118 = arith.constant dense<0.000000e+00> : vector<8x4xf32>
    %216 = vector.multi_reduction <add>, %215, %cst_118 [0] : vector<8x8x4xf32> to vector<8x4xf32>
    %cst_119 = arith.constant dense<0.000000e+00> : vector<4xf32>
    %217 = vector.multi_reduction <add>, %216, %cst_119 [0] : vector<8x4xf32> to vector<4xf32>
    %218 = vector.shape_cast %217 : vector<4xf32> to vector<1x4xf32>
    %219 = arith.addf %189, %218 : vector<1x4xf32>
    %220 = arith.mulf %215, %215 : vector<8x8x4xf32>
    %cst_120 = arith.constant dense<0.000000e+00> : vector<8x4xf32>
    %221 = vector.multi_reduction <add>, %220, %cst_120 [0] : vector<8x8x4xf32> to vector<8x4xf32>
    %cst_121 = arith.constant dense<0.000000e+00> : vector<4xf32>
    %222 = vector.multi_reduction <add>, %221, %cst_121 [0] : vector<8x4xf32> to vector<4xf32>
    %223 = vector.shape_cast %222 : vector<4xf32> to vector<1x4xf32>
    %224 = arith.addf %194, %223 : vector<1x4xf32>
    %225 = arith.truncf %210 : vector<8x8x4xf32> to vector<8x8x4xbf16>
    %c1_122 = arith.constant 1 : index
    %c0_123 = arith.constant 0 : index
    %c1_124 = arith.constant 1 : index
    %c0_125 = arith.constant 0 : index
    %c8_126 = arith.constant 8 : index
    %226 = vector.load %arg6[%c1_122, %c0_123, %c1_124, %c0_125, %c8_126] : memref<2x8x2x8x16xbf16, #tpu.memory_space<vmem>>, vector<1x8x1x8x4xbf16>
    %227 = vector.shape_cast %226 : vector<1x8x1x8x4xbf16> to vector<8x8x4xbf16>
    %228 = vector.shape_cast %225 : vector<8x8x4xbf16> to vector<1x8x1x8x4xbf16>
    tpu.vector_store %arg6[%c1_122, %c0_123, %c1_124, %c0_125, %c8_126], %228 {strides = array<i32>} : memref<2x8x2x8x16xbf16, #tpu.memory_space<vmem>>, vector<1x8x1x8x4xbf16>,
    %229 = arith.extf %225 : vector<8x8x4xbf16> to vector<8x8x4xf32>
    %cst_127 = arith.constant dense<0.000000e+00> : vector<8x4xf32>
    %230 = vector.multi_reduction <add>, %229, %cst_127 [0] : vector<8x8x4xf32> to vector<8x4xf32>
    %cst_128 = arith.constant dense<0.000000e+00> : vector<4xf32>
    %231 = vector.multi_reduction <add>, %230, %cst_128 [0] : vector<8x4xf32> to vector<4xf32>
    %232 = vector.shape_cast %231 : vector<4xf32> to vector<1x4xf32>
    %233 = arith.addf %219, %232 : vector<1x4xf32>
    %234 = arith.mulf %229, %229 : vector<8x8x4xf32>
    %cst_129 = arith.constant dense<0.000000e+00> : vector<8x4xf32>
    %235 = vector.multi_reduction <add>, %234, %cst_129 [0] : vector<8x8x4xf32> to vector<8x4xf32>
    %cst_130 = arith.constant dense<0.000000e+00> : vector<4xf32>
    %236 = vector.multi_reduction <add>, %235, %cst_130 [0] : vector<8x4xf32> to vector<4xf32>
    %237 = vector.shape_cast %236 : vector<4xf32> to vector<1x4xf32>
    %238 = arith.addf %224, %237 : vector<1x4xf32>
    %c1_131 = arith.constant 1 : index
    %c0_132 = arith.constant 0 : index
    %c0_133 = arith.constant 0 : index
    %c0_134 = arith.constant 0 : index
    %c0_135 = arith.constant 0 : index
    %239 = vector.load %arg5[%c1_131, %c0_132, %c0_133, %c0_134, %c0_135] : memref<2x8x2x8x8xbf16, #tpu.memory_space<vmem>>, vector<1x8x2x8x4xbf16>
    %240 = vector.shape_cast %239 : vector<1x8x2x8x4xbf16> to vector<8x2x8x4xbf16>
    %c1_136 = arith.constant 1 : index
    %c0_137 = arith.constant 0 : index
    %c0_138 = arith.constant 0 : index
    %c0_139 = arith.constant 0 : index
    %c4_140 = arith.constant 4 : index
    %241 = vector.load %arg6[%c1_136, %c0_137, %c0_138, %c0_139, %c4_140] : memref<2x8x2x8x16xbf16, #tpu.memory_space<vmem>>, vector<1x8x2x8x4xbf16>
    %242 = vector.shape_cast %241 : vector<1x8x2x8x4xbf16> to vector<8x2x8x4xbf16>
    %243 = vector.shape_cast %240 : vector<8x2x8x4xbf16> to vector<1x8x2x8x4xbf16>
    tpu.vector_store %arg6[%c1_136, %c0_137, %c0_138, %c0_139, %c4_140], %243 {strides = array<i32>} : memref<2x8x2x8x16xbf16, #tpu.memory_space<vmem>>, vector<1x8x2x8x4xbf16>,
    %c1_141 = arith.constant 1 : index
    %c0_142 = arith.constant 0 : index
    %c0_143 = arith.constant 0 : index
    %c0_144 = arith.constant 0 : index
    %c4_145 = arith.constant 4 : index
    %244 = vector.load %arg5[%c1_141, %c0_142, %c0_143, %c0_144, %c4_145] : memref<2x8x2x8x8xbf16, #tpu.memory_space<vmem>>, vector<1x8x2x8x4xbf16>
    %245 = vector.shape_cast %244 : vector<1x8x2x8x4xbf16> to vector<8x2x8x4xbf16>
    %c1_146 = arith.constant 1 : index
    %c0_147 = arith.constant 0 : index
    %c0_148 = arith.constant 0 : index
    %c0_149 = arith.constant 0 : index
    %c12_150 = arith.constant 12 : index
    %246 = vector.load %arg6[%c1_146, %c0_147, %c0_148, %c0_149, %c12_150] : memref<2x8x2x8x16xbf16, #tpu.memory_space<vmem>>, vector<1x8x2x8x4xbf16>
    %247 = vector.shape_cast %246 : vector<1x8x2x8x4xbf16> to vector<8x2x8x4xbf16>
    %248 = vector.shape_cast %245 : vector<8x2x8x4xbf16> to vector<1x8x2x8x4xbf16>
    tpu.vector_store %arg6[%c1_146, %c0_147, %c0_148, %c0_149, %c12_150], %248 {strides = array<i32>} : memref<2x8x2x8x16xbf16, #tpu.memory_space<vmem>>, vector<1x8x2x8x4xbf16>,
    %c0_151 = arith.constant 0 : index
    %c0_152 = arith.constant 0 : index
    %c0_153 = arith.constant 0 : index
    %c0_154 = arith.constant 0 : index
    %c0_155 = arith.constant 0 : index
    %249 = vector.load %arg5[%c0_151, %c0_152, %c0_153, %c0_154, %c0_155] : memref<2x8x2x8x8xbf16, #tpu.memory_space<vmem>>, vector<2x8x2x8x8xbf16>
    %250 = arith.extf %249 : vector<2x8x2x8x8xbf16> to vector<2x8x2x8x8xf32>
    %cst_156 = arith.constant dense<0.000000e+00> : vector<8x2x8x8xf32>
    %251 = vector.multi_reduction <add>, %250, %cst_156 [0] : vector<2x8x2x8x8xf32> to vector<8x2x8x8xf32>
    %cst_157 = arith.constant dense<0.000000e+00> : vector<2x8x8xf32>
    %252 = vector.multi_reduction <add>, %251, %cst_157 [0] : vector<8x2x8x8xf32> to vector<2x8x8xf32>
    %cst_158 = arith.constant dense<0.000000e+00> : vector<8x8xf32>
    %253 = vector.multi_reduction <add>, %252, %cst_158 [0] : vector<2x8x8xf32> to vector<8x8xf32>
    %254 = arith.mulf %250, %250 : vector<2x8x2x8x8xf32>
    %cst_159 = arith.constant dense<0.000000e+00> : vector<8x2x8x8xf32>
    %255 = vector.multi_reduction <add>, %254, %cst_159 [0] : vector<2x8x2x8x8xf32> to vector<8x2x8x8xf32>
    %cst_160 = arith.constant dense<0.000000e+00> : vector<2x8x8xf32>
    %256 = vector.multi_reduction <add>, %255, %cst_160 [0] : vector<8x2x8x8xf32> to vector<2x8x8xf32>
    %cst_161 = arith.constant dense<0.000000e+00> : vector<8x8xf32>
    %257 = vector.multi_reduction <add>, %256, %cst_161 [0] : vector<2x8x8xf32> to vector<8x8xf32>
    %c0_162 = arith.constant 0 : index
    %c0_163 = arith.constant 0 : index
    %c0_164 = arith.constant 0 : index
    %258 = vector.load %arg7[%c0_162, %c0_163, %c0_164] : memref<1x2x12xf32, #tpu.memory_space<vmem>>, vector<1x1x4xf32>
    %259 = vector.shape_cast %258 : vector<1x1x4xf32> to vector<1x4xf32>
    %260 = vector.shape_cast %233 : vector<1x4xf32> to vector<1x1x4xf32>
    tpu.vector_store %arg7[%c0_162, %c0_163, %c0_164], %260 {strides = array<i32>} : memref<1x2x12xf32, #tpu.memory_space<vmem>>, vector<1x1x4xf32>,
    %c0_165 = arith.constant 0 : index
    %c1_166 = arith.constant 1 : index
    %c0_167 = arith.constant 0 : index
    %261 = vector.load %arg7[%c0_165, %c1_166, %c0_167] : memref<1x2x12xf32, #tpu.memory_space<vmem>>, vector<1x1x4xf32>
    %262 = vector.shape_cast %261 : vector<1x1x4xf32> to vector<1x4xf32>
    %263 = vector.shape_cast %238 : vector<1x4xf32> to vector<1x1x4xf32>
    tpu.vector_store %arg7[%c0_165, %c1_166, %c0_167], %263 {strides = array<i32>} : memref<1x2x12xf32, #tpu.memory_space<vmem>>, vector<1x1x4xf32>,
    %cst_168 = arith.constant dense<0.000000e+00> : vector<8xf32>
    %264 = vector.multi_reduction <add>, %253, %cst_168 [0] : vector<8x8xf32> to vector<8xf32>
    %265 = vector.shape_cast %264 : vector<8xf32> to vector<1x8xf32>
    %c0_169 = arith.constant 0 : index
    %c0_170 = arith.constant 0 : index
    %c4_171 = arith.constant 4 : index
    %266 = vector.load %arg7[%c0_169, %c0_170, %c4_171] : memref<1x2x12xf32, #tpu.memory_space<vmem>>, vector<1x1x8xf32>
    %267 = vector.shape_cast %266 : vector<1x1x8xf32> to vector<1x8xf32>
    %268 = vector.shape_cast %265 : vector<1x8xf32> to vector<1x1x8xf32>
    tpu.vector_store %arg7[%c0_169, %c0_170, %c4_171], %268 {strides = array<i32>} : memref<1x2x12xf32, #tpu.memory_space<vmem>>, vector<1x1x8xf32>,
    %cst_172 = arith.constant dense<0.000000e+00> : vector<8xf32>
    %269 = vector.multi_reduction <add>, %257, %cst_172 [0] : vector<8x8xf32> to vector<8xf32>
    %270 = vector.shape_cast %269 : vector<8xf32> to vector<1x8xf32>
    %c0_173 = arith.constant 0 : index
    %c1_174 = arith.constant 1 : index
    %c4_175 = arith.constant 4 : index
    %271 = vector.load %arg7[%c0_173, %c1_174, %c4_175] : memref<1x2x12xf32, #tpu.memory_space<vmem>>, vector<1x1x8xf32>
    %272 = vector.shape_cast %271 : vector<1x1x8xf32> to vector<1x8xf32>
    %273 = vector.shape_cast %270 : vector<1x8xf32> to vector<1x1x8xf32>
    tpu.vector_store %arg7[%c0_173, %c1_174, %c4_175], %273 {strides = array<i32>} : memref<1x2x12xf32, #tpu.memory_space<vmem>>, vector<1x1x8xf32>,
    return
  }
  func.func @transform_0(%arg0: i32, %arg1: i32) -> (i32, i32, i32, i32, i32) {
    %c1_i32 = arith.constant 1 : i32
    %0 = arith.subi %arg1, %c1_i32 : i32
    %c0_i32 = arith.constant 0 : i32
    %1 = arith.maxsi %0, %c0_i32 : i32
    %c0_i32_0 = arith.constant 0 : i32
    %c0_i32_1 = arith.constant 0 : i32
    %c0_i32_2 = arith.constant 0 : i32
    %c0_i32_3 = arith.constant 0 : i32
    return %arg0, %1, %c0_i32_0, %c0_i32_1, %c0_i32_2 : i32, i32, i32, i32, i32
  }
  func.func @transform_1(%arg0: i32, %arg1: i32) -> (i32, i32, i32, i32, i32) {
    %c0_i32 = arith.constant 0 : i32
    %c0_i32_0 = arith.constant 0 : i32
    %c0_i32_1 = arith.constant 0 : i32
    %c0_i32_2 = arith.constant 0 : i32
    return %arg0, %arg1, %c0_i32, %c0_i32_0, %c0_i32_1 : i32, i32, i32, i32, i32
  }
  func.func @transform_2(%arg0: i32, %arg1: i32) -> (i32, i32, i32, i32, i32) {
    %c1_i32 = arith.constant 1 : i32
    %0 = arith.addi %arg1, %c1_i32 : i32
    %c3_i32 = arith.constant 3 : i32
    %1 = arith.minsi %0, %c3_i32 : i32
    %c0_i32 = arith.constant 0 : i32
    %c0_i32_0 = arith.constant 0 : i32
    %c0_i32_1 = arith.constant 0 : i32
    %c0_i32_2 = arith.constant 0 : i32
    return %arg0, %1, %c0_i32, %c0_i32_0, %c0_i32_1 : i32, i32, i32, i32, i32
  }
  func.func @transform_3(%arg0: i32, %arg1: i32) -> (i32, i32, i32, i32, i32) {
    %c4_i32 = arith.constant 4 : i32
    %0 = arith.muli %arg0, %c4_i32 : i32
    %1 = arith.addi %0, %arg1 : i32
    %c0_i32 = arith.constant 0 : i32
    %c0_i32_0 = arith.constant 0 : i32
    %c0_i32_1 = arith.constant 0 : i32
    %c0_i32_2 = arith.constant 0 : i32
    %c0_i32_3 = arith.constant 0 : i32
    return %1, %c0_i32, %c0_i32_0, %c0_i32_1, %c0_i32_2 : i32, i32, i32, i32, i32
  }
  func.func @transform_4(%arg0: i32, %arg1: i32) -> (i32, i32, i32, i32, i32) {
    %c4_i32 = arith.constant 4 : i32
    %0 = arith.muli %arg0, %c4_i32 : i32
    %1 = arith.addi %0, %arg1 : i32
    %c0_i32 = arith.constant 0 : i32
    %c0_i32_0 = arith.constant 0 : i32
    %c0_i32_1 = arith.constant 0 : i32
    %c0_i32_2 = arith.constant 0 : i32
    %c0_i32_3 = arith.constant 0 : i32
    return %1, %c0_i32, %c0_i32_0, %c0_i32_1, %c0_i32_2 : i32, i32, i32, i32, i32
  }
  func.func @transform_5(%arg0: i32, %arg1: i32) -> (i32, i32, i32) {
    %c4_i32 = arith.constant 4 : i32
    %0 = arith.muli %arg0, %c4_i32 : i32
    %1 = arith.addi %0, %arg1 : i32
    %c0_i32 = arith.constant 0 : i32
    %c0_i32_0 = arith.constant 0 : i32
    %c0_i32_1 = arith.constant 0 : i32
    return %1, %c0_i32, %c0_i32_0 : i32, i32, i32
  }
}

module attributes {stable_mosaic.version = 11 : i64} {
  func.func @_conv_kernel(%arg0: i32, %arg1: i32, %arg2: memref<1x4x16x128xbf16, #tpu.memory_space<vmem>>, %arg3: memref<1x1x16x128xbf16, #tpu.memory_space<vmem>>, %arg4: memref<1x1x16x128xbf16, #tpu.memory_space<vmem>>, %arg5: memref<1x128xf32, #tpu.memory_space<vmem>>, %arg6: memref<1x128xf32, #tpu.memory_space<vmem>>, %arg7: memref<1152x128xbf16, #tpu.memory_space<vmem>>, %arg8: memref<1x128xf32, #tpu.memory_space<vmem>>, %arg9: memref<1x64x128xbf16, #tpu.memory_space<vmem>>) attributes {dimension_semantics = [#tpu.dimension_semantics<parallel>, #tpu.dimension_semantics<parallel>], iteration_bounds = array<i64: 2, 2>, scalar_prefetch = 0 : i64, scratch_operands = 0 : i64, tpu.core_type = #tpu.core_type<tc>, window_params = [{transform_indices = @transform_0, window_bounds = array<i64: 1, 4, 16, 128>}, {transform_indices = @transform_1, window_bounds = array<i64: 1, 1, 16, 128>}, {transform_indices = @transform_2, window_bounds = array<i64: 1, 1, 16, 128>}, {pipeline_mode = #tpu.pipeline_mode<synchronous>, transform_indices = @transform_3, window_bounds = array<i64: 1, 128>}, {pipeline_mode = #tpu.pipeline_mode<synchronous>, transform_indices = @transform_4, window_bounds = array<i64: 1, 128>}, {pipeline_mode = #tpu.pipeline_mode<synchronous>, transform_indices = @transform_5, window_bounds = array<i64: 1152, 128>}, {pipeline_mode = #tpu.pipeline_mode<synchronous>, transform_indices = @transform_6, window_bounds = array<i64: 1, 128>}, {transform_indices = @transform_7, window_bounds = array<i64: 1, 64, 128>}]} {
    %c4_i32 = arith.constant 4 : i32
    %0 = arith.muli %arg1, %c4_i32 : i32
    %c0 = arith.constant 0 : index
    %c0_0 = arith.constant 0 : index
    %1 = vector.load %arg5[%c0, %c0_0] : memref<1x128xf32, #tpu.memory_space<vmem>>, vector<1x128xf32>
    %c0_1 = arith.constant 0 : index
    %c0_2 = arith.constant 0 : index
    %2 = vector.load %arg6[%c0_1, %c0_2] : memref<1x128xf32, #tpu.memory_space<vmem>>, vector<1x128xf32>
    %c0_3 = arith.constant 0 : index
    %c0_4 = arith.constant 0 : index
    %c0_5 = arith.constant 0 : index
    %c0_6 = arith.constant 0 : index
    %3 = vector.load %arg3[%c0_3, %c0_4, %c0_5, %c0_6] : memref<1x1x16x128xbf16, #tpu.memory_space<vmem>>, vector<1x1x16x128xbf16>
    %4 = vector.shape_cast %3 : vector<1x1x16x128xbf16> to vector<16x128xbf16>
    %c1_i32 = arith.constant 1 : i32
    %5 = arith.cmpi sge, %0, %c1_i32 : i32
    %6 = arith.extf %4 : vector<16x128xbf16> to vector<16x128xf32>
    %7 = vector.broadcast %1 : vector<1x128xf32> to vector<16x128xf32>
    %8 = arith.mulf %6, %7 : vector<16x128xf32>
    %9 = vector.broadcast %2 : vector<1x128xf32> to vector<16x128xf32>
    %10 = arith.addf %8, %9 : vector<16x128xf32>
    %cst = arith.constant 0.000000e+00 : f32
    %11 = vector.broadcast %cst : f32 to vector<16x128xf32>
    %12 = arith.select %5, %10, %11 : vector<16x128xf32>
    %c0_7 = arith.constant 0 : index
    %c0_8 = arith.constant 0 : index
    %c0_9 = arith.constant 0 : index
    %c0_10 = arith.constant 0 : index
    %13 = vector.load %arg2[%c0_7, %c0_8, %c0_9, %c0_10] : memref<1x4x16x128xbf16, #tpu.memory_space<vmem>>, vector<1x1x16x128xbf16>
    %14 = vector.shape_cast %13 : vector<1x1x16x128xbf16> to vector<16x128xbf16>
    %15 = arith.extf %14 : vector<16x128xbf16> to vector<16x128xf32>
    %16 = vector.broadcast %1 : vector<1x128xf32> to vector<16x128xf32>
    %17 = arith.mulf %15, %16 : vector<16x128xf32>
    %18 = vector.broadcast %2 : vector<1x128xf32> to vector<16x128xf32>
    %19 = arith.addf %17, %18 : vector<16x128xf32>
    %c0_11 = arith.constant 0 : index
    %c1 = arith.constant 1 : index
    %c0_12 = arith.constant 0 : index
    %c0_13 = arith.constant 0 : index
    %20 = vector.load %arg2[%c0_11, %c1, %c0_12, %c0_13] : memref<1x4x16x128xbf16, #tpu.memory_space<vmem>>, vector<1x1x16x128xbf16>
    %21 = vector.shape_cast %20 : vector<1x1x16x128xbf16> to vector<16x128xbf16>
    %22 = arith.extf %21 : vector<16x128xbf16> to vector<16x128xf32>
    %23 = vector.broadcast %1 : vector<1x128xf32> to vector<16x128xf32>
    %24 = arith.mulf %22, %23 : vector<16x128xf32>
    %25 = vector.broadcast %2 : vector<1x128xf32> to vector<16x128xf32>
    %26 = arith.addf %24, %25 : vector<16x128xf32>
    %c0_14 = arith.constant 0 : index
    %c2 = arith.constant 2 : index
    %c0_15 = arith.constant 0 : index
    %c0_16 = arith.constant 0 : index
    %27 = vector.load %arg2[%c0_14, %c2, %c0_15, %c0_16] : memref<1x4x16x128xbf16, #tpu.memory_space<vmem>>, vector<1x1x16x128xbf16>
    %28 = vector.shape_cast %27 : vector<1x1x16x128xbf16> to vector<16x128xbf16>
    %29 = arith.extf %28 : vector<16x128xbf16> to vector<16x128xf32>
    %30 = vector.broadcast %1 : vector<1x128xf32> to vector<16x128xf32>
    %31 = arith.mulf %29, %30 : vector<16x128xf32>
    %32 = vector.broadcast %2 : vector<1x128xf32> to vector<16x128xf32>
    %33 = arith.addf %31, %32 : vector<16x128xf32>
    %c0_17 = arith.constant 0 : index
    %c3 = arith.constant 3 : index
    %c0_18 = arith.constant 0 : index
    %c0_19 = arith.constant 0 : index
    %34 = vector.load %arg2[%c0_17, %c3, %c0_18, %c0_19] : memref<1x4x16x128xbf16, #tpu.memory_space<vmem>>, vector<1x1x16x128xbf16>
    %35 = vector.shape_cast %34 : vector<1x1x16x128xbf16> to vector<16x128xbf16>
    %36 = arith.extf %35 : vector<16x128xbf16> to vector<16x128xf32>
    %37 = vector.broadcast %1 : vector<1x128xf32> to vector<16x128xf32>
    %38 = arith.mulf %36, %37 : vector<16x128xf32>
    %39 = vector.broadcast %2 : vector<1x128xf32> to vector<16x128xf32>
    %40 = arith.addf %38, %39 : vector<16x128xf32>
    %c0_20 = arith.constant 0 : index
    %c0_21 = arith.constant 0 : index
    %c0_22 = arith.constant 0 : index
    %c0_23 = arith.constant 0 : index
    %41 = vector.load %arg4[%c0_20, %c0_21, %c0_22, %c0_23] : memref<1x1x16x128xbf16, #tpu.memory_space<vmem>>, vector<1x1x16x128xbf16>
    %42 = vector.shape_cast %41 : vector<1x1x16x128xbf16> to vector<16x128xbf16>
    %c4_i32_24 = arith.constant 4 : i32
    %43 = arith.addi %0, %c4_i32_24 : i32
    %c7_i32 = arith.constant 7 : i32
    %44 = arith.cmpi sle, %43, %c7_i32 : i32
    %45 = arith.extf %42 : vector<16x128xbf16> to vector<16x128xf32>
    %46 = vector.broadcast %1 : vector<1x128xf32> to vector<16x128xf32>
    %47 = arith.mulf %45, %46 : vector<16x128xf32>
    %48 = vector.broadcast %2 : vector<1x128xf32> to vector<16x128xf32>
    %49 = arith.addf %47, %48 : vector<16x128xf32>
    %cst_25 = arith.constant 0.000000e+00 : f32
    %50 = vector.broadcast %cst_25 : f32 to vector<16x128xf32>
    %51 = arith.select %44, %49, %50 : vector<16x128xf32>
    %52 = tpu.concatenate %12, %19, %26, %33 in 0 : vector<16x128xf32>, vector<16x128xf32>, vector<16x128xf32>, vector<16x128xf32> -> vector<64x128xf32>
    %53 = tpu.concatenate %19, %26, %33, %40 in 0 : vector<16x128xf32>, vector<16x128xf32>, vector<16x128xf32>, vector<16x128xf32> -> vector<64x128xf32>
    %54 = tpu.concatenate %26, %33, %40, %51 in 0 : vector<16x128xf32>, vector<16x128xf32>, vector<16x128xf32>, vector<16x128xf32> -> vector<64x128xf32>
    %55 = tpu.iota {dimensions = array<i32: 0>} : vector<64x128xi32>
    %c16_i32 = arith.constant 16 : i32
    %c0_i32 = arith.constant 0 : i32
    %56 = arith.cmpi eq, %c16_i32, %c0_i32 : i32
    %c1_i32_26 = arith.constant 1 : i32
    %57 = arith.select %56, %c1_i32_26, %c16_i32 : i32
    %58 = vector.broadcast %57 : i32 to vector<64x128xi32>
    %59 = arith.remsi %55, %58 : vector<64x128xi32>
    %c0_i32_27 = arith.constant 0 : i32
    %60 = vector.broadcast %c0_i32_27 : i32 to vector<64x128xi32>
    %61 = arith.cmpi ne, %59, %60 : vector<64x128xi32>
    %c0_i32_28 = arith.constant 0 : i32
    %62 = vector.broadcast %c0_i32_28 : i32 to vector<64x128xi32>
    %63 = arith.cmpi slt, %59, %62 : vector<64x128xi32>
    %c0_i32_29 = arith.constant 0 : i32
    %64 = arith.cmpi slt, %57, %c0_i32_29 : i32
    %65 = vector.broadcast %64 : i1 to vector<64x128xi1>
    %66 = vector.broadcast %65 : vector<64x128xi1> to vector<64x128xi1>
    %67 = arith.xori %63, %66 : vector<64x128xi1>
    %68 = arith.andi %67, %61 : vector<64x128xi1>
    %69 = vector.broadcast %57 : i32 to vector<64x128xi32>
    %70 = arith.addi %59, %69 : vector<64x128xi32>
    %71 = arith.select %68, %70, %59 : vector<64x128xi1>, vector<64x128xi32>
    %cst_30 = arith.constant 0.000000e+00 : f32
    %72 = vector.broadcast %cst_30 : f32 to vector<8x128xf32>
    %73 = tpu.concatenate %72, %52, %72 in 0 : vector<8x128xf32>, vector<64x128xf32>, vector<8x128xf32> -> vector<80x128xf32>
    %c1_i32_31 = arith.constant 1 : i32
    %74 = vector.broadcast %c1_i32_31 : i32 to vector<64x128xi32>
    %75 = arith.cmpi sge, %71, %74 : vector<64x128xi32>
    %76 = vector.extract_strided_slice %73 {offsets = [7, 0], sizes = [64, 128], strides = [1, 1]} : vector<80x128xf32> to vector<64x128xf32>
    %cst_32 = arith.constant 0.000000e+00 : f32
    %77 = vector.broadcast %cst_32 : f32 to vector<64x128xf32>
    %78 = arith.select %75, %76, %77 : vector<64x128xi1>, vector<64x128xf32>
    %c14_i32 = arith.constant 14 : i32
    %79 = vector.broadcast %c14_i32 : i32 to vector<64x128xi32>
    %80 = arith.cmpi sle, %71, %79 : vector<64x128xi32>
    %81 = vector.extract_strided_slice %73 {offsets = [9, 0], sizes = [64, 128], strides = [1, 1]} : vector<80x128xf32> to vector<64x128xf32>
    %cst_33 = arith.constant 0.000000e+00 : f32
    %82 = vector.broadcast %cst_33 : f32 to vector<64x128xf32>
    %83 = arith.select %80, %81, %82 : vector<64x128xi1>, vector<64x128xf32>
    %84 = arith.truncf %78 : vector<64x128xf32> to vector<64x128xbf16>
    %85 = arith.truncf %52 : vector<64x128xf32> to vector<64x128xbf16>
    %86 = arith.truncf %83 : vector<64x128xf32> to vector<64x128xbf16>
    %87 = tpu.concatenate %72, %53, %72 in 0 : vector<8x128xf32>, vector<64x128xf32>, vector<8x128xf32> -> vector<80x128xf32>
    %c1_i32_34 = arith.constant 1 : i32
    %88 = vector.broadcast %c1_i32_34 : i32 to vector<64x128xi32>
    %89 = arith.cmpi sge, %71, %88 : vector<64x128xi32>
    %90 = vector.extract_strided_slice %87 {offsets = [7, 0], sizes = [64, 128], strides = [1, 1]} : vector<80x128xf32> to vector<64x128xf32>
    %cst_35 = arith.constant 0.000000e+00 : f32
    %91 = vector.broadcast %cst_35 : f32 to vector<64x128xf32>
    %92 = arith.select %89, %90, %91 : vector<64x128xi1>, vector<64x128xf32>
    %c14_i32_36 = arith.constant 14 : i32
    %93 = vector.broadcast %c14_i32_36 : i32 to vector<64x128xi32>
    %94 = arith.cmpi sle, %71, %93 : vector<64x128xi32>
    %95 = vector.extract_strided_slice %87 {offsets = [9, 0], sizes = [64, 128], strides = [1, 1]} : vector<80x128xf32> to vector<64x128xf32>
    %cst_37 = arith.constant 0.000000e+00 : f32
    %96 = vector.broadcast %cst_37 : f32 to vector<64x128xf32>
    %97 = arith.select %94, %95, %96 : vector<64x128xi1>, vector<64x128xf32>
    %98 = arith.truncf %92 : vector<64x128xf32> to vector<64x128xbf16>
    %99 = arith.truncf %53 : vector<64x128xf32> to vector<64x128xbf16>
    %100 = arith.truncf %97 : vector<64x128xf32> to vector<64x128xbf16>
    %101 = tpu.concatenate %72, %54, %72 in 0 : vector<8x128xf32>, vector<64x128xf32>, vector<8x128xf32> -> vector<80x128xf32>
    %c1_i32_38 = arith.constant 1 : i32
    %102 = vector.broadcast %c1_i32_38 : i32 to vector<64x128xi32>
    %103 = arith.cmpi sge, %71, %102 : vector<64x128xi32>
    %104 = vector.extract_strided_slice %101 {offsets = [7, 0], sizes = [64, 128], strides = [1, 1]} : vector<80x128xf32> to vector<64x128xf32>
    %cst_39 = arith.constant 0.000000e+00 : f32
    %105 = vector.broadcast %cst_39 : f32 to vector<64x128xf32>
    %106 = arith.select %103, %104, %105 : vector<64x128xi1>, vector<64x128xf32>
    %c14_i32_40 = arith.constant 14 : i32
    %107 = vector.broadcast %c14_i32_40 : i32 to vector<64x128xi32>
    %108 = arith.cmpi sle, %71, %107 : vector<64x128xi32>
    %109 = vector.extract_strided_slice %101 {offsets = [9, 0], sizes = [64, 128], strides = [1, 1]} : vector<80x128xf32> to vector<64x128xf32>
    %cst_41 = arith.constant 0.000000e+00 : f32
    %110 = vector.broadcast %cst_41 : f32 to vector<64x128xf32>
    %111 = arith.select %108, %109, %110 : vector<64x128xi1>, vector<64x128xf32>
    %112 = arith.truncf %106 : vector<64x128xf32> to vector<64x128xbf16>
    %113 = arith.truncf %54 : vector<64x128xf32> to vector<64x128xbf16>
    %114 = arith.truncf %111 : vector<64x128xf32> to vector<64x128xbf16>
    %115 = tpu.concatenate %84, %85, %86, %98, %99, %100, %112, %113, %114 in 1 : vector<64x128xbf16>, vector<64x128xbf16>, vector<64x128xbf16>, vector<64x128xbf16>, vector<64x128xbf16>, vector<64x128xbf16>, vector<64x128xbf16>, vector<64x128xbf16>, vector<64x128xbf16> -> vector<64x1152xbf16>
    %c0_42 = arith.constant 0 : index
    %c0_43 = arith.constant 0 : index
    %116 = vector.load %arg7[%c0_42, %c0_43] : memref<1152x128xbf16, #tpu.memory_space<vmem>>, vector<1152x128xbf16>
    %cst_44 = arith.constant dense<0.000000e+00> : vector<64x128xf32>
    %117 = tpu.matmul %115, %116, %cst_44 {dimension_numbers = #tpu.dot_dimension_numbers<[1], [0], [0], [1], [0, 0, 1, 1], [], []>} : vector<64x1152xbf16>, vector<1152x128xbf16>, vector<64x128xf32> -> vector<64x128xf32>
    %c0_45 = arith.constant 0 : index
    %c0_46 = arith.constant 0 : index
    %118 = vector.load %arg8[%c0_45, %c0_46] : memref<1x128xf32, #tpu.memory_space<vmem>>, vector<1x128xf32>
    %119 = vector.broadcast %118 : vector<1x128xf32> to vector<64x128xf32>
    %120 = arith.addf %117, %119 : vector<64x128xf32>
    %121 = arith.negf %120 : vector<64x128xf32>
    %122 = math.exp %121 : vector<64x128xf32>
    %cst_47 = arith.constant 1.000000e+00 : f32
    %123 = vector.broadcast %cst_47 : f32 to vector<64x128xf32>
    %124 = arith.addf %123, %122 : vector<64x128xf32>
    %125 = arith.divf %123, %124 : vector<64x128xf32>
    %126 = arith.mulf %120, %125 : vector<64x128xf32>
    %127 = arith.truncf %126 : vector<64x128xf32> to vector<64x128xbf16>
    %c0_48 = arith.constant 0 : index
    %c0_49 = arith.constant 0 : index
    %c0_50 = arith.constant 0 : index
    %128 = vector.load %arg9[%c0_48, %c0_49, %c0_50] : memref<1x64x128xbf16, #tpu.memory_space<vmem>>, vector<1x64x128xbf16>
    %129 = vector.shape_cast %128 : vector<1x64x128xbf16> to vector<64x128xbf16>
    %130 = vector.shape_cast %127 : vector<64x128xbf16> to vector<1x64x128xbf16>
    tpu.vector_store %arg9[%c0_48, %c0_49, %c0_50], %130 {strides = array<i32>} : memref<1x64x128xbf16, #tpu.memory_space<vmem>>, vector<1x64x128xbf16>,
    return
  }
  func.func @transform_0(%arg0: i32, %arg1: i32) -> (i32, i32, i32, i32) {
    %c0_i32 = arith.constant 0 : i32
    %c0_i32_0 = arith.constant 0 : i32
    %c0_i32_1 = arith.constant 0 : i32
    return %arg0, %arg1, %c0_i32, %c0_i32_0 : i32, i32, i32, i32
  }
  func.func @transform_1(%arg0: i32, %arg1: i32) -> (i32, i32, i32, i32) {
    %c4_i32 = arith.constant 4 : i32
    %0 = arith.muli %arg1, %c4_i32 : i32
    %c1_i32 = arith.constant 1 : i32
    %1 = arith.subi %0, %c1_i32 : i32
    %c0_i32 = arith.constant 0 : i32
    %2 = arith.maxsi %1, %c0_i32 : i32
    %c0_i32_0 = arith.constant 0 : i32
    %c0_i32_1 = arith.constant 0 : i32
    %c0_i32_2 = arith.constant 0 : i32
    return %arg0, %2, %c0_i32_0, %c0_i32_1 : i32, i32, i32, i32
  }
  func.func @transform_2(%arg0: i32, %arg1: i32) -> (i32, i32, i32, i32) {
    %c4_i32 = arith.constant 4 : i32
    %0 = arith.muli %arg1, %c4_i32 : i32
    %c4_i32_0 = arith.constant 4 : i32
    %1 = arith.addi %0, %c4_i32_0 : i32
    %c7_i32 = arith.constant 7 : i32
    %2 = arith.minsi %1, %c7_i32 : i32
    %c0_i32 = arith.constant 0 : i32
    %c0_i32_1 = arith.constant 0 : i32
    %c0_i32_2 = arith.constant 0 : i32
    return %arg0, %2, %c0_i32, %c0_i32_1 : i32, i32, i32, i32
  }
  func.func @transform_3(%arg0: i32, %arg1: i32) -> (i32, i32) {
    %c0_i32 = arith.constant 0 : i32
    %c0_i32_0 = arith.constant 0 : i32
    %c0_i32_1 = arith.constant 0 : i32
    return %c0_i32, %c0_i32_0 : i32, i32
  }
  func.func @transform_4(%arg0: i32, %arg1: i32) -> (i32, i32) {
    %c0_i32 = arith.constant 0 : i32
    %c0_i32_0 = arith.constant 0 : i32
    %c0_i32_1 = arith.constant 0 : i32
    return %c0_i32, %c0_i32_0 : i32, i32
  }
  func.func @transform_5(%arg0: i32, %arg1: i32) -> (i32, i32) {
    %c0_i32 = arith.constant 0 : i32
    %c0_i32_0 = arith.constant 0 : i32
    %c0_i32_1 = arith.constant 0 : i32
    return %c0_i32, %c0_i32_0 : i32, i32
  }
  func.func @transform_6(%arg0: i32, %arg1: i32) -> (i32, i32) {
    %c0_i32 = arith.constant 0 : i32
    %c0_i32_0 = arith.constant 0 : i32
    %c0_i32_1 = arith.constant 0 : i32
    return %c0_i32, %c0_i32_0 : i32, i32
  }
  func.func @transform_7(%arg0: i32, %arg1: i32) -> (i32, i32, i32) {
    %c0_i32 = arith.constant 0 : i32
    %c0_i32_0 = arith.constant 0 : i32
    return %arg0, %arg1, %c0_i32 : i32, i32, i32
  }
}

module attributes {stable_mosaic.version = 11 : i64} {
  func.func @_conv_kernel(%arg0: i32, %arg1: i32, %arg2: memref<1x4x16x128xbf16, #tpu.memory_space<vmem>>, %arg3: memref<1x1x16x128xbf16, #tpu.memory_space<vmem>>, %arg4: memref<1x1x16x128xbf16, #tpu.memory_space<vmem>>, %arg5: memref<1x4x16x128xbf16, #tpu.memory_space<vmem>>, %arg6: memref<1280x128xbf16, #tpu.memory_space<vmem>>, %arg7: memref<1x128xf32, #tpu.memory_space<vmem>>, %arg8: memref<1x64x128xbf16, #tpu.memory_space<vmem>>, %arg9: memref<1x2x128xf32, #tpu.memory_space<vmem>>) attributes {dimension_semantics = [#tpu.dimension_semantics<parallel>, #tpu.dimension_semantics<parallel>], iteration_bounds = array<i64: 2, 2>, scalar_prefetch = 0 : i64, scratch_operands = 0 : i64, tpu.core_type = #tpu.core_type<tc>, window_params = [{transform_indices = @transform_0, window_bounds = array<i64: 1, 4, 16, 128>}, {transform_indices = @transform_1, window_bounds = array<i64: 1, 1, 16, 128>}, {transform_indices = @transform_2, window_bounds = array<i64: 1, 1, 16, 128>}, {transform_indices = @transform_3, window_bounds = array<i64: 1, 4, 16, 128>}, {pipeline_mode = #tpu.pipeline_mode<synchronous>, transform_indices = @transform_4, window_bounds = array<i64: 1280, 128>}, {pipeline_mode = #tpu.pipeline_mode<synchronous>, transform_indices = @transform_5, window_bounds = array<i64: 1, 128>}, {transform_indices = @transform_6, window_bounds = array<i64: 1, 64, 128>}, {transform_indices = @transform_7, window_bounds = array<i64: 1, 2, 128>}]} {
    %c4_i32 = arith.constant 4 : i32
    %0 = arith.muli %arg1, %c4_i32 : i32
    %c0 = arith.constant 0 : index
    %c0_0 = arith.constant 0 : index
    %c0_1 = arith.constant 0 : index
    %c0_2 = arith.constant 0 : index
    %1 = vector.load %arg3[%c0, %c0_0, %c0_1, %c0_2] : memref<1x1x16x128xbf16, #tpu.memory_space<vmem>>, vector<1x1x16x128xbf16>
    %2 = vector.shape_cast %1 : vector<1x1x16x128xbf16> to vector<16x128xbf16>
    %c1_i32 = arith.constant 1 : i32
    %3 = arith.cmpi sge, %0, %c1_i32 : i32
    %4 = arith.extf %2 : vector<16x128xbf16> to vector<16x128xf32>
    %cst = arith.constant 0.000000e+00 : f32
    %5 = vector.broadcast %cst : f32 to vector<16x128xf32>
    %6 = arith.select %3, %4, %5 : vector<16x128xf32>
    %c0_3 = arith.constant 0 : index
    %c0_4 = arith.constant 0 : index
    %c0_5 = arith.constant 0 : index
    %c0_6 = arith.constant 0 : index
    %7 = vector.load %arg2[%c0_3, %c0_4, %c0_5, %c0_6] : memref<1x4x16x128xbf16, #tpu.memory_space<vmem>>, vector<1x1x16x128xbf16>
    %8 = vector.shape_cast %7 : vector<1x1x16x128xbf16> to vector<16x128xbf16>
    %9 = arith.extf %8 : vector<16x128xbf16> to vector<16x128xf32>
    %c0_7 = arith.constant 0 : index
    %c1 = arith.constant 1 : index
    %c0_8 = arith.constant 0 : index
    %c0_9 = arith.constant 0 : index
    %10 = vector.load %arg2[%c0_7, %c1, %c0_8, %c0_9] : memref<1x4x16x128xbf16, #tpu.memory_space<vmem>>, vector<1x1x16x128xbf16>
    %11 = vector.shape_cast %10 : vector<1x1x16x128xbf16> to vector<16x128xbf16>
    %12 = arith.extf %11 : vector<16x128xbf16> to vector<16x128xf32>
    %c0_10 = arith.constant 0 : index
    %c2 = arith.constant 2 : index
    %c0_11 = arith.constant 0 : index
    %c0_12 = arith.constant 0 : index
    %13 = vector.load %arg2[%c0_10, %c2, %c0_11, %c0_12] : memref<1x4x16x128xbf16, #tpu.memory_space<vmem>>, vector<1x1x16x128xbf16>
    %14 = vector.shape_cast %13 : vector<1x1x16x128xbf16> to vector<16x128xbf16>
    %15 = arith.extf %14 : vector<16x128xbf16> to vector<16x128xf32>
    %c0_13 = arith.constant 0 : index
    %c3 = arith.constant 3 : index
    %c0_14 = arith.constant 0 : index
    %c0_15 = arith.constant 0 : index
    %16 = vector.load %arg2[%c0_13, %c3, %c0_14, %c0_15] : memref<1x4x16x128xbf16, #tpu.memory_space<vmem>>, vector<1x1x16x128xbf16>
    %17 = vector.shape_cast %16 : vector<1x1x16x128xbf16> to vector<16x128xbf16>
    %18 = arith.extf %17 : vector<16x128xbf16> to vector<16x128xf32>
    %c0_16 = arith.constant 0 : index
    %c0_17 = arith.constant 0 : index
    %c0_18 = arith.constant 0 : index
    %c0_19 = arith.constant 0 : index
    %19 = vector.load %arg4[%c0_16, %c0_17, %c0_18, %c0_19] : memref<1x1x16x128xbf16, #tpu.memory_space<vmem>>, vector<1x1x16x128xbf16>
    %20 = vector.shape_cast %19 : vector<1x1x16x128xbf16> to vector<16x128xbf16>
    %c4_i32_20 = arith.constant 4 : i32
    %21 = arith.addi %0, %c4_i32_20 : i32
    %c7_i32 = arith.constant 7 : i32
    %22 = arith.cmpi sle, %21, %c7_i32 : i32
    %23 = arith.extf %20 : vector<16x128xbf16> to vector<16x128xf32>
    %cst_21 = arith.constant 0.000000e+00 : f32
    %24 = vector.broadcast %cst_21 : f32 to vector<16x128xf32>
    %25 = arith.select %22, %23, %24 : vector<16x128xf32>
    %26 = tpu.concatenate %6, %9, %12, %15 in 0 : vector<16x128xf32>, vector<16x128xf32>, vector<16x128xf32>, vector<16x128xf32> -> vector<64x128xf32>
    %27 = tpu.concatenate %9, %12, %15, %18 in 0 : vector<16x128xf32>, vector<16x128xf32>, vector<16x128xf32>, vector<16x128xf32> -> vector<64x128xf32>
    %28 = tpu.concatenate %12, %15, %18, %25 in 0 : vector<16x128xf32>, vector<16x128xf32>, vector<16x128xf32>, vector<16x128xf32> -> vector<64x128xf32>
    %29 = tpu.iota {dimensions = array<i32: 0>} : vector<64x128xi32>
    %c16_i32 = arith.constant 16 : i32
    %c0_i32 = arith.constant 0 : i32
    %30 = arith.cmpi eq, %c16_i32, %c0_i32 : i32
    %c1_i32_22 = arith.constant 1 : i32
    %31 = arith.select %30, %c1_i32_22, %c16_i32 : i32
    %32 = vector.broadcast %31 : i32 to vector<64x128xi32>
    %33 = arith.remsi %29, %32 : vector<64x128xi32>
    %c0_i32_23 = arith.constant 0 : i32
    %34 = vector.broadcast %c0_i32_23 : i32 to vector<64x128xi32>
    %35 = arith.cmpi ne, %33, %34 : vector<64x128xi32>
    %c0_i32_24 = arith.constant 0 : i32
    %36 = vector.broadcast %c0_i32_24 : i32 to vector<64x128xi32>
    %37 = arith.cmpi slt, %33, %36 : vector<64x128xi32>
    %c0_i32_25 = arith.constant 0 : i32
    %38 = arith.cmpi slt, %31, %c0_i32_25 : i32
    %39 = vector.broadcast %38 : i1 to vector<64x128xi1>
    %40 = vector.broadcast %39 : vector<64x128xi1> to vector<64x128xi1>
    %41 = arith.xori %37, %40 : vector<64x128xi1>
    %42 = arith.andi %41, %35 : vector<64x128xi1>
    %43 = vector.broadcast %31 : i32 to vector<64x128xi32>
    %44 = arith.addi %33, %43 : vector<64x128xi32>
    %45 = arith.select %42, %44, %33 : vector<64x128xi1>, vector<64x128xi32>
    %cst_26 = arith.constant 0.000000e+00 : f32
    %46 = vector.broadcast %cst_26 : f32 to vector<8x128xf32>
    %47 = tpu.concatenate %46, %26, %46 in 0 : vector<8x128xf32>, vector<64x128xf32>, vector<8x128xf32> -> vector<80x128xf32>
    %c1_i32_27 = arith.constant 1 : i32
    %48 = vector.broadcast %c1_i32_27 : i32 to vector<64x128xi32>
    %49 = arith.cmpi sge, %45, %48 : vector<64x128xi32>
    %50 = vector.extract_strided_slice %47 {offsets = [7, 0], sizes = [64, 128], strides = [1, 1]} : vector<80x128xf32> to vector<64x128xf32>
    %cst_28 = arith.constant 0.000000e+00 : f32
    %51 = vector.broadcast %cst_28 : f32 to vector<64x128xf32>
    %52 = arith.select %49, %50, %51 : vector<64x128xi1>, vector<64x128xf32>
    %c14_i32 = arith.constant 14 : i32
    %53 = vector.broadcast %c14_i32 : i32 to vector<64x128xi32>
    %54 = arith.cmpi sle, %45, %53 : vector<64x128xi32>
    %55 = vector.extract_strided_slice %47 {offsets = [9, 0], sizes = [64, 128], strides = [1, 1]} : vector<80x128xf32> to vector<64x128xf32>
    %cst_29 = arith.constant 0.000000e+00 : f32
    %56 = vector.broadcast %cst_29 : f32 to vector<64x128xf32>
    %57 = arith.select %54, %55, %56 : vector<64x128xi1>, vector<64x128xf32>
    %58 = arith.truncf %52 : vector<64x128xf32> to vector<64x128xbf16>
    %59 = arith.truncf %26 : vector<64x128xf32> to vector<64x128xbf16>
    %60 = arith.truncf %57 : vector<64x128xf32> to vector<64x128xbf16>
    %61 = tpu.concatenate %46, %27, %46 in 0 : vector<8x128xf32>, vector<64x128xf32>, vector<8x128xf32> -> vector<80x128xf32>
    %c1_i32_30 = arith.constant 1 : i32
    %62 = vector.broadcast %c1_i32_30 : i32 to vector<64x128xi32>
    %63 = arith.cmpi sge, %45, %62 : vector<64x128xi32>
    %64 = vector.extract_strided_slice %61 {offsets = [7, 0], sizes = [64, 128], strides = [1, 1]} : vector<80x128xf32> to vector<64x128xf32>
    %cst_31 = arith.constant 0.000000e+00 : f32
    %65 = vector.broadcast %cst_31 : f32 to vector<64x128xf32>
    %66 = arith.select %63, %64, %65 : vector<64x128xi1>, vector<64x128xf32>
    %c14_i32_32 = arith.constant 14 : i32
    %67 = vector.broadcast %c14_i32_32 : i32 to vector<64x128xi32>
    %68 = arith.cmpi sle, %45, %67 : vector<64x128xi32>
    %69 = vector.extract_strided_slice %61 {offsets = [9, 0], sizes = [64, 128], strides = [1, 1]} : vector<80x128xf32> to vector<64x128xf32>
    %cst_33 = arith.constant 0.000000e+00 : f32
    %70 = vector.broadcast %cst_33 : f32 to vector<64x128xf32>
    %71 = arith.select %68, %69, %70 : vector<64x128xi1>, vector<64x128xf32>
    %72 = arith.truncf %66 : vector<64x128xf32> to vector<64x128xbf16>
    %73 = arith.truncf %27 : vector<64x128xf32> to vector<64x128xbf16>
    %74 = arith.truncf %71 : vector<64x128xf32> to vector<64x128xbf16>
    %75 = tpu.concatenate %46, %28, %46 in 0 : vector<8x128xf32>, vector<64x128xf32>, vector<8x128xf32> -> vector<80x128xf32>
    %c1_i32_34 = arith.constant 1 : i32
    %76 = vector.broadcast %c1_i32_34 : i32 to vector<64x128xi32>
    %77 = arith.cmpi sge, %45, %76 : vector<64x128xi32>
    %78 = vector.extract_strided_slice %75 {offsets = [7, 0], sizes = [64, 128], strides = [1, 1]} : vector<80x128xf32> to vector<64x128xf32>
    %cst_35 = arith.constant 0.000000e+00 : f32
    %79 = vector.broadcast %cst_35 : f32 to vector<64x128xf32>
    %80 = arith.select %77, %78, %79 : vector<64x128xi1>, vector<64x128xf32>
    %c14_i32_36 = arith.constant 14 : i32
    %81 = vector.broadcast %c14_i32_36 : i32 to vector<64x128xi32>
    %82 = arith.cmpi sle, %45, %81 : vector<64x128xi32>
    %83 = vector.extract_strided_slice %75 {offsets = [9, 0], sizes = [64, 128], strides = [1, 1]} : vector<80x128xf32> to vector<64x128xf32>
    %cst_37 = arith.constant 0.000000e+00 : f32
    %84 = vector.broadcast %cst_37 : f32 to vector<64x128xf32>
    %85 = arith.select %82, %83, %84 : vector<64x128xi1>, vector<64x128xf32>
    %86 = arith.truncf %80 : vector<64x128xf32> to vector<64x128xbf16>
    %87 = arith.truncf %28 : vector<64x128xf32> to vector<64x128xbf16>
    %88 = arith.truncf %85 : vector<64x128xf32> to vector<64x128xbf16>
    %c0_38 = arith.constant 0 : index
    %c0_39 = arith.constant 0 : index
    %c0_40 = arith.constant 0 : index
    %c0_41 = arith.constant 0 : index
    %89 = vector.load %arg5[%c0_38, %c0_39, %c0_40, %c0_41] : memref<1x4x16x128xbf16, #tpu.memory_space<vmem>>, vector<1x4x16x128xbf16>
    %90 = vector.shape_cast %89 : vector<1x4x16x128xbf16> to vector<4x16x128xbf16>
    %91 = vector.shape_cast %90 : vector<4x16x128xbf16> to vector<64x128xbf16>
    %92 = tpu.concatenate %58, %59, %60, %72, %73, %74, %86, %87, %88, %91 in 1 : vector<64x128xbf16>, vector<64x128xbf16>, vector<64x128xbf16>, vector<64x128xbf16>, vector<64x128xbf16>, vector<64x128xbf16>, vector<64x128xbf16>, vector<64x128xbf16>, vector<64x128xbf16>, vector<64x128xbf16> -> vector<64x1280xbf16>
    %c0_42 = arith.constant 0 : index
    %c0_43 = arith.constant 0 : index
    %93 = vector.load %arg6[%c0_42, %c0_43] : memref<1280x128xbf16, #tpu.memory_space<vmem>>, vector<1280x128xbf16>
    %cst_44 = arith.constant dense<0.000000e+00> : vector<64x128xf32>
    %94 = tpu.matmul %92, %93, %cst_44 {dimension_numbers = #tpu.dot_dimension_numbers<[1], [0], [0], [1], [0, 0, 1, 1], [], []>} : vector<64x1280xbf16>, vector<1280x128xbf16>, vector<64x128xf32> -> vector<64x128xf32>
    %c0_45 = arith.constant 0 : index
    %c0_46 = arith.constant 0 : index
    %95 = vector.load %arg7[%c0_45, %c0_46] : memref<1x128xf32, #tpu.memory_space<vmem>>, vector<1x128xf32>
    %96 = vector.broadcast %95 : vector<1x128xf32> to vector<64x128xf32>
    %97 = arith.addf %94, %96 : vector<64x128xf32>
    %98 = arith.truncf %97 : vector<64x128xf32> to vector<64x128xbf16>
    %c0_47 = arith.constant 0 : index
    %c0_48 = arith.constant 0 : index
    %c0_49 = arith.constant 0 : index
    %99 = vector.load %arg8[%c0_47, %c0_48, %c0_49] : memref<1x64x128xbf16, #tpu.memory_space<vmem>>, vector<1x64x128xbf16>
    %100 = vector.shape_cast %99 : vector<1x64x128xbf16> to vector<64x128xbf16>
    %101 = vector.shape_cast %98 : vector<64x128xbf16> to vector<1x64x128xbf16>
    tpu.vector_store %arg8[%c0_47, %c0_48, %c0_49], %101 {strides = array<i32>} : memref<1x64x128xbf16, #tpu.memory_space<vmem>>, vector<1x64x128xbf16>,
    %102 = arith.extf %98 : vector<64x128xbf16> to vector<64x128xf32>
    %cst_50 = arith.constant dense<0.000000e+00> : vector<128xf32>
    %103 = vector.multi_reduction <add>, %102, %cst_50 [0] : vector<64x128xf32> to vector<128xf32>
    %104 = vector.shape_cast %103 : vector<128xf32> to vector<1x128xf32>
    %c0_51 = arith.constant 0 : index
    %c0_52 = arith.constant 0 : index
    %c0_53 = arith.constant 0 : index
    %105 = vector.load %arg9[%c0_51, %c0_52, %c0_53] : memref<1x2x128xf32, #tpu.memory_space<vmem>>, vector<1x1x128xf32>
    %106 = vector.shape_cast %105 : vector<1x1x128xf32> to vector<1x128xf32>
    %107 = vector.shape_cast %104 : vector<1x128xf32> to vector<1x1x128xf32>
    tpu.vector_store %arg9[%c0_51, %c0_52, %c0_53], %107 {strides = array<i32>} : memref<1x2x128xf32, #tpu.memory_space<vmem>>, vector<1x1x128xf32>,
    %108 = arith.mulf %102, %102 : vector<64x128xf32>
    %cst_54 = arith.constant dense<0.000000e+00> : vector<128xf32>
    %109 = vector.multi_reduction <add>, %108, %cst_54 [0] : vector<64x128xf32> to vector<128xf32>
    %110 = vector.shape_cast %109 : vector<128xf32> to vector<1x128xf32>
    %c0_55 = arith.constant 0 : index
    %c1_56 = arith.constant 1 : index
    %c0_57 = arith.constant 0 : index
    %111 = vector.load %arg9[%c0_55, %c1_56, %c0_57] : memref<1x2x128xf32, #tpu.memory_space<vmem>>, vector<1x1x128xf32>
    %112 = vector.shape_cast %111 : vector<1x1x128xf32> to vector<1x128xf32>
    %113 = vector.shape_cast %110 : vector<1x128xf32> to vector<1x1x128xf32>
    tpu.vector_store %arg9[%c0_55, %c1_56, %c0_57], %113 {strides = array<i32>} : memref<1x2x128xf32, #tpu.memory_space<vmem>>, vector<1x1x128xf32>,
    return
  }
  func.func @transform_0(%arg0: i32, %arg1: i32) -> (i32, i32, i32, i32) {
    %c0_i32 = arith.constant 0 : i32
    %c0_i32_0 = arith.constant 0 : i32
    %c0_i32_1 = arith.constant 0 : i32
    return %arg0, %arg1, %c0_i32, %c0_i32_0 : i32, i32, i32, i32
  }
  func.func @transform_1(%arg0: i32, %arg1: i32) -> (i32, i32, i32, i32) {
    %c4_i32 = arith.constant 4 : i32
    %0 = arith.muli %arg1, %c4_i32 : i32
    %c1_i32 = arith.constant 1 : i32
    %1 = arith.subi %0, %c1_i32 : i32
    %c0_i32 = arith.constant 0 : i32
    %2 = arith.maxsi %1, %c0_i32 : i32
    %c0_i32_0 = arith.constant 0 : i32
    %c0_i32_1 = arith.constant 0 : i32
    %c0_i32_2 = arith.constant 0 : i32
    return %arg0, %2, %c0_i32_0, %c0_i32_1 : i32, i32, i32, i32
  }
  func.func @transform_2(%arg0: i32, %arg1: i32) -> (i32, i32, i32, i32) {
    %c4_i32 = arith.constant 4 : i32
    %0 = arith.muli %arg1, %c4_i32 : i32
    %c4_i32_0 = arith.constant 4 : i32
    %1 = arith.addi %0, %c4_i32_0 : i32
    %c7_i32 = arith.constant 7 : i32
    %2 = arith.minsi %1, %c7_i32 : i32
    %c0_i32 = arith.constant 0 : i32
    %c0_i32_1 = arith.constant 0 : i32
    %c0_i32_2 = arith.constant 0 : i32
    return %arg0, %2, %c0_i32, %c0_i32_1 : i32, i32, i32, i32
  }
  func.func @transform_3(%arg0: i32, %arg1: i32) -> (i32, i32, i32, i32) {
    %c0_i32 = arith.constant 0 : i32
    %c0_i32_0 = arith.constant 0 : i32
    %c0_i32_1 = arith.constant 0 : i32
    return %arg0, %arg1, %c0_i32, %c0_i32_0 : i32, i32, i32, i32
  }
  func.func @transform_4(%arg0: i32, %arg1: i32) -> (i32, i32) {
    %c0_i32 = arith.constant 0 : i32
    %c0_i32_0 = arith.constant 0 : i32
    %c0_i32_1 = arith.constant 0 : i32
    return %c0_i32, %c0_i32_0 : i32, i32
  }
  func.func @transform_5(%arg0: i32, %arg1: i32) -> (i32, i32) {
    %c0_i32 = arith.constant 0 : i32
    %c0_i32_0 = arith.constant 0 : i32
    %c0_i32_1 = arith.constant 0 : i32
    return %c0_i32, %c0_i32_0 : i32, i32
  }
  func.func @transform_6(%arg0: i32, %arg1: i32) -> (i32, i32, i32) {
    %c0_i32 = arith.constant 0 : i32
    %c0_i32_0 = arith.constant 0 : i32
    return %arg0, %arg1, %c0_i32 : i32, i32, i32
  }
  func.func @transform_7(%arg0: i32, %arg1: i32) -> (i32, i32, i32) {
    %c2_i32 = arith.constant 2 : i32
    %0 = arith.muli %arg0, %c2_i32 : i32
    %1 = arith.addi %0, %arg1 : i32
    %c0_i32 = arith.constant 0 : i32
    %c0_i32_0 = arith.constant 0 : i32
    %c0_i32_1 = arith.constant 0 : i32
    return %1, %c0_i32, %c0_i32_0 : i32, i32, i32
  }
}

module attributes {stable_mosaic.version = 11 : i64} {
  func.func @_stats_kernel(%arg0: i32, %arg1: memref<256x128xbf16, #tpu.memory_space<vmem>>, %arg2: memref<1x2x128xf32, #tpu.memory_space<vmem>>) attributes {dimension_semantics = [#tpu.dimension_semantics<parallel>], iteration_bounds = array<i64: 1>, scalar_prefetch = 0 : i64, scratch_operands = 0 : i64, tpu.core_type = #tpu.core_type<tc>, window_params = [{transform_indices = @transform_0, window_bounds = array<i64: 256, 128>}, {transform_indices = @transform_1, window_bounds = array<i64: 1, 2, 128>}]} {
    %c0 = arith.constant 0 : index
    %c0_0 = arith.constant 0 : index
    %0 = vector.load %arg1[%c0, %c0_0] : memref<256x128xbf16, #tpu.memory_space<vmem>>, vector<256x128xbf16>
    %1 = arith.extf %0 : vector<256x128xbf16> to vector<256x128xf32>
    %cst = arith.constant dense<0.000000e+00> : vector<128xf32>
    %2 = vector.multi_reduction <add>, %1, %cst [0] : vector<256x128xf32> to vector<128xf32>
    %3 = vector.shape_cast %2 : vector<128xf32> to vector<1x128xf32>
    %c0_1 = arith.constant 0 : index
    %c0_2 = arith.constant 0 : index
    %c0_3 = arith.constant 0 : index
    %4 = vector.load %arg2[%c0_1, %c0_2, %c0_3] : memref<1x2x128xf32, #tpu.memory_space<vmem>>, vector<1x1x128xf32>
    %5 = vector.shape_cast %4 : vector<1x1x128xf32> to vector<1x128xf32>
    %6 = vector.shape_cast %3 : vector<1x128xf32> to vector<1x1x128xf32>
    tpu.vector_store %arg2[%c0_1, %c0_2, %c0_3], %6 {strides = array<i32>} : memref<1x2x128xf32, #tpu.memory_space<vmem>>, vector<1x1x128xf32>,
    %7 = arith.mulf %1, %1 : vector<256x128xf32>
    %cst_4 = arith.constant dense<0.000000e+00> : vector<128xf32>
    %8 = vector.multi_reduction <add>, %7, %cst_4 [0] : vector<256x128xf32> to vector<128xf32>
    %9 = vector.shape_cast %8 : vector<128xf32> to vector<1x128xf32>
    %c0_5 = arith.constant 0 : index
    %c1 = arith.constant 1 : index
    %c0_6 = arith.constant 0 : index
    %10 = vector.load %arg2[%c0_5, %c1, %c0_6] : memref<1x2x128xf32, #tpu.memory_space<vmem>>, vector<1x1x128xf32>
    %11 = vector.shape_cast %10 : vector<1x1x128xf32> to vector<1x128xf32>
    %12 = vector.shape_cast %9 : vector<1x128xf32> to vector<1x1x128xf32>
    tpu.vector_store %arg2[%c0_5, %c1, %c0_6], %12 {strides = array<i32>} : memref<1x2x128xf32, #tpu.memory_space<vmem>>, vector<1x1x128xf32>,
    return
  }
  func.func @transform_0(%arg0: i32) -> (i32, i32) {
    %c0_i32 = arith.constant 0 : i32
    %c0_i32_0 = arith.constant 0 : i32
    return %arg0, %c0_i32 : i32, i32
  }
  func.func @transform_1(%arg0: i32) -> (i32, i32, i32) {
    %c0_i32 = arith.constant 0 : i32
    %c0_i32_0 = arith.constant 0 : i32
    %c0_i32_1 = arith.constant 0 : i32
    return %arg0, %c0_i32, %c0_i32_0 : i32, i32, i32
  }
}

module attributes {stable_mosaic.version = 11 : i64} {
  func.func @_conv_kernel(%arg0: i32, %arg1: i32, %arg2: memref<1x4x16x256xbf16, #tpu.memory_space<vmem>>, %arg3: memref<1x1x16x256xbf16, #tpu.memory_space<vmem>>, %arg4: memref<1x1x16x256xbf16, #tpu.memory_space<vmem>>, %arg5: memref<1x256xf32, #tpu.memory_space<vmem>>, %arg6: memref<1x256xf32, #tpu.memory_space<vmem>>, %arg7: memref<2304x128xbf16, #tpu.memory_space<vmem>>, %arg8: memref<1x128xf32, #tpu.memory_space<vmem>>, %arg9: memref<1x64x128xbf16, #tpu.memory_space<vmem>>) attributes {dimension_semantics = [#tpu.dimension_semantics<parallel>, #tpu.dimension_semantics<parallel>], iteration_bounds = array<i64: 2, 2>, scalar_prefetch = 0 : i64, scratch_operands = 0 : i64, tpu.core_type = #tpu.core_type<tc>, window_params = [{transform_indices = @transform_0, window_bounds = array<i64: 1, 4, 16, 256>}, {transform_indices = @transform_1, window_bounds = array<i64: 1, 1, 16, 256>}, {transform_indices = @transform_2, window_bounds = array<i64: 1, 1, 16, 256>}, {pipeline_mode = #tpu.pipeline_mode<synchronous>, transform_indices = @transform_3, window_bounds = array<i64: 1, 256>}, {pipeline_mode = #tpu.pipeline_mode<synchronous>, transform_indices = @transform_4, window_bounds = array<i64: 1, 256>}, {pipeline_mode = #tpu.pipeline_mode<synchronous>, transform_indices = @transform_5, window_bounds = array<i64: 2304, 128>}, {pipeline_mode = #tpu.pipeline_mode<synchronous>, transform_indices = @transform_6, window_bounds = array<i64: 1, 128>}, {transform_indices = @transform_7, window_bounds = array<i64: 1, 64, 128>}]} {
    %c4_i32 = arith.constant 4 : i32
    %0 = arith.muli %arg1, %c4_i32 : i32
    %c0 = arith.constant 0 : index
    %c0_0 = arith.constant 0 : index
    %1 = vector.load %arg5[%c0, %c0_0] : memref<1x256xf32, #tpu.memory_space<vmem>>, vector<1x256xf32>
    %c0_1 = arith.constant 0 : index
    %c0_2 = arith.constant 0 : index
    %2 = vector.load %arg6[%c0_1, %c0_2] : memref<1x256xf32, #tpu.memory_space<vmem>>, vector<1x256xf32>
    %c0_3 = arith.constant 0 : index
    %c0_4 = arith.constant 0 : index
    %c0_5 = arith.constant 0 : index
    %c0_6 = arith.constant 0 : index
    %3 = vector.load %arg3[%c0_3, %c0_4, %c0_5, %c0_6] : memref<1x1x16x256xbf16, #tpu.memory_space<vmem>>, vector<1x1x16x256xbf16>
    %4 = vector.shape_cast %3 : vector<1x1x16x256xbf16> to vector<16x256xbf16>
    %c1_i32 = arith.constant 1 : i32
    %5 = arith.cmpi sge, %0, %c1_i32 : i32
    %6 = arith.extf %4 : vector<16x256xbf16> to vector<16x256xf32>
    %7 = vector.broadcast %1 : vector<1x256xf32> to vector<16x256xf32>
    %8 = arith.mulf %6, %7 : vector<16x256xf32>
    %9 = vector.broadcast %2 : vector<1x256xf32> to vector<16x256xf32>
    %10 = arith.addf %8, %9 : vector<16x256xf32>
    %cst = arith.constant 0.000000e+00 : f32
    %11 = vector.broadcast %cst : f32 to vector<16x256xf32>
    %12 = arith.select %5, %10, %11 : vector<16x256xf32>
    %c0_7 = arith.constant 0 : index
    %c0_8 = arith.constant 0 : index
    %c0_9 = arith.constant 0 : index
    %c0_10 = arith.constant 0 : index
    %13 = vector.load %arg2[%c0_7, %c0_8, %c0_9, %c0_10] : memref<1x4x16x256xbf16, #tpu.memory_space<vmem>>, vector<1x1x16x256xbf16>
    %14 = vector.shape_cast %13 : vector<1x1x16x256xbf16> to vector<16x256xbf16>
    %15 = arith.extf %14 : vector<16x256xbf16> to vector<16x256xf32>
    %16 = vector.broadcast %1 : vector<1x256xf32> to vector<16x256xf32>
    %17 = arith.mulf %15, %16 : vector<16x256xf32>
    %18 = vector.broadcast %2 : vector<1x256xf32> to vector<16x256xf32>
    %19 = arith.addf %17, %18 : vector<16x256xf32>
    %c0_11 = arith.constant 0 : index
    %c1 = arith.constant 1 : index
    %c0_12 = arith.constant 0 : index
    %c0_13 = arith.constant 0 : index
    %20 = vector.load %arg2[%c0_11, %c1, %c0_12, %c0_13] : memref<1x4x16x256xbf16, #tpu.memory_space<vmem>>, vector<1x1x16x256xbf16>
    %21 = vector.shape_cast %20 : vector<1x1x16x256xbf16> to vector<16x256xbf16>
    %22 = arith.extf %21 : vector<16x256xbf16> to vector<16x256xf32>
    %23 = vector.broadcast %1 : vector<1x256xf32> to vector<16x256xf32>
    %24 = arith.mulf %22, %23 : vector<16x256xf32>
    %25 = vector.broadcast %2 : vector<1x256xf32> to vector<16x256xf32>
    %26 = arith.addf %24, %25 : vector<16x256xf32>
    %c0_14 = arith.constant 0 : index
    %c2 = arith.constant 2 : index
    %c0_15 = arith.constant 0 : index
    %c0_16 = arith.constant 0 : index
    %27 = vector.load %arg2[%c0_14, %c2, %c0_15, %c0_16] : memref<1x4x16x256xbf16, #tpu.memory_space<vmem>>, vector<1x1x16x256xbf16>
    %28 = vector.shape_cast %27 : vector<1x1x16x256xbf16> to vector<16x256xbf16>
    %29 = arith.extf %28 : vector<16x256xbf16> to vector<16x256xf32>
    %30 = vector.broadcast %1 : vector<1x256xf32> to vector<16x256xf32>
    %31 = arith.mulf %29, %30 : vector<16x256xf32>
    %32 = vector.broadcast %2 : vector<1x256xf32> to vector<16x256xf32>
    %33 = arith.addf %31, %32 : vector<16x256xf32>
    %c0_17 = arith.constant 0 : index
    %c3 = arith.constant 3 : index
    %c0_18 = arith.constant 0 : index
    %c0_19 = arith.constant 0 : index
    %34 = vector.load %arg2[%c0_17, %c3, %c0_18, %c0_19] : memref<1x4x16x256xbf16, #tpu.memory_space<vmem>>, vector<1x1x16x256xbf16>
    %35 = vector.shape_cast %34 : vector<1x1x16x256xbf16> to vector<16x256xbf16>
    %36 = arith.extf %35 : vector<16x256xbf16> to vector<16x256xf32>
    %37 = vector.broadcast %1 : vector<1x256xf32> to vector<16x256xf32>
    %38 = arith.mulf %36, %37 : vector<16x256xf32>
    %39 = vector.broadcast %2 : vector<1x256xf32> to vector<16x256xf32>
    %40 = arith.addf %38, %39 : vector<16x256xf32>
    %c0_20 = arith.constant 0 : index
    %c0_21 = arith.constant 0 : index
    %c0_22 = arith.constant 0 : index
    %c0_23 = arith.constant 0 : index
    %41 = vector.load %arg4[%c0_20, %c0_21, %c0_22, %c0_23] : memref<1x1x16x256xbf16, #tpu.memory_space<vmem>>, vector<1x1x16x256xbf16>
    %42 = vector.shape_cast %41 : vector<1x1x16x256xbf16> to vector<16x256xbf16>
    %c4_i32_24 = arith.constant 4 : i32
    %43 = arith.addi %0, %c4_i32_24 : i32
    %c7_i32 = arith.constant 7 : i32
    %44 = arith.cmpi sle, %43, %c7_i32 : i32
    %45 = arith.extf %42 : vector<16x256xbf16> to vector<16x256xf32>
    %46 = vector.broadcast %1 : vector<1x256xf32> to vector<16x256xf32>
    %47 = arith.mulf %45, %46 : vector<16x256xf32>
    %48 = vector.broadcast %2 : vector<1x256xf32> to vector<16x256xf32>
    %49 = arith.addf %47, %48 : vector<16x256xf32>
    %cst_25 = arith.constant 0.000000e+00 : f32
    %50 = vector.broadcast %cst_25 : f32 to vector<16x256xf32>
    %51 = arith.select %44, %49, %50 : vector<16x256xf32>
    %52 = tpu.concatenate %12, %19, %26, %33 in 0 : vector<16x256xf32>, vector<16x256xf32>, vector<16x256xf32>, vector<16x256xf32> -> vector<64x256xf32>
    %53 = tpu.concatenate %19, %26, %33, %40 in 0 : vector<16x256xf32>, vector<16x256xf32>, vector<16x256xf32>, vector<16x256xf32> -> vector<64x256xf32>
    %54 = tpu.concatenate %26, %33, %40, %51 in 0 : vector<16x256xf32>, vector<16x256xf32>, vector<16x256xf32>, vector<16x256xf32> -> vector<64x256xf32>
    %55 = tpu.iota {dimensions = array<i32: 0>} : vector<64x256xi32>
    %c16_i32 = arith.constant 16 : i32
    %c0_i32 = arith.constant 0 : i32
    %56 = arith.cmpi eq, %c16_i32, %c0_i32 : i32
    %c1_i32_26 = arith.constant 1 : i32
    %57 = arith.select %56, %c1_i32_26, %c16_i32 : i32
    %58 = vector.broadcast %57 : i32 to vector<64x256xi32>
    %59 = arith.remsi %55, %58 : vector<64x256xi32>
    %c0_i32_27 = arith.constant 0 : i32
    %60 = vector.broadcast %c0_i32_27 : i32 to vector<64x256xi32>
    %61 = arith.cmpi ne, %59, %60 : vector<64x256xi32>
    %c0_i32_28 = arith.constant 0 : i32
    %62 = vector.broadcast %c0_i32_28 : i32 to vector<64x256xi32>
    %63 = arith.cmpi slt, %59, %62 : vector<64x256xi32>
    %c0_i32_29 = arith.constant 0 : i32
    %64 = arith.cmpi slt, %57, %c0_i32_29 : i32
    %65 = vector.broadcast %64 : i1 to vector<64x256xi1>
    %66 = vector.broadcast %65 : vector<64x256xi1> to vector<64x256xi1>
    %67 = arith.xori %63, %66 : vector<64x256xi1>
    %68 = arith.andi %67, %61 : vector<64x256xi1>
    %69 = vector.broadcast %57 : i32 to vector<64x256xi32>
    %70 = arith.addi %59, %69 : vector<64x256xi32>
    %71 = arith.select %68, %70, %59 : vector<64x256xi1>, vector<64x256xi32>
    %cst_30 = arith.constant 0.000000e+00 : f32
    %72 = vector.broadcast %cst_30 : f32 to vector<8x256xf32>
    %73 = tpu.concatenate %72, %52, %72 in 0 : vector<8x256xf32>, vector<64x256xf32>, vector<8x256xf32> -> vector<80x256xf32>
    %c1_i32_31 = arith.constant 1 : i32
    %74 = vector.broadcast %c1_i32_31 : i32 to vector<64x256xi32>
    %75 = arith.cmpi sge, %71, %74 : vector<64x256xi32>
    %76 = vector.extract_strided_slice %73 {offsets = [7, 0], sizes = [64, 256], strides = [1, 1]} : vector<80x256xf32> to vector<64x256xf32>
    %cst_32 = arith.constant 0.000000e+00 : f32
    %77 = vector.broadcast %cst_32 : f32 to vector<64x256xf32>
    %78 = arith.select %75, %76, %77 : vector<64x256xi1>, vector<64x256xf32>
    %c14_i32 = arith.constant 14 : i32
    %79 = vector.broadcast %c14_i32 : i32 to vector<64x256xi32>
    %80 = arith.cmpi sle, %71, %79 : vector<64x256xi32>
    %81 = vector.extract_strided_slice %73 {offsets = [9, 0], sizes = [64, 256], strides = [1, 1]} : vector<80x256xf32> to vector<64x256xf32>
    %cst_33 = arith.constant 0.000000e+00 : f32
    %82 = vector.broadcast %cst_33 : f32 to vector<64x256xf32>
    %83 = arith.select %80, %81, %82 : vector<64x256xi1>, vector<64x256xf32>
    %84 = arith.truncf %78 : vector<64x256xf32> to vector<64x256xbf16>
    %85 = arith.truncf %52 : vector<64x256xf32> to vector<64x256xbf16>
    %86 = arith.truncf %83 : vector<64x256xf32> to vector<64x256xbf16>
    %87 = tpu.concatenate %72, %53, %72 in 0 : vector<8x256xf32>, vector<64x256xf32>, vector<8x256xf32> -> vector<80x256xf32>
    %c1_i32_34 = arith.constant 1 : i32
    %88 = vector.broadcast %c1_i32_34 : i32 to vector<64x256xi32>
    %89 = arith.cmpi sge, %71, %88 : vector<64x256xi32>
    %90 = vector.extract_strided_slice %87 {offsets = [7, 0], sizes = [64, 256], strides = [1, 1]} : vector<80x256xf32> to vector<64x256xf32>
    %cst_35 = arith.constant 0.000000e+00 : f32
    %91 = vector.broadcast %cst_35 : f32 to vector<64x256xf32>
    %92 = arith.select %89, %90, %91 : vector<64x256xi1>, vector<64x256xf32>
    %c14_i32_36 = arith.constant 14 : i32
    %93 = vector.broadcast %c14_i32_36 : i32 to vector<64x256xi32>
    %94 = arith.cmpi sle, %71, %93 : vector<64x256xi32>
    %95 = vector.extract_strided_slice %87 {offsets = [9, 0], sizes = [64, 256], strides = [1, 1]} : vector<80x256xf32> to vector<64x256xf32>
    %cst_37 = arith.constant 0.000000e+00 : f32
    %96 = vector.broadcast %cst_37 : f32 to vector<64x256xf32>
    %97 = arith.select %94, %95, %96 : vector<64x256xi1>, vector<64x256xf32>
    %98 = arith.truncf %92 : vector<64x256xf32> to vector<64x256xbf16>
    %99 = arith.truncf %53 : vector<64x256xf32> to vector<64x256xbf16>
    %100 = arith.truncf %97 : vector<64x256xf32> to vector<64x256xbf16>
    %101 = tpu.concatenate %72, %54, %72 in 0 : vector<8x256xf32>, vector<64x256xf32>, vector<8x256xf32> -> vector<80x256xf32>
    %c1_i32_38 = arith.constant 1 : i32
    %102 = vector.broadcast %c1_i32_38 : i32 to vector<64x256xi32>
    %103 = arith.cmpi sge, %71, %102 : vector<64x256xi32>
    %104 = vector.extract_strided_slice %101 {offsets = [7, 0], sizes = [64, 256], strides = [1, 1]} : vector<80x256xf32> to vector<64x256xf32>
    %cst_39 = arith.constant 0.000000e+00 : f32
    %105 = vector.broadcast %cst_39 : f32 to vector<64x256xf32>
    %106 = arith.select %103, %104, %105 : vector<64x256xi1>, vector<64x256xf32>
    %c14_i32_40 = arith.constant 14 : i32
    %107 = vector.broadcast %c14_i32_40 : i32 to vector<64x256xi32>
    %108 = arith.cmpi sle, %71, %107 : vector<64x256xi32>
    %109 = vector.extract_strided_slice %101 {offsets = [9, 0], sizes = [64, 256], strides = [1, 1]} : vector<80x256xf32> to vector<64x256xf32>
    %cst_41 = arith.constant 0.000000e+00 : f32
    %110 = vector.broadcast %cst_41 : f32 to vector<64x256xf32>
    %111 = arith.select %108, %109, %110 : vector<64x256xi1>, vector<64x256xf32>
    %112 = arith.truncf %106 : vector<64x256xf32> to vector<64x256xbf16>
    %113 = arith.truncf %54 : vector<64x256xf32> to vector<64x256xbf16>
    %114 = arith.truncf %111 : vector<64x256xf32> to vector<64x256xbf16>
    %115 = tpu.concatenate %84, %85, %86, %98, %99, %100, %112, %113, %114 in 1 : vector<64x256xbf16>, vector<64x256xbf16>, vector<64x256xbf16>, vector<64x256xbf16>, vector<64x256xbf16>, vector<64x256xbf16>, vector<64x256xbf16>, vector<64x256xbf16>, vector<64x256xbf16> -> vector<64x2304xbf16>
    %c0_42 = arith.constant 0 : index
    %c0_43 = arith.constant 0 : index
    %116 = vector.load %arg7[%c0_42, %c0_43] : memref<2304x128xbf16, #tpu.memory_space<vmem>>, vector<2304x128xbf16>
    %cst_44 = arith.constant dense<0.000000e+00> : vector<64x128xf32>
    %117 = tpu.matmul %115, %116, %cst_44 {dimension_numbers = #tpu.dot_dimension_numbers<[1], [0], [0], [1], [0, 0, 1, 1], [], []>} : vector<64x2304xbf16>, vector<2304x128xbf16>, vector<64x128xf32> -> vector<64x128xf32>
    %c0_45 = arith.constant 0 : index
    %c0_46 = arith.constant 0 : index
    %118 = vector.load %arg8[%c0_45, %c0_46] : memref<1x128xf32, #tpu.memory_space<vmem>>, vector<1x128xf32>
    %119 = vector.broadcast %118 : vector<1x128xf32> to vector<64x128xf32>
    %120 = arith.addf %117, %119 : vector<64x128xf32>
    %121 = arith.negf %120 : vector<64x128xf32>
    %122 = math.exp %121 : vector<64x128xf32>
    %cst_47 = arith.constant 1.000000e+00 : f32
    %123 = vector.broadcast %cst_47 : f32 to vector<64x128xf32>
    %124 = arith.addf %123, %122 : vector<64x128xf32>
    %125 = arith.divf %123, %124 : vector<64x128xf32>
    %126 = arith.mulf %120, %125 : vector<64x128xf32>
    %127 = arith.truncf %126 : vector<64x128xf32> to vector<64x128xbf16>
    %c0_48 = arith.constant 0 : index
    %c0_49 = arith.constant 0 : index
    %c0_50 = arith.constant 0 : index
    %128 = vector.load %arg9[%c0_48, %c0_49, %c0_50] : memref<1x64x128xbf16, #tpu.memory_space<vmem>>, vector<1x64x128xbf16>
    %129 = vector.shape_cast %128 : vector<1x64x128xbf16> to vector<64x128xbf16>
    %130 = vector.shape_cast %127 : vector<64x128xbf16> to vector<1x64x128xbf16>
    tpu.vector_store %arg9[%c0_48, %c0_49, %c0_50], %130 {strides = array<i32>} : memref<1x64x128xbf16, #tpu.memory_space<vmem>>, vector<1x64x128xbf16>,
    return
  }
  func.func @transform_0(%arg0: i32, %arg1: i32) -> (i32, i32, i32, i32) {
    %c0_i32 = arith.constant 0 : i32
    %c0_i32_0 = arith.constant 0 : i32
    %c0_i32_1 = arith.constant 0 : i32
    return %arg0, %arg1, %c0_i32, %c0_i32_0 : i32, i32, i32, i32
  }
  func.func @transform_1(%arg0: i32, %arg1: i32) -> (i32, i32, i32, i32) {
    %c4_i32 = arith.constant 4 : i32
    %0 = arith.muli %arg1, %c4_i32 : i32
    %c1_i32 = arith.constant 1 : i32
    %1 = arith.subi %0, %c1_i32 : i32
    %c0_i32 = arith.constant 0 : i32
    %2 = arith.maxsi %1, %c0_i32 : i32
    %c0_i32_0 = arith.constant 0 : i32
    %c0_i32_1 = arith.constant 0 : i32
    %c0_i32_2 = arith.constant 0 : i32
    return %arg0, %2, %c0_i32_0, %c0_i32_1 : i32, i32, i32, i32
  }
  func.func @transform_2(%arg0: i32, %arg1: i32) -> (i32, i32, i32, i32) {
    %c4_i32 = arith.constant 4 : i32
    %0 = arith.muli %arg1, %c4_i32 : i32
    %c4_i32_0 = arith.constant 4 : i32
    %1 = arith.addi %0, %c4_i32_0 : i32
    %c7_i32 = arith.constant 7 : i32
    %2 = arith.minsi %1, %c7_i32 : i32
    %c0_i32 = arith.constant 0 : i32
    %c0_i32_1 = arith.constant 0 : i32
    %c0_i32_2 = arith.constant 0 : i32
    return %arg0, %2, %c0_i32, %c0_i32_1 : i32, i32, i32, i32
  }
  func.func @transform_3(%arg0: i32, %arg1: i32) -> (i32, i32) {
    %c0_i32 = arith.constant 0 : i32
    %c0_i32_0 = arith.constant 0 : i32
    %c0_i32_1 = arith.constant 0 : i32
    return %c0_i32, %c0_i32_0 : i32, i32
  }
  func.func @transform_4(%arg0: i32, %arg1: i32) -> (i32, i32) {
    %c0_i32 = arith.constant 0 : i32
    %c0_i32_0 = arith.constant 0 : i32
    %c0_i32_1 = arith.constant 0 : i32
    return %c0_i32, %c0_i32_0 : i32, i32
  }
  func.func @transform_5(%arg0: i32, %arg1: i32) -> (i32, i32) {
    %c0_i32 = arith.constant 0 : i32
    %c0_i32_0 = arith.constant 0 : i32
    %c0_i32_1 = arith.constant 0 : i32
    return %c0_i32, %c0_i32_0 : i32, i32
  }
  func.func @transform_6(%arg0: i32, %arg1: i32) -> (i32, i32) {
    %c0_i32 = arith.constant 0 : i32
    %c0_i32_0 = arith.constant 0 : i32
    %c0_i32_1 = arith.constant 0 : i32
    return %c0_i32, %c0_i32_0 : i32, i32
  }
  func.func @transform_7(%arg0: i32, %arg1: i32) -> (i32, i32, i32) {
    %c0_i32 = arith.constant 0 : i32
    %c0_i32_0 = arith.constant 0 : i32
    return %arg0, %arg1, %c0_i32 : i32, i32, i32
  }
}

module attributes {stable_mosaic.version = 11 : i64} {
  func.func @_conv_kernel(%arg0: i32, %arg1: i32, %arg2: memref<1x4x16x128xbf16, #tpu.memory_space<vmem>>, %arg3: memref<1x1x16x128xbf16, #tpu.memory_space<vmem>>, %arg4: memref<1x1x16x128xbf16, #tpu.memory_space<vmem>>, %arg5: memref<1x4x16x256xbf16, #tpu.memory_space<vmem>>, %arg6: memref<1408x128xbf16, #tpu.memory_space<vmem>>, %arg7: memref<1x128xf32, #tpu.memory_space<vmem>>, %arg8: memref<1x64x128xbf16, #tpu.memory_space<vmem>>) attributes {dimension_semantics = [#tpu.dimension_semantics<parallel>, #tpu.dimension_semantics<parallel>], iteration_bounds = array<i64: 2, 2>, scalar_prefetch = 0 : i64, scratch_operands = 0 : i64, tpu.core_type = #tpu.core_type<tc>, window_params = [{transform_indices = @transform_0, window_bounds = array<i64: 1, 4, 16, 128>}, {transform_indices = @transform_1, window_bounds = array<i64: 1, 1, 16, 128>}, {transform_indices = @transform_2, window_bounds = array<i64: 1, 1, 16, 128>}, {transform_indices = @transform_3, window_bounds = array<i64: 1, 4, 16, 256>}, {pipeline_mode = #tpu.pipeline_mode<synchronous>, transform_indices = @transform_4, window_bounds = array<i64: 1408, 128>}, {pipeline_mode = #tpu.pipeline_mode<synchronous>, transform_indices = @transform_5, window_bounds = array<i64: 1, 128>}, {transform_indices = @transform_6, window_bounds = array<i64: 1, 64, 128>}]} {
    %c4_i32 = arith.constant 4 : i32
    %0 = arith.muli %arg1, %c4_i32 : i32
    %c0 = arith.constant 0 : index
    %c0_0 = arith.constant 0 : index
    %c0_1 = arith.constant 0 : index
    %c0_2 = arith.constant 0 : index
    %1 = vector.load %arg3[%c0, %c0_0, %c0_1, %c0_2] : memref<1x1x16x128xbf16, #tpu.memory_space<vmem>>, vector<1x1x16x128xbf16>
    %2 = vector.shape_cast %1 : vector<1x1x16x128xbf16> to vector<16x128xbf16>
    %c1_i32 = arith.constant 1 : i32
    %3 = arith.cmpi sge, %0, %c1_i32 : i32
    %4 = arith.extf %2 : vector<16x128xbf16> to vector<16x128xf32>
    %cst = arith.constant 0.000000e+00 : f32
    %5 = vector.broadcast %cst : f32 to vector<16x128xf32>
    %6 = arith.select %3, %4, %5 : vector<16x128xf32>
    %c0_3 = arith.constant 0 : index
    %c0_4 = arith.constant 0 : index
    %c0_5 = arith.constant 0 : index
    %c0_6 = arith.constant 0 : index
    %7 = vector.load %arg2[%c0_3, %c0_4, %c0_5, %c0_6] : memref<1x4x16x128xbf16, #tpu.memory_space<vmem>>, vector<1x1x16x128xbf16>
    %8 = vector.shape_cast %7 : vector<1x1x16x128xbf16> to vector<16x128xbf16>
    %9 = arith.extf %8 : vector<16x128xbf16> to vector<16x128xf32>
    %c0_7 = arith.constant 0 : index
    %c1 = arith.constant 1 : index
    %c0_8 = arith.constant 0 : index
    %c0_9 = arith.constant 0 : index
    %10 = vector.load %arg2[%c0_7, %c1, %c0_8, %c0_9] : memref<1x4x16x128xbf16, #tpu.memory_space<vmem>>, vector<1x1x16x128xbf16>
    %11 = vector.shape_cast %10 : vector<1x1x16x128xbf16> to vector<16x128xbf16>
    %12 = arith.extf %11 : vector<16x128xbf16> to vector<16x128xf32>
    %c0_10 = arith.constant 0 : index
    %c2 = arith.constant 2 : index
    %c0_11 = arith.constant 0 : index
    %c0_12 = arith.constant 0 : index
    %13 = vector.load %arg2[%c0_10, %c2, %c0_11, %c0_12] : memref<1x4x16x128xbf16, #tpu.memory_space<vmem>>, vector<1x1x16x128xbf16>
    %14 = vector.shape_cast %13 : vector<1x1x16x128xbf16> to vector<16x128xbf16>
    %15 = arith.extf %14 : vector<16x128xbf16> to vector<16x128xf32>
    %c0_13 = arith.constant 0 : index
    %c3 = arith.constant 3 : index
    %c0_14 = arith.constant 0 : index
    %c0_15 = arith.constant 0 : index
    %16 = vector.load %arg2[%c0_13, %c3, %c0_14, %c0_15] : memref<1x4x16x128xbf16, #tpu.memory_space<vmem>>, vector<1x1x16x128xbf16>
    %17 = vector.shape_cast %16 : vector<1x1x16x128xbf16> to vector<16x128xbf16>
    %18 = arith.extf %17 : vector<16x128xbf16> to vector<16x128xf32>
    %c0_16 = arith.constant 0 : index
    %c0_17 = arith.constant 0 : index
    %c0_18 = arith.constant 0 : index
    %c0_19 = arith.constant 0 : index
    %19 = vector.load %arg4[%c0_16, %c0_17, %c0_18, %c0_19] : memref<1x1x16x128xbf16, #tpu.memory_space<vmem>>, vector<1x1x16x128xbf16>
    %20 = vector.shape_cast %19 : vector<1x1x16x128xbf16> to vector<16x128xbf16>
    %c4_i32_20 = arith.constant 4 : i32
    %21 = arith.addi %0, %c4_i32_20 : i32
    %c7_i32 = arith.constant 7 : i32
    %22 = arith.cmpi sle, %21, %c7_i32 : i32
    %23 = arith.extf %20 : vector<16x128xbf16> to vector<16x128xf32>
    %cst_21 = arith.constant 0.000000e+00 : f32
    %24 = vector.broadcast %cst_21 : f32 to vector<16x128xf32>
    %25 = arith.select %22, %23, %24 : vector<16x128xf32>
    %26 = tpu.concatenate %6, %9, %12, %15 in 0 : vector<16x128xf32>, vector<16x128xf32>, vector<16x128xf32>, vector<16x128xf32> -> vector<64x128xf32>
    %27 = tpu.concatenate %9, %12, %15, %18 in 0 : vector<16x128xf32>, vector<16x128xf32>, vector<16x128xf32>, vector<16x128xf32> -> vector<64x128xf32>
    %28 = tpu.concatenate %12, %15, %18, %25 in 0 : vector<16x128xf32>, vector<16x128xf32>, vector<16x128xf32>, vector<16x128xf32> -> vector<64x128xf32>
    %29 = tpu.iota {dimensions = array<i32: 0>} : vector<64x128xi32>
    %c16_i32 = arith.constant 16 : i32
    %c0_i32 = arith.constant 0 : i32
    %30 = arith.cmpi eq, %c16_i32, %c0_i32 : i32
    %c1_i32_22 = arith.constant 1 : i32
    %31 = arith.select %30, %c1_i32_22, %c16_i32 : i32
    %32 = vector.broadcast %31 : i32 to vector<64x128xi32>
    %33 = arith.remsi %29, %32 : vector<64x128xi32>
    %c0_i32_23 = arith.constant 0 : i32
    %34 = vector.broadcast %c0_i32_23 : i32 to vector<64x128xi32>
    %35 = arith.cmpi ne, %33, %34 : vector<64x128xi32>
    %c0_i32_24 = arith.constant 0 : i32
    %36 = vector.broadcast %c0_i32_24 : i32 to vector<64x128xi32>
    %37 = arith.cmpi slt, %33, %36 : vector<64x128xi32>
    %c0_i32_25 = arith.constant 0 : i32
    %38 = arith.cmpi slt, %31, %c0_i32_25 : i32
    %39 = vector.broadcast %38 : i1 to vector<64x128xi1>
    %40 = vector.broadcast %39 : vector<64x128xi1> to vector<64x128xi1>
    %41 = arith.xori %37, %40 : vector<64x128xi1>
    %42 = arith.andi %41, %35 : vector<64x128xi1>
    %43 = vector.broadcast %31 : i32 to vector<64x128xi32>
    %44 = arith.addi %33, %43 : vector<64x128xi32>
    %45 = arith.select %42, %44, %33 : vector<64x128xi1>, vector<64x128xi32>
    %cst_26 = arith.constant 0.000000e+00 : f32
    %46 = vector.broadcast %cst_26 : f32 to vector<8x128xf32>
    %47 = tpu.concatenate %46, %26, %46 in 0 : vector<8x128xf32>, vector<64x128xf32>, vector<8x128xf32> -> vector<80x128xf32>
    %c1_i32_27 = arith.constant 1 : i32
    %48 = vector.broadcast %c1_i32_27 : i32 to vector<64x128xi32>
    %49 = arith.cmpi sge, %45, %48 : vector<64x128xi32>
    %50 = vector.extract_strided_slice %47 {offsets = [7, 0], sizes = [64, 128], strides = [1, 1]} : vector<80x128xf32> to vector<64x128xf32>
    %cst_28 = arith.constant 0.000000e+00 : f32
    %51 = vector.broadcast %cst_28 : f32 to vector<64x128xf32>
    %52 = arith.select %49, %50, %51 : vector<64x128xi1>, vector<64x128xf32>
    %c14_i32 = arith.constant 14 : i32
    %53 = vector.broadcast %c14_i32 : i32 to vector<64x128xi32>
    %54 = arith.cmpi sle, %45, %53 : vector<64x128xi32>
    %55 = vector.extract_strided_slice %47 {offsets = [9, 0], sizes = [64, 128], strides = [1, 1]} : vector<80x128xf32> to vector<64x128xf32>
    %cst_29 = arith.constant 0.000000e+00 : f32
    %56 = vector.broadcast %cst_29 : f32 to vector<64x128xf32>
    %57 = arith.select %54, %55, %56 : vector<64x128xi1>, vector<64x128xf32>
    %58 = arith.truncf %52 : vector<64x128xf32> to vector<64x128xbf16>
    %59 = arith.truncf %26 : vector<64x128xf32> to vector<64x128xbf16>
    %60 = arith.truncf %57 : vector<64x128xf32> to vector<64x128xbf16>
    %61 = tpu.concatenate %46, %27, %46 in 0 : vector<8x128xf32>, vector<64x128xf32>, vector<8x128xf32> -> vector<80x128xf32>
    %c1_i32_30 = arith.constant 1 : i32
    %62 = vector.broadcast %c1_i32_30 : i32 to vector<64x128xi32>
    %63 = arith.cmpi sge, %45, %62 : vector<64x128xi32>
    %64 = vector.extract_strided_slice %61 {offsets = [7, 0], sizes = [64, 128], strides = [1, 1]} : vector<80x128xf32> to vector<64x128xf32>
    %cst_31 = arith.constant 0.000000e+00 : f32
    %65 = vector.broadcast %cst_31 : f32 to vector<64x128xf32>
    %66 = arith.select %63, %64, %65 : vector<64x128xi1>, vector<64x128xf32>
    %c14_i32_32 = arith.constant 14 : i32
    %67 = vector.broadcast %c14_i32_32 : i32 to vector<64x128xi32>
    %68 = arith.cmpi sle, %45, %67 : vector<64x128xi32>
    %69 = vector.extract_strided_slice %61 {offsets = [9, 0], sizes = [64, 128], strides = [1, 1]} : vector<80x128xf32> to vector<64x128xf32>
    %cst_33 = arith.constant 0.000000e+00 : f32
    %70 = vector.broadcast %cst_33 : f32 to vector<64x128xf32>
    %71 = arith.select %68, %69, %70 : vector<64x128xi1>, vector<64x128xf32>
    %72 = arith.truncf %66 : vector<64x128xf32> to vector<64x128xbf16>
    %73 = arith.truncf %27 : vector<64x128xf32> to vector<64x128xbf16>
    %74 = arith.truncf %71 : vector<64x128xf32> to vector<64x128xbf16>
    %75 = tpu.concatenate %46, %28, %46 in 0 : vector<8x128xf32>, vector<64x128xf32>, vector<8x128xf32> -> vector<80x128xf32>
    %c1_i32_34 = arith.constant 1 : i32
    %76 = vector.broadcast %c1_i32_34 : i32 to vector<64x128xi32>
    %77 = arith.cmpi sge, %45, %76 : vector<64x128xi32>
    %78 = vector.extract_strided_slice %75 {offsets = [7, 0], sizes = [64, 128], strides = [1, 1]} : vector<80x128xf32> to vector<64x128xf32>
    %cst_35 = arith.constant 0.000000e+00 : f32
    %79 = vector.broadcast %cst_35 : f32 to vector<64x128xf32>
    %80 = arith.select %77, %78, %79 : vector<64x128xi1>, vector<64x128xf32>
    %c14_i32_36 = arith.constant 14 : i32
    %81 = vector.broadcast %c14_i32_36 : i32 to vector<64x128xi32>
    %82 = arith.cmpi sle, %45, %81 : vector<64x128xi32>
    %83 = vector.extract_strided_slice %75 {offsets = [9, 0], sizes = [64, 128], strides = [1, 1]} : vector<80x128xf32> to vector<64x128xf32>
    %cst_37 = arith.constant 0.000000e+00 : f32
    %84 = vector.broadcast %cst_37 : f32 to vector<64x128xf32>
    %85 = arith.select %82, %83, %84 : vector<64x128xi1>, vector<64x128xf32>
    %86 = arith.truncf %80 : vector<64x128xf32> to vector<64x128xbf16>
    %87 = arith.truncf %28 : vector<64x128xf32> to vector<64x128xbf16>
    %88 = arith.truncf %85 : vector<64x128xf32> to vector<64x128xbf16>
    %c0_38 = arith.constant 0 : index
    %c0_39 = arith.constant 0 : index
    %c0_40 = arith.constant 0 : index
    %c0_41 = arith.constant 0 : index
    %89 = vector.load %arg5[%c0_38, %c0_39, %c0_40, %c0_41] : memref<1x4x16x256xbf16, #tpu.memory_space<vmem>>, vector<1x4x16x256xbf16>
    %90 = vector.shape_cast %89 : vector<1x4x16x256xbf16> to vector<4x16x256xbf16>
    %91 = vector.shape_cast %90 : vector<4x16x256xbf16> to vector<64x256xbf16>
    %92 = tpu.concatenate %58, %59, %60, %72, %73, %74, %86, %87, %88, %91 in 1 : vector<64x128xbf16>, vector<64x128xbf16>, vector<64x128xbf16>, vector<64x128xbf16>, vector<64x128xbf16>, vector<64x128xbf16>, vector<64x128xbf16>, vector<64x128xbf16>, vector<64x128xbf16>, vector<64x256xbf16> -> vector<64x1408xbf16>
    %c0_42 = arith.constant 0 : index
    %c0_43 = arith.constant 0 : index
    %93 = vector.load %arg6[%c0_42, %c0_43] : memref<1408x128xbf16, #tpu.memory_space<vmem>>, vector<1408x128xbf16>
    %cst_44 = arith.constant dense<0.000000e+00> : vector<64x128xf32>
    %94 = tpu.matmul %92, %93, %cst_44 {dimension_numbers = #tpu.dot_dimension_numbers<[1], [0], [0], [1], [0, 0, 1, 1], [], []>} : vector<64x1408xbf16>, vector<1408x128xbf16>, vector<64x128xf32> -> vector<64x128xf32>
    %c0_45 = arith.constant 0 : index
    %c0_46 = arith.constant 0 : index
    %95 = vector.load %arg7[%c0_45, %c0_46] : memref<1x128xf32, #tpu.memory_space<vmem>>, vector<1x128xf32>
    %96 = vector.broadcast %95 : vector<1x128xf32> to vector<64x128xf32>
    %97 = arith.addf %94, %96 : vector<64x128xf32>
    %98 = arith.truncf %97 : vector<64x128xf32> to vector<64x128xbf16>
    %c0_47 = arith.constant 0 : index
    %c0_48 = arith.constant 0 : index
    %c0_49 = arith.constant 0 : index
    %99 = vector.load %arg8[%c0_47, %c0_48, %c0_49] : memref<1x64x128xbf16, #tpu.memory_space<vmem>>, vector<1x64x128xbf16>
    %100 = vector.shape_cast %99 : vector<1x64x128xbf16> to vector<64x128xbf16>
    %101 = vector.shape_cast %98 : vector<64x128xbf16> to vector<1x64x128xbf16>
    tpu.vector_store %arg8[%c0_47, %c0_48, %c0_49], %101 {strides = array<i32>} : memref<1x64x128xbf16, #tpu.memory_space<vmem>>, vector<1x64x128xbf16>,
    return
  }
  func.func @transform_0(%arg0: i32, %arg1: i32) -> (i32, i32, i32, i32) {
    %c0_i32 = arith.constant 0 : i32
    %c0_i32_0 = arith.constant 0 : i32
    %c0_i32_1 = arith.constant 0 : i32
    return %arg0, %arg1, %c0_i32, %c0_i32_0 : i32, i32, i32, i32
  }
  func.func @transform_1(%arg0: i32, %arg1: i32) -> (i32, i32, i32, i32) {
    %c4_i32 = arith.constant 4 : i32
    %0 = arith.muli %arg1, %c4_i32 : i32
    %c1_i32 = arith.constant 1 : i32
    %1 = arith.subi %0, %c1_i32 : i32
    %c0_i32 = arith.constant 0 : i32
    %2 = arith.maxsi %1, %c0_i32 : i32
    %c0_i32_0 = arith.constant 0 : i32
    %c0_i32_1 = arith.constant 0 : i32
    %c0_i32_2 = arith.constant 0 : i32
    return %arg0, %2, %c0_i32_0, %c0_i32_1 : i32, i32, i32, i32
  }
  func.func @transform_2(%arg0: i32, %arg1: i32) -> (i32, i32, i32, i32) {
    %c4_i32 = arith.constant 4 : i32
    %0 = arith.muli %arg1, %c4_i32 : i32
    %c4_i32_0 = arith.constant 4 : i32
    %1 = arith.addi %0, %c4_i32_0 : i32
    %c7_i32 = arith.constant 7 : i32
    %2 = arith.minsi %1, %c7_i32 : i32
    %c0_i32 = arith.constant 0 : i32
    %c0_i32_1 = arith.constant 0 : i32
    %c0_i32_2 = arith.constant 0 : i32
    return %arg0, %2, %c0_i32, %c0_i32_1 : i32, i32, i32, i32
  }
  func.func @transform_3(%arg0: i32, %arg1: i32) -> (i32, i32, i32, i32) {
    %c0_i32 = arith.constant 0 : i32
    %c0_i32_0 = arith.constant 0 : i32
    %c0_i32_1 = arith.constant 0 : i32
    return %arg0, %arg1, %c0_i32, %c0_i32_0 : i32, i32, i32, i32
  }
  func.func @transform_4(%arg0: i32, %arg1: i32) -> (i32, i32) {
    %c0_i32 = arith.constant 0 : i32
    %c0_i32_0 = arith.constant 0 : i32
    %c0_i32_1 = arith.constant 0 : i32
    return %c0_i32, %c0_i32_0 : i32, i32
  }
  func.func @transform_5(%arg0: i32, %arg1: i32) -> (i32, i32) {
    %c0_i32 = arith.constant 0 : i32
    %c0_i32_0 = arith.constant 0 : i32
    %c0_i32_1 = arith.constant 0 : i32
    return %c0_i32, %c0_i32_0 : i32, i32
  }
  func.func @transform_6(%arg0: i32, %arg1: i32) -> (i32, i32, i32) {
    %c0_i32 = arith.constant 0 : i32
    %c0_i32_0 = arith.constant 0 : i32
    return %arg0, %arg1, %c0_i32 : i32, i32, i32
  }
}

</mosaic_0001>

<bundles_post_ra>
// kernel: upblock_forward.6
= control target key start
LH: loop header
LB: loop body
LE: loop exit
PB: predicated region body
PF: predicated region fallthrough
CT: control target
= control target key end

     0   :  { %s2989_s18 = smov 0   ;;  %s2991_s19 = smov 0   ;;  %s4690_s0 = inlined_call_operand.vmem [shape: bf16[2,4,8,8,4], index: 0, kind: input, shape index: {}, may-alias: {0,1,2}]   ;;  %s4691_s1 = inlined_call_operand.vmem [shape: bf16[2,4,8,8,4], index: 1, kind: input, shape index: {}, may-alias: {0,1,2}]   ;;  %s4692_s2 = inlined_call_operand.vmem [shape: bf16[2,4,8,8,4], index: 2, kind: input, shape index: {}, may-alias: {0,1,2}]   ;;  %s4693_s3 = inlined_call_operand.vmem [shape: bf16[16,8,2,8,8], index: 3, kind: input, shape index: {}]   ;;  %s4694_s4 = inlined_call_operand.vmem [shape: bf16[16,8,2,8,16], index: 4, kind: output, shape index: {0}]   ;;  %s4695_s5 = inlined_call_operand.vmem [shape: f32[8,2,12], index: 5, kind: output, shape index: {1}]  }
   0x1   :  { %s2993_s20 = smov 0   ;;  %s2995_s21 = smov 0  }
   0x2   :  { %s2997_s22 = smov 0  }
   0x3 LB: > { %s25_s23 = sadd.s32 1, %s2947_s20  ;;  %s28_s24 = sadd.s32 1, %s2951_s21  ;;  %s2955_s22 = sphi %s2997_s22, %s16_s22   ;;  %s2951_s21 = sphi %s2995_s21, %s4789_s21   ;;  %s2947_s20 = sphi %s2993_s20, %s4788_s20   ;;  %s2943_s19 = sphi %s2991_s19, %s4787_s19   ;;  %s2939_s18 = sphi %s2989_s18, %s4786_s18  }
   0x4   : > { %p26_p0 = scmp.ge.s32.totalorder %s25_s23, 4  ;;  %p2592_p1 = scmp.ge.s32.totalorder %s2955_s22, 1 }
   0x5   : > { %p292_p2 = scmp.lt.s32.totalorder %s2955_s22, 9 }
   0x6   : > { %s4791_s23 = smov (%p26_p0, %s25_s23), 0  ;;  %s4793_s24 = smov (!%p26_p0, %s28_s24), %s2951_s21 }
   0x7   : > { %p293_p3 = pnand %p2592_p1, %p292_p2  ;;  %p30_p4 = scmp.ge.s32.totalorder %s4793_s24, 2 }
   0x9   : > { %s4795_s24 = smov (%p30_p4, %s4793_s24), 0  ;;  %296 = sbr.rel (%p293_p3) target bundleno = 453 (0x1c5), region = 36 }
   0xe   : > { %s2593_s25 = sadd.s32 4294967295, %s2939_s18  ;;  %p368_p5 = scmp.lt.s32.totalorder %s2943_s19, 1  ;;  %vm578_vm0 = vcmask 1040384   ;;  %vm603_vm1 = vcmask 1046528   ;;  %vm677_vm2 = vcmask 31744   ;;  %vm660_vm3 = vcmask 27648  }
   0xf   : > { %p366_p6 = scmp.gt.s32.totalorder %s2593_s25, 0  ;;  %p2594_p7 = scmp.lt.s32.totalorder %s2593_s25, 3  ;;  %vm772_vm4 = vcmask 93248   ;;  %vm1208_vm5 = vcmask 60448   ;;  %vm1305_vm6 = vcmask 126048   ;;  %vm2181_vm7 = vcmask 64512  }
  0x10   : > { %s369_s26 = scalar_select %p368_p5, %s2943_s19, 1  ;;  %vm2376_vm8 = vcmask 24576   ;;  %vm2390_vm9 = vcmask 90144  }
  0x11   : > { %s4797_s25 = smov (!%p366_p6, %s2593_s25), 0  ;;  %p382_p8 = scmp.lt.s32.totalorder %s2939_s18, 3 }
  0x12   : > { %s3026_s27 = sshll.u32 %s369_s26, 5  ;;  %s4799_s25 = smov (!%p2594_p7, %s4797_s25), 3 }
  0x13   : > { %s383_s28 = scalar_select %p382_p8, %s2939_s18, 3 }
  0x14   : > { %s2599_s29 = sshll.u32 %s4799_s25, 3  ;;  %s2957_s16 = smov 8  }
  0x15   : > { %s374_s30 = sadd.s32 %s3026_s27, %s2599_s29  ;;  %s2602_s6 = sshll.u32 %s383_s28, 3 }
  0x16   : > { %s2601_s7 = sshll.u32 %s374_s30, 2  ;;  %s386_s8 = sadd.s32 %s2602_s6, %s3026_s27 }
  0x17   : > { %s3035_s11 = scalar_lea.vmem %s4690_s0, %s2601_s7  ;;  %s2604_s12 = sshll.u32 %s386_s8, 2 }
  0x18   : > { %s3040_s15 = scalar_lea.vmem %s4691_s1, %s2604_s12  ;;  %v2740_v0 = vld [vmem:[%s3035_s11] sm:$0xff]   ;;  %v2851_v1 = vld [vmem:[%s3035_s11 + $0x8] sm:$0xff]   ;;  %v2853_v20 = vld [vmem:[%s3035_s11 + $0x18] sm:$0xff]   ;;  %s2611_s17 = sshll.u32 %s2943_s19, 2 }
  0x19   : > { %v2742_v2 = vunpack.c.h.bf16 %v2740_v0  ;;  %v2745_v3 = vunpack.c.l.bf16 %v2851_v1  ;;  %v2746_v4 = vunpack.c.h.bf16 %v2851_v1  ;;  %v2756_v5 = vld [vmem:[%s3040_s15] sm:$0xff]   ;;  %v2854_v6 = vld [vmem:[%s3040_s15 + $0x8] sm:$0xff]   ;;  %v2741_v7 = vunpack.c.l.bf16 %v2740_v0  ;;  %v2856_v26 = vld [vmem:[%s3040_s15 + $0x18] sm:$0xff]   ;;  %s3229_s19 = sadd.s32 %s2939_s18, %s2611_s17  ;;  %s2958_s7 = smov 4  }
  0x1a   : > { %v2758_v8 = vunpack.c.h.bf16 %v2756_v5  ;;  %v2761_v9 = vunpack.c.l.bf16 %v2854_v6  ;;  %v2762_v10 = vunpack.c.h.bf16 %v2854_v6  ;;  %v2757_v11 = vunpack.c.l.bf16 %v2756_v5  ;;  %s2612_s25 = sshll.u32 %s3229_s19, 1  ;;  %s389_s8 = sadd.s32 1, %s2939_s18 }
  0x1b   : > { %v483_v12 = vmul.f32 0.25, %v2742_v2  ;;  %v484_v13 = vmul.f32 0.25, %v2745_v3  ;;  %v482_v14 = vmul.f32 0.25, %v2741_v7  ;;  %v485_v15 = vmul.f32 0.25, %v2746_v4  ;;  %p3259_p9 = scmp.lt.s32.totalorder %s2612_s25, 15  ;;  %p3477_p10 = scmp.lt.s32.totalorder %s389_s8, 3 }
  0x1c   : > { %v3046_v16 = vmul.f32 0.75, %v2758_v8  ;;  %v3048_v17 = vmul.f32 0.75, %v2761_v9  ;;  %v3050_v18 = vmul.f32 0.75, %v2757_v11  ;;  %v3052_v19 = vmul.f32 0.75, %v2762_v10  ;;  %p428_p11 = scmp.lt.s32.totalorder %s3229_s19, 7 }
  0x1d   : > { %v2753_v25 = vunpack.c.l.bf16 %v2853_v20  ;;  %v2754_v36 = vunpack.c.h.bf16 %v2853_v20  ;;  %v2769_v37 = vunpack.c.l.bf16 %v2856_v26  ;;  %v2770_v40 = vunpack.c.h.bf16 %v2856_v26  ;;  %s4801_s25 = smov (!%p3259_p9, %s2612_s25), 15  ;;  %s4803_s8 = smov (!%p3477_p10, %s389_s8), 3 }
  0x1e   : > { %v499_v21 = vadd.f32 %v3046_v16, %v483_v12  ;;  %v500_v22 = vadd.f32 %v3048_v17, %v484_v13  ;;  %v498_v23 = vadd.f32 %v3050_v18, %v482_v14  ;;  %v3059_v24 = vadd.f32 %v3052_v19, %v485_v15  ;;  %v3105_v14 = vld [vmem:[%s3035_s11 + $0x10] sm:$0xff]   ;;  %s2737_s28 = sshll.u32 %s4801_s25, 6  ;;  %s4805_s8 = smov (!%p3477_p10, %s4803_s8), 3 }
  0x1f   : > { %v488_v41 = vmul.f32 0.25, %v2753_v25  ;;  %v3091_v5 = vmul.f32 0.75, %v2769_v37  ;;  %v489_v11 = vmul.f32 0.25, %v2754_v36  ;;  %v3099_v12 = vmul.f32 0.75, %v2770_v40  ;;  %s3330_s6 = scalar_lea.vmem %s4693_s3, %s2737_s28  ;;  %s2608_s18 = sshll.u32 %s4805_s8, 3 }
  0x20   : > { %v3062_v27 = vmul.f32 0.25, %v499_v21  ;;  %v3064_v28 = vmul.f32 0.75, %v500_v22  ;;  %v522_v29 = vmul.f32 0.25, %v498_v23  ;;  %v3066_v30 = vmul.f32 0.75, %v498_v23  ;;  %v3109_v23 = vld [vmem:[%s3040_s15 + $0x10] sm:$0xff]   ;;  %s398_s10 = sadd.s32 %s2608_s18, %s3026_s27  ;;  %s3560_s17 = scalar_lea.vmem %s4694_s4, %s2737_s28 }
  0x21   : > { %v3068_v31 = vmul.f32 0.25, %v500_v22  ;;  %v3071_v32 = vmul.f32 0.75, %v3059_v24  ;;  %v3073_v33 = vmul.f32 0.75, %v499_v21  ;;  %v504_v22 = vadd.f32 %v3091_v5, %v488_v41  ;;  %s2610_s11 = sshll.u32 %s398_s10, 2  ;;  %s4807_s19 = smov (!%p428_p11, %s3229_s19), 7 }
  0x22   : > { %v539_v34 = vadd.f32 %v3064_v28, %v3062_v27  ;;  %v537_v35 = vadd.f32 %v3066_v30, %v522_v29  ;;  %v3112_v26 = vadd.f32 %v3099_v12, %v489_v11  ;;  %s3549_s13 = scalar_lea.vmem %s4692_s2, %s2610_s11 }
  0x23   : > { %v540_v38 = vadd.f32 %v3071_v32, %v3068_v31  ;;  %v538_v39 = vadd.f32 %v3073_v33, %v522_v29  ;;  %v2750_v29 = vunpack.c.h.bf16 %v3105_v14 }
  0x24   : > { %v589_v42 = vrot.slane %v539_v34, 1  ;;  %v622_v43 = vmul.f32 0.75, %v539_v34  ;;  %v564_v44 = vrot.slane %v539_v34, 7  ;;  %v587_v45 = vrot.slane %v537_v35, 1 }
  0x25   : > { %v620_v46 = vmul.f32 0.75, %v537_v35  ;;  %v562_v47 = vrot.slane %v537_v35, 7  ;;  %v565_v48 = vrot.slane %v540_v38, 7  ;;  %v590_v49 = vrot.slane %v540_v38, 1 }
  0x26   : > { %v606_v50 = vsel %vm603_vm1, %v589_v42, %v539_v34  ;;  %v581_v51 = vsel %vm578_vm0, %v539_v34, %v564_v44  ;;  %v604_v52 = vsel %vm603_vm1, %v587_v45, %v537_v35  ;;  %v623_v53 = vmul.f32 0.75, %v540_v38 }
  0x27   : > { %v638_v54 = vmul.f32 0.25, %v606_v50  ;;  %v614_v55 = vmul.f32 0.25, %v581_v51  ;;  %v636_v56 = vmul.f32 0.25, %v604_v52  ;;  %v579_v57 = vsel %vm578_vm0, %v537_v35, %v562_v47 }
  0x28   : > { %v612_v58 = vmul.f32 0.25, %v579_v57  ;;  %v582_v59 = vsel %vm578_vm0, %v540_v38, %v565_v48  ;;  %v607_v60 = vsel %vm603_vm1, %v590_v49, %v540_v38  ;;  %v563_v61 = vrot.slane %v538_v39, 7 }
  0x29   : > { %v646_v62 = vadd.f32 %v638_v54, %v622_v43  ;;  %v3087_v63 = vadd.f32 %v622_v43, %v614_v55  ;;  %v644_v0 = vadd.f32 %v636_v56, %v620_v46  ;;  %v615_v1 = vmul.f32 0.25, %v582_v59 }
  0x2a   : > { %v3089_v2 = vadd.f32 %v620_v46, %v612_v58  ;;  %v639_v3 = vmul.f32 0.25, %v607_v60  ;;  %v588_v4 = vrot.slane %v538_v39, 1  ;;  %v580_v9 = vsel %vm578_vm0, %v538_v39, %v563_v61 }
  0x2b   : > { %v3093_v6 = vpack.c.bf16 %v646_v62, %v646_v62  ;;  %v732_v7 = vpack.c.bf16 %v644_v0, %v644_v0  ;;  %v3095_v8 = vadd.f32 %v623_v53, %v615_v1  ;;  %v613_v15 = vmul.f32 0.25, %v580_v9 }
  0x2c   : > { %v605_v10 = vsel %vm603_vm1, %v588_v4, %v538_v39  ;;  %v647_v13 = vadd.f32 %v639_v3, %v623_v53  ;;  %v621_v20 = vmul.f32 0.75, %v538_v39  ;;  %v2766_v35 = vunpack.c.h.bf16 %v3109_v23 }
  0x2d   : > { %752 = vrot.lane.b32.xlu1 %v3093_v6, %s2957_s16  ;;  %748 = vrot.lane.b32.xlu0 %v732_v7, %s2957_s16  ;;  %v637_v21 = vmul.f32 0.25, %v605_v10  ;;  %v781_v25 = vunpack.c.l.bf16 %v732_v7  ;;  %v3120_v38 = vmul.f32 0.25, %v504_v22  ;;  %v3123_v41 = vmul.f32 0.75, %v3112_v26 }
  0x2e   : > { %v3115_v34 = vpack.c.bf16 %v647_v13, %v647_v13  ;;  %v3118_v36 = vadd.f32 %v621_v20, %v613_v15  ;;  %v487_v42 = vmul.f32 0.25, %v2750_v29  ;;  %v3127_v43 = vmul.f32 0.75, %v2766_v35 }
  0x2f   : > { %v645_v37 = vadd.f32 %v637_v21, %v621_v20  ;;  %v812_v39 = vmul.f32 %v781_v25, %v781_v25  ;;  %v789_v44 = vsel %vm677_vm2, %v781_v25, 0.0  ;;  %v544_v46 = vadd.f32 %v3123_v41, %v3120_v38 }
  0x30   : > { %4716 = vst [vmem:[#allocation2_spill] sm:$0xff] %v3127_v43  ;;  %v3135_v48 = vadd.f32 %v3127_v43, %v487_v42  ;;  %v3138_v51 = vmul.f32 0.75, %v504_v22  ;;  %v3141_v52 = vmul.f32 0.25, %v3059_v24  ;;  %v547_v24 = vadd.f32 %v3073_v33, %v3068_v31 }
  0x31   : > { %v733_v40 = vpack.c.bf16 %v645_v37, %v645_v37  ;;  %v820_v47 = vsel %vm677_vm2, %v812_v39, 0.0  ;;  %v569_v54 = vrot.slane %v544_v46, 7  ;;  %v594_v55 = vrot.slane %v544_v46, 1 }
  0x32   : > { %v627_v57 = vmul.f32 0.75, %v544_v46  ;;  %v3147_v58 = vmul.f32 0.25, %v3135_v48  ;;  %v548_v3 = vadd.f32 %v3064_v28, %v3141_v52  ;;  %v852_v4 = vrot.slane %v547_v24, 7 }
  0x33   : > { %v782_v45 = vunpack.c.l.bf16 %v733_v40  ;;  %v586_v60 = vsel %vm578_vm0, %v544_v46, %v569_v54  ;;  %v611_v61 = vsel %vm603_vm1, %v594_v55, %v544_v46  ;;  %v876_v21 = vrot.slane %v547_v24, 1 }
  0x34   : > { %v619_v62 = vmul.f32 0.25, %v586_v60  ;;  %v643_v0 = vmul.f32 0.25, %v611_v61  ;;  %v543_v1 = vadd.f32 %v3138_v51, %v3147_v58  ;;  %v853_v15 = vrot.slane %v548_v3, 7 }
  0x35   : > { %754 = vrot.lane.b32.xlu1 %v3115_v34, %s2957_s16  ;;  %750 = vrot.lane.b32.xlu0 %v733_v40, %s2957_s16  ;;  %v790_v49 = vsel %vm677_vm2, %v782_v45, 0.0  ;;  %v813_v50 = vmul.f32 %v782_v45, %v782_v45  ;;  %v877_v20 = vrot.slane %v548_v3, 1  ;;  %v909_v25 = vmul.f32 0.75, %v548_v3 }
  0x36   : > { %v3143_v53 = vadd.f32 %v790_v49, %v789_v44  ;;  %v3159_v7 = vadd.f32 %v627_v57, %v619_v62  ;;  %v651_v9 = vadd.f32 %v643_v0, %v627_v57  ;;  %v568_v10 = vrot.slane %v543_v1, 7 }
  0x37   : > { %v821_v56 = vsel %vm677_vm2, %v813_v50, 0.0  ;;  %v593_v11 = vrot.slane %v543_v1, 1  ;;  %v626_v13 = vmul.f32 0.75, %v543_v1  ;;  %v869_v28 = vsel %vm578_vm0, %v548_v3, %v853_v15 }
  0x38   : > { %v3149_v59 = vadd.f32 %v821_v56, %v820_v47  ;;  %v3161_v22 = vpack.c.bf16 %v651_v9, %v651_v9  ;;  %v585_v31 = vsel %vm578_vm0, %v543_v1, %v568_v10  ;;  %v893_v37 = vsel %vm603_vm1, %v877_v20, %v548_v3 }
  0x39   : > { %v610_v33 = vsel %vm603_vm1, %v593_v11, %v543_v1  ;;  %v618_v29 = vmul.f32 0.25, %v585_v31  ;;  %v783_v39 = vunpack.c.l.bf16 %v3093_v6  ;;  %v901_v40 = vmul.f32 0.25, %v869_v28 }
  0x3a   : > { %v642_v35 = vmul.f32 0.25, %v610_v33  ;;  %v925_v42 = vmul.f32 0.25, %v893_v37  ;;  %v2749_v44 = vunpack.c.l.bf16 %v3105_v14  ;;  %v868_v47 = vsel %vm578_vm0, %v547_v24, %v852_v4 }
  0x3b   : > { %v3171_v45 = vadd.f32 %v626_v13, %v618_v29  ;;  %v892_v49 = vsel %vm603_vm1, %v876_v21, %v547_v24  ;;  %v908_v50 = vmul.f32 0.75, %v547_v24  ;;  %v2765_v54 = vunpack.c.l.bf16 %v3109_v23 }
  0x3c   : > { %v650_v46 = vadd.f32 %v642_v35, %v626_v13  ;;  %v784_v55 = vunpack.c.l.bf16 %v3115_v34  ;;  %v3179_v56 = vadd.f32 %v909_v25, %v901_v40  ;;  %v933_v57 = vadd.f32 %v925_v42, %v909_v25 }
  0x3d   : > { %762 = vrot.lane.b32.xlu1 %v3161_v22, %s2957_s16  ;;  %v900_v60 = vmul.f32 0.25, %v868_v47  ;;  %v924_v61 = vmul.f32 0.25, %v892_v49  ;;  %v814_v14 = vmul.f32 %v783_v39, %v783_v39  ;;  %v486_v0 = vmul.f32 0.25, %v2749_v44 }
  0x3e   : > { %v3177_v6 = vpack.c.bf16 %v650_v46, %v650_v46  ;;  %v3183_v62 = vpack.c.bf16 %v933_v57, %v933_v57  ;;  %v3187_v1 = vmul.f32 0.75, %v2765_v54  ;;  %v815_v34 = vmul.f32 %v784_v55, %v784_v55 }
  0x3f   : > { %v3185_v24 = vadd.f32 %v908_v50, %v900_v60  ;;  %v932_v23 = vadd.f32 %v924_v61, %v908_v50  ;;  %v3191_v3 = vpack.c.bf16 %v3087_v63, %v3087_v63  ;;  %v792_v4 = vsel %vm677_vm2, %v783_v39, 0.0 }
  0x40   : > { %760 = vrot.lane.b32.xlu0 %v3177_v6, %s2957_s16  ;;  %v823_v9 = vsel %vm677_vm2, %v814_v14, 0.0  ;;  %v502_v11 = vadd.f32 %v3187_v1, %v486_v0  ;;  %v3205_v15 = vpack.c.bf16 %v3089_v2, %v3089_v2  ;;  %v3210_v63 = vpack.c.bf16 %v3095_v8, %v3095_v8 }
  0x41   : > { %v3197_v10 = vpack.c.bf16 %v932_v23, %v932_v23  ;;  %v3201_v13 = vunpack.c.l.bf16 %v3191_v3  ;;  %v794_v20 = vsel %vm677_vm2, %v784_v55, 0.0  ;;  %v825_v21 = vsel %vm677_vm2, %v815_v34, 0.0  ;;  %663 = vst.msk [vmem:[%s3560_s17 + $0x10] sm:$0xf] %vm660_vm3, %v3191_v3 }
  0x42   : > { %v533_v31 = vmul.f32 0.75, %v502_v11  ;;  %v793_v33 = vadd.f32 %v792_v4, %v3143_v53  ;;  %v824_v25 = vadd.f32 %v823_v9, %v3149_v59  ;;  %v3221_v2 = vunpack.c.l.bf16 %v3205_v15  ;;  %661 = vst.msk [vmem:[%s3560_s17] sm:$0xf] %vm660_vm3, %v3205_v15  ;;  %v3590_v15 = vld [vmem:[%s3549_s13 + $0x10] sm:$0xff]  }
  0x43   : > { %4717 = vst [vmem:[#allocation3_spill] sm:$0xff] %v3201_v13  ;;  %v3218_v29 = vsel %vm677_vm2, %v3201_v13, 0.0  ;;  %v3224_v35 = vunpack.c.l.bf16 %v3210_v63  ;;  %v3233_v8 = vpack.c.bf16 %v3118_v36, %v3118_v36  ;;  %v534_v40 = vmul.f32 0.75, %v3135_v48 }
  0x44   : > { %4718 = vst [vmem:[#allocation4_spill] sm:$0xff] %v3221_v2  ;;  %v541_v53 = vadd.f32 %v533_v31, %v3141_v52  ;;  %v795_v59 = vadd.f32 %v794_v20, %v793_v33  ;;  %v3236_v28 = vadd.f32 %v825_v21, %v824_v25  ;;  %v678_v37 = vsel %vm677_vm2, %v3221_v2, 0.0 }
  0x45   : > { %1038 = vrot.lane.b32.xlu1 %v3183_v62, %s2957_s16  ;;  %4719 = vst [vmem:[#allocation5_spill] sm:$0xff] %v3224_v35  ;;  %v3242_v39 = vsel %vm677_vm2, %v3224_v35, 0.0  ;;  %v550_v42 = vadd.f32 %v533_v31, %v3147_v58  ;;  %v3247_v44 = vunpack.c.l.bf16 %v3233_v8  ;;  %v3249_v46 = vmul.f32 0.25, %v502_v11  ;;  %v1131_v35 = vld [vmem:[%s3330_s6 + $0xc] sm:$0xf] }
  0x46   : > { %v591_v36 = vrot.slane %v541_v53, 1  ;;  %v566_v52 = vrot.slane %v541_v53, 7  ;;  %v624_v47 = vmul.f32 0.75, %v541_v53  ;;  %v551_v49 = vadd.f32 %v534_v40, %v3120_v38  ;;  %662 = vst.msk [vmem:[%s3560_s17 + $0x8] sm:$0xf] %vm660_vm3, %v3233_v8 }
  0x47   : > { %4720 = vst [vmem:[#allocation6_spill] sm:$0xff] %v3247_v44  ;;  %v855_v50 = vrot.slane %v550_v42, 7  ;;  %v879_v54 = vrot.slane %v550_v42, 1  ;;  %v679_v55 = vsel %vm677_vm2, %v3247_v44, 0.0  ;;  %v911_v57 = vmul.f32 0.75, %v550_v42 }
  0x48   : > { %1036 = vrot.lane.b32.xlu0 %v3197_v10, %s2957_s16  ;;  %v608_v48 = vsel %vm603_vm1, %v591_v36, %v541_v53  ;;  %v583_v58 = vsel %vm578_vm0, %v541_v53, %v566_v52  ;;  %v856_v14 = vrot.slane %v551_v49, 7  ;;  %v880_v0 = vrot.slane %v551_v49, 1  ;;  %664 = vst.msk [vmem:[%s3560_s17 + $0x18] sm:$0xf] %vm660_vm3, %v3210_v63 }
  0x49   : > { %v640_v60 = vmul.f32 0.25, %v608_v48  ;;  %v616_v61 = vmul.f32 0.25, %v583_v58  ;;  %v912_v38 = vmul.f32 0.75, %v551_v49  ;;  %v871_v23 = vsel %vm578_vm0, %v550_v42, %v855_v50 }
  0x4a   : > { %v895_v34 = vsel %vm603_vm1, %v879_v54, %v550_v42  ;;  %v542_v4 = vadd.f32 %v534_v40, %v3249_v46  ;;  %v872_v20 = vsel %vm578_vm0, %v551_v49, %v856_v14  ;;  %v896_v21 = vsel %vm603_vm1, %v880_v0, %v551_v49 }
  0x4b   : > { %v648_v9 = vadd.f32 %v640_v60, %v624_v47  ;;  %v632_v11 = vadd.f32 %v624_v47, %v616_v61  ;;  %v904_v31 = vmul.f32 0.25, %v872_v20  ;;  %v928_v33 = vmul.f32 0.25, %v896_v21 }
  0x4c   : > { %v903_v25 = vmul.f32 0.25, %v871_v23  ;;  %v927_v53 = vmul.f32 0.25, %v895_v34  ;;  %v3270_v36 = vpack.c.bf16 %v3159_v7, %v3159_v7  ;;  %v788_v52 = vunpack.c.l.bf16 %v3161_v22 }
  0x4d   : > { %v736_v50 = vpack.c.bf16 %v648_v9, %v648_v9  ;;  %v567_v42 = vrot.slane %v542_v4, 7  ;;  %v3279_v40 = vadd.f32 %v912_v38, %v904_v31  ;;  %v936_v47 = vadd.f32 %v928_v33, %v912_v38 }
  0x4e   : > { %v3281_v49 = vadd.f32 %v911_v57, %v903_v25  ;;  %v935_v54 = vadd.f32 %v927_v53, %v911_v57  ;;  %v680_v48 = vadd.f32 %v679_v55, %v678_v37  ;;  %v3284_v58 = vunpack.c.l.bf16 %v3270_v36  ;;  %668 = vst.msk [vmem:[%s3560_s17 + $0x38] sm:$0xf] %vm660_vm3, %v3270_v36 }
  0x4f   : > { %v787_v7 = vunpack.c.l.bf16 %v3177_v6  ;;  %756 = vrot.lane.b32.xlu2 %v736_v50, %s2957_s16  ;;  %v785_v22 = vunpack.c.l.bf16 %v736_v50  ;;  %v3290_v60 = vpack.c.bf16 %v3171_v45, %v3171_v45  ;;  %v3292_v61 = vpack.c.bf16 %v936_v47, %v936_v47 }
  0x50   : > { %4722 = vst [vmem:[#allocation7_spill] sm:$0xff] %v3284_v58  ;;  %v3294_v14 = vpack.c.bf16 %v935_v54, %v935_v54  ;;  %v592_v0 = vrot.slane %v542_v4, 1  ;;  %v819_v38 = vmul.f32 %v788_v52, %v788_v52  ;;  %v584_v57 = vsel %vm578_vm0, %v542_v4, %v567_v42 }
  0x51   : > { %v796_v37 = vsel %vm677_vm2, %v785_v22, 0.0  ;;  %v816_v55 = vmul.f32 %v785_v22, %v785_v22  ;;  %v3301_v6 = vsel %vm677_vm2, %v3284_v58, 0.0  ;;  %v3304_v45 = vunpack.c.l.bf16 %v3290_v60  ;;  %1044 = vrot.lane.b32.xlu1 %v3292_v61, %s2957_s16  ;;  %v1128_v22 = vld [vmem:[%s3330_s6] sm:$0xf]  ;;  %667 = vst.msk [vmem:[%s3560_s17 + $0x30] sm:$0xf] %vm660_vm3, %v3290_v60 }
  0x52   : > { %v3308_v23 = vpack.c.bf16 %v3179_v56, %v3179_v56  ;;  %v797_v34 = vadd.f32 %v796_v37, %v795_v59  ;;  %1042 = vrot.lane.b32.xlu0 %v3294_v14, %s2957_s16  ;;  %v818_v9 = vmul.f32 %v787_v7, %v787_v7  ;;  %v682_v20 = vadd.f32 %v3218_v29, %v680_v48 }
  0x53   : > { %4723 = vst [vmem:[#allocation8_spill] sm:$0xff] %v3304_v45  ;;  %v827_v21 = vsel %vm677_vm2, %v816_v55, 0.0  ;;  %v3317_v31 = vmul.f32 0.25, %v3112_v26  ;;  %v3319_v33 = vpack.c.bf16 %v632_v11, %v632_v11  ;;  %v609_v59 = vsel %vm603_vm1, %v592_v0, %v542_v4 }
  0x54   : > { %v3322_v56 = vadd.f32 %v827_v21, %v3236_v28  ;;  %v617_v25 = vmul.f32 0.25, %v584_v57  ;;  %v3333_v29 = vsel %vm677_vm2, %v788_v52, 0.0  ;;  %v3336_v26 = vsel %vm677_vm2, %v819_v38, 0.0  ;;  %2623 = vst.msk [vmem:[%s3560_s17 + $0x14] sm:$0xf] %vm660_vm3, %v3308_v23 }
  0x55   : > { %v689_v28 = vsel %vm677_vm2, %v3304_v45, 0.0  ;;  %v958_v11 = vunpack.c.l.bf16 %v3308_v23  ;;  %v800_v53 = vsel %vm677_vm2, %v787_v7, 0.0  ;;  %v1068_v50 = vunpack.c.l.bf16 %v3183_v62  ;;  %665 = vst.msk [vmem:[%s3560_s17 + $0x20] sm:$0xf] %vm660_vm3, %v3319_v33 }
  0x56   : > { %v3344_v42 = vunpack.c.l.bf16 %v3319_v33  ;;  %v625_v47 = vmul.f32 0.75, %v542_v4  ;;  %v3348_v52 = vpack.c.bf16 %v3185_v24, %v3185_v24  ;;  %v684_v54 = vadd.f32 %v3242_v39, %v682_v20 }
  0x57   : > { %v641_v48 = vmul.f32 0.25, %v609_v59  ;;  %v3354_v0 = vadd.f32 %v3317_v31, %v3123_v41  ;;  %v831_v7 = vsel %vm677_vm2, %v818_v9, 0.0  ;;  %v546_v4 = vadd.f32 %v3066_v30, %v3062_v27 }
  0x58   : > { %4724 = vst [vmem:[#allocation9_spill] sm:$0xff] %v3344_v42  ;;  %v685_v62 = vsel %vm677_vm2, %v3344_v42, 0.0  ;;  %v633_v38 = vadd.f32 %v625_v47, %v617_v25  ;;  %v3362_v24 = vsel %vm677_vm2, %v958_v11, 0.0  ;;  %v989_v37 = vmul.f32 %v958_v11, %v958_v11 }
  0x59   : > { %v649_v39 = vadd.f32 %v641_v48, %v625_v47  ;;  %v882_v55 = vrot.slane %v3354_v0, 1  ;;  %v957_v57 = vunpack.c.l.bf16 %v3348_v52  ;;  %1160 = vrot.lane.b32.xlu1 %v1128_v22, %s2958_s7  ;;  %v3370_v9 = vmul.f32 0.75, %v3354_v0  ;;  %2622 = vst.msk [vmem:[%s3560_s17 + $0xc] sm:$0xf] %vm660_vm3, %v3348_v52 }
  0x5a   : > { %v3366_v41 = vpack.c.bf16 %v633_v38, %v633_v38  ;;  %v875_v20 = vrot.slane %v546_v4, 1  ;;  %v686_v21 = vadd.f32 %v685_v62, %v684_v54  ;;  %v907_v59 = vmul.f32 0.75, %v546_v4 }
  0x5b   : > { %v737_v27 = vpack.c.bf16 %v649_v39, %v649_v39  ;;  %v898_v30 = vsel %vm603_vm1, %v882_v55, %v3354_v0  ;;  %v851_v48 = vrot.slane %v546_v4, 7  ;;  %v3379_v22 = vsel %vm677_vm2, %v1068_v50, 0.0 }
  0x5c   : > { %v3375_v25 = vunpack.c.l.bf16 %v3366_v41  ;;  %v930_v11 = vmul.f32 0.25, %v898_v30  ;;  %v891_v47 = vsel %vm603_vm1, %v875_v20, %v546_v4  ;;  %v1067_v38 = vunpack.c.l.bf16 %v3197_v10  ;;  %666 = vst.msk [vmem:[%s3560_s17 + $0x28] sm:$0xf] %vm660_vm3, %v3366_v41 }
  0x5d   : > { %v786_v58 = vunpack.c.l.bf16 %v737_v27  ;;  %758 = vrot.lane.b32.xlu2 %v737_v27, %s2957_s16  ;;  %v923_v54 = vmul.f32 0.25, %v891_v47  ;;  %v3384_v62 = vsel %vm677_vm2, %v989_v37, 0.0  ;;  %v1099_v39 = vmul.f32 %v1068_v50, %v1068_v50 }
  0x5e   : > { %4725 = vst [vmem:[#allocation10_spill] sm:$0xff] %v3375_v25  ;;  %v687_v55 = vsel %vm677_vm2, %v3375_v25, 0.0  ;;  %v938_v30 = vadd.f32 %v930_v11, %v3370_v9  ;;  %v988_v10 = vmul.f32 %v957_v57, %v957_v57  ;;  %v867_v27 = vsel %vm578_vm0, %v546_v4, %v851_v48 }
  0x5f   : > { %v798_v20 = vsel %vm677_vm2, %v786_v58, 0.0  ;;  %v817_v45 = vmul.f32 %v786_v58, %v786_v58  ;;  %v688_v42 = vadd.f32 %v687_v55, %v686_v21  ;;  %v931_v13 = vadd.f32 %v923_v54, %v907_v59  ;;  %v1134_v55 = vld [vmem:[%s3330_s6 + $0x18] sm:$0xf] }
  0x60   : > { %v799_v44 = vadd.f32 %v798_v20, %v797_v34  ;;  %v3391_v2 = vpack.c.bf16 %v938_v30, %v938_v30  ;;  %v1098_v37 = vmul.f32 %v1067_v38, %v1067_v38  ;;  %v3396_v25 = vsel %vm677_vm2, %v1099_v39, 0.0  ;;  %v1130_v39 = vld [vmem:[%s3330_s6 + $0x8] sm:$0xf] }
  0x61   : > { %v829_v50 = vsel %vm677_vm2, %v817_v45, 0.0  ;;  %v690_v47 = vadd.f32 %v689_v28, %v688_v42  ;;  %v1018_v43 = vpack.c.bf16 %v931_v13, %v931_v13  ;;  %v3399_v11 = vsel %vm677_vm2, %v957_v57, 0.0  ;;  %1166 = vrot.lane.b32.xlu1 %v1131_v35, %s2958_s7 }
  0x62   : > { %v801_v58 = vadd.f32 %v800_v53, %v799_v44  ;;  %v830_v21 = vadd.f32 %v829_v50, %v3322_v56  ;;  %1048 = vrot.lane.b32.xlu0 %v3391_v2, %s2957_s16  ;;  %v1075_v34 = vsel %vm677_vm2, %v1067_v38, 0.0  ;;  %v899_v28 = vmul.f32 0.25, %v867_v27 }
  0x63   : > { %v692_v45 = vadd.f32 %v3301_v6, %v690_v47  ;;  %v549_v13 = vadd.f32 %v3071_v32, %v3249_v46  ;;  %v3410_v42 = vsel %vm677_vm2, %v988_v10, 0.0  ;;  %v858_v53 = vrot.slane %v3354_v0, 7 }
  0x64   : > { %v803_v44 = vadd.f32 %v3333_v29, %v801_v58  ;;  %v832_v56 = vadd.f32 %v831_v7, %v830_v21  ;;  %v1106_v35 = vsel %vm677_vm2, %v1098_v37, 0.0  ;;  %v3417_v4 = vpack.c.bf16 %v3279_v40, %v3279_v40 }
  0x65   : > { %v693_v6 = vsel %vm677_vm2, %v692_v45, 0.0  ;;  %1034 = vrot.lane.b32.xlu2 %v1018_v43, %s2957_s16  ;;  %v854_v32 = vrot.slane %v549_v13, 7  ;;  %v1066_v7 = vunpack.c.l.bf16 %v1018_v43  ;;  %v3428_v38 = vpack.c.bf16 %v3281_v49, %v3281_v49 }
  0x66   : > { %v694_v46 = vrot.slane %v693_v6, 4  ;;  %v804_v57 = vsel %vm677_vm2, %v803_v44, 0.0  ;;  %v3423_v29 = vadd.f32 %v3336_v26, %v832_v56  ;;  %v961_v48 = vunpack.c.l.bf16 %v3417_v4  ;;  %2626 = vst.msk [vmem:[%s3560_s17 + $0x2c] sm:$0xf] %vm660_vm3, %v3417_v4 }
  0x67   : > { %v805_v40 = vrot.slane %v804_v57, 4  ;;  %v915_v54 = vadd.f32 %v907_v59, %v899_v28  ;;  %v1071_v30 = vunpack.c.l.bf16 %v3292_v61  ;;  %v874_v10 = vsel %vm578_vm0, %v3354_v0, %v858_v53  ;;  %2625 = vst.msk [vmem:[%s3560_s17 + $0x24] sm:$0xf] %vm660_vm3, %v3428_v38 }
  0x68   : > { %4726 = vst [vmem:[#allocation11_spill] sm:$0xff] %v3423_v29  ;;  %v695_v20 = vadd.f32 %v694_v46, %v693_v6  ;;  %v1074_v26 = vsel %vm677_vm2, %v1066_v7, 0.0  ;;  %v870_v50 = vsel %vm578_vm0, %v549_v13, %v854_v32  ;;  %v960_v49 = vunpack.c.l.bf16 %v3428_v38  ;;  %v1236_v38 = vld [vmem:[%s3330_s6 + $0x2c] sm:$0xf] }
  0x69   : > { %v806_v27 = vadd.f32 %v805_v40, %v804_v57  ;;  %v3436_v43 = vpack.c.bf16 %v915_v54, %v915_v54  ;;  %v1076_v37 = vadd.f32 %v1075_v34, %v1074_v26  ;;  %v1097_v59 = vmul.f32 %v1066_v7, %v1066_v7  ;;  %1172 = vrot.lane.b32.xlu1 %v1134_v55, %s2958_s7 }
  0x6a   : > { %v696_v47 = vrot.slane %v695_v20, 2  ;;  %1164 = vrot.lane.b32.xlu0 %v1130_v39, %s2958_s7  ;;  %v878_v61 = vrot.slane %v549_v13, 1  ;;  %v3443_v58 = vsel %vm677_vm2, %v961_v48, 0.0  ;;  %v1070_v0 = vunpack.c.l.bf16 %v3294_v14 }
  0x6b   : > { %v807_v21 = vrot.slane %v806_v27, 2  ;;  %v956_v45 = vunpack.c.l.bf16 %v3436_v43  ;;  %v906_v28 = vmul.f32 0.25, %v874_v10  ;;  %v1105_v44 = vsel %vm677_vm2, %v1097_v59, 0.0  ;;  %v1133_v10 = vld [vmem:[%s3330_s6 + $0x14] sm:$0xf] }
  0x6c   : > { %v697_v34 = vadd.f32 %v696_v47, %v695_v20  ;;  %v902_v56 = vmul.f32 0.25, %v870_v50  ;;  %v894_v46 = vsel %vm603_vm1, %v878_v61, %v549_v13  ;;  %v3450_v57 = vmul.f32 %v961_v48, %v961_v48  ;;  %v1137_v59 = vld [vmem:[%s3330_s6 + $0x24] sm:$0xf]  ;;  %2621 = vst.msk [vmem:[%s3560_s17 + $0x4] sm:$0xf] %vm660_vm3, %v3436_v43 }
  0x6d   : > { %v808_v53 = vadd.f32 %v807_v21, %v806_v27  ;;  %v964_v6 = vsel %vm677_vm2, %v956_v45, 0.0  ;;  %v987_v32 = vmul.f32 %v956_v45, %v956_v45  ;;  %v3453_v14 = vsel %vm677_vm2, %v1071_v30, 0.0 }
  0x6e   : > { %v698_v7 = vrot.slane %v697_v34, 1  ;;  %v1107_v40 = vadd.f32 %v1106_v35, %v1105_v44  ;;  %v3455_v54 = vmul.f32 %v1071_v30, %v1071_v30  ;;  %v910_v20 = vmul.f32 0.75, %v549_v13 }
  0x6f   : > { %v809_v39 = vrot.slane %v808_v53, 1  ;;  %v995_v55 = vsel %vm677_vm2, %v987_v32, 0.0  ;;  %v991_v26 = vmul.f32 %v960_v49, %v960_v49  ;;  %v966_v50 = vadd.f32 %v3399_v11, %v964_v6 }
  0x70   : > { %v699_v27 = vadd.f32 %v698_v7, %v697_v34  ;;  %v926_v47 = vmul.f32 0.25, %v894_v46  ;;  %v1101_v48 = vmul.f32 %v1070_v0, %v1070_v0  ;;  %v922_v21 = vadd.f32 %v3370_v9, %v906_v28 }
  0x71   : > { %v810_v61 = vadd.f32 %v809_v39, %v808_v53  ;;  %v918_v35 = vadd.f32 %v910_v20, %v902_v56  ;;  %v997_v30 = vadd.f32 %v3410_v42, %v995_v55  ;;  %v1078_v44 = vadd.f32 %v3379_v22, %v1076_v37  ;;  %1178 = vrot.lane.b32.xlu1 %v1137_v59, %s2958_s7  ;;  %v1136_v39 = vld [vmem:[%s3330_s6 + $0x20] sm:$0xf] }
  0x72   : > { %v934_v45 = vadd.f32 %v926_v47, %v910_v20  ;;  %v1109_v13 = vadd.f32 %v3396_v25, %v1107_v40  ;;  %1170 = vrot.lane.b32.xlu0 %v1133_v10, %s2958_s7  ;;  %v971_v11 = vsel %vm677_vm2, %v960_v49, 0.0  ;;  %v552_v9 = vadd.f32 %v3317_v31, %v3138_v51 }
  0x73   : > { %v3468_v34 = vadd.f32 %v810_v61, %v699_v27  ;;  %v3470_v6 = vpack.c.bf16 %v918_v35, %v918_v35  ;;  %v1002_v25 = vsel %vm677_vm2, %v991_v26, 0.0  ;;  %v1081_v22 = vsel %vm677_vm2, %v1070_v0, 0.0 }
  0x74   : > { %v1021_v42 = vpack.c.bf16 %v934_v45, %v934_v45  ;;  %v968_v37 = vadd.f32 %v3362_v24, %v966_v50  ;;  %v1112_v49 = vsel %vm677_vm2, %v1101_v48, 0.0  ;;  %v857_v51 = vrot.slane %v552_v9, 7 }
  0x75   : > { %4727 = vst [vmem:[#allocation12_spill] sm:$0xff] %v3468_v34  ;;  %v959_v28 = vunpack.c.l.bf16 %v3470_v6  ;;  %v881_v31 = vrot.slane %v552_v9, 1  ;;  %v3486_v56 = vpack.c.bf16 %v922_v21, %v922_v21  ;;  %v999_v0 = vadd.f32 %v3384_v62, %v997_v30  ;;  %v1140_v62 = vld [vmem:[%s3330_s6 + $0x30] sm:$0xf] }
  0x76   : > { %v1069_v53 = vunpack.c.l.bf16 %v1021_v42  ;;  %1040 = vrot.lane.b32.xlu2 %v1021_v42, %s2957_s16  ;;  %v913_v32 = vmul.f32 0.75, %v552_v9  ;;  %v873_v24 = vsel %vm578_vm0, %v552_v9, %v857_v51  ;;  %v1073_v30 = vunpack.c.l.bf16 %v3391_v2  ;;  %2624 = vst.msk [vmem:[%s3560_s17 + $0x1c] sm:$0xf] %vm660_vm3, %v3470_v6  ;;  %v1232_v6 = vld [vmem:[%s3330_s6 + $0x1c] sm:$0xf] }
  0x77   : > { %v969_v46 = vsel %vm677_vm2, %v959_v28, 0.0  ;;  %v990_v7 = vmul.f32 %v959_v28, %v959_v28  ;;  %v897_v40 = vsel %vm603_vm1, %v881_v31, %v552_v9  ;;  %v905_v26 = vmul.f32 0.25, %v873_v24  ;;  %2628 = vst.msk [vmem:[%s3560_s17 + $0x3c] sm:$0xf] %vm660_vm3, %v3486_v56 }
  0x78   : > { %v1079_v55 = vsel %vm677_vm2, %v1069_v53, 0.0  ;;  %v1100_v20 = vmul.f32 %v1069_v53, %v1069_v53  ;;  %v970_v10 = vadd.f32 %v969_v46, %v968_v37  ;;  %v963_v27 = vunpack.c.l.bf16 %v3486_v56 }
  0x79   : > { %v1000_v50 = vsel %vm677_vm2, %v990_v7, 0.0  ;;  %v1080_v47 = vadd.f32 %v1079_v55, %v1078_v44  ;;  %v929_v59 = vmul.f32 0.25, %v897_v40  ;;  %v921_v35 = vadd.f32 %v913_v32, %v905_v26  ;;  %1184 = vrot.lane.b32.xlu1 %v1140_v62, %s2958_s7 }
  0x7a   : > { %v1110_v48 = vsel %vm677_vm2, %v1100_v20, 0.0  ;;  %v972_v61 = vadd.f32 %v971_v11, %v970_v10  ;;  %v1001_v21 = vadd.f32 %v1000_v50, %v999_v0  ;;  %1176 = vrot.lane.b32.xlu0 %v1136_v39, %s2958_s7  ;;  %v1004_v44 = vsel %vm677_vm2, %v3450_v57, 0.0 }
  0x7b   : > { %v1082_v45 = vadd.f32 %v1081_v22, %v1080_v47  ;;  %v1111_v9 = vadd.f32 %v1110_v48, %v1109_v13  ;;  %v937_v42 = vadd.f32 %v929_v59, %v913_v32  ;;  %v1114_v11 = vsel %vm677_vm2, %v3455_v54, 0.0  ;;  %v1129_v48 = vld [vmem:[%s3330_s6 + $0x4] sm:$0xf] }
  0x7c   : > { %v1003_v37 = vadd.f32 %v1002_v25, %v1001_v21  ;;  %v3515_v28 = vpack.c.bf16 %v921_v35, %v921_v35  ;;  %v974_v13 = vadd.f32 %v3443_v58, %v972_v61  ;;  %v994_v31 = vmul.f32 %v963_v27, %v963_v27  ;;  %v1139_v25 = vld [vmem:[%s3330_s6 + $0x2c] sm:$0xf]  ;;  %v1143_v58 = vld [vmem:[%s3330_s6 + $0x3c] sm:$0xf]  ;;  %v1142_v35 = vld [vmem:[%s3330_s6 + $0x38] sm:$0xf] }
  0x7d   : > { %v1113_v51 = vadd.f32 %v1112_v49, %v1111_v9  ;;  %v1024_v2 = vpack.c.bf16 %v937_v42, %v937_v42  ;;  %v1084_v22 = vadd.f32 %v3453_v14, %v1082_v45  ;;  %v1104_v0 = vmul.f32 %v1073_v30, %v1073_v30  ;;  %v2772_v45 = vld [vmem:[%s3549_s13] sm:$0xff]   ;;  %v1132_v9 = vld [vmem:[%s3330_s6 + $0x10] sm:$0xf] }
  0x7e   : > { %v962_v53 = vunpack.c.l.bf16 %v3515_v28  ;;  %v1005_v57 = vadd.f32 %v1004_v44, %v1003_v37  ;;  %v977_v49 = vsel %vm677_vm2, %v963_v27, 0.0  ;;  %v1087_v14 = vsel %vm677_vm2, %v1073_v30, 0.0  ;;  %v1227_v30 = vld [vmem:[%s3330_s6 + $0x8] sm:$0xf]  ;;  %2627 = vst.msk [vmem:[%s3560_s17 + $0x34] sm:$0xf] %vm660_vm3, %v3515_v28 }
  0x7f   : > { %v1072_v32 = vunpack.c.l.bf16 %v1024_v2  ;;  %1046 = vrot.lane.b32.xlu2 %v1024_v2, %s2957_s16  ;;  %v1115_v54 = vadd.f32 %v1114_v11, %v1113_v51  ;;  %v1008_v55 = vsel %vm677_vm2, %v994_v31, 0.0  ;;  %v1118_v26 = vsel %vm677_vm2, %v1104_v0, 0.0  ;;  %v1226_v51 = vld [vmem:[%s3330_s6 + $0x4] sm:$0xf]  ;;  %v1230_v2 = vld [vmem:[%s3330_s6 + $0x14] sm:$0xf] }
  0x80   : > { %v975_v46 = vsel %vm677_vm2, %v962_v53, 0.0  ;;  %v993_v7 = vmul.f32 %v962_v53, %v962_v53  ;;  %v2773_v42 = vunpack.c.l.bf16 %v2772_v45  ;;  %v2774_v44 = vunpack.c.h.bf16 %v2772_v45  ;;  %v1135_v0 = vld [vmem:[%s3330_s6 + $0x1c] sm:$0xf] }
  0x81   : > { %v1085_v24 = vsel %vm677_vm2, %v1072_v32, 0.0  ;;  %v1103_v40 = vmul.f32 %v1072_v32, %v1072_v32  ;;  %v976_v39 = vadd.f32 %v975_v46, %v974_v13  ;;  %1190 = vrot.lane.b32.xlu1 %v1143_v58, %s2958_s7 }
  0x82   : > { %v1006_v20 = vsel %vm677_vm2, %v993_v7, 0.0  ;;  %v1086_v10 = vadd.f32 %v1085_v24, %v1084_v22  ;;  %1182 = vrot.lane.b32.xlu0 %v1139_v25, %s2958_s7  ;;  %v506_v11 = vmul.f32 0.25, %v2773_v42  ;;  %v507_v37 = vmul.f32 0.25, %v2774_v44  ;;  %v1229_v7 = vld [vmem:[%s3330_s6 + $0x10] sm:$0xf] }
  0x83   : > { %v1116_v62 = vsel %vm677_vm2, %v1103_v40, 0.0  ;;  %v3533_v27 = vadd.f32 %v977_v49, %v976_v39  ;;  %v1007_v50 = vadd.f32 %v1006_v20, %v1005_v57  ;;  %v1233_v24 = vld [vmem:[%s3330_s6 + $0x20] sm:$0xf] }
  0x84   : > { %v3536_v47 = vadd.f32 %v1087_v14, %v1086_v10  ;;  %v1117_v59 = vadd.f32 %v1116_v62, %v1115_v54  ;;  %v514_v13 = vadd.f32 %v506_v11, %v3050_v18  ;;  %v3570_v22 = vadd.f32 %v507_v37, %v3046_v16  ;;  %v2857_v18 = vld [vmem:[%s3549_s13 + $0x8] sm:$0xff]  }
  0x85   : > { %4729 = vst [vmem:[#allocation13_spill] sm:$0xff] %v3533_v27  ;;  %v3539_v61 = vadd.f32 %v1008_v55, %v1007_v50  ;;  %v2778_v57 = vunpack.c.h.bf16 %v2857_v18  ;;  %v2781_v54 = vunpack.c.l.bf16 %v3590_v15  ;;  %v2777_v46 = vunpack.c.l.bf16 %v2857_v18 }
  0x86   : > { %4730 = vst [vmem:[#allocation14_spill] sm:$0xff] %v3536_v47  ;;  %v3541_v21 = vadd.f32 %v1118_v26, %v1117_v59  ;;  %v1322_v31 = vmul.f32 0.25, %v514_v13  ;;  %v3580_v3 = vmul.f32 0.75, %v3570_v22  ;;  %v3582_v53 = vmul.f32 0.75, %v514_v13 }
  0x87   : > { %4731 = vst [vmem:[#allocation15_spill] sm:$0xff] %v3539_v61  ;;  %1162 = vrot.lane.b32.xlu2 %v1129_v48, %s2958_s7  ;;  %v509_v40 = vmul.f32 0.25, %v2778_v57  ;;  %v510_v39 = vmul.f32 0.25, %v2781_v54  ;;  %v508_v43 = vmul.f32 0.25, %v2777_v46  ;;  %v2859_v48 = vld [vmem:[%s3549_s13 + $0x18] sm:$0xff]  }
  0x88   : > { %4732 = vst [vmem:[#allocation16_spill] sm:$0xff] %v3541_v21  ;;  %v1338_v8 = vadd.f32 %v3580_v3, %v1322_v31  ;;  %v3597_v32 = vadd.f32 %v3582_v53, %v1322_v31  ;;  %v2786_v28 = vunpack.c.h.bf16 %v2859_v48 }
  0x89   : > { %1261 = vrot.lane.b32.xlu1 %v1227_v30, %s2957_s16  ;;  %v517_v26 = vadd.f32 %v509_v40, %v3052_v19  ;;  %v3630_v62 = vadd.f32 %v510_v39, %v3187_v1  ;;  %v3647_v30 = vadd.f32 %v508_v43, %v3048_v17 }
  0x8a   : > { %1188 = vrot.lane.b32.xlu0 %v1142_v35, %s2958_s7  ;;  %v1387_v25 = vrot.slane %v1338_v8, 1  ;;  %v1386_v49 = vrot.slane %v3597_v32, 1  ;;  %v1363_v58 = vrot.slane %v1338_v8, 7  ;;  %v1419_v14 = vmul.f32 0.75, %v1338_v8  ;;  %v1138_v35 = vld [vmem:[%s3330_s6 + $0x28] sm:$0xf] }
  0x8b   : > { %v1418_v20 = vmul.f32 0.75, %v3597_v32  ;;  %v3641_v1 = vmul.f32 0.25, %v517_v26  ;;  %v3644_v52 = vmul.f32 0.75, %v3630_v62  ;;  %v3664_v17 = vmul.f32 0.75, %v517_v26 }
  0x8c   : > { %v1403_v33 = vsel %vm603_vm1, %v1387_v25, %v1338_v8  ;;  %v1402_v41 = vsel %vm603_vm1, %v1386_v49, %v3597_v32  ;;  %v1379_v60 = vsel %vm578_vm0, %v1338_v8, %v1363_v58  ;;  %v1362_v4 = vrot.slane %v3597_v32, 7  ;;  %v1141_v49 = vld [vmem:[%s3330_s6 + $0x34] sm:$0xf] }
  0x8d   : > { %v1435_v55 = vmul.f32 0.25, %v1403_v33  ;;  %v1434_v36 = vmul.f32 0.25, %v1402_v41  ;;  %v1411_v10 = vmul.f32 0.25, %v1379_v60  ;;  %v3662_v44 = vadd.f32 %v3644_v52, %v3641_v1 }
  0x8e   : > { %v3679_v31 = vmul.f32 0.25, %v3647_v30  ;;  %v1378_v8 = vsel %vm578_vm0, %v3597_v32, %v1362_v4  ;;  %v513_v40 = vmul.f32 0.25, %v2786_v28  ;;  %v1225_v28 = vld [vmem:[%s3330_s6] sm:$0xf] }
  0x8f   : > { %1168 = vrot.lane.b32.xlu2 %v1132_v9, %s2958_s7  ;;  %v1443_v50 = vadd.f32 %v1435_v55, %v1419_v14  ;;  %v1442_v59 = vadd.f32 %v1434_v36, %v1418_v20  ;;  %v1427_v19 = vadd.f32 %v1419_v14, %v1411_v10  ;;  %v2785_v9 = vunpack.c.l.bf16 %v2859_v48  ;;  %v1235_v10 = vld [vmem:[%s3330_s6 + $0x28] sm:$0xf] }
  0x90   : > { %v1366_v13 = vrot.slane %v3662_v44, 7  ;;  %v1410_v54 = vmul.f32 0.25, %v1378_v8  ;;  %v1390_v58 = vrot.slane %v3662_v44, 1  ;;  %v1340_v41 = vadd.f32 %v3664_v17, %v3679_v31 }
  0x91   : > { %1267 = vrot.lane.b32.xlu1 %v1230_v2, %s2957_s16  ;;  %v3652_v23 = vpack.c.bf16 %v1443_v50, %v1443_v50  ;;  %v3654_v45 = vpack.c.bf16 %v1442_v59, %v1442_v59  ;;  %v1451_v11 = vpack.c.bf16 %v1427_v19, %v1427_v19  ;;  %v3712_v43 = vadd.f32 %v513_v40, %v3099_v12  ;;  %v1239_v50 = vld [vmem:[%s3330_s6 + $0x38] sm:$0xf] }
  0x92   : > { %1259 = vrot.lane.b32.xlu0 %v1226_v51, %s2957_s16  ;;  %v1382_v32 = vsel %vm578_vm0, %v3662_v44, %v1366_v13  ;;  %v1365_v26 = vrot.slane %v1340_v41, 7  ;;  %v2782_v13 = vunpack.c.h.bf16 %v3590_v15  ;;  %v1238_v15 = vld [vmem:[%s3330_s6 + $0x34] sm:$0xf] }
  0x93   : > { %v1578_v37 = vunpack.c.l.bf16 %v3652_v23  ;;  %v1577_v51 = vunpack.c.l.bf16 %v3654_v45  ;;  %v1468_v57 = vunpack.c.l.bf16 %v1451_v11  ;;  %2638 = vst.msk [vmem:[%s3560_s17 + $0x48] sm:$0xf] %vm660_vm3, %v1451_v11  ;;  %v1414_v14 = vmul.f32 0.25, %v1382_v32 }
  0x94   : > { %v3726_v12 = vmul.f32 0.75, %v3712_v43 }
  0x95   : > { %v1586_v18 = vsel %vm677_vm2, %v1578_v37, 0.0  ;;  %v1585_v56 = vsel %vm677_vm2, %v1577_v51, 0.0  ;;  %v1608_v46 = vmul.f32 %v1577_v51, %v1577_v51  ;;  %v1499_v60 = vmul.f32 %v1468_v57, %v1468_v57 }
  0x96   : > { %v3690_v25 = vadd.f32 %v1586_v18, %v1585_v56  ;;  %v1476_v59 = vsel %vm677_vm2, %v1468_v57, 0.0  ;;  %v1389_v56 = vrot.slane %v1340_v41, 1 }
  0x97   : > { %1174 = vrot.lane.b32.xlu2 %v1135_v0, %s2958_s7  ;;  %v1609_v0 = vmul.f32 %v1578_v37, %v1578_v37  ;;  %v1616_v33 = vsel %vm677_vm2, %v1608_v46, 0.0  ;;  %v1406_v37 = vsel %vm603_vm1, %v1390_v58, %v3662_v44  ;;  %v3754_v58 = vmul.f32 0.75, %v3647_v30 }
  0x98   : > { %v1438_v8 = vmul.f32 0.25, %v1406_v37 }
  0x99   : > { %1273 = vrot.lane.b32.xlu1 %v1233_v24, %s2957_s16  ;;  %v1422_v24 = vmul.f32 0.75, %v3662_v44  ;;  %v1348_v30 = vadd.f32 %v3754_v58, %v3641_v1 }
  0x9a   : > { %1265 = vrot.lane.b32.xlu0 %v1229_v7, %s2957_s16  ;;  %v1426_v7 = vadd.f32 %v1418_v20, %v1410_v54 }
  0x9b   : > { %v1430_v20 = vadd.f32 %v1422_v24, %v1414_v14  ;;  %v1446_v14 = vadd.f32 %v1438_v8, %v1422_v24  ;;  %v1228_v24 = vld [vmem:[%s3330_s6 + $0xc] sm:$0xf]  ;;  %v1705_v37 = vmul.f32 0.75, %v1348_v30 }
  0x9c   : > { %v1450_v55 = vpack.c.bf16 %v1426_v7, %v1426_v7 }
  0x9e   : > { %v1467_v48 = vunpack.c.l.bf16 %v1450_v55  ;;  %2637 = vst.msk [vmem:[%s3560_s17 + $0x40] sm:$0xf] %vm660_vm3, %v1450_v55  ;;  %v4733_v55 = vld [vmem:[#allocation2_spill] sm:$0xff] }
  0x9f   : > { %v753_v16 = vpop.permute.xlu1 %752  ;;  %v749_v63 = vpop.permute.xlu0 %748  ;;  %1180 = vrot.lane.b32.xlu2 %v1138_v35, %s2958_s7  ;;  %v3718_v35 = vpack.c.bf16 %v1430_v20, %v1430_v20 }
  0xa0   : > { %775 = vst.msk [vmem:[%s3560_s17 + $0x10] sm:$0xf] %vm772_vm4, %v753_v16  ;;  %v512_v16 = vmul.f32 0.25, %v2785_v9  ;;  %v1498_v11 = vmul.f32 %v1467_v48, %v1467_v48 }
  0xa1   : > { %773 = vst.msk [vmem:[%s3560_s17] sm:$0xf] %vm772_vm4, %v749_v63  ;;  %1279 = vrot.lane.b32.xlu1 %v1236_v38, %s2957_s16  ;;  %v1617_v63 = vsel %vm677_vm2, %v1609_v0, 0.0  ;;  %v1475_v38 = vsel %vm677_vm2, %v1467_v48, 0.0 }
  0xa2   : > { %1271 = vrot.lane.b32.xlu0 %v1232_v6, %s2957_s16  ;;  %v520_v39 = vadd.f32 %v512_v16, %v3091_v5  ;;  %v3707_v36 = vadd.f32 %v1617_v63, %v1616_v33  ;;  %v1381_v6 = vsel %vm578_vm0, %v1340_v41, %v1365_v26  ;;  %v3736_v4 = vadd.f32 %v1476_v59, %v1475_v38 }
  0xa3   : > { %2641 = vst.msk [vmem:[%s3560_s17 + $0x60] sm:$0xf] %vm660_vm3, %v3718_v35  ;;  %v1413_v51 = vmul.f32 0.25, %v1381_v6  ;;  %v1506_v16 = vsel %vm677_vm2, %v1498_v11, 0.0  ;;  %v511_v63 = vmul.f32 0.25, %v2782_v13  ;;  %v1405_v33 = vsel %vm603_vm1, %v1389_v56, %v1340_v41 }
  0xa4   : > { %v3720_v19 = vmul.f32 0.25, %v520_v39  ;;  %v1649_v59 = vrot.slane %v1348_v30, 7  ;;  %v1437_v48 = vmul.f32 0.25, %v1405_v33  ;;  %v1673_v13 = vrot.slane %v1348_v30, 1 }
  0xa5   : > { %v519_v20 = vadd.f32 %v511_v63, %v4733_v55 }
  0xa6   : > { %v1344_v18 = vadd.f32 %v3726_v12, %v3720_v19  ;;  %v1665_v6 = vsel %vm578_vm0, %v1348_v30, %v1649_v59 }
  0xa7   : > { %v755_v42 = vpop.permute.xlu1 %754  ;;  %v751_v2 = vpop.permute.xlu0 %750  ;;  %1186 = vrot.lane.b32.xlu2 %v1141_v49, %s2958_s7  ;;  %v1697_v11 = vmul.f32 0.25, %v1665_v6 }
  0xa8   : > { %776 = vst.msk [vmem:[%s3560_s17 + $0x18] sm:$0xf] %vm772_vm4, %v755_v42  ;;  %v1507_v42 = vsel %vm677_vm2, %v1499_v60, 0.0  ;;  %v1369_v54 = vrot.slane %v1344_v18, 7  ;;  %v1393_v7 = vrot.slane %v1344_v18, 1  ;;  %v1425_v60 = vmul.f32 0.75, %v1344_v18 }
  0xa9   : > { %774 = vst.msk [vmem:[%s3560_s17 + $0x8] sm:$0xf] %vm772_vm4, %v751_v2  ;;  %v757_v9 = vpop.permute.xlu2 %756  ;;  %1285 = vrot.lane.b32.xlu1 %v1239_v50, %s2957_s16  ;;  %v1421_v2 = vmul.f32 0.75, %v1340_v41  ;;  %v3746_v0 = vadd.f32 %v1507_v42, %v1506_v16  ;;  %v3771_v50 = vmul.f32 0.25, %v519_v20  ;;  %v1713_v16 = vadd.f32 %v1705_v37, %v1697_v11 }
  0xaa   : > { %1277 = vrot.lane.b32.xlu0 %v1235_v10, %s2957_s16  ;;  %777 = vst.msk [vmem:[%s3560_s17 + $0x20] sm:$0xf] %vm772_vm4, %v757_v9  ;;  %v1385_v32 = vsel %vm578_vm0, %v1344_v18, %v1369_v54  ;;  %v3763_v10 = vmul.f32 0.75, %v520_v39  ;;  %v1409_v41 = vsel %vm603_vm1, %v1393_v7, %v1344_v18  ;;  %v1347_v39 = vadd.f32 %v3580_v3, %v3679_v31  ;;  %v1231_v54 = vld [vmem:[%s3330_s6 + $0x18] sm:$0xf] }
  0xab   : > { %v1429_v57 = vadd.f32 %v1421_v2, %v1413_v51  ;;  %v1417_v40 = vmul.f32 0.25, %v1385_v32  ;;  %v1533_v9 = vpack.c.bf16 %v1446_v14, %v1446_v14  ;;  %v1441_v38 = vmul.f32 0.25, %v1409_v41 }
  0xac   : > { %v1648_v51 = vrot.slane %v1347_v39, 7  ;;  %v1471_v18 = vunpack.c.l.bf16 %v3718_v35 }
  0xad   : > { %v1453_v49 = vpack.c.bf16 %v1429_v57, %v1429_v57  ;;  %v1433_v26 = vadd.f32 %v1425_v60, %v1417_v40  ;;  %v1449_v8 = vadd.f32 %v1441_v38, %v1425_v60  ;;  %v1672_v40 = vrot.slane %v1347_v39, 1 }
  0xae   : > { %v1704_v60 = vmul.f32 0.75, %v1347_v39  ;;  %v1502_v55 = vmul.f32 %v1471_v18, %v1471_v18  ;;  %v3813_v6 = vsel %vm677_vm2, %v1471_v18, 0.0 }
  0xaf   : > { %v763_v5 = vpop.permute.xlu1 %762  ;;  %1257 = vrot.lane.b32.xlu2 %v1225_v28, %s2957_s16  ;;  %2640 = vst.msk [vmem:[%s3560_s17 + $0x58] sm:$0xf] %vm660_vm3, %v1453_v49  ;;  %v3777_v1 = vpack.c.bf16 %v1433_v26, %v1433_v26  ;;  %v1445_v28 = vadd.f32 %v1437_v48, %v1421_v2  ;;  %v3795_v2 = vpack.c.bf16 %v1713_v16, %v1713_v16  ;;  %v1470_v32 = vunpack.c.l.bf16 %v1453_v49 }
  0xb0   : > { %780 = vst.msk [vmem:[%s3560_s17 + $0x38] sm:$0xf] %vm772_vm4, %v763_v5  ;;  %v1536_v41 = vpack.c.bf16 %v1449_v8, %v1449_v8  ;;  %v3808_v48 = vmul.f32 0.25, %v3570_v22  ;;  %v1688_v38 = vsel %vm603_vm1, %v1672_v40, %v1347_v39  ;;  %v3823_v22 = vsel %vm677_vm2, %v1502_v55, 0.0 }
  0xb1   : > { %1547 = vrot.lane.b32.xlu1 %v3652_v23, %s2957_s16  ;;  %v1343_v23 = vadd.f32 %v3763_v10, %v3771_v50  ;;  %2644 = vst.msk [vmem:[%s3560_s17 + $0x78] sm:$0xf] %vm660_vm3, %v3777_v1  ;;  %v1532_v35 = vpack.c.bf16 %v1445_v28, %v1445_v28 }
  0xb2   : > { %v761_v44 = vpop.permute.xlu0 %760  ;;  %1283 = vrot.lane.b32.xlu0 %v1238_v15, %s2957_s16  ;;  %v1581_v15 = vunpack.c.l.bf16 %v1533_v9  ;;  %2655 = vst.msk [vmem:[%s3560_s17 + $0x54] sm:$0xf] %vm660_vm3, %v3795_v2 }
  0xb3   : > { %779 = vst.msk [vmem:[%s3560_s17 + $0x30] sm:$0xf] %vm772_vm4, %v761_v44  ;;  %v1368_v3 = vrot.slane %v1343_v23, 7  ;;  %v1392_v31 = vrot.slane %v1343_v23, 1  ;;  %v1664_v44 = vsel %vm578_vm0, %v1347_v39, %v1648_v51  ;;  %v1234_v51 = vld [vmem:[%s3330_s6 + $0x24] sm:$0xf] }
  0xb4   : > { %v1696_v7 = vmul.f32 0.25, %v1664_v44  ;;  %v1612_v59 = vmul.f32 %v1581_v15, %v1581_v15  ;;  %v3836_v39 = vsel %vm677_vm2, %v1470_v32, 0.0 }
  0xb5   : > { %v1384_v56 = vsel %vm578_vm0, %v1343_v23, %v1368_v3  ;;  %v1408_v57 = vsel %vm603_vm1, %v1392_v31, %v1343_v23 }
  0xb6   : > { %v1416_v63 = vmul.f32 0.25, %v1384_v56  ;;  %v1440_v33 = vmul.f32 0.25, %v1408_v57 }
  0xb7   : > { %v1039_v46 = vpop.permute.xlu1 %1038  ;;  %1263 = vrot.lane.b32.xlu2 %v1228_v24, %s2957_s16  ;;  %v759_v42 = vpop.permute.xlu2 %758 }
  0xb8   : > { %2631 = vst.msk [vmem:[%s3560_s17 + $0x14] sm:$0xf] %vm772_vm4, %v1039_v46  ;;  %v1424_v46 = vmul.f32 0.75, %v1343_v23  ;;  %v3810_v23 = vmul.f32 0.75, %v519_v20  ;;  %v3826_v20 = vsel %vm677_vm2, %v1581_v15, 0.0 }
  0xb9   : > { %778 = vst.msk [vmem:[%s3560_s17 + $0x28] sm:$0xf] %vm772_vm4, %v759_v42  ;;  %1553 = vrot.lane.b32.xlu1 %v1533_v9, %s2957_s16  ;;  %v1580_v9 = vunpack.c.l.bf16 %v1532_v35 }
  0xba   : > { %v1037_v5 = vpop.permute.xlu0 %1036  ;;  %1545 = vrot.lane.b32.xlu0 %v3654_v45, %s2957_s16  ;;  %v1689_v45 = vsel %vm603_vm1, %v1673_v13, %v1348_v30  ;;  %v1432_v14 = vadd.f32 %v1424_v46, %v1416_v63  ;;  %v1712_v30 = vadd.f32 %v1704_v60, %v1696_v7  ;;  %v1448_v42 = vadd.f32 %v1440_v33, %v1424_v46 }
  0xbb   : > { %2630 = vst.msk [vmem:[%s3560_s17 + $0xc] sm:$0xf] %vm772_vm4, %v1037_v5  ;;  %v1721_v26 = vmul.f32 0.25, %v1689_v45  ;;  %v1501_v5 = vmul.f32 %v1470_v32, %v1470_v32  ;;  %v1351_v31 = vadd.f32 %v3810_v23, %v3720_v19  ;;  %v3833_v13 = vsel %vm677_vm2, %v1612_v59, 0.0 }
  0xbc   : > { %v3805_v49 = vpack.c.bf16 %v1432_v14, %v1432_v14  ;;  %v3820_v11 = vpack.c.bf16 %v1712_v30, %v1712_v30  ;;  %v3839_v28 = vsel %vm677_vm2, %v1580_v9, 0.0  ;;  %v1611_v44 = vmul.f32 %v1580_v9, %v1580_v9  ;;  %v1237_v9 = vld [vmem:[%s3330_s6 + $0x30] sm:$0xf] }
  0xbd   : > { %v1729_v3 = vadd.f32 %v1721_v26, %v1705_v37  ;;  %v1339_v37 = vadd.f32 %v3754_v58, %v3808_v48  ;;  %v1720_v19 = vmul.f32 0.25, %v1688_v38  ;;  %v1652_v8 = vrot.slane %v1351_v31, 7 }
  0xbe   : > { %2643 = vst.msk [vmem:[%s3560_s17 + $0x70] sm:$0xf] %vm660_vm3, %v3805_v49  ;;  %v1676_v56 = vrot.slane %v1351_v31, 1  ;;  %v3849_v57 = vsel %vm677_vm2, %v1501_v5, 0.0  ;;  %v3852_v15 = vpack.c.bf16 %v1448_v42, %v1448_v42  ;;  %v1584_v46 = vunpack.c.l.bf16 %v1536_v41 }
  0xbf   : > { %1269 = vrot.lane.b32.xlu2 %v1231_v54, %s2957_s16  ;;  %v1035_v24 = vpop.permute.xlu2 %1034  ;;  %2654 = vst.msk [vmem:[%s3560_s17 + $0x4c] sm:$0xf] %vm660_vm3, %v3820_v11  ;;  %v1474_v54 = vunpack.c.l.bf16 %v3777_v1  ;;  %v1364_v63 = vrot.slane %v1339_v37, 7  ;;  %v3857_v58 = vpack.c.bf16 %v1729_v3, %v1729_v3  ;;  %v1708_v45 = vmul.f32 0.75, %v1351_v31 }
  0xc0   : > { %2629 = vst.msk [vmem:[%s3560_s17 + $0x4] sm:$0xf] %vm772_vm4, %v1035_v24  ;;  %v1350_v32 = vadd.f32 %v3644_v52, %v3771_v50  ;;  %v1692_v7 = vsel %vm603_vm1, %v1676_v56, %v1351_v31  ;;  %v1388_v14 = vrot.slane %v1339_v37, 1  ;;  %v1728_v33 = vadd.f32 %v1720_v19, %v1704_v60 }
  0xc1   : > { %1559 = vrot.lane.b32.xlu1 %v1536_v41, %s2957_s16  ;;  %v1380_v1 = vsel %vm578_vm0, %v1339_v37, %v1364_v63  ;;  %v1724_v55 = vmul.f32 0.25, %v1692_v7  ;;  %v1420_v52 = vmul.f32 0.75, %v1339_v37  ;;  %v1505_v60 = vmul.f32 %v1474_v54, %v1474_v54 }
  0xc2   : > { %1551 = vrot.lane.b32.xlu0 %v1532_v35, %s2957_s16  ;;  %v1668_v35 = vsel %vm578_vm0, %v1351_v31, %v1652_v8  ;;  %v1404_v24 = vsel %vm603_vm1, %v1388_v14, %v1339_v37  ;;  %v1412_v41 = vmul.f32 0.25, %v1380_v1  ;;  %v1651_v50 = vrot.slane %v1350_v32, 7 }
  0xc3   : > { %v1045_v16 = vpop.permute.xlu1 %1044  ;;  %v1700_v40 = vmul.f32 0.25, %v1668_v35  ;;  %v1732_v59 = vadd.f32 %v1724_v55, %v1708_v45  ;;  %v1436_v30 = vmul.f32 0.25, %v1404_v24  ;;  %v1675_v5 = vrot.slane %v1350_v32, 1 }
  0xc4   : > { %v1043_v18 = vpop.permute.xlu0 %1042  ;;  %2634 = vst.msk [vmem:[%s3560_s17 + $0x2c] sm:$0xf] %vm772_vm4, %v1045_v16  ;;  %v1428_v38 = vadd.f32 %v1420_v52, %v1412_v41  ;;  %v3872_v3 = vmul.f32 0.25, %v3630_v62  ;;  %v1707_v37 = vmul.f32 0.75, %v1350_v32  ;;  %v3879_v19 = vpack.c.bf16 %v1728_v33, %v1728_v33 }
  0xc5   : > { %2633 = vst.msk [vmem:[%s3560_s17 + $0x24] sm:$0xf] %vm772_vm4, %v1043_v18  ;;  %v1716_v26 = vadd.f32 %v1708_v45, %v1700_v40  ;;  %v1444_v16 = vadd.f32 %v1436_v30, %v1420_v52  ;;  %v1691_v18 = vsel %vm603_vm1, %v1675_v5, %v1350_v32  ;;  %v1615_v45 = vmul.f32 %v1584_v46, %v1584_v46  ;;  %v1240_v5 = vld [vmem:[%s3330_s6 + $0x3c] sm:$0xf] }
  0xc6   : > { %v1452_v8 = vpack.c.bf16 %v1428_v38, %v1428_v38  ;;  %v1723_v63 = vmul.f32 0.25, %v1691_v18  ;;  %v3883_v62 = vunpack.c.l.bf16 %v3795_v2  ;;  %v3885_v35 = vpack.c.bf16 %v1732_v59, %v1732_v59 }
  0xc7   : > { %1275 = vrot.lane.b32.xlu2 %v1234_v51, %s2957_s16  ;;  %v1667_v51 = vsel %vm578_vm0, %v1350_v32, %v1651_v50  ;;  %v3876_v31 = vpack.c.bf16 %v1716_v26, %v1716_v26  ;;  %v1342_v32 = vadd.f32 %v3810_v23, %v3872_v3  ;;  %v1621_v7 = vsel %vm677_vm2, %v1611_v44, 0.0 }
  0xc8   : > { %v1699_v56 = vmul.f32 0.25, %v1667_v51  ;;  %v1469_v14 = vunpack.c.l.bf16 %v1452_v8  ;;  %v3893_v33 = vpack.c.bf16 %v1444_v16, %v1444_v16  ;;  %2639 = vst.msk [vmem:[%s3560_s17 + $0x50] sm:$0xf] %vm660_vm3, %v1452_v8  ;;  %v3898_v2 = vsel %vm677_vm2, %v1474_v54, 0.0 }
  0xc9   : > { %1834 = vrot.lane.b32.xlu1 %v3857_v58, %s2957_s16  ;;  %2658 = vst.msk [vmem:[%s3560_s17 + $0x6c] sm:$0xf] %vm660_vm3, %v3876_v31  ;;  %v3901_v55 = vsel %vm677_vm2, %v1584_v46, 0.0  ;;  %v1731_v24 = vadd.f32 %v1723_v63, %v1707_v37  ;;  %v1367_v23 = vrot.slane %v1342_v32, 7  ;;  %v3912_v50 = vsel %vm677_vm2, %v1505_v60, 0.0 }
  0xca   : > { %1557 = vrot.lane.b32.xlu0 %v3852_v15, %s2957_s16  ;;  %v1715_v40 = vadd.f32 %v1707_v37, %v1699_v56  ;;  %v1478_v44 = vsel %vm677_vm2, %v1469_v14, 0.0  ;;  %v1500_v41 = vmul.f32 %v1469_v14, %v1469_v14  ;;  %v1579_v52 = vunpack.c.l.bf16 %v3893_v33  ;;  %v2669_v14 = vld [vmem:[%s3330_s6 + $0x40] sm:$0xf] }
  0xcb   : > { %v1161_v42 = vpop.permute.xlu1 %1160  ;;  %v3915_v46 = vsel %vm677_vm2, %v1615_v45, 0.0  ;;  %v3919_v26 = vmul.f32 %v3883_v62, %v3883_v62  ;;  %v1479_v59 = vadd.f32 %v1478_v44, %v3736_v4  ;;  %v1473_v30 = vunpack.c.l.bf16 %v3805_v49 }
  0xcc   : > { %1209 = vst.msk [vmem:[%s3560_s17] sm:$0xf] %vm1208_vm5, %v1161_v42  ;;  %v3909_v54 = vpack.c.bf16 %v1715_v40, %v1715_v40  ;;  %v1509_v60 = vsel %vm677_vm2, %v1500_v41, 0.0  ;;  %v1588_v42 = vsel %vm677_vm2, %v1579_v52, 0.0  ;;  %v1610_v38 = vmul.f32 %v1579_v52, %v1579_v52 }
  0xcd   : > { %v3932_v16 = vunpack.c.l.bf16 %v3857_v58  ;;  %v1481_v4 = vadd.f32 %v3836_v39, %v1479_v59  ;;  %v1510_v49 = vadd.f32 %v1509_v60, %v3746_v0  ;;  %v1589_v18 = vadd.f32 %v1588_v42, %v3690_v25 }
  0xce   : > { %2657 = vst.msk [vmem:[%s3560_s17 + $0x64] sm:$0xf] %vm660_vm3, %v3909_v54  ;;  %v1619_v37 = vsel %vm677_vm2, %v1610_v38, 0.0  ;;  %v3940_v8 = vpack.c.bf16 %v1731_v24, %v1731_v24  ;;  %v1383_v56 = vsel %vm578_vm0, %v1342_v32, %v1367_v23  ;;  %v3946_v58 = vmul.f32 0.25, %v3712_v43 }
  0xcf   : > { %1281 = vrot.lane.b32.xlu2 %v1237_v9, %s2957_s16  ;;  %v1583_v63 = vunpack.c.l.bf16 %v3852_v15  ;;  %v1512_v0 = vadd.f32 %v3849_v57, %v1510_v49  ;;  %v1591_v25 = vadd.f32 %v3839_v28, %v1589_v18  ;;  %v1620_v39 = vadd.f32 %v1619_v37, %v3707_v36  ;;  %v2672_v37 = vld [vmem:[%s3330_s6 + $0x4c] sm:$0xf] }
  0xd0   : > { %v1041_v1 = vpop.permute.xlu2 %1040  ;;  %v3954_v45 = vsel %vm677_vm2, %v1473_v30, 0.0  ;;  %v1391_v40 = vrot.slane %v1342_v32, 1  ;;  %v1415_v24 = vmul.f32 0.25, %v1383_v56  ;;  %v1423_v44 = vmul.f32 0.75, %v1342_v32 }
  0xd1   : > { %2632 = vst.msk [vmem:[%s3560_s17 + $0x1c] sm:$0xf] %vm772_vm4, %v1041_v1  ;;  %1840 = vrot.lane.b32.xlu1 %v3885_v35, %s2957_s16  ;;  %v1504_v1 = vmul.f32 %v1473_v30, %v1473_v30  ;;  %v1622_v23 = vadd.f32 %v1621_v7, %v1620_v39  ;;  %v1483_v15 = vadd.f32 %v3813_v6, %v1481_v4  ;;  %v3960_v57 = vsel %vm677_vm2, %v1583_v63, 0.0 }
  0xd2   : > { %1832 = vrot.lane.b32.xlu0 %v3879_v19, %s2957_s16  ;;  %v1514_v41 = vadd.f32 %v3823_v22, %v1512_v0  ;;  %v1407_v36 = vsel %vm603_vm1, %v1391_v40, %v1342_v32  ;;  %v1593_v28 = vadd.f32 %v3826_v20, %v1591_v25  ;;  %v1353_v7 = vadd.f32 %v3946_v58, %v3726_v12 }
  0xd3   : > { %v1167_v51 = vpop.permute.xlu1 %1166  ;;  %v1431_v6 = vadd.f32 %v1423_v44, %v1415_v24  ;;  %v1439_v22 = vmul.f32 0.25, %v1407_v36  ;;  %v1624_v52 = vadd.f32 %v3833_v13, %v1622_v23  ;;  %v1346_v59 = vadd.f32 %v3582_v53, %v3808_v48 }
  0xd4   : > { %v1049_v9 = vpop.permute.xlu0 %1048  ;;  %1212 = vst.msk [vmem:[%s3560_s17 + $0xc] sm:$0xf] %vm1208_vm5, %v1167_v51  ;;  %v1614_v30 = vmul.f32 %v1583_v63, %v1583_v63  ;;  %v1678_v60 = vrot.slane %v1353_v7, 1  ;;  %v3976_v20 = vadd.f32 %v3664_v17, %v3872_v3  ;;  %v3981_v53 = vunpack.c.l.bf16 %v3820_v11 }
  0xd5   : > { %2636 = vst.msk [vmem:[%s3560_s17 + $0x3c] sm:$0xf] %vm772_vm4, %v1049_v9  ;;  %v1654_v9 = vrot.slane %v1353_v7, 7  ;;  %v1447_v12 = vadd.f32 %v1439_v22, %v1423_v44  ;;  %v1455_v42 = vpack.c.bf16 %v1431_v6, %v1431_v6  ;;  %v1647_v13 = vrot.slane %v1346_v59, 7 }
  0xd6   : > { %v1671_v38 = vrot.slane %v1346_v59, 1  ;;  %v1694_v51 = vsel %vm603_vm1, %v1678_v60, %v1353_v7  ;;  %v1710_v4 = vmul.f32 0.75, %v1353_v7  ;;  %v1517_v11 = vsel %vm677_vm2, %v1504_v1, 0.0 }
  0xd7   : > { %1287 = vrot.lane.b32.xlu2 %v1240_v5, %s2957_s16  ;;  %v1670_v48 = vsel %vm578_vm0, %v1353_v7, %v1654_v9  ;;  %v1472_v17 = vunpack.c.l.bf16 %v1455_v42  ;;  %v1534_v3 = vpack.c.bf16 %v1447_v12, %v1447_v12  ;;  %2642 = vst.msk [vmem:[%s3560_s17 + $0x68] sm:$0xf] %vm660_vm3, %v1455_v42  ;;  %v1726_v18 = vmul.f32 0.25, %v1694_v51 }
  0xd8   : > { %v1702_v49 = vmul.f32 0.25, %v1670_v48  ;;  %v1663_v56 = vsel %vm578_vm0, %v1346_v59, %v1647_v13  ;;  %v1687_v63 = vsel %vm603_vm1, %v1671_v38, %v1346_v59  ;;  %v1703_v0 = vmul.f32 0.75, %v1346_v59 }
  0xd9   : > { %v1047_v43 = vpop.permute.xlu2 %1046  ;;  %1957 = vrot.lane.b32.xlu1 %v2669_v14, %s2958_s7  ;;  %v1484_v39 = vsel %vm677_vm2, %v1472_v17, 0.0  ;;  %v1503_v14 = vmul.f32 %v1472_v17, %v1472_v17  ;;  %v1695_v23 = vmul.f32 0.25, %v1663_v56  ;;  %v1719_v44 = vmul.f32 0.25, %v1687_v63  ;;  %v2675_v17 = vld [vmem:[%s3330_s6 + $0x58] sm:$0xf] }
  0xda   : > { %2635 = vst.msk [vmem:[%s3560_s17 + $0x34] sm:$0xf] %vm772_vm4, %v1047_v43  ;;  %1838 = vrot.lane.b32.xlu0 %v3940_v8, %s2957_s16  ;;  %v1718_v40 = vadd.f32 %v1710_v4, %v1702_v49  ;;  %v1485_v24 = vadd.f32 %v1484_v39, %v1483_v15  ;;  %v1734_v43 = vadd.f32 %v1726_v18, %v1710_v4  ;;  %v1627_v60 = vsel %vm677_vm2, %v1614_v30, 0.0 }
  0xdb   : > { %v1173_v32 = vpop.permute.xlu1 %1172  ;;  %v1515_v1 = vsel %vm677_vm2, %v1503_v14, 0.0  ;;  %v1711_v42 = vadd.f32 %v1703_v0, %v1695_v23  ;;  %v1784_v30 = vmul.f32 %v3981_v53, %v3981_v53  ;;  %v1650_v48 = vrot.slane %v3976_v20, 7 }
  0xdc   : > { %v1165_v5 = vpop.permute.xlu0 %1164  ;;  %1215 = vst.msk [vmem:[%s3560_s17 + $0x18] sm:$0xf] %vm1208_vm5, %v1173_v32  ;;  %v4000_v6 = vpack.c.bf16 %v1718_v40, %v1718_v40  ;;  %v1487_v22 = vadd.f32 %v3954_v45, %v1485_v24  ;;  %v1516_v59 = vadd.f32 %v1515_v1, %v1514_v41  ;;  %v4004_v9 = vpack.c.bf16 %v1734_v43, %v1734_v43 }
  0xdd   : > { %1211 = vst.msk [vmem:[%s3560_s17 + $0x8] sm:$0xf] %vm1208_vm5, %v1165_v5  ;;  %v1863_v32 = vunpack.c.l.bf16 %v3879_v19  ;;  %v1895_v19 = vmul.f32 %v3932_v16, %v3932_v16  ;;  %v1727_v4 = vadd.f32 %v1719_v44, %v1703_v0  ;;  %v1794_v49 = vsel %vm677_vm2, %v3919_v26, 0.0 }
  0xde   : > { %2660 = vst.msk [vmem:[%s3560_s17 + $0x7c] sm:$0xf] %vm660_vm3, %v4000_v6  ;;  %v4013_v45 = vadd.f32 %v3898_v2, %v1487_v22  ;;  %v1518_v41 = vadd.f32 %v1517_v11, %v1516_v59  ;;  %v1735_v2 = vpack.c.bf16 %v1711_v42, %v1711_v42  ;;  %v1757_v11 = vunpack.c.l.bf16 %v3876_v31  ;;  %v2678_v42 = vld [vmem:[%s3330_s6 + $0x64] sm:$0xf] }
  0xdf   : > { %1549 = vrot.lane.b32.xlu2 %v3893_v33, %s2957_s16  ;;  %v1582_v33 = vunpack.c.l.bf16 %v1534_v3  ;;  %v1894_v18 = vmul.f32 %v1863_v32, %v1863_v32  ;;  %v1904_v26 = vsel %vm677_vm2, %v1895_v19, 0.0  ;;  %v1761_v31 = vsel %vm677_vm2, %v3981_v53, 0.0 }
  0xe0   : > { %4734 = vst [vmem:[#allocation2_spill] sm:$0xff] %v4013_v45  ;;  %v1752_v56 = vunpack.c.l.bf16 %v1735_v2  ;;  %v1792_v63 = vsel %vm677_vm2, %v1784_v30, 0.0  ;;  %v1867_v0 = vunpack.c.l.bf16 %v3885_v35  ;;  %v1814_v39 = vpack.c.bf16 %v1727_v4, %v1727_v4 }
  0xe1   : > { %v1163_v25 = vpop.permute.xlu2 %1162  ;;  %v1594_v36 = vsel %vm677_vm2, %v1582_v33, 0.0  ;;  %v1613_v7 = vmul.f32 %v1582_v33, %v1582_v33  ;;  %1963 = vrot.lane.b32.xlu1 %v2672_v37, %s2958_s7  ;;  %2653 = vst.msk [vmem:[%s3560_s17 + $0x44] sm:$0xf] %vm660_vm3, %v1735_v2  ;;  %v1666_v33 = vsel %vm578_vm0, %v3976_v20, %v1650_v48  ;;  %v1871_v40 = vsel %vm677_vm2, %v1863_v32, 0.0 }
  0xe2   : > { %1210 = vst.msk [vmem:[%s3560_s17 + $0x4] sm:$0xf] %vm1208_vm5, %v1163_v25  ;;  %v1595_v5 = vadd.f32 %v1594_v36, %v1593_v28  ;;  %1844 = vrot.lane.b32.xlu0 %v4004_v9, %s2957_s16  ;;  %v2671_v25 = vld [vmem:[%s3330_s6 + $0x48] sm:$0xf]  ;;  %v1902_v53 = vsel %vm677_vm2, %v1894_v18, 0.0  ;;  %v4063_v24 = vsel %vm677_vm2, %v1757_v11, 0.0  ;;  %v1788_v35 = vmul.f32 %v1757_v11, %v1757_v11 }
  0xe3   : > { %v1625_v12 = vsel %vm677_vm2, %v1613_v7, 0.0  ;;  %v1179_v13 = vpop.permute.xlu1 %1178  ;;  %v1862_v1 = vunpack.c.l.bf16 %v1814_v39  ;;  %v1898_v7 = vmul.f32 %v1867_v0, %v1867_v0  ;;  %v1756_v22 = vunpack.c.l.bf16 %v3909_v54 }
  0xe4   : > { %v1171_v15 = vpop.permute.xlu0 %1170  ;;  %v1597_v28 = vadd.f32 %v3960_v57, %v1595_v5  ;;  %v1626_v38 = vadd.f32 %v1625_v12, %v1624_v52  ;;  %v4027_v57 = vadd.f32 %v3912_v50, %v1518_v41  ;;  %1218 = vst.msk [vmem:[%s3560_s17 + $0x24] sm:$0xf] %vm1208_vm5, %v1179_v13  ;;  %v1698_v5 = vmul.f32 0.25, %v1666_v33 }
  0xe5   : > { %1214 = vst.msk [vmem:[%s3560_s17 + $0x14] sm:$0xf] %vm1208_vm5, %v1171_v15  ;;  %v1870_v15 = vsel %vm677_vm2, %v1862_v1, 0.0  ;;  %v1706_v32 = vmul.f32 0.75, %v3976_v20  ;;  %v4079_v13 = vsel %vm677_vm2, %v1867_v0, 0.0  ;;  %v1866_v41 = vunpack.c.l.bf16 %v3940_v8 }
  0xe6   : > { %4735 = vst [vmem:[#allocation17_spill] sm:$0xff] %v4027_v57  ;;  %v4030_v52 = vadd.f32 %v3901_v55, %v1597_v28  ;;  %v1628_v51 = vadd.f32 %v1627_v60, %v1626_v38  ;;  %v1873_v55 = vsel %vm677_vm2, %v3932_v16, 0.0  ;;  %v1783_v16 = vmul.f32 %v1752_v56, %v1752_v56 }
  0xe7   : > { %1555 = vrot.lane.b32.xlu2 %v1534_v3, %s2957_s16  ;;  %v1763_v3 = vsel %vm677_vm2, %v3883_v62, 0.0  ;;  %v1674_v62 = vrot.slane %v3976_v20, 1  ;;  %v1893_v60 = vmul.f32 %v1862_v1, %v1862_v1  ;;  %v1872_v28 = vadd.f32 %v1871_v40, %v1870_v15 }
  0xe8   : > { %4736 = vst [vmem:[#allocation18_spill] sm:$0xff] %v4030_v52  ;;  %v4045_v37 = vadd.f32 %v3915_v46, %v1628_v51  ;;  %v1760_v46 = vsel %vm677_vm2, %v1752_v56, 0.0  ;;  %v1791_v44 = vsel %vm677_vm2, %v1783_v16, 0.0  ;;  %v1714_v30 = vadd.f32 %v1706_v32, %v1698_v5 }
  0xe9   : > { %v1169_v50 = vpop.permute.xlu2 %1168  ;;  %1969 = vrot.lane.b32.xlu1 %v2675_v17, %s2958_s7  ;;  %v1762_v23 = vadd.f32 %v1761_v31, %v1760_v46  ;;  %v1690_v36 = vsel %vm603_vm1, %v1674_v62, %v3976_v20  ;;  %v1793_v59 = vadd.f32 %v1792_v63, %v1791_v44  ;;  %v1901_v19 = vsel %vm677_vm2, %v1893_v60, 0.0  ;;  %v2674_v17 = vld [vmem:[%s3330_s6 + $0x54] sm:$0xf] }
  0xea   : > { %4737 = vst [vmem:[#allocation19_spill] sm:$0xff] %v4045_v37  ;;  %1961 = vrot.lane.b32.xlu0 %v2671_v25, %s2958_s7  ;;  %v1722_v12 = vmul.f32 0.25, %v1690_v36  ;;  %v1787_v20 = vmul.f32 %v1756_v22, %v1756_v22  ;;  %v1903_v51 = vadd.f32 %v1902_v53, %v1901_v19  ;;  %v1874_v4 = vadd.f32 %v1873_v55, %v1872_v28  ;;  %v2676_v37 = vld [vmem:[%s3330_s6 + $0x5c] sm:$0xf] }
  0xeb   : > { %1213 = vst.msk [vmem:[%s3560_s17 + $0x10] sm:$0xf] %vm1208_vm5, %v1169_v50  ;;  %v1185_v43 = vpop.permute.xlu1 %1184  ;;  %v1764_v54 = vadd.f32 %v1763_v3, %v1762_v23  ;;  %v1795_v48 = vadd.f32 %v1794_v49, %v1793_v59  ;;  %v1352_v8 = vadd.f32 %v3946_v58, %v3763_v10  ;;  %v1800_v3 = vsel %vm677_vm2, %v1788_v35, 0.0  ;;  %v2681_v35 = vld [vmem:[%s3330_s6 + $0x70] sm:$0xf] }
  0xec   : > { %v1177_v14 = vpop.permute.xlu0 %1176  ;;  %1221 = vst.msk [vmem:[%s3560_s17 + $0x30] sm:$0xf] %vm1208_vm5, %v1185_v43  ;;  %v1730_v2 = vadd.f32 %v1722_v12, %v1706_v32  ;;  %v1910_v18 = vsel %vm677_vm2, %v1898_v7, 0.0  ;;  %v1738_v11 = vpack.c.bf16 %v1714_v30, %v1714_v30  ;;  %v1767_v62 = vsel %vm677_vm2, %v1756_v22, 0.0  ;;  %v2677_v12 = vld [vmem:[%s3330_s6 + $0x60] sm:$0xf] }
  0xed   : > { %1217 = vst.msk [vmem:[%s3560_s17 + $0x20] sm:$0xf] %vm1208_vm5, %v1177_v14  ;;  %v1905_v49 = vadd.f32 %v1904_v26, %v1903_v51  ;;  %v1653_v55 = vrot.slane %v1352_v8, 7  ;;  %v1677_v31 = vrot.slane %v1352_v8, 1  ;;  %v1877_v0 = vsel %vm677_vm2, %v1866_v41, 0.0 }
  0xee   : > { %v1817_v50 = vpack.c.bf16 %v1730_v2, %v1730_v2  ;;  %v1897_v10 = vmul.f32 %v1866_v41, %v1866_v41  ;;  %v1755_v58 = vunpack.c.l.bf16 %v1738_v11  ;;  %2656 = vst.msk [vmem:[%s3560_s17 + $0x5c] sm:$0xf] %vm660_vm3, %v1738_v11  ;;  %v1798_v46 = vsel %vm677_vm2, %v1787_v20, 0.0 }
  0xef   : > { %1830 = vrot.lane.b32.xlu2 %v1814_v39, %s2957_s16  ;;  %v1669_v26 = vsel %vm578_vm0, %v1352_v8, %v1653_v55  ;;  %v1693_v16 = vsel %vm603_vm1, %v1677_v31, %v1352_v8  ;;  %v1709_v39 = vmul.f32 0.75, %v1352_v8  ;;  %v1869_v41 = vunpack.c.l.bf16 %v4004_v9 }
  0xf0   : > { %v1865_v25 = vunpack.c.l.bf16 %v1817_v50  ;;  %v1765_v14 = vsel %vm677_vm2, %v1755_v58, 0.0  ;;  %v1786_v33 = vmul.f32 %v1755_v58, %v1755_v58  ;;  %v1701_v1 = vmul.f32 0.25, %v1669_v26 }
  0xf1   : > { %v1175_v38 = vpop.permute.xlu2 %1174  ;;  %1975 = vrot.lane.b32.xlu1 %v2678_v42, %s2958_s7  ;;  %v1766_v43 = vadd.f32 %v1765_v14, %v1764_v54  ;;  %v1725_v36 = vmul.f32 0.25, %v1693_v16  ;;  %v1908_v7 = vsel %vm677_vm2, %v1897_v10, 0.0  ;;  %v1759_v42 = vunpack.c.l.bf16 %v4000_v6  ;;  %v2788_v10 = vld [vmem:[%s3330_s6] sm:$0xff]  }
  0xf2   : > { %1216 = vst.msk [vmem:[%s3560_s17 + $0x1c] sm:$0xf] %vm1208_vm5, %v1175_v38  ;;  %1967 = vrot.lane.b32.xlu0 %v2674_v17, %s2958_s7  ;;  %v1875_v40 = vsel %vm677_vm2, %v1865_v25, 0.0  ;;  %v1896_v53 = vmul.f32 %v1865_v25, %v1865_v25  ;;  %v1796_v22 = vsel %vm677_vm2, %v1786_v33, 0.0  ;;  %v1717_v28 = vadd.f32 %v1709_v39, %v1701_v1 }
  0xf3   : > { %v1191_v63 = vpop.permute.xlu1 %1190  ;;  %v1876_v23 = vadd.f32 %v1875_v40, %v1874_v4  ;;  %v1768_v5 = vadd.f32 %v1767_v62, %v1766_v43  ;;  %v1797_v15 = vadd.f32 %v1796_v22, %v1795_v48  ;;  %v1733_v38 = vadd.f32 %v1725_v36, %v1709_v39  ;;  %v2860_v39 = vld [vmem:[%s3330_s6 + $0x8] sm:$0xff]   ;;  %v2867_v22 = vld [vmem:[%s3330_s6 + $0x40] sm:$0xff]  }
  0xf4   : > { %v1183_v56 = vpop.permute.xlu0 %1182  ;;  %1224 = vst.msk [vmem:[%s3560_s17 + $0x3c] sm:$0xf] %vm1208_vm5, %v1191_v63  ;;  %v1906_v59 = vsel %vm677_vm2, %v1896_v53, 0.0  ;;  %v1741_v51 = vpack.c.bf16 %v1717_v28, %v1717_v28  ;;  %v1790_v17 = vmul.f32 %v1759_v42, %v1759_v42  ;;  %v1900_v8 = vmul.f32 %v1869_v41, %v1869_v41 }
  0xf5   : > { %1220 = vst.msk [vmem:[%s3560_s17 + $0x2c] sm:$0xf] %vm1208_vm5, %v1183_v56  ;;  %v1878_v60 = vadd.f32 %v1877_v0, %v1876_v23  ;;  %v1907_v32 = vadd.f32 %v1906_v59, %v1905_v49  ;;  %v1799_v19 = vadd.f32 %v1798_v46, %v1797_v15  ;;  %v1770_v2 = vadd.f32 %v4063_v24, %v1768_v5  ;;  %v2680_v0 = vld [vmem:[%s3330_s6 + $0x6c] sm:$0xf]  ;;  %v2861_v23 = vld [vmem:[%s3330_s6 + $0x10] sm:$0xff]  }
  0xf6   : > { %v1820_v4 = vpack.c.bf16 %v1733_v38, %v1733_v38  ;;  %v1758_v11 = vunpack.c.l.bf16 %v1741_v51  ;;  %2659 = vst.msk [vmem:[%s3560_s17 + $0x74] sm:$0xf] %vm660_vm3, %v1741_v51  ;;  %v1883_v56 = vsel %vm677_vm2, %v1869_v41, 0.0  ;;  %v1804_v58 = vsel %vm677_vm2, %v1790_v17, 0.0 }
  0xf7   : > { %1836 = vrot.lane.b32.xlu2 %v1817_v50, %s2957_s16  ;;  %v1909_v30 = vadd.f32 %v1908_v7, %v1907_v32  ;;  %v1880_v48 = vadd.f32 %v4079_v13, %v1878_v60  ;;  %v1801_v6 = vadd.f32 %v1800_v3, %v1799_v19  ;;  %v2684_v13 = vld [vmem:[%s3330_s6 + $0x7c] sm:$0xf]  ;;  %v1773_v50 = vsel %vm677_vm2, %v1759_v42, 0.0  ;;  %v2863_v7 = vld [vmem:[%s3330_s6 + $0x20] sm:$0xff]   ;;  %v2864_v32 = vld [vmem:[%s3330_s6 + $0x28] sm:$0xff]  }
  0xf8   : > { %v1868_v24 = vunpack.c.l.bf16 %v1820_v4  ;;  %v1771_v3 = vsel %vm677_vm2, %v1758_v11, 0.0  ;;  %v1914_v25 = vsel %vm677_vm2, %v1900_v8, 0.0  ;;  %v4153_v1 = vunpack.c.l.bf16 %v2788_v10  ;;  %v2703_v42 = vld [vmem:[%s3330_s6 + $0x48] sm:$0xf]  ;;  %v2865_v19 = vld [vmem:[%s3330_s6 + $0x30] sm:$0xff]  }
  0xf9   : > { %v1181_v44 = vpop.permute.xlu2 %1180  ;;  %1981 = vrot.lane.b32.xlu1 %v2681_v35, %s2958_s7  ;;  %v1911_v9 = vadd.f32 %v1910_v18, %v1909_v30  ;;  %v1789_v18 = vmul.f32 %v1758_v11, %v1758_v11  ;;  %v1772_v31 = vadd.f32 %v1771_v3, %v1770_v2  ;;  %v2670_v35 = vld [vmem:[%s3330_s6 + $0x44] sm:$0xf]  ;;  %v4155_v36 = vunpack.c.h.bf16 %v2788_v10  ;;  %v2866_v30 = vld [vmem:[%s3330_s6 + $0x38] sm:$0xff]  }
  0xfa   : > { %1219 = vst.msk [vmem:[%s3560_s17 + $0x28] sm:$0xf] %vm1208_vm5, %v1181_v44  ;;  %1973 = vrot.lane.b32.xlu0 %v2677_v12, %s2958_s7  ;;  %v1881_v49 = vsel %vm677_vm2, %v1868_v24, 0.0  ;;  %v1899_v55 = vmul.f32 %v1868_v24, %v1868_v24  ;;  %v2862_v44 = vld [vmem:[%s3330_s6 + $0x18] sm:$0xff]   ;;  %v4163_v15 = vunpack.c.l.bf16 %v2860_v39  ;;  %v4165_v60 = vunpack.c.h.bf16 %v2860_v39  ;;  %v2868_v12 = vld [vmem:[%s3330_s6 + $0x48] sm:$0xff]  }
  0xfb   : > { %v1262_v20 = vpop.permute.xlu1 %1261  ;;  %v1882_v63 = vadd.f32 %v1881_v49, %v1880_v48  ;;  %v1802_v46 = vsel %vm677_vm2, %v1789_v18, 0.0  ;;  %v4141_v14 = vadd.f32 %v1773_v50, %v1772_v31  ;;  %v4171_v41 = vunpack.c.l.bf16 %v2861_v23  ;;  %v2872_v50 = vld [vmem:[%s3330_s6 + $0x68] sm:$0xff]   ;;  %v2874_v31 = vld [vmem:[%s3330_s6 + $0x78] sm:$0xff]  }
  0xfc   : > { %v1189_v54 = vpop.permute.xlu0 %1188  ;;  %1308 = vst.msk [vmem:[%s3560_s17 + $0x8] sm:$0xf] %vm1305_vm6, %v1262_v20  ;;  %v1912_v26 = vsel %vm677_vm2, %v1899_v55, 0.0  ;;  %v1803_v33 = vadd.f32 %v1802_v46, %v1801_v6  ;;  %v4173_v28 = vunpack.c.h.bf16 %v2861_v23  ;;  %v4175_v38 = vunpack.c.l.bf16 %v2862_v44  ;;  %v2869_v6 = vld [vmem:[%s3330_s6 + $0x50] sm:$0xff]  }
  0xfd   : > { %1223 = vst.msk [vmem:[%s3560_s17 + $0x38] sm:$0xf] %vm1208_vm5, %v1189_v54  ;;  %v4143_v40 = vadd.f32 %v1883_v56, %v1882_v63  ;;  %v1913_v53 = vadd.f32 %v1912_v26, %v1911_v9  ;;  %v4177_v54 = vunpack.c.h.bf16 %v2862_v44  ;;  %v4181_v48 = vunpack.c.l.bf16 %v2863_v7  ;;  %v2870_v9 = vld [vmem:[%s3330_s6 + $0x58] sm:$0xff]   ;;  %v2873_v55 = vld [vmem:[%s3330_s6 + $0x70] sm:$0xff]  }
  0xfe   : > { %4738 = vst [vmem:[#allocation20_spill] sm:$0xff] %v4141_v14  ;;  %v4159_v59 = vadd.f32 %v1804_v58, %v1803_v33  ;;  %v4183_v20 = vunpack.c.h.bf16 %v2863_v7  ;;  %v4185_v51 = vunpack.c.l.bf16 %v2867_v22  ;;  %v4193_v17 = vunpack.c.l.bf16 %v2864_v32  ;;  %v2683_v56 = vld [vmem:[%s3330_s6 + $0x78] sm:$0xf]  ;;  %v2673_v46 = vld [vmem:[%s3330_s6 + $0x50] sm:$0xf] }
  0xff   : > { %1842 = vrot.lane.b32.xlu2 %v1820_v4, %s2957_s16  ;;  %4739 = vst [vmem:[#allocation21_spill] sm:$0xff] %v4143_v40  ;;  %v4161_v5 = vadd.f32 %v1914_v25, %v1913_v53  ;;  %v4187_v4 = vunpack.c.h.bf16 %v2867_v22  ;;  %v4195_v8 = vunpack.c.h.bf16 %v2864_v32  ;;  %v4197_v11 = vunpack.c.l.bf16 %v2868_v12 }
 0x100   : > { %4740 = vst [vmem:[#allocation22_spill] sm:$0xff] %v4159_v59  ;;  %v4199_v24 = vunpack.c.h.bf16 %v2868_v12  ;;  %v4207_v3 = vunpack.c.h.bf16 %v2865_v19  ;;  %v4209_v18 = vunpack.c.l.bf16 %v2866_v30  ;;  %v4211_v49 = vunpack.c.h.bf16 %v2866_v30  ;;  %v2706_v12 = vld [vmem:[%s3330_s6 + $0x54] sm:$0xf] }
 0x101   : > { %v1187_v62 = vpop.permute.xlu2 %1186  ;;  %1987 = vrot.lane.b32.xlu1 %v2684_v13, %s2958_s7  ;;  %4741 = vst [vmem:[#allocation23_spill] sm:$0xff] %v4161_v5  ;;  %v2871_v13 = vld [vmem:[%s3330_s6 + $0x60] sm:$0xff]   ;;  %v4217_v10 = vunpack.c.h.bf16 %v2869_v6  ;;  %v4219_v58 = vunpack.c.l.bf16 %v2870_v9  ;;  %v4221_v25 = vunpack.c.h.bf16 %v2870_v9  ;;  %v4230_v33 = vunpack.c.l.bf16 %v2872_v50 }
 0x102   : > { %1222 = vst.msk [vmem:[%s3560_s17 + $0x34] sm:$0xf] %vm1208_vm5, %v1187_v62  ;;  %1979 = vrot.lane.b32.xlu0 %v2680_v0, %s2958_s7  ;;  %v4205_v62 = vunpack.c.l.bf16 %v2865_v19  ;;  %v4215_v0 = vunpack.c.l.bf16 %v2869_v6  ;;  %v4228_v39 = vunpack.c.h.bf16 %v2871_v13  ;;  %v4232_v53 = vunpack.c.h.bf16 %v2872_v50 }
 0x103   : > { %v1268_v43 = vpop.permute.xlu1 %1267  ;;  %4742 = vst [vmem:[#allocation24_spill] sm:$0xff] %v4195_v8  ;;  %v4241_v23 = vunpack.c.l.bf16 %v2874_v31  ;;  %v4243_v44 = vunpack.c.h.bf16 %v2874_v31  ;;  %v2263_v7 = vmul.f32 %v4153_v1, %v4153_v1  ;;  %v2264_v22 = vmul.f32 %v4155_v36, %v4155_v36 }
 0x104   : > { %v1260_v16 = vpop.permute.xlu0 %1259  ;;  %1311 = vst.msk [vmem:[%s3560_s17 + $0x14] sm:$0xf] %vm1305_vm6, %v1268_v43  ;;  %v4239_v43 = vunpack.c.h.bf16 %v2873_v55  ;;  %v2265_v32 = vmul.f32 %v4163_v15, %v4163_v15  ;;  %v2267_v19 = vmul.f32 %v4171_v41, %v4171_v41  ;;  %v2268_v30 = vmul.f32 %v4173_v28, %v4173_v28 }
 0x105   : > { %1307 = vst.msk [vmem:[%s3560_s17 + $0x4] sm:$0xf] %vm1305_vm6, %v1260_v16  ;;  %v4226_v16 = vunpack.c.l.bf16 %v2871_v13  ;;  %v2270_v9 = vmul.f32 %v4177_v54, %v4177_v54  ;;  %v2271_v13 = vmul.f32 %v4181_v48, %v4181_v48  ;;  %v2272_v50 = vmul.f32 %v4183_v20, %v4183_v20 }
 0x106   : > { %4743 = vst [vmem:[#allocation25_spill] sm:$0xff] %v4205_v62  ;;  %v4277_v31 = vmul.f32 %v4195_v8, %v4195_v8  ;;  %v4293_v34 = vmul.f32 %v4209_v18, %v4209_v18  ;;  %v4297_v40 = vmul.f32 %v4211_v49, %v4211_v49  ;;  %v2281_v14 = vmul.f32 %v4197_v11, %v4197_v11 }
 0x107   : > { %1959 = vrot.lane.b32.xlu2 %v2670_v35, %s2958_s7  ;;  %4744 = vst [vmem:[#allocation26_spill] sm:$0xff] %v4207_v3  ;;  %v4237_v35 = vunpack.c.l.bf16 %v2873_v55  ;;  %v4273_v55 = vmul.f32 %v4193_v17, %v4193_v17  ;;  %v2283_v5 = vmul.f32 %v4215_v0, %v4215_v0  ;;  %v2284_v45 = vmul.f32 %v4217_v10, %v4217_v10 }
 0x108   : > { %4745 = vst [vmem:[#allocation27_spill] sm:$0xff] %v4209_v18  ;;  %v2285_v59 = vmul.f32 %v4219_v58, %v4219_v58  ;;  %v2286_v47 = vmul.f32 %v4221_v25, %v4221_v25  ;;  %v2287_v27 = vmul.f32 %v4226_v16, %v4226_v16  ;;  %v2295_v21 = vsel %vm2181_vm7, %v2263_v7, 0.0 }
 0x109   : > { %v1258_v2 = vpop.permute.xlu2 %1257  ;;  %2057 = vrot.lane.b32.xlu1 %v2703_v42, %s2957_s16  ;;  %4746 = vst [vmem:[#allocation28_spill] sm:$0xff] %v4211_v49  ;;  %v2266_v42 = vmul.f32 %v4165_v60, %v4165_v60  ;;  %v2288_v29 = vmul.f32 %v4228_v39, %v4228_v39  ;;  %v2301_v18 = vsel %vm2181_vm7, %v2265_v32, 0.0  ;;  %v2290_v7 = vmul.f32 %v4232_v53, %v4232_v53 }
 0x10a   : > { %1306 = vst.msk [vmem:[%s3560_s17] sm:$0xf] %vm1305_vm6, %v1258_v2  ;;  %1985 = vrot.lane.b32.xlu0 %v2683_v56, %s2958_s7  ;;  %v2269_v2 = vmul.f32 %v4175_v38, %v4175_v38  ;;  %v2279_v56 = vmul.f32 %v4185_v51, %v4185_v51  ;;  %v2293_v32 = vmul.f32 %v4241_v23, %v4241_v23 }
 0x10b   : > { %v1274_v26 = vpop.permute.xlu1 %1273  ;;  %4747 = vst [vmem:[#allocation29_spill] sm:$0xff] %v4230_v33 }
 0x10c   : > { %v1266_v63 = vpop.permute.xlu0 %1265  ;;  %4748 = vst [vmem:[#allocation30_spill] sm:$0xff] %v4232_v53  ;;  %v2296_v61 = vsel %vm2181_vm7, %v2279_v56, 0.0  ;;  %v2291_v56 = vmul.f32 %v4237_v35, %v4237_v35 }
 0x10d   : > { %1310 = vst.msk [vmem:[%s3560_s17 + $0x10] sm:$0xf] %vm1305_vm6, %v1266_v63  ;;  %v4281_v63 = vmul.f32 %v4205_v62, %v4205_v62  ;;  %v2297_v62 = vadd.f32 %v2296_v61, %v2295_v21  ;;  %v2705_v61 = vld [vmem:[%s3330_s6 + $0x50] sm:$0xf]  ;;  %v2313_v21 = vsel %vm2181_vm7, %v2269_v2, 0.0 }
 0x10e   : > { %1314 = vst.msk [vmem:[%s3560_s17 + $0x20] sm:$0xf] %vm1305_vm6, %v1274_v26  ;;  %v2702_v26 = vld [vmem:[%s3330_s6 + $0x44] sm:$0xf] }
 0x10f   : > { %4749 = vst [vmem:[#allocation31_spill] sm:$0xff] %v4237_v35  ;;  %1965 = vrot.lane.b32.xlu2 %v2673_v46, %s2958_s7  ;;  %v2280_v46 = vmul.f32 %v4187_v4, %v4187_v4  ;;  %v2304_v35 = vsel %vm2181_vm7, %v2266_v42, 0.0 }
 0x110   : > { %4750 = vst [vmem:[#allocation32_spill] sm:$0xff] %v4239_v43 }
 0x111   : > { %4751 = vst [vmem:[#allocation33_spill] sm:$0xff] %v4241_v23  ;;  %v1264_v6 = vpop.permute.xlu2 %1263  ;;  %2063 = vrot.lane.b32.xlu1 %v2706_v12, %s2957_s16  ;;  %v2282_v12 = vmul.f32 %v4199_v24, %v4199_v24  ;;  %v2299_v49 = vsel %vm2181_vm7, %v2280_v46, 0.0  ;;  %v2292_v46 = vmul.f32 %v4239_v43, %v4239_v43  ;;  %v2308_v43 = vsel %vm2181_vm7, %v2283_v5, 0.0 }
 0x112   : > { %4752 = vst [vmem:[#allocation34_spill] sm:$0xff] %v4243_v44  ;;  %2055 = vrot.lane.b32.xlu0 %v2702_v26, %s2957_s16  ;;  %v2294_v26 = vmul.f32 %v4243_v44, %v4243_v44  ;;  %v2310_v23 = vsel %vm2181_vm7, %v2268_v30, 0.0  ;;  %v2311_v44 = vsel %vm2181_vm7, %v2284_v45, 0.0  ;;  %v2320_v5 = vsel %vm2181_vm7, %v2287_v27, 0.0 }
 0x113   : > { %1309 = vst.msk [vmem:[%s3560_s17 + $0xc] sm:$0xf] %vm1305_vm6, %v1264_v6  ;;  %v4289_v6 = vmul.f32 %v4207_v3, %v4207_v3  ;;  %v1280_v57 = vpop.permute.xlu1 %1279  ;;  %v2289_v3 = vmul.f32 %v4230_v33, %v4230_v33  ;;  %v2322_v30 = vsel %vm2181_vm7, %v2272_v50, 0.0  ;;  %v2323_v45 = vsel %vm2181_vm7, %v2288_v29, 0.0 }
 0x114   : > { %v1272_v52 = vpop.permute.xlu0 %1271  ;;  %1317 = vst.msk [vmem:[%s3560_s17 + $0x2c] sm:$0xf] %vm1305_vm6, %v1280_v57  ;;  %v2302_v57 = vsel %vm2181_vm7, %v2281_v14, 0.0  ;;  %v2305_v14 = vsel %vm2181_vm7, %v2282_v12, 0.0  ;;  %v2679_v12 = vld [vmem:[%s3330_s6 + $0x68] sm:$0xf]  ;;  %v2312_v27 = vadd.f32 %v2311_v44, %v2310_v23 }
 0x115   : > { %1313 = vst.msk [vmem:[%s3560_s17 + $0x1c] sm:$0xf] %vm1305_vm6, %v1272_v52  ;;  %v2298_v52 = vsel %vm2181_vm7, %v2264_v22, 0.0  ;;  %v2709_v22 = vld [vmem:[%s3330_s6 + $0x60] sm:$0xf]  ;;  %v2303_v33 = vadd.f32 %v2302_v57, %v2301_v18  ;;  %v2314_v18 = vsel %vm2181_vm7, %v2285_v59, 0.0  ;;  %v2306_v59 = vadd.f32 %v2305_v14, %v2304_v35 }
 0x116   : > { %v2300_v8 = vadd.f32 %v2299_v49, %v2298_v52  ;;  %v2316_v49 = vsel %vm2181_vm7, %v2270_v9, 0.0  ;;  %v2325_v9 = vsel %vm2181_vm7, %v4273_v55, 0.0  ;;  %v2331_v29 = vsel %vm2181_vm7, %v4281_v63, 0.0 }
 0x117   : > { %1971 = vrot.lane.b32.xlu2 %v2676_v37, %s2958_s7  ;;  %v2307_v37 = vsel %vm2181_vm7, %v2267_v19, 0.0  ;;  %v2319_v19 = vsel %vm2181_vm7, %v2271_v13, 0.0  ;;  %v2315_v13 = vadd.f32 %v2314_v18, %v2313_v21  ;;  %v2332_v50 = vsel %vm2181_vm7, %v2291_v56, 0.0  ;;  %v2708_v18 = vld [vmem:[%s3330_s6 + $0x5c] sm:$0xf] }
 0x118   : > { %v2309_v52 = vadd.f32 %v2308_v43, %v2307_v37  ;;  %v2321_v35 = vadd.f32 %v2320_v5, %v2319_v19  ;;  %v2324_v43 = vadd.f32 %v2323_v45, %v2322_v30  ;;  %v2328_v55 = vsel %vm2181_vm7, %v4277_v31, 0.0  ;;  %v2682_v5 = vld [vmem:[%s3330_s6 + $0x74] sm:$0xf] }
 0x119   : > { %v1270_v53 = vpop.permute.xlu2 %1269  ;;  %2069 = vrot.lane.b32.xlu1 %v2709_v22, %s2957_s16  ;;  %v2329_v23 = vsel %vm2181_vm7, %v2290_v7, 0.0  ;;  %v2337_v44 = vsel %vm2181_vm7, %v4293_v34, 0.0  ;;  %v2338_v63 = vsel %vm2181_vm7, %v2293_v32, 0.0  ;;  %v2333_v14 = vadd.f32 %v2332_v50, %v2331_v29 }
 0x11a   : > { %1312 = vst.msk [vmem:[%s3560_s17 + $0x18] sm:$0xf] %vm1305_vm6, %v1270_v53  ;;  %v2317_v53 = vsel %vm2181_vm7, %v2286_v47, 0.0  ;;  %v2326_v47 = vsel %vm2181_vm7, %v2289_v3, 0.0  ;;  %2061 = vrot.lane.b32.xlu0 %v2705_v61, %s2957_s16  ;;  %v2712_v3 = vld [vmem:[%s3330_s6 + $0x6c] sm:$0xf] }
 0x11b   : > { %v1286_v2 = vpop.permute.xlu1 %1285  ;;  %v2318_v57 = vadd.f32 %v2317_v53, %v2316_v49  ;;  %v2327_v22 = vadd.f32 %v2326_v47, %v2325_v9  ;;  %v2334_v37 = vsel %vm2181_vm7, %v4289_v6, 0.0  ;;  %v2343_v61 = vsel %vm2181_vm7, %v2297_v62, 0.0 }
 0x11c   : > { %v1278_v42 = vpop.permute.xlu0 %1277  ;;  %1320 = vst.msk [vmem:[%s3560_s17 + $0x38] sm:$0xf] %vm1305_vm6, %v1286_v2  ;;  %v2344_v31 = vsel %vm2181_vm7, %v2303_v33, 0.0  ;;  %v2335_v21 = vsel %vm2181_vm7, %v2292_v46, 0.0  ;;  %v2340_v34 = vsel %vm2181_vm7, %v4297_v40, 0.0  ;;  %v2346_v32 = vsel %vm2181_vm7, %v2309_v52, 0.0 }
 0x11d   : > { %1316 = vst.msk [vmem:[%s3560_s17 + $0x28] sm:$0xf] %vm1305_vm6, %v1278_v42  ;;  %v2345_v7 = vadd.f32 %v2344_v31, %v2343_v61  ;;  %v2339_v6 = vadd.f32 %v2338_v63, %v2337_v44  ;;  %v2341_v62 = vsel %vm2181_vm7, %v2294_v26, 0.0  ;;  %v2348_v33 = vsel %vm2181_vm7, %v2315_v13, 0.0 }
 0x11e   : > { %v2358_v49 = vsel %vm2181_vm7, %v2300_v8, 0.0  ;;  %v2330_v46 = vadd.f32 %v2329_v23, %v2328_v55  ;;  %v2359_v19 = vsel %vm2181_vm7, %v2306_v59, 0.0  ;;  %v2361_v40 = vsel %vm2181_vm7, %v2312_v27, 0.0 }
 0x11f   : > { %1977 = vrot.lane.b32.xlu2 %v2679_v12, %s2958_s7  ;;  %v2347_v42 = vadd.f32 %v2346_v32, %v2345_v7  ;;  %v2350_v45 = vsel %vm2181_vm7, %v2321_v35, 0.0  ;;  %v2360_v12 = vadd.f32 %v2359_v19, %v2358_v49  ;;  %v2182_v26 = vsel %vm2181_vm7, %v4153_v1, 0.0  ;;  %v2715_v1 = vld [vmem:[%s3330_s6 + $0x78] sm:$0xf] }
 0x120   : > { %v2336_v8 = vadd.f32 %v2335_v21, %v2334_v37  ;;  %v2342_v2 = vadd.f32 %v2341_v62, %v2340_v34  ;;  %v2363_v52 = vsel %vm2181_vm7, %v2318_v57, 0.0  ;;  %v2352_v9 = vsel %vm2181_vm7, %v2327_v22, 0.0 }
 0x121   : > { %v1276_v56 = vpop.permute.xlu2 %1275  ;;  %2075 = vrot.lane.b32.xlu1 %v2712_v3, %s2957_s16  ;;  %v2349_v59 = vadd.f32 %v2348_v33, %v2347_v42  ;;  %v2354_v47 = vsel %vm2181_vm7, %v2333_v14, 0.0  ;;  %v2356_v27 = vsel %vm2181_vm7, %v2339_v6, 0.0  ;;  %v2362_v13 = vadd.f32 %v2361_v40, %v2360_v12 }
 0x122   : > { %1315 = vst.msk [vmem:[%s3560_s17 + $0x24] sm:$0xf] %vm1305_vm6, %v1276_v56  ;;  %2067 = vrot.lane.b32.xlu0 %v2708_v18, %s2957_s16  ;;  %v2365_v50 = vsel %vm2181_vm7, %v2324_v43, 0.0  ;;  %v2367_v35 = vsel %vm2181_vm7, %v2330_v46, 0.0  ;;  %v2183_v57 = vsel %vm2181_vm7, %v4185_v51, 0.0  ;;  %v2185_v22 = vsel %vm2181_vm7, %v4155_v36, 0.0 }
 0x123   : > { %v1548_v30 = vpop.permute.xlu1 %1547  ;;  %v2351_v29 = vadd.f32 %v2350_v45, %v2349_v59  ;;  %v2364_v3 = vadd.f32 %v2363_v52, %v2362_v13  ;;  %v2186_v23 = vsel %vm2181_vm7, %v4187_v4, 0.0  ;;  %v2188_v44 = vsel %vm2181_vm7, %v4163_v15, 0.0  ;;  %v2711_v56 = vld [vmem:[%s3330_s6 + $0x68] sm:$0xf]  ;;  %v2704_v52 = vld [vmem:[%s3330_s6 + $0x4c] sm:$0xf] }
 0x124   : > { %v1284_v53 = vpop.permute.xlu0 %1283  ;;  %2646 = vst.msk [vmem:[%s3560_s17 + $0x48] sm:$0xf] %vm772_vm4, %v1548_v30  ;;  %v2189_v63 = vsel %vm2181_vm7, %v4197_v11, 0.0  ;;  %v2191_v51 = vsel %vm2181_vm7, %v4165_v60, 0.0  ;;  %v2192_v36 = vsel %vm2181_vm7, %v4199_v24, 0.0  ;;  %v2369_v15 = vsel %vm2181_vm7, %v2336_v8, 0.0 }
 0x125   : > { %1319 = vst.msk [vmem:[%s3560_s17 + $0x34] sm:$0xf] %vm1305_vm6, %v1284_v53  ;;  %v2353_v43 = vadd.f32 %v2352_v9, %v2351_v29  ;;  %v2366_v4 = vadd.f32 %v2365_v50, %v2364_v3  ;;  %v2194_v14 = vsel %vm2181_vm7, %v4171_v41, 0.0  ;;  %v2195_v37 = vsel %vm2181_vm7, %v4215_v0, 0.0  ;;  %v2701_v24 = vld [vmem:[%s3330_s6 + $0x40] sm:$0xf] }
 0x126   : > { %v2371_v60 = vsel %vm2181_vm7, %v2342_v2, 0.0  ;;  %v2184_v31 = vadd.f32 %v2183_v57, %v2182_v26  ;;  %v2187_v21 = vadd.f32 %v2186_v23, %v2185_v22  ;;  %v2190_v32 = vadd.f32 %v2189_v63, %v2188_v44  ;;  %v2714_v26 = vld [vmem:[%s3330_s6 + $0x74] sm:$0xf]  ;;  %v4756_v13 = vld [vmem:[#allocation25_spill] sm:$0xff]  ;;  %v4757_v29 = vld [vmem:[#allocation31_spill] sm:$0xff] }
 0x127   : > { %1983 = vrot.lane.b32.xlu2 %v2682_v5, %s2958_s7  ;;  %v2355_v61 = vadd.f32 %v2354_v47, %v2353_v43  ;;  %v2368_v7 = vadd.f32 %v2367_v35, %v2366_v4  ;;  %v2193_v18 = vadd.f32 %v2192_v36, %v2191_v51  ;;  %v2197_v6 = vsel %vm2181_vm7, %v4173_v28, 0.0  ;;  %v4753_v5 = vld [vmem:[#allocation29_spill] sm:$0xff]  ;;  %v4758_v57 = vld [vmem:[#allocation26_spill] sm:$0xff]  ;;  %v4759_v44 = vld [vmem:[#allocation32_spill] sm:$0xff] }
 0x128   : > { %v2196_v0 = vadd.f32 %v2195_v37, %v2194_v14  ;;  %v2198_v62 = vsel %vm2181_vm7, %v4217_v10, 0.0  ;;  %v2200_v33 = vsel %vm2181_vm7, %v4175_v38, 0.0  ;;  %v2201_v53 = vsel %vm2181_vm7, %v4219_v58, 0.0  ;;  %v4760_v4 = vld [vmem:[#allocation27_spill] sm:$0xff] }
 0x129   : > { %v1282_v55 = vpop.permute.xlu2 %1281  ;;  %2081 = vrot.lane.b32.xlu1 %v2715_v1, %s2957_s16  ;;  %v2357_v41 = vadd.f32 %v2356_v27, %v2355_v61  ;;  %v2370_v49 = vadd.f32 %v2369_v15, %v2368_v7  ;;  %v2203_v28 = vsel %vm2181_vm7, %v4177_v54, 0.0  ;;  %v2204_v46 = vsel %vm2181_vm7, %v4221_v25, 0.0 }
 0x12a   : > { %1318 = vst.msk [vmem:[%s3560_s17 + $0x30] sm:$0xf] %vm1305_vm6, %v1282_v55  ;;  %2073 = vrot.lane.b32.xlu0 %v2711_v56, %s2957_s16  ;;  %v2206_v10 = vsel %vm2181_vm7, %v4181_v48, 0.0  ;;  %v2207_v42 = vsel %vm2181_vm7, %v4226_v16, 0.0  ;;  %v2209_v38 = vsel %vm2181_vm7, %v4183_v20, 0.0  ;;  %v2210_v58 = vsel %vm2181_vm7, %v4228_v39, 0.0 }
 0x12b   : > { %v1554_v34 = vpop.permute.xlu1 %1553  ;;  %v2372_v19 = vadd.f32 %v2371_v60, %v2370_v49  ;;  %v2373_v25 = vsel %vm2181_vm7, %v2357_v41, 0.0  ;;  %v2212_v40 = vsel %vm2181_vm7, %v4193_v17, 0.0  ;;  %v2213_v48 = vsel %vm2181_vm7, %v4753_v5, 0.0  ;;  %v4754_v20 = vld [vmem:[#allocation24_spill] sm:$0xff]  ;;  %v4755_v39 = vld [vmem:[#allocation30_spill] sm:$0xff] }
 0x12c   : > { %v1546_v11 = vpop.permute.xlu0 %1545  ;;  %2649 = vst.msk [vmem:[%s3560_s17 + $0x60] sm:$0xf] %vm772_vm4, %v1554_v34  ;;  %v2199_v16 = vadd.f32 %v2198_v62, %v2197_v6  ;;  %v2202_v30 = vadd.f32 %v2201_v53, %v2200_v33  ;;  %v2215_v45 = vsel %vm2181_vm7, %v4754_v20, 0.0  ;;  %v2216_v12 = vsel %vm2181_vm7, %v4755_v39, 0.0  ;;  %v4763_v33 = vld [vmem:[#allocation34_spill] sm:$0xff] }
 0x12d   : > { %2645 = vst.msk [vmem:[%s3560_s17 + $0x40] sm:$0xf] %vm772_vm4, %v1546_v11  ;;  %v2374_v8 = vsel %vm2181_vm7, %v2372_v19, 0.0  ;;  %v2205_v2 = vadd.f32 %v2204_v46, %v2203_v28  ;;  %v2208_v59 = vadd.f32 %v2207_v42, %v2206_v10  ;;  %v2211_v17 = vadd.f32 %v2210_v58, %v2209_v38  ;;  %v4761_v11 = vld [vmem:[#allocation33_spill] sm:$0xff] }
 0x12e   : > { %v2375_v47 = vadd.f32 %v2374_v8, %v2373_v25  ;;  %v2214_v27 = vadd.f32 %v2213_v48, %v2212_v40  ;;  %v2218_v1 = vsel %vm2181_vm7, %v4756_v13, 0.0  ;;  %v2219_v50 = vsel %vm2181_vm7, %v4757_v29, 0.0  ;;  %v2707_v25 = vld [vmem:[%s3330_s6 + $0x58] sm:$0xf]  ;;  %v2710_v29 = vld [vmem:[%s3330_s6 + $0x64] sm:$0xf] }
 0x12f   : > { %2053 = vrot.lane.b32.xlu2 %v2701_v24, %s2957_s16  ;;  %v2217_v35 = vadd.f32 %v2216_v12, %v2215_v45  ;;  %v2221_v55 = vsel %vm2181_vm7, %v4758_v57, 0.0  ;;  %v2230_v3 = vsel %vm2181_vm7, %v2184_v31, 0.0  ;;  %v2231_v22 = vsel %vm2181_vm7, %v2190_v32, 0.0 }
 0x130   : > { %v2392_v23 = vsel %vm2181_vm7, %v2375_v47, 0.0  ;;  %v2222_v43 = vsel %vm2181_vm7, %v4759_v44, 0.0  ;;  %v2232_v63 = vadd.f32 %v2231_v22, %v2230_v3  ;;  %v2233_v51 = vsel %vm2181_vm7, %v2196_v0, 0.0  ;;  %v4762_v0 = vld [vmem:[#allocation28_spill] sm:$0xff] }
 0x131   : > { %v1288_v54 = vpop.permute.xlu2 %1287  ;;  %v2393_v36 = vrot.slane %v2392_v23, 4  ;;  %v2220_v56 = vadd.f32 %v2219_v50, %v2218_v1  ;;  %v2224_v15 = vsel %vm2181_vm7, %v4760_v4, 0.0  ;;  %v2235_v14 = vsel %vm2181_vm7, %v2202_v30, 0.0 }
 0x132   : > { %1321 = vst.msk [vmem:[%s3560_s17 + $0x3c] sm:$0xf] %vm1305_vm6, %v1288_v54  ;;  %2079 = vrot.lane.b32.xlu0 %v2714_v26, %s2957_s16  ;;  %v2225_v61 = vsel %vm2181_vm7, %v4761_v11, 0.0  ;;  %v2234_v60 = vadd.f32 %v2233_v51, %v2232_v63  ;;  %v2245_v31 = vsel %vm2181_vm7, %v2187_v21, 0.0  ;;  %v2246_v24 = vsel %vm2181_vm7, %v2193_v18, 0.0 }
 0x133   : > { %v1560_v37 = vpop.permute.xlu1 %1559  ;;  %v2394_v7 = vadd.f32 %v2393_v36, %v2392_v23  ;;  %v2237_v32 = vsel %vm2181_vm7, %v2208_v59, 0.0  ;;  %v2247_v6 = vadd.f32 %v2246_v24, %v2245_v31  ;;  %v2248_v41 = vsel %vm2181_vm7, %v2199_v16, 0.0  ;;  %v4765_v31 = vld [vmem:[#allocation6_spill] sm:$0xff] }
 0x134   : > { %v1552_v9 = vpop.permute.xlu0 %1551  ;;  %2652 = vst.msk [vmem:[%s3560_s17 + $0x78] sm:$0xf] %vm772_vm4, %v1560_v37  ;;  %v2227_v62 = vsel %vm2181_vm7, %v4762_v0, 0.0  ;;  %v2228_v21 = vsel %vm2181_vm7, %v4763_v33, 0.0  ;;  %v2236_v18 = vadd.f32 %v2235_v14, %v2234_v60  ;;  %v2250_v49 = vsel %vm2181_vm7, %v2205_v2, 0.0 }
 0x135   : > { %2648 = vst.msk [vmem:[%s3560_s17 + $0x58] sm:$0xf] %vm772_vm4, %v1552_v9  ;;  %v2395_v53 = vrot.slane %v2394_v7, 2  ;;  %v2226_v28 = vadd.f32 %v2225_v61, %v2224_v15  ;;  %v2239_v46 = vsel %vm2181_vm7, %v2214_v27, 0.0  ;;  %v2249_v10 = vadd.f32 %v2248_v41, %v2247_v6  ;;  %v2716_v14 = vld [vmem:[%s3330_s6 + $0x7c] sm:$0xf] }
 0x136   : > { %v2223_v42 = vadd.f32 %v2222_v43, %v2221_v55  ;;  %v2238_v38 = vadd.f32 %v2237_v32, %v2236_v18  ;;  %v2252_v58 = vsel %vm2181_vm7, %v2211_v17, 0.0  ;;  %v2241_v40 = vsel %vm2181_vm7, %v2220_v56, 0.0  ;;  %v2713_v43 = vld [vmem:[%s3330_s6 + $0x70] sm:$0xf]  ;;  %v4767_v18 = vld [vmem:[#allocation5_spill] sm:$0xff] }
 0x137   : > { %2059 = vrot.lane.b32.xlu2 %v2704_v52, %s2957_s16  ;;  %v2396_v19 = vadd.f32 %v2395_v53, %v2394_v7  ;;  %v2251_v5 = vadd.f32 %v2250_v49, %v2249_v10  ;;  %v2229_v48 = vadd.f32 %v2228_v21, %v2227_v62  ;;  %v2254_v30 = vsel %vm2181_vm7, %v2217_v35, 0.0  ;;  %v4764_v61 = vld [vmem:[#allocation4_spill] sm:$0xff]  ;;  %v4766_v7 = vld [vmem:[#allocation3_spill] sm:$0xff]  ;;  %v4768_v10 = vld [vmem:[#allocation9_spill] sm:$0xff] }
 0x138   : > { %v2240_v16 = vadd.f32 %v2239_v46, %v2238_v38  ;;  %v2243_v45 = vsel %vm2181_vm7, %v2226_v28, 0.0  ;;  %v2256_v8 = vsel %vm2181_vm7, %v2223_v42, 0.0  ;;  %v701_v60 = vmul.f32 %v4764_v61, %v4764_v61 }
 0x139   : > { %v1550_v34 = vpop.permute.xlu2 %1549  ;;  %v2397_v20 = vrot.slane %v2396_v19, 1  ;;  %v2253_v39 = vadd.f32 %v2252_v58, %v2251_v5  ;;  %v2258_v9 = vsel %vm2181_vm7, %v2229_v48, 0.0  ;;  %v702_v24 = vmul.f32 %v4765_v31, %v4765_v31 }
 0x13a   : > { %2647 = vst.msk [vmem:[%s3560_s17 + $0x50] sm:$0xf] %vm772_vm4, %v1550_v34  ;;  %v2242_v26 = vadd.f32 %v2241_v40, %v2240_v16  ;;  %v703_v32 = vmul.f32 %v4766_v7, %v4766_v7  ;;  %v709_v6 = vsel %vm677_vm2, %v701_v60, 0.0  ;;  %v704_v49 = vmul.f32 %v4767_v18, %v4767_v18  ;;  %v4770_v16 = vld [vmem:[#allocation8_spill] sm:$0xff] }
 0x13b   : > { %v1835_v12 = vpop.permute.xlu1 %1834  ;;  %v2398_v2 = vadd.f32 %v2397_v20, %v2396_v19  ;;  %v2255_v59 = vadd.f32 %v2254_v30, %v2253_v39  ;;  %v710_v41 = vsel %vm677_vm2, %v702_v24, 0.0  ;;  %v705_v42 = vmul.f32 %v4768_v10, %v4768_v10  ;;  %v4778_v24 = vld [vmem:[#allocation19_spill] sm:$0xff] }
 0x13c   : > { %v1558_v54 = vpop.permute.xlu0 %1557  ;;  %2663 = vst.msk [vmem:[%s3560_s17 + $0x54] sm:$0xf] %vm772_vm4, %v1835_v12  ;;  %v2244_v52 = vadd.f32 %v2243_v45, %v2242_v26  ;;  %v711_v33 = vadd.f32 %v710_v41, %v709_v6  ;;  %v712_v21 = vsel %vm677_vm2, %v703_v32, 0.0  ;;  %v714_v46 = vsel %vm677_vm2, %v704_v49, 0.0  ;;  %v4771_v26 = vld [vmem:[#allocation7_spill] sm:$0xff]  ;;  %v4779_v41 = vld [vmem:[#allocation22_spill] sm:$0xff] }
 0x13d   : > { %2651 = vst.msk [vmem:[%s3560_s17 + $0x70] sm:$0xf] %vm772_vm4, %v1558_v54  ;;  %2400 = vrot.lane.b32.xlu1 %v2398_v2, %s2958_s7  ;;  %v2257_v47 = vadd.f32 %v2256_v8, %v2255_v59  ;;  %v716_v19 = vsel %vm677_vm2, %v705_v42, 0.0  ;;  %v707_v30 = vmul.f32 %v4770_v16, %v4770_v16  ;;  %v708_v8 = vmul.f32 %v4771_v26, %v4771_v26  ;;  %v4782_v42 = vld [vmem:[#allocation18_spill] sm:$0xff]  ;;  %v4783_v26 = vld [vmem:[#allocation20_spill] sm:$0xff] }
 0x13e   : > { %v2260_v1 = vsel %vm2181_vm7, %v2244_v52, 0.0  ;;  %v713_v28 = vadd.f32 %v712_v21, %v711_v33  ;;  %v4780_v21 = vld [vmem:[#allocation2_spill] sm:$0xff] }
 0x13f   : > { %2065 = vrot.lane.b32.xlu2 %v2707_v25, %s2957_s16  ;;  %v2259_v13 = vadd.f32 %v2258_v9, %v2257_v47  ;;  %v4769_v25 = vld [vmem:[#allocation10_spill] sm:$0xff]  ;;  %v720_v2 = vsel %vm677_vm2, %v707_v30, 0.0  ;;  %v722_v52 = vsel %vm677_vm2, %v708_v8, 0.0  ;;  %v1490_v18 = vsel %vm677_vm2, %v4780_v21, 0.0 }
 0x140   : > { %v715_v54 = vadd.f32 %v714_v46, %v713_v28  ;;  %v706_v40 = vmul.f32 %v4769_v25, %v4769_v25  ;;  %v1491_v16 = vrot.slane %v1490_v18, 4  ;;  %v1775_v8 = vsel %vm677_vm2, %v4783_v26, 0.0 }
 0x141   : > { %v1556_v17 = vpop.permute.xlu2 %1555  ;;  %v2261_v50 = vsel %vm2181_vm7, %v2259_v13, 0.0 }
 0x142   : > { %2650 = vst.msk [vmem:[%s3560_s17 + $0x68] sm:$0xf] %vm772_vm4, %v1556_v17  ;;  %v2262_v57 = vadd.f32 %v2261_v50, %v2260_v1  ;;  %v717_v48 = vadd.f32 %v716_v19, %v715_v54  ;;  %v718_v20 = vsel %vm677_vm2, %v706_v40, 0.0  ;;  %v4772_v1 = vld [vmem:[#allocation11_spill] sm:$0xff] }
 0x143   : > { %v1841_v35 = vpop.permute.xlu1 %1840 }
 0x144   : > { %v1833_v27 = vpop.permute.xlu0 %1832  ;;  %2666 = vst.msk [vmem:[%s3560_s17 + $0x6c] sm:$0xf] %vm772_vm4, %v1841_v35  ;;  %v2379_v3 = vsel %vm2181_vm7, %v2262_v57, 0.0  ;;  %v719_v12 = vadd.f32 %v718_v20, %v717_v48  ;;  %v4773_v35 = vld [vmem:[#allocation15_spill] sm:$0xff] }
 0x145   : > { %2662 = vst.msk [vmem:[%s3560_s17 + $0x4c] sm:$0xf] %vm772_vm4, %v1833_v27  ;;  %v2380_v22 = vrot.slane %v2379_v3, 4  ;;  %v1010_v57 = vsel %vm677_vm2, %v4773_v35, 0.0 }
 0x146   : > { %v721_v17 = vadd.f32 %v720_v2, %v719_v12 }
 0x147   : > { %2071 = vrot.lane.b32.xlu2 %v2710_v29, %s2957_s16  ;;  %v2381_v44 = vadd.f32 %v2380_v22, %v2379_v3  ;;  %v835_v29 = vsel %vm677_vm2, %v4772_v1, 0.0  ;;  %v4774_v3 = vld [vmem:[#allocation16_spill] sm:$0xff] }
 0x148   : > { %v723_v27 = vadd.f32 %v722_v52, %v721_v17  ;;  %v1120_v22 = vsel %vm677_vm2, %v4774_v3, 0.0 }
 0x149   : > { %v1831_v55 = vpop.permute.xlu2 %1830  ;;  %v2382_v63 = vrot.slane %v2381_v44, 2 }
 0x14a   : > { %2661 = vst.msk [vmem:[%s3560_s17 + $0x44] sm:$0xf] %vm772_vm4, %v1831_v55  ;;  %v724_v50 = vsel %vm677_vm2, %v723_v27, 0.0  ;;  %v836_v55 = vrot.slane %v835_v29, 4 }
 0x14b   : > { %v1958_v51 = vpop.permute.xlu1 %1957  ;;  %v2383_v36 = vadd.f32 %v2382_v63, %v2381_v44  ;;  %v725_v44 = vrot.slane %v724_v50, 4  ;;  %v4775_v63 = vld [vmem:[#allocation13_spill] sm:$0xff] }
 0x14c   : > { %v1839_v23 = vpop.permute.xlu0 %1838  ;;  %2685 = vst.msk [vmem:[%s3560_s17 + $0x40] sm:$0xf] %vm1208_vm5, %v1958_v51  ;;  %v979_v51 = vsel %vm677_vm2, %v4775_v63, 0.0  ;;  %v837_v61 = vadd.f32 %v836_v55, %v835_v29  ;;  %v1492_v29 = vadd.f32 %v1491_v16, %v1490_v18 }
 0x14d   : > { %2665 = vst.msk [vmem:[%s3560_s17 + $0x64] sm:$0xf] %vm772_vm4, %v1839_v23  ;;  %v2384_v4 = vrot.slane %v2383_v36, 1  ;;  %v726_v60 = vadd.f32 %v725_v44, %v724_v50  ;;  %v980_v31 = vrot.slane %v979_v51, 4  ;;  %v1776_v50 = vrot.slane %v1775_v8, 4 }
 0x14e   : > { %v838_v33 = vrot.slane %v837_v61, 2 }
 0x14f   : > { %2077 = vrot.lane.b32.xlu2 %v2713_v43, %s2957_s16  ;;  %v2385_v15 = vadd.f32 %v2384_v4, %v2383_v36  ;;  %v1011_v36 = vrot.slane %v1010_v57, 4  ;;  %v981_v10 = vadd.f32 %v980_v31, %v979_v51  ;;  %v727_v19 = vrot.slane %v726_v60, 2 }
 0x151   : > { %v1837_v56 = vpop.permute.xlu2 %1836  ;;  %2387 = vrot.lane.b32.xlu0 %v2385_v15, %s2958_s7  ;;  %v1121_v15 = vrot.slane %v1120_v22, 4  ;;  %v1012_v7 = vadd.f32 %v1011_v36, %v1010_v57  ;;  %v982_v2 = vrot.slane %v981_v10, 2 }
 0x152   : > { %2664 = vst.msk [vmem:[%s3560_s17 + $0x5c] sm:$0xf] %vm772_vm4, %v1837_v56  ;;  %v4776_v56 = vld [vmem:[#allocation14_spill] sm:$0xff] }
 0x153   : > { %v1964_v37 = vpop.permute.xlu1 %1963  ;;  %v1089_v4 = vsel %vm677_vm2, %v4776_v56, 0.0  ;;  %v1013_v25 = vrot.slane %v1012_v7, 2  ;;  %v983_v44 = vadd.f32 %v982_v2, %v981_v10 }
 0x154   : > { %v1845_v11 = vpop.permute.xlu0 %1844  ;;  %2688 = vst.msk [vmem:[%s3560_s17 + $0x4c] sm:$0xf] %vm1208_vm5, %v1964_v37  ;;  %v1090_v32 = vrot.slane %v1089_v4, 4 }
 0x155   : > { %2668 = vst.msk [vmem:[%s3560_s17 + $0x7c] sm:$0xf] %vm772_vm4, %v1845_v11 }
 0x156   : > { %v1091_v40 = vadd.f32 %v1090_v32, %v1089_v4 }
 0x157   : > { %2083 = vrot.lane.b32.xlu2 %v2716_v14, %s2957_s16  ;;  %v4777_v14 = vld [vmem:[#allocation17_spill] sm:$0xff]  ;;  %s2620_s16 = sshll.u32 %s4807_s19, 1 }
 0x158   : > { %v1521_v37 = vsel %vm677_vm2, %v4777_v14, 0.0  ;;  %v1092_v27 = vrot.slane %v1091_v40, 2  ;;  %v1493_v14 = vrot.slane %v1492_v29, 2  ;;  %s431_s28 = scalar_lea.vmem %s4695_s5, %s2620_s16 }
 0x159   : > { %v1843_v34 = vpop.permute.xlu2 %1842  ;;  %v1522_v6 = vrot.slane %v1521_v37, 4 }
 0x15a   : > { %2667 = vst.msk [vmem:[%s3560_s17 + $0x74] sm:$0xf] %vm772_vm4, %v1843_v34  ;;  %v1631_v34 = vsel %vm677_vm2, %v4778_v24, 0.0  ;;  %v1093_v56 = vadd.f32 %v1092_v27, %v1091_v40  ;;  %v1494_v18 = vadd.f32 %v1493_v14, %v1492_v29 }
 0x15b   : > { %v1970_v0 = vpop.permute.xlu1 %1969  ;;  %v1632_v49 = vrot.slane %v1631_v34, 4 }
 0x15c   : > { %v1962_v62 = vpop.permute.xlu0 %1961  ;;  %2691 = vst.msk [vmem:[%s3560_s17 + $0x58] sm:$0xf] %vm1208_vm5, %v1970_v0  ;;  %v1806_v0 = vsel %vm677_vm2, %v4779_v41, 0.0  ;;  %v1495_v40 = vrot.slane %v1494_v18, 1 }
 0x15d   : > { %2687 = vst.msk [vmem:[%s3560_s17 + $0x48] sm:$0xf] %vm1208_vm5, %v1962_v62  ;;  %v1122_v62 = vadd.f32 %v1121_v15, %v1120_v22  ;;  %v1633_v12 = vadd.f32 %v1632_v49, %v1631_v34 }
 0x15e   : > { %v1496_v2 = vadd.f32 %v1495_v40, %v1494_v18 }
 0x15f   : > { %v1123_v48 = vrot.slane %v1122_v62, 2  ;;  %v1634_v3 = vrot.slane %v1633_v12, 2 }
 0x161   : > { %v1960_v53 = vpop.permute.xlu2 %1959  ;;  %v1124_v1 = vadd.f32 %v1123_v48, %v1122_v62  ;;  %v1635_v34 = vadd.f32 %v1634_v3, %v1633_v12 }
 0x162   : > { %2686 = vst.msk [vmem:[%s3560_s17 + $0x44] sm:$0xf] %vm1208_vm5, %v1960_v53  ;;  %v4781_v53 = vld [vmem:[#allocation23_spill] sm:$0xff] }
 0x163   : > { %v1976_v38 = vpop.permute.xlu1 %1975  ;;  %v1916_v28 = vsel %vm677_vm2, %v4781_v53, 0.0  ;;  %v1125_v15 = vrot.slane %v1124_v1, 1  ;;  %v1636_v10 = vrot.slane %v1635_v34, 1 }
 0x164   : > { %v1968_v58 = vpop.permute.xlu0 %1967  ;;  %2694 = vst.msk [vmem:[%s3560_s17 + $0x64] sm:$0xf] %vm1208_vm5, %v1976_v38  ;;  %v1600_v38 = vsel %vm677_vm2, %v4782_v42, 0.0  ;;  %v1917_v30 = vrot.slane %v1916_v28, 4 }
 0x165   : > { %2690 = vst.msk [vmem:[%s3560_s17 + $0x54] sm:$0xf] %vm1208_vm5, %v1968_v58  ;;  %v1807_v58 = vrot.slane %v1806_v0, 4 }
 0x166   : > { %v1918_v35 = vadd.f32 %v1917_v30, %v1916_v28 }
 0x167   : > { %v1808_v52 = vadd.f32 %v1807_v58, %v1806_v0 }
 0x169   : > { %v1966_v5 = vpop.permute.xlu2 %1965  ;;  %v1809_v63 = vrot.slane %v1808_v52, 2 }
 0x16a   : > { %2689 = vst.msk [vmem:[%s3560_s17 + $0x50] sm:$0xf] %vm1208_vm5, %v1966_v5  ;;  %v1523_v5 = vadd.f32 %v1522_v6, %v1521_v37  ;;  %v1777_v37 = vadd.f32 %v1776_v50, %v1775_v8  ;;  %v1094_v6 = vrot.slane %v1093_v56, 1 }
 0x16b   : > { %v1982_v45 = vpop.permute.xlu1 %1981  ;;  %v1810_v32 = vadd.f32 %v1809_v63, %v1808_v52 }
 0x16c   : > { %v1974_v39 = vpop.permute.xlu0 %1973  ;;  %2697 = vst.msk [vmem:[%s3560_s17 + $0x70] sm:$0xf] %vm1208_vm5, %v1982_v45  ;;  %v839_v45 = vadd.f32 %v838_v33, %v837_v61  ;;  %v1919_v61 = vrot.slane %v1918_v35, 2  ;;  %v1126_v33 = vadd.f32 %v1125_v15, %v1124_v1  ;;  %v1778_v49 = vrot.slane %v1777_v37, 2 }
 0x16d   : > { %2693 = vst.msk [vmem:[%s3560_s17 + $0x60] sm:$0xf] %vm1208_vm5, %v1974_v39  ;;  %v1601_v39 = vrot.slane %v1600_v38, 4  ;;  %v1095_v48 = vadd.f32 %v1094_v6, %v1093_v56 }
 0x16e   : > { %v840_v57 = vrot.slane %v839_v45, 1  ;;  %v1920_v21 = vadd.f32 %v1919_v61, %v1918_v35 }
 0x16f   : > { %v1602_v55 = vadd.f32 %v1601_v39, %v1600_v38 }
 0x170   : > { %v1921_v30 = vrot.slane %v1920_v21, 1 }
 0x171   : > { %v1972_v59 = vpop.permute.xlu2 %1971  ;;  %v1603_v31 = vrot.slane %v1602_v55, 2 }
 0x172   : > { %2692 = vst.msk [vmem:[%s3560_s17 + $0x5c] sm:$0xf] %vm1208_vm5, %v1972_v59  ;;  %v4784_v59 = vld [vmem:[#allocation21_spill] sm:$0xff] }
 0x173   : > { %v1988_v9 = vpop.permute.xlu1 %1987  ;;  %v1885_v17 = vsel %vm677_vm2, %v4784_v59, 0.0  ;;  %v1604_v53 = vadd.f32 %v1603_v31, %v1602_v55 }
 0x174   : > { %v1980_v47 = vpop.permute.xlu0 %1979  ;;  %2700 = vst.msk [vmem:[%s3560_s17 + $0x7c] sm:$0xf] %vm1208_vm5, %v1988_v9  ;;  %v728_v9 = vadd.f32 %v727_v19, %v726_v60  ;;  %v1886_v22 = vrot.slane %v1885_v17, 4  ;;  %v841_v60 = vadd.f32 %v840_v57, %v839_v45 }
 0x175   : > { %2696 = vst.msk [vmem:[%s3560_s17 + $0x6c] sm:$0xf] %vm1208_vm5, %v1980_v47  ;;  %v1014_v47 = vadd.f32 %v1013_v25, %v1012_v7  ;;  %v984_v7 = vrot.slane %v983_v44, 1  ;;  %v1605_v39 = vrot.slane %v1604_v53, 1 }
 0x176   : > { %v729_v51 = vrot.slane %v728_v9, 1  ;;  %v1887_v24 = vadd.f32 %v1886_v22, %v1885_v17  ;;  %v4785_v17 = vld [vmem:[#allocation12_spill] sm:$0xff] }
 0x177   : > { %v1015_v36 = vrot.slane %v1014_v47, 1  ;;  %v985_v38 = vadd.f32 %v984_v7, %v983_v44 }
 0x178   : > { %v730_v0 = vadd.f32 %v729_v51, %v728_v9  ;;  %v1888_v28 = vrot.slane %v1887_v24, 2  ;;  %v1922_v9 = vadd.f32 %v1921_v30, %v1920_v21 }
 0x179   : > { %v1978_v13 = vpop.permute.xlu2 %1977  ;;  %v1016_v62 = vadd.f32 %v1015_v36, %v1014_v47  ;;  %v986_v52 = vadd.f32 %v985_v38, %v4785_v17 }
 0x17a   : > { %2695 = vst.msk [vmem:[%s3560_s17 + $0x68] sm:$0xf] %vm1208_vm5, %v1978_v13  ;;  %v1524_v13 = vrot.slane %v1523_v5, 2  ;;  %v842_v42 = vadd.f32 %v841_v60, %v730_v0  ;;  %v1889_v12 = vadd.f32 %v1888_v28, %v1887_v24 }
 0x17b   : > { %v2058_v23 = vpop.permute.xlu1 %2057  ;;  %v1096_v29 = vadd.f32 %v1095_v48, %v986_v52 }
 0x17c   : > { %v1986_v43 = vpop.permute.xlu0 %1985  ;;  %2719 = vst.msk [vmem:[%s3560_s17 + $0x48] sm:$0xf] %vm1305_vm6, %v2058_v23  ;;  %v1525_v4 = vadd.f32 %v1524_v13, %v1523_v5  ;;  %v1017_v25 = vadd.f32 %v1016_v62, %v842_v42  ;;  %v1779_v5 = vadd.f32 %v1778_v49, %v1777_v37  ;;  %v1606_v13 = vadd.f32 %v1605_v39, %v1604_v53 }
 0x17d   : > { %2699 = vst.msk [vmem:[%s3560_s17 + $0x78] sm:$0xf] %vm1208_vm5, %v1986_v43  ;;  %v1890_v1 = vrot.slane %v1889_v12, 1  ;;  %v1497_v55 = vadd.f32 %v1496_v2, %v1096_v29 }
 0x17e   : > { %v1526_v41 = vrot.slane %v1525_v4, 1  ;;  %v1127_v45 = vadd.f32 %v1126_v33, %v1017_v25  ;;  %v1780_v59 = vrot.slane %v1779_v5, 1 }
 0x17f   : > { %v1607_v44 = vadd.f32 %v1606_v13, %v1497_v55 }
 0x180   : > { %v1527_v19 = vadd.f32 %v1526_v41, %v1525_v4  ;;  %v1781_v57 = vadd.f32 %v1780_v59, %v1779_v5 }
 0x181   : > { %v1984_v11 = vpop.permute.xlu2 %1983 }
 0x182   : > { %2698 = vst.msk [vmem:[%s3560_s17 + $0x74] sm:$0xf] %vm1208_vm5, %v1984_v11  ;;  %v1528_v8 = vadd.f32 %v1527_v19, %v1127_v45 }
 0x183   : > { %v2064_v46 = vpop.permute.xlu1 %2063 }
 0x184   : > { %v2056_v54 = vpop.permute.xlu0 %2055  ;;  %2722 = vst.msk [vmem:[%s3560_s17 + $0x54] sm:$0xf] %vm1305_vm6, %v2064_v46 }
 0x185   : > { %2718 = vst.msk [vmem:[%s3560_s17 + $0x44] sm:$0xf] %vm1305_vm6, %v2056_v54  ;;  %v1811_v54 = vrot.slane %v1810_v32, 1 }
 0x187   : > { %v1812_v26 = vadd.f32 %v1811_v54, %v1810_v32 }
 0x189   : > { %v2054_v20 = vpop.permute.xlu2 %2053 }
 0x18a   : > { %2717 = vst.msk [vmem:[%s3560_s17 + $0x40] sm:$0xf] %vm1305_vm6, %v2054_v20  ;;  %v1637_v20 = vadd.f32 %v1636_v10, %v1635_v34 }
 0x18b   : > { %v2070_v23 = vpop.permute.xlu1 %2069 }
 0x18c   : > { %v2062_v43 = vpop.permute.xlu0 %2061  ;;  %2725 = vst.msk [vmem:[%s3560_s17 + $0x60] sm:$0xf] %vm1305_vm6, %v2070_v23  ;;  %v1638_v27 = vadd.f32 %v1637_v20, %v1528_v8  ;;  %v1891_v23 = vadd.f32 %v1890_v1, %v1889_v12 }
 0x18d   : > { %2721 = vst.msk [vmem:[%s3560_s17 + $0x50] sm:$0xf] %vm1305_vm6, %v2062_v43  ;;  %v1782_v43 = vadd.f32 %v1781_v57, %v1607_v44 }
 0x18e   : > { %v1813_v35 = vadd.f32 %v1812_v26, %v1638_v27 }
 0x18f   : > { %v1892_v63 = vadd.f32 %v1891_v23, %v1782_v43 }
 0x190   : > { %v1923_v22 = vadd.f32 %v1922_v9, %v1813_v35 }
 0x191   : > { %v2060_v11 = vpop.permute.xlu2 %2059  ;;  %2377 = vst.msk [vmem:[%s431_s28] sm:$0x1] %vm2376_vm8, %v1892_v63 }
 0x192   : > { %2720 = vst.msk [vmem:[%s3560_s17 + $0x4c] sm:$0xf] %vm1305_vm6, %v2060_v11 }
 0x193   : > { %v2076_v46 = vpop.permute.xlu1 %2075  ;;  %2378 = vst.msk [vmem:[%s431_s28 + $0x1] sm:$0x1] %vm2376_vm8, %v1923_v22 }
 0x194   : > { %v2068_v58 = vpop.permute.xlu0 %2067  ;;  %2728 = vst.msk [vmem:[%s3560_s17 + $0x6c] sm:$0xf] %vm1305_vm6, %v2076_v46 }
 0x195   : > { %2724 = vst.msk [vmem:[%s3560_s17 + $0x5c] sm:$0xf] %vm1305_vm6, %v2068_v58 }
 0x199   : > { %v2066_v16 = vpop.permute.xlu2 %2065 }
 0x19a   : > { %2723 = vst.msk [vmem:[%s3560_s17 + $0x58] sm:$0xf] %vm1305_vm6, %v2066_v16 }
 0x19b   : > { %v2082_v47 = vpop.permute.xlu1 %2081 }
 0x19c   : > { %v2074_v50 = vpop.permute.xlu0 %2073  ;;  %2731 = vst.msk [vmem:[%s3560_s17 + $0x78] sm:$0xf] %vm1305_vm6, %v2082_v47 }
 0x19d   : > { %2727 = vst.msk [vmem:[%s3560_s17 + $0x68] sm:$0xf] %vm1305_vm6, %v2074_v50 }
 0x1a1   : > { %v2072_v3 = vpop.permute.xlu2 %2071 }
 0x1a2   : > { %2726 = vst.msk [vmem:[%s3560_s17 + $0x64] sm:$0xf] %vm1305_vm6, %v2072_v3 }
 0x1a4   : > { %v2080_v51 = vpop.permute.xlu0 %2079 }
 0x1a5   : > { %2730 = vst.msk [vmem:[%s3560_s17 + $0x74] sm:$0xf] %vm1305_vm6, %v2080_v51 }
 0x1a9   : > { %v2078_v36 = vpop.permute.xlu2 %2077 }
 0x1aa   : > { %2729 = vst.msk [vmem:[%s3560_s17 + $0x70] sm:$0xf] %vm1305_vm6, %v2078_v36 }
 0x1af   : > { %v2401_v4 = vpop.permute.xlu1 %2400 }
 0x1b0   : > { %2403 = vst.msk [vmem:[%s431_s28 + $0x1] sm:$0x1] %vm2390_vm9, %v2401_v4 }
 0x1b1   : > { %v2084_v56 = vpop.permute.xlu2 %2083 }
 0x1b2   : > { %2732 = vst.msk [vmem:[%s3560_s17 + $0x7c] sm:$0xf] %vm1305_vm6, %v2084_v56 }
 0x1c3   : > { %v2388_v15 = vpop.permute.xlu0 %2387 }
 0x1c4   : > { %2391 = vst.msk [vmem:[%s431_s28] sm:$0x1] %vm2390_vm9, %v2388_v15 }
 0x1c5 PF: > { %s16_s22 = sadd.s32 1, %s2955_s22   ;;  %s4786_s18 = smov %s2947_s20 }
 0x1c6   : > { %p13_p12 = scmp.ge.s32.totalorder %s16_s22, 10   ;;  %s4787_s19 = smov %s2951_s21 }
 0x1c7   : > { %s4788_s20 = smov %s4791_s23  ;;  %s4789_s21 = smov %s4795_s24 }
 0x1c8   :  { %15 = sbr.rel (!%p13_p12) target bundleno = 3 (0x3), region = 91 }

// kernel: upblock_forward.7
= control target key start
LH: loop header
LB: loop body
LE: loop exit
PB: predicated region body
PF: predicated region fallthrough
CT: control target
= control target key end

     0   :  { %s2813_s24 = smov 0   ;;  %s2815_s25 = smov 0   ;;  %s3584_s0 = inlined_call_operand.vmem [shape: bf16[2,8,16,128], index: 0, kind: input, shape index: {}, may-alias: {0,1,2}]   ;;  %s3585_s1 = inlined_call_operand.vmem [shape: bf16[2,8,16,128], index: 1, kind: input, shape index: {}, may-alias: {0,1,2}]   ;;  %s3586_s2 = inlined_call_operand.vmem [shape: bf16[2,8,16,128], index: 2, kind: input, shape index: {}, may-alias: {0,1,2}]   ;;  %s3587_s3 = inlined_call_operand.vmem [shape: f32[1,128], index: 3, kind: input, shape index: {}]   ;;  %s3588_s4 = inlined_call_operand.vmem [shape: f32[1,128], index: 4, kind: input, shape index: {}]   ;;  %s3589_s5 = inlined_call_operand.vmem [shape: bf16[1152,128], index: 5, kind: input, shape index: {}]   ;;  %s3590_s6 = inlined_call_operand.vmem [shape: f32[1,128], index: 6, kind: input, shape index: {}]   ;;  %s3591_s7 = inlined_call_operand.vmem [shape: bf16[2,128,128], index: 7, kind: output, shape index: {}]  }
   0x1   :  { %s2817_s26 = smov 0   ;;  %s2819_s27 = smov 0  }
   0x2   :  { %s2821_s28 = smov 0  }
   0x3 LB: > { %s26_s29 = sadd.s32 1, %s2762_s26  ;;  %s29_s30 = sadd.s32 1, %s2766_s27  ;;  %s2770_s28 = sphi %s2821_s28, %s17_s28   ;;  %s2766_s27 = sphi %s2819_s27, %s3618_s27   ;;  %s2762_s26 = sphi %s2817_s26, %s3617_s26   ;;  %s2758_s25 = sphi %s2815_s25, %s3616_s25   ;;  %s2754_s24 = sphi %s2813_s24, %s3615_s24  }
   0x4   : > { %p27_p0 = scmp.ge.s32.totalorder %s26_s29, 2  ;;  %p2186_p1 = scmp.ge.s32.totalorder %s2770_s28, 1 }
   0x5   : > { %p323_p2 = scmp.lt.s32.totalorder %s2770_s28, 5 }
   0x6   : > { %s3620_s29 = smov (%p27_p0, %s26_s29), 0  ;;  %s3622_s30 = smov (!%p27_p0, %s29_s30), %s2766_s27 }
   0x7   : > { %p324_p3 = pnand %p2186_p1, %p323_p2  ;;  %p31_p4 = scmp.ge.s32.totalorder %s3622_s30, 2 }
   0x8   : > { %s2849_s10 = sshll.u32 (!%p324_p3), %s2754_s24, 2  ;;  %p391_p5 = scmp.lt.s32.totalorder (!%p324_p3), %s2758_s25, 1 }
   0x9   : > { %s3624_s30 = smov (%p31_p4, %s3622_s30), 0  ;;  %327 = sbr.rel (%p324_p3) target bundleno = 365 (0x16d), region = 48 }
   0xa   : > { %p393_p6 = scmp.lt.s32.totalorder (!%p324_p3), %s2849_s10, 7  ;;  %s2856_s13 = sadd.s32 (!%p324_p3), 4294967295, %s2849_s10 }
   0xb   : > { %p403_p7 = scmp.gt.s32.totalorder (!%p324_p3), %s2856_s13, 0  ;;  %p2193_p8 = scmp.lt.s32.totalorder (!%p324_p3), %s2856_s13, 7 }
   0xc   : > { %p450_p9 = scmp.ge.s32.totalorder (!%p324_p3), %s2849_s10, 1  ;;  %s3347_s19 = sadd.s32 (!%p324_p3), 4, %s2849_s10 }
   0xd   : > { %p420_p10 = scmp.lt.s32.totalorder (!%p324_p3), %s3347_s19, 7  ;;  %p506_p11 = scmp.le.s32.totalorder (!%p324_p3), %s3347_s19, 7 }
   0xe   : > { %v2525_v0 = vld [vmem:[%s3589_s5 + $0x38] sm:$0xff]  ;;  %v518_v1 = vlaneseq  ;;  %v2524_v3 = vld [vmem:[%s3589_s5 + $0x30] sm:$0xff]  ;;  %s3626_s25 = smov (!%p391_p5, %s2758_s25), 1  ;;  %v2523_v8 = vld [vmem:[%s3589_s5 + $0x28] sm:$0xff]  ;;  %vm640_vm0 = vcmask 1040384   ;;  %v2772_v36 = vmov 0.0  }
   0xf   : > { %v2541_v2 = vld [vmem:[%s3589_s5 + $0xb8] sm:$0xff]  ;;  %2640 = vmatpush.bf16.msra.mxu1 %v2525_v0  ;;  %1604 = vmatpush.bf16.msra.mxu0 %v2525_v0  ;;  %v2540_v4 = vld [vmem:[%s3589_s5 + $0xb0] sm:$0xff]  ;;  %s394_s20 = scalar_select %p393_p6, %s2849_s10, 7  ;;  %v2539_v9 = vld [vmem:[%s3589_s5 + $0xa8] sm:$0xff]  ;;  %v2945_v37 = vrot.slane %v2772_v36, 7  ;;  %vm682_vm2 = vcmask 1046528  }
  0x10   : > { %1662 = vmatpush.bf16.msra.mxu2 %v2541_v2  ;;  %v2549_v5 = vld [vmem:[%s3589_s5 + $0xf8] sm:$0xff]  ;;  %v2868_v6 = vshrl.u32 %v518_v1, 7  ;;  %s2870_s21 = sshll.u32 %s3626_s25, 4  ;;  %v2548_v7 = vld [vmem:[%s3589_s5 + $0xf0] sm:$0xff]  ;;  %v2893_v11 = vld [vmem:[%s3587_s3] ss:$0 sm:$0xff] }
  0x11   : > { %1691 = vmatpush.bf16.msra.mxu3 %v2549_v5  ;;  %s2188_s8 = sshll.u32 %s394_s20, 1  ;;  %v2547_v12 = vld [vmem:[%s3589_s5 + $0xe8] sm:$0xff]  ;;  %v2522_v15 = vld [vmem:[%s3589_s5 + $0x20] sm:$0xff]  ;;  %v2521_v32 = vld [vmem:[%s3589_s5 + $0x18] sm:$0xff]  ;;  %s2208_s9 = sshll.u32 %s2754_s24, 3 }
  0x12   : > { %s397_s12 = sadd.s32 %s2870_s21, %s2188_s8  ;;  %v523_v10 = vadd.s32 32, %v2868_v6  ;;  %v2910_v16 = vld [vmem:[%s3588_s4] ss:$0 sm:$0xff]  ;;  %v520_v26 = vadd.s32 8, %v2868_v6  ;;  %v525_v31 = vadd.s32 48, %v2868_v6  ;;  %v2537_v38 = vld [vmem:[%s3589_s5 + $0x98] sm:$0xff] }
  0x13   : > { %2641 = vmatpush.bf16.msra.mxu1 %v2524_v3  ;;  %1605 = vmatpush.bf16.msra.mxu0 %v2524_v3  ;;  %s2190_s15 = sshll.u32 %s397_s12, 2  ;;  %v2538_v20 = vld [vmem:[%s3589_s5 + $0xa0] sm:$0xff]  ;;  %v531_v40 = vand.u32 15, %v2868_v6  ;;  %v2545_v49 = vld [vmem:[%s3589_s5 + $0xd8] sm:$0xff]  ;;  %v2520_v53 = vld [vmem:[%s3589_s5 + $0x10] sm:$0xff]  ;;  %p3484_p12 = scmp.lt.s32.totalorder %s2208_s9, 15 }
  0x14   : > { %1663 = vmatpush.bf16.msra.mxu2 %v2540_v4  ;;  %s2888_s18 = scalar_lea.vmem %s3584_s0, %s2190_s15  ;;  %v559_v21 = vand.u32 15, %v523_v10  ;;  %v2546_v28 = vld [vmem:[%s3589_s5 + $0xe0] sm:$0xff]  ;;  %v538_v46 = vand.u32 15, %v520_v26  ;;  %v573_v52 = vand.u32 15, %v525_v31  ;;  %v2536_v58 = vld [vmem:[%s3589_s5 + $0x90] sm:$0xff]  ;;  %v2581_v2 = vld [vmem:[%s3589_s5 + $0x1f8] sm:$0xff] }
  0x15   : > { %1692 = vmatpush.bf16.msra.mxu3 %v2548_v7  ;;  %v2595_v13 = vld [vmem:[%s2888_s18] sm:$0xff]   ;;  %v2634_v14 = vld [vmem:[%s2888_s18 + $0x8] sm:$0xff]   ;;  %s404_s8 = scalar_select %p403_p7, %s2856_s13, 0  ;;  %v2635_v27 = vld [vmem:[%s2888_s18 + $0x10] sm:$0xff]   ;;  %vm2999_vm4 = vcmp.ge.s32.totalorder %v531_v40, 1 }
  0x16   : > { %v2597_v17 = vunpack.c.h.bf16 %v2595_v13  ;;  %v2600_v18 = vunpack.c.l.bf16 %v2634_v14  ;;  %v2601_v19 = vunpack.c.h.bf16 %v2634_v14  ;;  %v2596_v22 = vunpack.c.l.bf16 %v2595_v13  ;;  %s2922_s16 = scalar_select %p450_p9, 1, 0  ;;  %v2544_v5 = vld [vmem:[%s3589_s5 + $0xd0] sm:$0xff]  ;;  %v2535_v14 = vld [vmem:[%s3589_s5 + $0x88] sm:$0xff]  ;;  %v2533_v40 = vld [vmem:[%s3589_s5 + $0x78] sm:$0xff] }
  0x17   : > { %2642 = vmatpush.bf16.msra.mxu1 %v2523_v8  ;;  %1606 = vmatpush.bf16.msra.mxu0 %v2523_v8  ;;  %s3628_s8 = smov (!%p2193_p8, %s404_s8), 7  ;;  %v2604_v30 = vunpack.c.l.bf16 %v2635_v27  ;;  %vm2950_vm1 = vcmp.ge.s32.totalorder %v559_v21, 1  ;;  %v2605_v41 = vunpack.c.h.bf16 %v2635_v27  ;;  %vm3003_vm5 = vcmp.le.s32.totalorder %v538_v46, 14  ;;  %v2519_v8 = vld [vmem:[%s3589_s5 + $0x8] sm:$0xff]  ;;  %v2586_v3 = vld [vmem:[%s3589_s5 + $0x220] sm:$0xff]  ;;  %s3632_s9 = smov (!%p3484_p12, %s2208_s9), 15 }
  0x18   : > { %1664 = vmatpush.bf16.msra.mxu2 %v2539_v9  ;;  %v473_v23 = vmul.f32 %v2893_v11, %v2597_v17  ;;  %v481_v24 = vmul.f32 %v2893_v11, %v2600_v18  ;;  %v482_v25 = vmul.f32 %v2893_v11, %v2601_v19  ;;  %s2198_s13 = sshll.u32 %s3628_s8, 1  ;;  %v472_v29 = vmul.f32 %v2893_v11, %v2596_v22  ;;  %s441_s24 = sadd.s32 %s2870_s21, %s3632_s9 }
  0x19   : > { %1693 = vmatpush.bf16.msra.mxu3 %v2547_v12  ;;  %s411_s23 = sadd.s32 %s2198_s13, %s2870_s21  ;;  %v490_v42 = vmul.f32 %v2893_v11, %v2604_v30  ;;  %v464_v48 = vstv %s2922_s16  ;;  %v491_v60 = vmul.f32 %v2893_v11, %v2605_v41  ;;  %vm3010_vm6 = vcmp.ge.s32.totalorder %v573_v52, 1  ;;  %v2534_v41 = vld [vmem:[%s3589_s5 + $0x80] sm:$0xff] }
  0x1a   : > { %v2935_v33 = vadd.f32 %v2910_v16, %v473_v23  ;;  %v2938_v34 = vadd.f32 %v2910_v16, %v481_v24  ;;  %v2941_v35 = vadd.f32 %v2910_v16, %v482_v25  ;;  %s2200_s11 = sshll.u32 %s411_s23, 2  ;;  %v2969_v50 = vadd.f32 %v2910_v16, %v472_v29  ;;  %v2518_v29 = vld [vmem:[%s3589_s5] sm:$0xff] }
  0x1b   : > { %2643 = vmatpush.bf16.msra.mxu1 %v2522_v15  ;;  %1607 = vmatpush.bf16.msra.mxu0 %v2522_v15  ;;  %s413_s14 = scalar_lea.vmem %s3585_s1, %s2200_s11  ;;  %v2972_v51 = vadd.f32 %v2910_v16, %v490_v42  ;;  %vm2995_vm3 = vcmp.eq.s32.totalorder %v464_v48, 1  ;;  %v521_v13 = vadd.s32 16, %v2868_v6  ;;  %v3026_v17 = vadd.f32 %v2910_v16, %v491_v60  ;;  %v2542_v60 = vld [vmem:[%s3589_s5 + $0xc0] sm:$0xff] }
  0x1c   : > { %1665 = vmatpush.bf16.msra.mxu2 %v2538_v20  ;;  %v648_v43 = vrot.slane %v2935_v33, 7  ;;  %v2958_v44 = vrot.slane %v2938_v34, 7  ;;  %v652_v45 = vrot.slane %v2941_v35, 7  ;;  %v2591_v47 = vld [vmem:[%s413_s14] sm:$0xff]   ;;  %v2991_v61 = vrot.slane %v2969_v50, 7  ;;  %s421_s12 = scalar_select %p420_p10, %s3347_s19, 7 }
  0x1d   : > { %1694 = vmatpush.bf16.msra.mxu3 %v2546_v28  ;;  %v2592_v56 = vunpack.c.l.bf16 %v2591_v47  ;;  %v2593_v57 = vunpack.c.h.bf16 %v2591_v47  ;;  %v654_v12 = vrot.slane %v2972_v51, 7  ;;  %v686_v15 = vrot.slane %v2969_v50, 1  ;;  %v2543_v28 = vld [vmem:[%s3589_s5 + $0xc8] sm:$0xff]  ;;  %s513_s23 = scalar_select %p506_p11, 1, 0 }
  0x1e   : > { %v2979_v54 = vsel %vm640_vm0, %v648_v43, %v2958_v44  ;;  %v653_v55 = vsel %vm640_vm0, %v2958_v44, %v652_v45  ;;  %v649_v18 = vsel %vm640_vm0, %v2991_v61, %v648_v43  ;;  %v742_v19 = vsel %vm640_vm0, %v2945_v37, %v2991_v61  ;;  %s3630_s12 = smov (!%p420_p10, %s421_s12), 7 }
  0x1f   : > { %2644 = vmatpush.bf16.msra.mxu1 %v2521_v32  ;;  %1608 = vmatpush.bf16.msra.mxu0 %v2521_v32  ;;  %v670_v59 = vsel %vm2950_vm1, %v2979_v54, 0.0  ;;  %v721_v63 = vpack.c.bf16 %v653_v55, %v653_v55  ;;  %v456_v0 = vmul.f32 %v2893_v11, %v2592_v56  ;;  %v457_v1 = vmul.f32 %v2893_v11, %v2593_v57  ;;  %v2573_v55 = vld [vmem:[%s3589_s5 + $0x1b8] sm:$0xff]  ;;  %s2205_s15 = sshll.u32 %s3630_s12, 1  ;;  %s2210_s12 = sshll.u32 %s441_s24, 2 }
  0x20   : > { %1666 = vmatpush.bf16.msra.mxu2 %v2537_v38  ;;  %v720_v62 = vpack.c.bf16 %v670_v59, %v670_v59  ;;  %v3056_v30 = vsel %vm640_vm0, %v652_v45, %v654_v12  ;;  %v545_v31 = vand.u32 15, %v521_v13  ;;  %v719_v32 = vpack.c.bf16 %v649_v18, %v649_v18  ;;  %s428_s16 = sadd.s32 %s2205_s15, %s2870_s21  ;;  %s3522_s14 = scalar_lea.vmem %s3591_s7, %s2210_s12 }
  0x21   : > { %1695 = vmatpush.bf16.msra.mxu3 %v2545_v49  ;;  %v461_v9 = vadd.f32 %v2910_v16, %v456_v0  ;;  %v462_v10 = vadd.f32 %v2910_v16, %v457_v1  ;;  %v3033_v21 = vunpack.c.l.b16 %v721_v63  ;;  %v750_v38 = vsel %vm2999_vm4, %v742_v19, 0.0  ;;  %v2557_v49 = vld [vmem:[%s3589_s5 + $0x138] sm:$0xff]  ;;  %s2207_s20 = sshll.u32 %s428_s16, 2 }
  0x22   : > { %v856_v20 = vunpack.c.l.b16 %v720_v62  ;;  %v656_v59 = vrot.slane %v3026_v17, 7  ;;  %v3088_v0 = vunpack.c.l.b16 %v719_v32  ;;  %v774_v1 = vpack.c.bf16 %v750_v38, %v750_v38  ;;  %s430_s22 = scalar_lea.vmem %s3586_s2, %s2207_s20 }
  0x23   : > { %2645 = vmatpush.bf16.msra.mxu1 %v2520_v53  ;;  %1609 = vmatpush.bf16.msra.mxu0 %v2520_v53  ;;  %v3037_v22 = vsel %vm2995_vm3, %v461_v9, 0.0  ;;  %v3041_v23 = vsel %vm2995_vm3, %v462_v10, 0.0  ;;  %vm3096_vm7 = vcmp.ge.s32.totalorder %v545_v31, 1  ;;  %v522_v13 = vadd.s32 24, %v2868_v6  ;;  %v2572_v31 = vld [vmem:[%s3589_s5 + $0x1b0] sm:$0xff] }
  0x24   : > { %1667 = vmatpush.bf16.msra.mxu2 %v2536_v58  ;;  %v642_v24 = vrot.slane %v3037_v22, 7  ;;  %v644_v25 = vrot.slane %v3041_v23, 7  ;;  %v683_v26 = vrot.slane %v3037_v22, 1  ;;  %v684_v27 = vrot.slane %v3041_v23, 1  ;;  %v2584_v10 = vld [vmem:[%s3589_s5 + $0x210] sm:$0xff] }
  0x25   : > { %1696 = vmatpush.bf16.msra.mxu3 %v2544_v5  ;;  %v862_v56 = vpack.c.b16 %v3033_v21, %v856_v20  ;;  %v2532_v5 = vld [vmem:[%s3589_s5 + $0x70] sm:$0xff]  ;;  %v672_v18 = vsel %vm3010_vm6, %v3056_v30, 0.0  ;;  %v924_v19 = vunpack.c.l.b16 %v774_v1  ;;  %v688_v20 = vrot.slane %v2935_v33, 1 }
  0x26   : > { %v643_v42 = vsel %vm640_vm0, %v2945_v37, %v642_v24  ;;  %v645_v43 = vsel %vm640_vm0, %v642_v24, %v644_v25  ;;  %v685_v45 = vsel %vm682_vm2, %v683_v26, %v684_v27  ;;  %v687_v46 = vsel %vm682_vm2, %v684_v27, %v686_v15 }
  0x27   : > { %2646 = vmatpush.bf16.msra.mxu1 %v2519_v8  ;;  %1610 = vmatpush.bf16.msra.mxu0 %v2519_v8  ;;  %v666_v47 = vsel %vm2999_vm4, %v643_v42, 0.0  ;;  %v717_v48 = vpack.c.bf16 %v645_v43, %v645_v43  ;;  %v709_v52 = vsel %vm3003_vm5, %v687_v46, 0.0  ;;  %v732_v53 = vpack.c.bf16 %v685_v45, %v685_v45  ;;  %v2555_v43 = vld [vmem:[%s3589_s5 + $0x128] sm:$0xff] }
  0x28   : > { %1668 = vmatpush.bf16.msra.mxu2 %v2535_v14  ;;  %v716_v57 = vpack.c.bf16 %v666_v47, %v666_v47  ;;  %v733_v58 = vpack.c.bf16 %v709_v52, %v709_v52  ;;  %v2556_v14 = vld [vmem:[%s3589_s5 + $0x130] sm:$0xff]  ;;  %v690_v24 = vrot.slane %v2938_v34, 1  ;;  %v657_v32 = vsel %vm640_vm0, %v654_v12, %v656_v59  ;;  %v2571_v52 = vld [vmem:[%s3589_s5 + $0x1a8] sm:$0xff] }
  0x29   : > { %1697 = vmatpush.bf16.msra.mxu3 %v2543_v28  ;;  %v853_v62 = vunpack.c.l.b16 %v717_v48  ;;  %v900_v63 = vunpack.c.l.b16 %v732_v53  ;;  %v647_v28 = vsel %vm640_vm0, %v644_v25, %v2991_v61  ;;  %v932_v38 = vpack.c.b16 %v3088_v0, %v924_v19  ;;  %v2531_v25 = vld [vmem:[%s3589_s5 + $0x68] sm:$0xff] }
  0x2a   : > { %v852_v8 = vunpack.c.l.b16 %v716_v57  ;;  %v901_v9 = vunpack.c.l.b16 %v733_v58  ;;  %v691_v61 = vsel %vm682_vm2, %v688_v20, %v690_v24  ;;  %v668_v45 = vsel %vm3096_vm7, %v647_v28, 0.0  ;;  %v2579_v57 = vld [vmem:[%s3589_s5 + $0x1e8] sm:$0xff]  ;;  %v2530_v58 = vld [vmem:[%s3589_s5 + $0x60] sm:$0xff] }
  0x2b   : > { %2647 = vmatpush.bf16.msra.mxu1 %v2518_v29  ;;  %1611 = vmatpush.bf16.msra.mxu0 %v2518_v29  ;;  %v552_v29 = vand.u32 15, %v522_v13  ;;  %v767_v42 = vsel %vm3003_vm5, %v691_v61, 0.0  ;;  %v722_v47 = vpack.c.bf16 %v672_v18, %v672_v18  ;;  %v723_v48 = vpack.c.bf16 %v657_v32, %v657_v32  ;;  %v2529_v13 = vld [vmem:[%s3589_s5 + $0x58] sm:$0xff] }
  0x2c   : > { %1669 = vmatpush.bf16.msra.mxu2 %v2534_v41  ;;  %v860_v26 = vpack.c.b16 %v853_v62, %v852_v8  ;;  %v908_v27 = vpack.c.b16 %v901_v9, %v900_v63  ;;  %v785_v46 = vpack.c.bf16 %v767_v42, %v767_v42  ;;  %v2554_v62 = vld [vmem:[%s3589_s5 + $0x120] sm:$0xff]  ;;  %v524_v9 = vadd.s32 40, %v2868_v6  ;;  %v2553_v18 = vld [vmem:[%s3589_s5 + $0x118] sm:$0xff]  ;;  %v2527_v42 = vld [vmem:[%s3589_s5 + $0x48] sm:$0xff] }
  0x2d   : > { %1698 = vmatpush.bf16.msra.mxu3 %v2542_v60  ;;  %vm3129_vm8 = vcmp.le.s32.totalorder %v552_v29, 14  ;;  %v718_v60 = vpack.c.bf16 %v668_v45, %v668_v45  ;;  %v858_v1 = vunpack.c.l.b16 %v722_v47  ;;  %v2570_v8 = vld [vmem:[%s3589_s5 + $0x1a0] sm:$0xff]  ;;  %v692_v28 = vrot.slane %v2941_v35, 1 }
  0x2e   : > { %1622 = vmatmul.bf16.vlgmr.msra.gmra.mxu1 %v862_v56  ;;  %1612 = vmatmul.bf16.vlgmr.msra.gmra.mxu0 %v860_v26  ;;  %v752_v56 = vsel %vm3096_vm7, %v2979_v54, 0.0  ;;  %v694_v29 = vrot.slane %v2972_v51, 1  ;;  %v724_v45 = vpack.c.bf16 %v3037_v22, %v3037_v22  ;;  %v754_v22 = vsel %vm2950_vm1, %v3056_v30, 0.0 }
  0x2f   : > { %1633 = vmatpush.bf16.msrb.mxu1 %v2533_v40  ;;  %1720 = vmatpush.bf16.msrb.mxu0 %v2557_v49  ;;  %v689_v40 = vsel %vm682_vm2, %v686_v15, %v688_v20  ;;  %v2580_v15 = vld [vmem:[%s3589_s5 + $0x1f0] sm:$0xff]  ;;  %v711_v49 = vsel %vm3129_vm8, %v691_v61, 0.0  ;;  %v693_v47 = vsel %vm682_vm2, %v690_v24, %v692_v28  ;;  %v2526_v24 = vld [vmem:[%s3589_s5 + $0x40] sm:$0xff] }
  0x30   : > { %1778 = vmatpush.bf16.msrb.mxu2 %v2573_v55  ;;  %v734_v12 = vpack.c.bf16 %v689_v40, %v689_v40  ;;  %1699 = vmatmul.bf16.vlgmr.msra.gmra.mxu3 %v932_v38  ;;  %v3150_v55 = vunpack.c.l.b16 %v785_v46  ;;  %v735_v63 = vpack.c.bf16 %v711_v49, %v711_v49  ;;  %v2552_v40 = vld [vmem:[%s3589_s5 + $0x110] sm:$0xff]  ;;  %v725_v46 = vpack.c.bf16 %v3041_v23, %v3041_v23  ;;  %v2577_v23 = vld [vmem:[%s3589_s5 + $0x1d8] sm:$0xff] }
  0x31   : > { %1807 = vmatpush.bf16.msrb.mxu3 %v2581_v2  ;;  %1670 = vmatmul.bf16.vlgmr.msra.gmra.mxu2 %v908_v27  ;;  %v3166_v2 = vunpack.c.l.b16 %v723_v48  ;;  %v566_v27 = vand.u32 15, %v524_v9  ;;  %v2568_v49 = vld [vmem:[%s3589_s5 + $0x190] sm:$0xff] }
  0x32   : > { %v3148_v53 = vunpack.c.l.b16 %v734_v12  ;;  %v903_v19 = vunpack.c.l.b16 %v735_v63  ;;  %v736_v63 = vpack.c.bf16 %v693_v47, %v693_v47  ;;  %v877_v9 = vunpack.c.l.b16 %v725_v46  ;;  %v2563_v46 = vld [vmem:[%s3589_s5 + $0x168] sm:$0xff] }
  0x33   : > { %1634 = vmatpush.bf16.msrb.mxu1 %v2532_v5  ;;  %1721 = vmatpush.bf16.msrb.mxu0 %v2556_v14  ;;  %v776_v5 = vpack.c.bf16 %v752_v56, %v752_v56  ;;  %v854_v14 = vunpack.c.l.b16 %v718_v60  ;;  %v863_v20 = vpack.c.b16 %v3166_v2, %v858_v1  ;;  %vm3193_vm9 = vcmp.le.s32.totalorder %v566_v27, 14  ;;  %v2565_v60 = vld [vmem:[%s3589_s5 + $0x178] sm:$0xff]  ;;  %v2567_v47 = vld [vmem:[%s3589_s5 + $0x188] sm:$0xff] }
  0x34   : > { %1779 = vmatpush.bf16.msrb.mxu2 %v2572_v31  ;;  %v962_v54 = vpack.c.b16 %v3150_v55, %v3148_v53  ;;  %v2528_v31 = vld [vmem:[%s3589_s5 + $0x50] sm:$0xff]  ;;  %v909_v38 = vpack.c.b16 %v903_v19, %v3148_v53  ;;  %v726_v56 = vpack.c.bf16 %v2969_v50, %v2969_v50  ;;  %v3253_v27 = vunpack.c.l.b16 %v736_v63 }
  0x35   : > { %1808 = vmatpush.bf16.msrb.mxu3 %v2580_v15  ;;  %v926_v26 = vunpack.c.l.b16 %v776_v5  ;;  %v861_v32 = vpack.c.b16 %v3088_v0, %v854_v14  ;;  %v3200_v0 = vsel %vm682_vm2, %v692_v28, %v694_v29  ;;  %v2578_v15 = vld [vmem:[%s3589_s5 + $0x1e0] sm:$0xff]  ;;  %v526_v14 = vadd.s32 56, %v2868_v6 }
  0x36   : > { %v713_v48 = vsel %vm3193_vm9, %v3200_v0, 0.0  ;;  %v878_v19 = vunpack.c.l.b16 %v726_v56  ;;  %v2576_v56 = vld [vmem:[%s3589_s5 + $0x1d0] sm:$0xff] }
  0x37   : > { %1635 = vmatpush.bf16.msrb.mxu1 %v2531_v25  ;;  %1722 = vmatpush.bf16.msrb.mxu0 %v2555_v43  ;;  %v933_v61 = vpack.c.b16 %v3033_v21, %v926_v26  ;;  %v2569_v25 = vld [vmem:[%s3589_s5 + $0x198] sm:$0xff]  ;;  %v2551_v43 = vld [vmem:[%s3589_s5 + $0x108] sm:$0xff]  ;;  %v737_v1 = vpack.c.bf16 %v713_v48, %v713_v48 }
  0x38   : > { %1780 = vmatpush.bf16.msrb.mxu2 %v2571_v52  ;;  %v2636_v52 = vld [vmem:[%s2888_s18 + $0x18] sm:$0xff]  }
  0x39   : > { %1809 = vmatpush.bf16.msrb.mxu3 %v2579_v57  ;;  %v727_v57 = vpack.c.bf16 %v2935_v33, %v2935_v33  ;;  %v2609_v5 = vunpack.c.h.bf16 %v2636_v52  ;;  %v2589_v33 = vld [vmem:[%s3589_s5 + $0x238] sm:$0xff]  ;;  %v905_v28 = vunpack.c.l.b16 %v737_v1 }
  0x3b   : > { %1636 = vmatpush.bf16.msrb.mxu1 %v2530_v58  ;;  %1723 = vmatpush.bf16.msrb.mxu0 %v2554_v62  ;;  %v2608_v58 = vunpack.c.l.bf16 %v2636_v52  ;;  %v2550_v62 = vld [vmem:[%s3589_s5 + $0x100] sm:$0xff]  ;;  %v794_v52 = vsel %vm640_vm0, %v2945_v37, %v2958_v44 }
  0x3c   : > { %1781 = vmatpush.bf16.msrb.mxu2 %v2570_v8  ;;  %v876_v8 = vunpack.c.l.b16 %v724_v45  ;;  %v910_v45 = vpack.c.b16 %v905_v28, %v3253_v27  ;;  %v2562_v37 = vld [vmem:[%s3589_s5 + $0x160] sm:$0xff]  ;;  %v2560_v28 = vld [vmem:[%s3589_s5 + $0x150] sm:$0xff] }
  0x3d   : > { %1810 = vmatpush.bf16.msrb.mxu3 %v2578_v15  ;;  %v499_v50 = vmul.f32 %v2893_v11, %v2608_v58  ;;  %v802_v58 = vsel %vm2999_vm4, %v794_v52, 0.0  ;;  %v2583_v52 = vld [vmem:[%s3589_s5 + $0x208] sm:$0xff] }
  0x3e   : > { %1627 = vmatmul.bf16.gmra.mxu1 %v863_v20  ;;  %1617 = vmatmul.bf16.gmra.mxu0 %v861_v32  ;;  %v879_v20 = vunpack.c.l.b16 %v727_v57  ;;  %v884_v32 = vpack.c.b16 %v877_v9, %v876_v8  ;;  %v2587_v57 = vld [vmem:[%s3589_s5 + $0x228] sm:$0xff]  ;;  %v826_v44 = vpack.c.bf16 %v802_v58, %v802_v58  ;;  %v729_v8 = vpack.c.bf16 %v2941_v35, %v2941_v35  ;;  %v2582_v58 = vld [vmem:[%s3589_s5 + $0x200] sm:$0xff] }
  0x3f   : > { %1637 = vmatpush.bf16.msrb.mxu1 %v2529_v13  ;;  %1724 = vmatpush.bf16.msrb.mxu0 %v2553_v18  ;;  %v778_v13 = vpack.c.bf16 %v754_v22, %v754_v22  ;;  %v500_v18 = vmul.f32 %v2893_v11, %v2609_v5  ;;  %v3251_v26 = vadd.f32 %v2910_v16, %v499_v50  ;;  %v2566_v22 = vld [vmem:[%s3589_s5 + $0x180] sm:$0xff]  ;;  %v2561_v50 = vld [vmem:[%s3589_s5 + $0x158] sm:$0xff] }
  0x40   : > { %1704 = vmatmul.bf16.gmra.mxu3 %v933_v61  ;;  %1782 = vmatpush.bf16.msrb.mxu2 %v2569_v25  ;;  %v3262_v61 = vrot.slane %v3026_v17, 1  ;;  %v3265_v25 = vrot.slane %v2772_v36, 1  ;;  %v885_v15 = vpack.c.b16 %v879_v20, %v878_v19  ;;  %v3324_v1 = vunpack.c.l.b16 %v826_v44 }
  0x41   : > { %1675 = vmatmul.bf16.gmra.mxu2 %v909_v38  ;;  %1811 = vmatpush.bf16.msrb.mxu3 %v2577_v23  ;;  %v928_v6 = vunpack.c.l.b16 %v778_v13  ;;  %v2588_v38 = vld [vmem:[%s3589_s5 + $0x230] sm:$0xff]  ;;  %v728_v5 = vpack.c.bf16 %v2938_v34, %v2938_v34  ;;  %v881_v20 = vunpack.c.l.b16 %v729_v8  ;;  %v769_v44 = vsel %vm3129_vm8, %v3200_v0, 0.0 }
  0x43   : > { %1638 = vmatpush.bf16.msrb.mxu1 %v2528_v31  ;;  %1725 = vmatpush.bf16.msrb.mxu0 %v2552_v40  ;;  %v2564_v31 = vld [vmem:[%s3589_s5 + $0x170] sm:$0xff]  ;;  %v580_v40 = vand.u32 15, %v526_v14  ;;  %v934_v36 = vpack.c.b16 %v3166_v2, %v928_v6  ;;  %v986_v14 = vpack.c.b16 %v3033_v21, %v3324_v1  ;;  %v880_v34 = vunpack.c.l.b16 %v728_v5 }
  0x44   : > { %1783 = vmatpush.bf16.msrb.mxu2 %v2568_v49  ;;  %v699_v49 = vsel %vm682_vm2, %v3262_v61, %v3265_v25 }
  0x45   : > { %vm3279_vm10 = vcmp.le.s32.totalorder %v580_v40, 14  ;;  %1812 = vmatpush.bf16.msrb.mxu3 %v2576_v56  ;;  %v886_v21 = vpack.c.b16 %v881_v20, %v880_v34  ;;  %v2559_v40 = vld [vmem:[%s3589_s5 + $0x148] sm:$0xff]  ;;  %v819_v56 = vsel %vm3003_vm5, %v3200_v0, 0.0  ;;  %v2611_v0 = vld [vmem:[%s430_s22] sm:$0xff]  }
  0x46   : > { %v2612_v8 = vunpack.c.l.bf16 %v2611_v0 }
  0x47   : > { %1639 = vmatpush.bf16.msrb.mxu1 %v2527_v42  ;;  %1726 = vmatpush.bf16.msrb.mxu0 %v2551_v43  ;;  %v3268_v42 = vadd.f32 %v2910_v16, %v500_v18  ;;  %v743_v43 = vrot.slane %v3251_v26, 7 }
  0x48   : > { %1784 = vmatpush.bf16.msrb.mxu2 %v2567_v47  ;;  %v2558_v47 = vld [vmem:[%s3589_s5 + $0x140] sm:$0xff] }
  0x49   : > { %v745_v23 = vrot.slane %v3268_v42, 7 }
  0x4b   : > { %1640 = vmatpush.bf16.msrb.mxu1 %v2526_v24  ;;  %1727 = vmatpush.bf16.msrb.mxu0 %v2550_v62  ;;  %v3296_v24 = vsel %vm640_vm0, %v656_v59, %v743_v43  ;;  %v697_v59 = vsel %vm682_vm2, %v694_v29, %v3262_v61  ;;  %v746_v62 = vsel %vm640_vm0, %v743_v43, %v745_v23  ;;  %v2575_v29 = vld [vmem:[%s3589_s5 + $0x1c8] sm:$0xff]  ;;  %v2574_v43 = vld [vmem:[%s3589_s5 + $0x1c0] sm:$0xff] }
  0x4c   : > { %1785 = vmatpush.bf16.msrb.mxu2 %v2566_v22  ;;  %v756_v63 = vsel %vm3010_vm6, %v3296_v24, 0.0  ;;  %v738_v9 = vpack.c.bf16 %v697_v59, %v697_v59  ;;  %v781_v19 = vpack.c.bf16 %v746_v62, %v746_v62  ;;  %1813 = vmatpush.bf16.msrb.mxu3 %v2575_v29  ;;  %v787_v59 = vpack.c.bf16 %v769_v44, %v769_v44 }
  0x4d   : > { %v780_v18 = vpack.c.bf16 %v756_v63, %v756_v63 }
  0x4e   : > { %1641 = vmatmul.bf16.vlgmr.msrb.gmra.mxu1 %v884_v32  ;;  %1728 = vmatmul.bf16.vlgmr.msrb.gmra.mxu0 %v885_v15  ;;  %v3338_v35 = vunpack.c.l.b16 %v738_v9  ;;  %v3343_v32 = vunpack.c.l.b16 %v781_v19  ;;  %v957_v62 = vunpack.c.l.b16 %v787_v59  ;;  %v2613_v9 = vunpack.c.h.bf16 %v2611_v0 }
  0x4f   : > { %1749 = vmatpush.bf16.msra.mxu1 %v2565_v60  ;;  %1836 = vmatpush.bf16.msra.mxu0 %v2589_v33  ;;  %v715_v60 = vsel %vm3279_vm10, %v699_v49, 0.0  ;;  %v731_v49 = vpack.c.bf16 %v3026_v17, %v3026_v17  ;;  %v837_v17 = vpack.c.bf16 %v819_v56, %v819_v56 }
  0x50   : > { %1709 = vmatmul.bf16.gmra.mxu3 %v934_v36  ;;  %2648 = vmatpush.bf16.msra.mxu2 %v2589_v33  ;;  %v739_v13 = vpack.c.bf16 %v715_v60, %v715_v60  ;;  %v730_v36 = vpack.c.bf16 %v2972_v51, %v2972_v51  ;;  %v782_v60 = vpack.c.bf16 %v3251_v26, %v3251_v26 }
  0x51   : > { %1680 = vmatmul.bf16.gmra.mxu2 %v910_v45  ;;  %v804_v45 = vsel %vm3096_vm7, %v3056_v30, 0.0  ;;  %1814 = vmatpush.bf16.msrb.mxu3 %v2574_v43  ;;  %v963_v63 = vpack.c.b16 %v957_v62, %v3253_v27 }
  0x52   : > { %v907_v33 = vunpack.c.l.b16 %v739_v13  ;;  %v882_v51 = vunpack.c.l.b16 %v730_v36  ;;  %v942_v1 = vunpack.c.l.b16 %v782_v60  ;;  %v509_v13 = vmul.f32 %v2893_v11, %v2612_v8 }
  0x53   : > { %1750 = vmatpush.bf16.msra.mxu1 %v2564_v31  ;;  %1837 = vmatpush.bf16.msra.mxu0 %v2588_v38  ;;  %v930_v31 = vunpack.c.l.b16 %v780_v18 }
  0x54   : > { %2649 = vmatpush.bf16.msra.mxu2 %v2588_v38  ;;  %v911_v6 = vpack.c.b16 %v907_v33, %v3338_v35  ;;  %v511_v18 = vadd.f32 %v2910_v16, %v509_v13 }
  0x55   : > { %v935_v38 = vpack.c.b16 %v3343_v32, %v930_v31  ;;  %v760_v31 = vrot.slane %v3268_v42, 1 }
  0x57   : > { %1751 = vmatpush.bf16.msra.mxu1 %v2563_v46  ;;  %1838 = vmatpush.bf16.msra.mxu0 %v2587_v57  ;;  %v828_v46 = vpack.c.bf16 %v804_v45, %v804_v45  ;;  %v762_v12 = vsel %vm682_vm2, %v760_v31, %v3265_v25 }
  0x58   : > { %2650 = vmatpush.bf16.msra.mxu2 %v2587_v57  ;;  %v883_v57 = vunpack.c.l.b16 %v731_v49 }
  0x59   : > { %v980_v30 = vunpack.c.l.b16 %v828_v46 }
  0x5b   : > { %1752 = vmatpush.bf16.msra.mxu1 %v2562_v37  ;;  %1839 = vmatpush.bf16.msra.mxu0 %v2586_v3  ;;  %v987_v22 = vpack.c.b16 %v3166_v2, %v980_v30  ;;  %v887_v2 = vpack.c.b16 %v883_v57, %v882_v51  ;;  %v1009_v37 = vunpack.c.l.b16 %v837_v17 }
  0x5c   : > { %2651 = vmatpush.bf16.msra.mxu2 %v2586_v3  ;;  %v783_v3 = vpack.c.bf16 %v3268_v42, %v3268_v42 }
  0x5d   : > { %v1016_v4 = vpack.c.b16 %v1009_v37, %v3253_v27  ;;  %v510_v27 = vmul.f32 %v2893_v11, %v2613_v9 }
  0x5e   : > { %1646 = vmatmul.bf16.gmra.mxu1 %v885_v15  ;;  %1733 = vmatmul.bf16.gmra.mxu0 %v886_v21  ;;  %v2585_v15 = vld [vmem:[%s3589_s5 + $0x218] sm:$0xff]  ;;  %v943_v29 = vunpack.c.l.b16 %v783_v3 }
  0x5f   : > { %1753 = vmatpush.bf16.msra.mxu1 %v2561_v50  ;;  %1840 = vmatpush.bf16.msra.mxu0 %v2585_v15  ;;  %v514_v50 = vstv %s513_s23  ;;  %v512_v34 = vadd.f32 %v2910_v16, %v510_v27 }
  0x60   : > { %1714 = vmatmul.bf16.gmra.mxu3 %v935_v38  ;;  %2652 = vmatpush.bf16.msra.mxu2 %v2585_v15  ;;  %v944_v5 = vpack.c.b16 %v943_v29, %v942_v1  ;;  %vm515_vm11 = vcmp.eq.s32.totalorder %v514_v50, 1 }
  0x61   : > { %1685 = vmatmul.bf16.gmra.mxu2 %v911_v6  ;;  %v516_v20 = vsel %vm515_vm11, %v511_v18, 0.0  ;;  %v517_v6 = vsel %vm515_vm11, %v512_v34, 0.0 }
  0x62   : > { %v795_v38 = vrot.slane %v516_v20, 7  ;;  %v834_v42 = vpack.c.bf16 %v516_v20, %v516_v20  ;;  %v835_v36 = vpack.c.bf16 %v517_v6, %v517_v6  ;;  %v812_v51 = vrot.slane %v517_v6, 1 }
  0x63   : > { %1754 = vmatpush.bf16.msra.mxu1 %v2560_v28  ;;  %1841 = vmatpush.bf16.msra.mxu0 %v2584_v10  ;;  %v758_v28 = vrot.slane %v3251_v26, 1  ;;  %v797_v26 = vrot.slane %v517_v6, 7 }
  0x64   : > { %2653 = vmatpush.bf16.msra.mxu2 %v2584_v10  ;;  %v796_v15 = vsel %vm640_vm0, %v745_v23, %v795_v38  ;;  %v997_v56 = vunpack.c.l.b16 %v835_v36  ;;  %v814_v7 = vsel %vm682_vm2, %v812_v51, %v3265_v25 }
  0x65   : > { %v761_v11 = vsel %vm682_vm2, %v758_v28, %v760_v31  ;;  %v759_v16 = vsel %vm682_vm2, %v3262_v61, %v758_v28  ;;  %v798_v53 = vsel %vm640_vm0, %v795_v38, %v797_v26  ;;  %v808_v55 = vsel %vm3010_vm6, %v796_v15, 0.0 }
  0x66   : > { %v790_v43 = vpack.c.bf16 %v761_v11, %v761_v11  ;;  %v832_v30 = vpack.c.bf16 %v808_v55, %v808_v55  ;;  %v833_v10 = vpack.c.bf16 %v798_v53, %v798_v53 }
  0x67   : > { %1755 = vmatpush.bf16.msra.mxu1 %v2559_v40  ;;  %1842 = vmatpush.bf16.msra.mxu0 %v2583_v52 }
  0x68   : > { %2654 = vmatpush.bf16.msra.mxu2 %v2583_v52  ;;  %v984_v49 = vunpack.c.l.b16 %v832_v30  ;;  %v996_v52 = vunpack.c.l.b16 %v834_v42 }
  0x6a   : > { %v998_v17 = vpack.c.b16 %v997_v56, %v996_v52 }
  0x6b   : > { %1756 = vmatpush.bf16.msra.mxu1 %v2558_v47  ;;  %1843 = vmatpush.bf16.msra.mxu0 %v2582_v58  ;;  %v821_v47 = vsel %vm3129_vm8, %v759_v16, 0.0 }
  0x6c   : > { %2655 = vmatpush.bf16.msra.mxu2 %v2582_v58  ;;  %v839_v61 = vpack.c.bf16 %v821_v47, %v821_v47  ;;  %v825_v58 = vsel %vm3279_vm10, %v814_v7, 0.0 }
  0x6d   : > { %v843_v44 = vpack.c.bf16 %v825_v58, %v825_v58 }
  0x6e   : > { %1651 = vmatmul.bf16.gmra.mxu1 %v886_v21  ;;  %1738 = vmatmul.bf16.gmra.mxu0 %v887_v2  ;;  %v1011_v23 = vunpack.c.l.b16 %v839_v61 }
  0x6f   : > { %v1015_v62 = vunpack.c.l.b16 %v843_v44 }
  0x70   : > { %1815 = vmatmul.bf16.vlgmr.msrb.gmra.mxu3 %v886_v21  ;;  %v810_v21 = vrot.slane %v516_v20, 1  ;;  %v1017_v41 = vpack.c.b16 %v1011_v23, %v3338_v35 }
  0x71   : > { %1786 = vmatmul.bf16.vlgmr.msrb.gmra.mxu2 %v986_v14  ;;  %v806_v14 = vsel %vm2950_vm1, %v3296_v24, 0.0 }
  0x72   : > { %v830_v19 = vpack.c.bf16 %v806_v14, %v806_v14  ;;  %v811_v39 = vsel %vm682_vm2, %v760_v31, %v810_v21  ;;  %v2699_v31 = vld [vmem:[%s3590_s6] ss:$0 sm:$0xff] }
  0x73   : > { %v823_v40 = vsel %vm3193_vm9, %v811_v39, 0.0 }
  0x74   : > { %v982_v33 = vunpack.c.l.b16 %v830_v19  ;;  %v841_v45 = vpack.c.bf16 %v823_v40, %v823_v40 }
  0x76   : > { %v988_v24 = vpack.c.b16 %v3343_v32, %v982_v33  ;;  %v960_v32 = vunpack.c.l.b16 %v790_v43  ;;  %v1013_v46 = vunpack.c.l.b16 %v841_v45 }
  0x7e   : > { %1656 = vmatmul.bf16.gmra.mxu1 %v887_v2  ;;  %1743 = vmatmul.bf16.gmra.mxu0 %v944_v5 }
  0x80   : > { %1820 = vmatmul.bf16.gmra.mxu3 %v887_v2  ;;  %v771_v2 = vsel %vm3193_vm9, %v759_v16, 0.0 }
  0x81   : > { %1791 = vmatmul.bf16.gmra.mxu2 %v987_v22  ;;  %v985_v22 = vunpack.c.l.b16 %v833_v10  ;;  %v789_v37 = vpack.c.bf16 %v771_v2, %v771_v2 }
  0x83   : > { %v989_v57 = vpack.c.b16 %v985_v22, %v984_v49  ;;  %v959_v60 = vunpack.c.l.b16 %v789_v37 }
  0x8e   : > { %1757 = vmatmul.bf16.vlgmr.msra.gmra.mxu1 %v962_v54  ;;  %1844 = vmatmul.bf16.vlgmr.msra.gmra.mxu0 %v1016_v4  ;;  %v1018_v54 = vpack.c.b16 %v1013_v46, %v960_v32  ;;  %v813_v4 = vsel %vm682_vm2, %v810_v21, %v812_v51 }
  0x8f   : > { %v842_v59 = vpack.c.bf16 %v813_v4, %v813_v4 }
  0x90   : > { %1825 = vmatmul.bf16.gmra.mxu3 %v944_v5  ;;  %v773_v5 = vsel %vm3279_vm10, %v762_v12, 0.0 }
  0x91   : > { %1796 = vmatmul.bf16.gmra.mxu2 %v988_v24  ;;  %v1014_v3 = vunpack.c.l.b16 %v842_v59  ;;  %v791_v8 = vpack.c.bf16 %v773_v5, %v773_v5 }
  0x93   : > { %v1019_v0 = vpack.c.b16 %v1015_v62, %v1014_v3  ;;  %v961_v27 = vunpack.c.l.b16 %v791_v8 }
  0x95   : > { %v965_v18 = vpack.c.b16 %v961_v27, %v960_v32 }
  0x9e   : > { %1762 = vmatmul.bf16.gmra.mxu1 %v963_v63  ;;  %1849 = vmatmul.bf16.gmra.mxu0 %v1017_v41  ;;  %v964_v63 = vpack.c.b16 %v959_v60, %v3338_v35 }
  0xa0   : > { %1830 = vmatmul.bf16.gmra.mxu3 %v998_v17 }
  0xa1   : > { %1801 = vmatmul.bf16.gmra.mxu2 %v989_v57 }
  0xab   : > { %v1623_v1 = vpop.f32.mrf.mxu1  ;;  %v1613_v29 = vpop.f32.mrf.mxu0 }
  0xac   : > { %v1614_v21 = vadd.f32 %v2699_v31, %v1613_v29  ;;  %v1624_v17 = vadd.f32 %v2699_v31, %v1623_v1 }
  0xae   : > { %1767 = vmatmul.bf16.gmra.mxu1 %v964_v63  ;;  %1854 = vmatmul.bf16.gmra.mxu0 %v1018_v54 }
  0xb1   : > { %1859 = vmatmul.bf16.vlgmr.msra.gmra.mxu2 %v1019_v0 }
  0xb3   : > { %v1625_v9 = vpop.f32.mrf.mxu1  ;;  %v1615_v50 = vpop.f32.mrf.mxu0 }
  0xb4   : > { %v1671_v13 = vpop.f32.mrf.mxu2  ;;  %v1700_v14 = vpop.f32.mrf.mxu3  ;;  %v1616_v26 = vadd.f32 %v2699_v31, %v1615_v50  ;;  %v1626_v60 = vadd.f32 %v2699_v31, %v1625_v9 }
  0xbb   : > { %v1628_v35 = vpop.f32.mrf.mxu1  ;;  %v1618_v34 = vpop.f32.mrf.mxu0 }
  0xbc   : > { %v1673_v19 = vpop.f32.mrf.mxu2  ;;  %v3442_v20 = vpop.f32.mrf.mxu3  ;;  %v1619_v55 = vadd.f32 %v2699_v31, %v1618_v34  ;;  %v1629_v1 = vadd.f32 %v2699_v31, %v1628_v35 }
  0xbe   : > { %1772 = vmatmul.bf16.gmra.mxu1 %v965_v18 }
  0xc3   : > { %v1630_v25 = vpop.f32.mrf.mxu1  ;;  %v1620_v28 = vpop.f32.mrf.mxu0 }
  0xc4   : > { %v1676_v33 = vpop.f32.mrf.mxu2  ;;  %v1705_v48 = vpop.f32.mrf.mxu3  ;;  %v1621_v23 = vadd.f32 %v2699_v31, %v1620_v28  ;;  %v1631_v9 = vadd.f32 %v2699_v31, %v1630_v25 }
  0xcb   : > { %v1642_v6 = vpop.f32.mrf.mxu1  ;;  %v1729_v24 = vpop.f32.mrf.mxu0 }
  0xcc   : > { %v1643_v38 = vadd.f32 %v1642_v6, %v1614_v21  ;;  %v1678_v39 = vpop.f32.mrf.mxu2  ;;  %v3447_v40 = vpop.f32.mrf.mxu3 }
  0xce   : > { %v1672_v11 = vadd.f32 %v1671_v13, %v1643_v38 }
  0xd0   : > { %v1701_v16 = vadd.f32 %v1700_v14, %v1672_v11 }
  0xd2   : > { %v1730_v43 = vadd.f32 %v1729_v24, %v1701_v16 }
  0xd3   : > { %v1644_v45 = vpop.f32.mrf.mxu1  ;;  %v1731_v46 = vpop.f32.mrf.mxu0 }
  0xd4   : > { %v1645_v15 = vadd.f32 %v1644_v45, %v1616_v26  ;;  %v1681_v32 = vpop.f32.mrf.mxu2  ;;  %v1710_v53 = vpop.f32.mrf.mxu3 }
  0xd6   : > { %v1674_v47 = vadd.f32 %v1673_v19, %v1645_v15 }
  0xd8   : > { %v1703_v16 = vadd.f32 %v3442_v20, %v1674_v47 }
  0xda   : > { %v1732_v15 = vadd.f32 %v1731_v46, %v1703_v16 }
  0xdb   : > { %v1647_v54 = vpop.f32.mrf.mxu1  ;;  %v1734_v10 = vpop.f32.mrf.mxu0 }
  0xdc   : > { %v1648_v61 = vadd.f32 %v1647_v54, %v1619_v55  ;;  %v1683_v30 = vpop.f32.mrf.mxu2  ;;  %v3449_v52 = vpop.f32.mrf.mxu3 }
  0xde   : > { %v1677_v42 = vadd.f32 %v1676_v33, %v1648_v61 }
  0xe0   : > { %v1706_v36 = vadd.f32 %v1705_v48, %v1677_v42 }
  0xe2   : > { %v1735_v49 = vadd.f32 %v1734_v10, %v1706_v36 }
  0xe3   : > { %v1649_v22 = vpop.f32.mrf.mxu1  ;;  %v3451_v41 = vpop.f32.mrf.mxu0 }
  0xe4   : > { %v1650_v56 = vadd.f32 %v1649_v22, %v1621_v23  ;;  %v1686_v51 = vpop.f32.mrf.mxu2  ;;  %v1715_v4 = vpop.f32.mrf.mxu3 }
  0xe6   : > { %v1679_v57 = vadd.f32 %v1678_v39, %v1650_v56 }
  0xe8   : > { %v1708_v22 = vadd.f32 %v3447_v40, %v1679_v57 }
  0xeb   : > { %v1652_v7 = vpop.f32.mrf.mxu1  ;;  %v1739_v37 = vpop.f32.mrf.mxu0 }
  0xec   : > { %v1653_v2 = vadd.f32 %v1652_v7, %v1624_v17  ;;  %v1688_v58 = vpop.f32.mrf.mxu2  ;;  %v3459_v5 = vpop.f32.mrf.mxu3 }
  0xee   : > { %v1682_v44 = vadd.f32 %v1681_v32, %v1653_v2  ;;  %v1737_v2 = vadd.f32 %v3451_v41, %v1708_v22 }
  0xf0   : > { %v1711_v59 = vadd.f32 %v1710_v53, %v1682_v44 }
  0xf2   : > { %v3453_v3 = vadd.f32 %v1739_v37, %v1711_v59 }
  0xf3   : > { %v1654_v62 = vpop.f32.mrf.mxu1  ;;  %v3455_v29 = vpop.f32.mrf.mxu0 }
  0xf4   : > { %v1655_v63 = vadd.f32 %v1654_v62, %v1626_v60  ;;  %v1787_v12 = vpop.f32.mrf.mxu2  ;;  %v1816_v19 = vpop.f32.mrf.mxu3 }
  0xf6   : > { %v3457_v0 = vadd.f32 %v1683_v30, %v1655_v63 }
  0xfb   : > { %v1657_v8 = vpop.f32.mrf.mxu1  ;;  %v1744_v14 = vpop.f32.mrf.mxu0 }
  0xfc   : > { %v1658_v13 = vadd.f32 %v1657_v8, %v1629_v1  ;;  %v1789_v50 = vpop.f32.mrf.mxu2  ;;  %v1818_v39 = vpop.f32.mrf.mxu3 }
  0xfe   : > { %v1687_v27 = vadd.f32 %v1686_v51, %v1658_v13 }
 0x100   : > { %v1716_v18 = vadd.f32 %v1715_v4, %v1687_v27 }
 0x102   : > { %v3461_v34 = vadd.f32 %v1744_v14, %v1716_v18 }
 0x103   : > { %v1659_v33 = vpop.f32.mrf.mxu1  ;;  %v3463_v21 = vpop.f32.mrf.mxu0 }
 0x104   : > { %v1660_v28 = vadd.f32 %v1659_v33, %v1631_v9  ;;  %v1792_v48 = vpop.f32.mrf.mxu2  ;;  %v1821_v55 = vpop.f32.mrf.mxu3 }
 0x106   : > { %v3465_v6 = vadd.f32 %v1688_v58, %v1660_v28 }
 0x10b   : > { %v1758_v38 = vpop.f32.mrf.mxu1  ;;  %v1845_v11 = vpop.f32.mrf.mxu0 }
 0x10c   : > { %v1759_v35 = vadd.f32 %v1758_v38, %v1730_v43  ;;  %v1794_v24 = vpop.f32.mrf.mxu2  ;;  %v1823_v51 = vpop.f32.mrf.mxu3 }
 0x10e   : > { %v1788_v26 = vadd.f32 %v1787_v12, %v1759_v35 }
 0x110   : > { %v1817_v45 = vadd.f32 %v1816_v19, %v1788_v26 }
 0x112   : > { %v3468_v25 = vadd.f32 %v1845_v11, %v1817_v45 }
 0x113   : > { %v1760_v31 = vpop.f32.mrf.mxu1  ;;  %v1847_v54 = vpop.f32.mrf.mxu0 }
 0x114   : > { %v2506_v32 = vmul.f32 -1.442695, %v3468_v25  ;;  %v1761_v53 = vadd.f32 %v1760_v31, %v1732_v15  ;;  %v1797_v30 = vpop.f32.mrf.mxu2  ;;  %v1826_v1 = vpop.f32.mrf.mxu3 }
 0x116   : > { %2700 = vpow2.f32 %v2506_v32  ;;  %v1790_v61 = vadd.f32 %v1789_v50, %v1761_v53 }
 0x118   : > { %v1819_v10 = vadd.f32 %v1818_v39, %v1790_v61 }
 0x11a   : > { %v3471_v43 = vadd.f32 %v1847_v54, %v1819_v10 }
 0x11b   : > { %v1763_v42 = vpop.f32.mrf.mxu1  ;;  %v1850_v23 = vpop.f32.mrf.mxu0 }
 0x11c   : > { %v2701_v36 = vpop.eup %2700  ;;  %v2507_v20 = vmul.f32 -1.442695, %v3471_v43  ;;  %v1764_v47 = vadd.f32 %v1763_v42, %v1735_v49  ;;  %v3475_v7 = vpop.f32.mrf.mxu2 }
 0x11d   : > { %v1889_v46 = vadd.f32 1.0, %v2701_v36  ;;  %v1828_v32 = vpop.f32.mrf.mxu3 }
 0x11e   : > { %2702 = vpow2.f32 %v2507_v20  ;;  %v1793_v56 = vadd.f32 %v1792_v48, %v1764_v47  ;;  %v1713_v48 = vadd.f32 %v3449_v52, %v3457_v0 }
 0x11f   : > { %2704 = vrcp.f32 %v1889_v46  ;;  %v1908_v38 = vand.u32 2147483648, %v1889_v46  ;;  %vm1902_vm13 = vweird.f32 %v1889_v46 }
 0x120   : > { %v1822_v17 = vadd.f32 %v1821_v55, %v1793_v56  ;;  %v1742_v15 = vadd.f32 %v3455_v29, %v1713_v48 }
 0x121   : > { %v1909_v31 = vor.u32 1.1754944e-38, %v1908_v38 }
 0x122   : > { %v3478_v58 = vadd.f32 %v1850_v23, %v1822_v17 }
 0x123   : > { %v1765_v37 = vpop.f32.mrf.mxu1  ;;  %v1852_v62 = vpop.f32.mrf.mxu0 }
 0x124   : > { %v2703_v4 = vpop.eup %2702  ;;  %v2508_v49 = vmul.f32 -1.442695, %v3478_v58  ;;  %v1766_v44 = vadd.f32 %v1765_v37, %v1737_v2  ;;  %v3488_v13 = vpop.f32.mrf.mxu2 }
 0x125   : > { %v2705_v59 = vpop.eup %2704  ;;  %v1890_v60 = vadd.f32 1.0, %v2703_v4 }
 0x126   : > { %v1898_v40 = vmul.f32 %v2705_v59, %v1889_v46  ;;  %2706 = vpow2.f32 %v2508_v49  ;;  %v1795_v57 = vadd.f32 %v1794_v24, %v1766_v44  ;;  %vm1903_vm12 = vweird.f32 %v2705_v59 }
 0x127   : > { %2708 = vrcp.f32 %v1890_v60  ;;  %vm3501_vm14 = vmor %vm1902_vm13, %vm1903_vm12  ;;  %v1921_v16 = vand.u32 2147483647, %v1890_v60  ;;  %v1923_v26 = vand.u32 2147483648, %v1890_v60  ;;  %vm1917_vm1 = vweird.f32 %v1890_v60 }
 0x128   : > { %v1899_v63 = vsub.f32 1.0, %v1898_v40  ;;  %v1824_v12 = vadd.f32 %v1823_v51, %v1795_v57  ;;  %v1831_v57 = vpop.f32.mrf.mxu3 }
 0x129   : > { %v1924_v42 = vor.u32 1.1754944e-38, %v1923_v26  ;;  %vm1922_vm3 = vcmp.eq.f32.partialorder %v1921_v16, 8.507059e+37 }
 0x12a   : > { %v1900_v8 = vmul.f32 %v2705_v59, %v1899_v63  ;;  %v3482_v41 = vadd.f32 %v1852_v62, %v1824_v12 }
 0x12b   : > { %v1768_v50 = vpop.f32.mrf.mxu1  ;;  %v1855_v24 = vpop.f32.mrf.mxu0 }
 0x12c   : > { %v2707_v14 = vpop.eup %2706  ;;  %v2509_v27 = vmul.f32 -1.442695, %v3482_v41  ;;  %v1769_v18 = vadd.f32 %v1768_v50, %v3453_v3  ;;  %v1901_v33 = vadd.f32 %v2705_v59, %v1900_v8  ;;  %v1906_v3 = vand.u32 2147483647, %v1889_v46  ;;  %v1804_v20 = vpop.f32.mrf.mxu2 }
 0x12d   : > { %v2709_v19 = vpop.eup %2708  ;;  %v3492_v9 = vadd.f32 1.0, %v2707_v14 }
 0x12e   : > { %v1913_v28 = vmul.f32 %v2709_v19, %v1890_v60  ;;  %2710 = vpow2.f32 %v2509_v27  ;;  %v1798_v35 = vadd.f32 %v1797_v30, %v1769_v18  ;;  %v1905_v52 = vsel %vm3501_vm14, %v2705_v59, %v1901_v33 }
 0x12f   : > { %2712 = vrcp.f32 %v3492_v9  ;;  %vm1918_vm15 = vweird.f32 %v2709_v19  ;;  %vm1907_vm0 = vcmp.eq.f32.partialorder %v1906_v3, 8.507059e+37  ;;  %vm1932_vm5 = vweird.f32 %v3492_v9 }
 0x130   : > { %v1914_v39 = vsub.f32 1.0, %v1913_v28  ;;  %v1827_v45 = vadd.f32 %v1826_v1, %v1798_v35  ;;  %v1910_v10 = vsel %vm1907_vm0, %v1909_v31, %v1905_v52  ;;  %vm1919_vm2 = vmor %vm1917_vm1, %vm1918_vm15  ;;  %v1936_v1 = vand.u32 2147483647, %v3492_v9 }
 0x131   : > { %v2017_v56 = vmul.f32 %v1910_v10, %v3468_v25  ;;  %v1718_v25 = vadd.f32 %v3459_v5, %v3465_v6  ;;  %v1938_v5 = vand.u32 2147483648, %v3492_v9 }
 0x132   : > { %v1915_v0 = vmul.f32 %v2709_v19, %v1914_v39  ;;  %v3510_v61 = vadd.f32 %v1855_v24, %v1827_v45  ;;  %vm1937_vm8 = vcmp.eq.f32.partialorder %v1936_v1, 8.507059e+37 }
 0x133   : > { %v1770_v53 = vpop.f32.mrf.mxu1  ;;  %v1857_v49 = vpop.f32.mrf.mxu0  ;;  %v1747_v50 = vadd.f32 %v3463_v21, %v1718_v25  ;;  %v1939_v21 = vor.u32 1.1754944e-38, %v1938_v5 }
 0x134   : > { %v2711_v55 = vpop.eup %2710  ;;  %v1916_v54 = vadd.f32 %v2709_v19, %v1915_v0  ;;  %v1771_v47 = vadd.f32 %v1770_v53, %v1742_v15  ;;  %v2510_v23 = vmul.f32 -1.442695, %v3510_v61  ;;  %v1860_v8 = vpop.f32.mrf.mxu2 }
 0x135   : > { %v3512_v30 = vpop.eup %2712  ;;  %v1892_v36 = vadd.f32 1.0, %v2711_v55  ;;  %v1833_v0 = vpop.f32.mrf.mxu3 }
 0x136   : > { %v1920_v29 = vsel %vm1919_vm2, %v2709_v19, %v1916_v54  ;;  %v1928_v46 = vmul.f32 %v3512_v30, %v3492_v9  ;;  %v1800_v2 = vadd.f32 %v3475_v7, %v1771_v47  ;;  %vm1933_vm4 = vweird.f32 %v3512_v30 }
 0x137   : > { %v1925_v22 = vsel %vm1922_vm3, %v1924_v42, %v1920_v29  ;;  %2714 = vrcp.f32 %v1892_v36  ;;  %vm3542_vm6 = vmor %vm1932_vm5, %vm1933_vm4  ;;  %v1951_v19 = vand.u32 2147483647, %v1892_v36  ;;  %v1953_v33 = vand.u32 2147483648, %v1892_v36 }
 0x138   : > { %v2018_v51 = vmul.f32 %v1925_v22, %v3471_v43  ;;  %v1929_v17 = vsub.f32 1.0, %v1928_v46  ;;  %2716 = vpow2.f32 %v2510_v23  ;;  %v1829_v44 = vadd.f32 %v1828_v32, %v1800_v2 }
 0x139   : > { %vm1947_vm9 = vweird.f32 %v1892_v36  ;;  %v1954_v24 = vor.u32 1.1754944e-38, %v1953_v33  ;;  %vm1952_vm11 = vcmp.eq.f32.partialorder %v1951_v19, 8.507059e+37 }
 0x13a   : > { %v2617_v37 = vpack.c.bf16 %v2018_v51, %v2017_v56  ;;  %v1930_v4 = vmul.f32 %v3512_v30, %v1929_v17  ;;  %v3532_v62 = vadd.f32 %v1857_v49, %v1829_v44 }
 0x13b   : > { %v1773_v59 = vpop.f32.mrf.mxu1 }
 0x13c   : > { %2618 = vst [vmem:[%s3522_s14] sm:$0xff] %v2617_v37   ;;  %v1774_v43 = vadd.f32 %v1773_v59, %v3461_v34  ;;  %v1931_v40 = vadd.f32 %v3512_v30, %v1930_v4  ;;  %v2511_v34 = vmul.f32 -1.442695, %v3532_v62  ;;  %v1862_v54 = vpop.f32.mrf.mxu2 }
 0x13d   : > { %v2715_v60 = vpop.eup %2714 }
 0x13e   : > { %v2717_v7 = vpop.eup %2716  ;;  %v1943_v63 = vmul.f32 %v2715_v60, %v1892_v36  ;;  %v1803_v12 = vadd.f32 %v3488_v13, %v1774_v43  ;;  %v1935_v13 = vsel %vm3542_vm6, %v3512_v30, %v1931_v40  ;;  %vm1948_vm7 = vweird.f32 %v2715_v60 }
 0x13f   : > { %v3538_v6 = vadd.f32 1.0, %v2717_v7  ;;  %v1940_v35 = vsel %vm1937_vm8, %v1939_v21, %v1935_v13  ;;  %vm1949_vm10 = vmor %vm1947_vm9, %vm1948_vm7 }
 0x140   : > { %v1944_v27 = vsub.f32 1.0, %v1943_v63  ;;  %v1832_v18 = vadd.f32 %v1831_v57, %v1803_v12  ;;  %v2019_v15 = vmul.f32 %v1940_v35, %v3478_v58 }
 0x141   : > { %2718 = vrcp.f32 %v3538_v6  ;;  %v1968_v23 = vand.u32 2147483648, %v3538_v6  ;;  %vm1962_vm13 = vweird.f32 %v3538_v6  ;;  %v1966_v56 = vand.u32 2147483647, %v3538_v6 }
 0x142   : > { %v1945_v9 = vmul.f32 %v2715_v60, %v1944_v27  ;;  %2720 = vpow2.f32 %v2511_v34  ;;  %v3550_v28 = vadd.f32 %v1860_v8, %v1832_v18 }
 0x143   : > { %v1775_v48 = vpop.f32.mrf.mxu1  ;;  %v1969_v25 = vor.u32 1.1754944e-38, %v1968_v23  ;;  %vm1967_vm0 = vcmp.eq.f32.partialorder %v1966_v56, 8.507059e+37 }
 0x144   : > { %v1946_v38 = vadd.f32 %v2715_v60, %v1945_v9  ;;  %v2512_v3 = vmul.f32 -1.442695, %v3550_v28  ;;  %v1776_v39 = vadd.f32 %v1775_v48, %v1747_v50 }
 0x146   : > { %v1950_v11 = vsel %vm1949_vm10, %v2715_v60, %v1946_v38  ;;  %2722 = vpow2.f32 %v2512_v3  ;;  %v1805_v16 = vadd.f32 %v1804_v20, %v1776_v39 }
 0x147   : > { %v2719_v26 = vpop.eup %2718  ;;  %v1955_v52 = vsel %vm1952_vm11, %v1954_v24, %v1950_v11 }
 0x148   : > { %v2721_v45 = vpop.eup %2720  ;;  %v2020_v31 = vmul.f32 %v1955_v52, %v3482_v41  ;;  %v1958_v32 = vmul.f32 %v2719_v26, %v3538_v6  ;;  %v1834_v53 = vadd.f32 %v1833_v0, %v1805_v16  ;;  %vm1963_vm12 = vweird.f32 %v2719_v26 }
 0x149   : > { %v1894_v55 = vadd.f32 1.0, %v2721_v45  ;;  %vm1964_vm14 = vmor %vm1962_vm13, %vm1963_vm12 }
 0x14a   : > { %v2622_v30 = vpack.c.bf16 %v2020_v31, %v2019_v15  ;;  %v1959_v10 = vsub.f32 1.0, %v1958_v32  ;;  %v3556_v42 = vadd.f32 %v1862_v54, %v1834_v53 }
 0x14b   : > { %2724 = vrcp.f32 %v1894_v55  ;;  %v1981_v2 = vand.u32 2147483647, %v1894_v55  ;;  %v1983_v37 = vand.u32 2147483648, %v1894_v55  ;;  %vm1977_vm1 = vweird.f32 %v1894_v55 }
 0x14c   : > { %v2723_v36 = vpop.eup %2722  ;;  %2637 = vst [vmem:[%s3522_s14 + $0x8] sm:$0xff] %v2622_v30   ;;  %v2513_v20 = vmul.f32 -1.442695, %v3556_v42  ;;  %v1960_v29 = vmul.f32 %v2719_v26, %v1959_v10 }
 0x14d   : > { %v1895_v47 = vadd.f32 1.0, %v2723_v36  ;;  %v1984_v57 = vor.u32 1.1754944e-38, %v1983_v37  ;;  %vm1982_vm3 = vcmp.eq.f32.partialorder %v1981_v2, 8.507059e+37 }
 0x14e   : > { %2726 = vpow2.f32 %v2513_v20  ;;  %v1961_v41 = vadd.f32 %v2719_v26, %v1960_v29 }
 0x14f   : > { %2728 = vrcp.f32 %v1895_v47  ;;  %v1998_v14 = vand.u32 2147483648, %v1895_v47  ;;  %vm1992_vm5 = vweird.f32 %v1895_v47  ;;  %v1996_v27 = vand.u32 2147483647, %v1895_v47 }
 0x150   : > { %v1965_v49 = vsel %vm1964_vm14, %v2719_v26, %v1961_v41 }
 0x151   : > { %v2725_v58 = vpop.eup %2724  ;;  %v1970_v40 = vsel %vm1967_vm0, %v1969_v25, %v1965_v49  ;;  %vm1997_vm8 = vcmp.eq.f32.partialorder %v1996_v27, 8.507059e+37 }
 0x152   : > { %v1973_v46 = vmul.f32 %v2725_v58, %v1894_v55  ;;  %vm1978_vm15 = vweird.f32 %v2725_v58  ;;  %v2021_v1 = vmul.f32 %v1970_v40, %v3510_v61  ;;  %v1999_v61 = vor.u32 1.1754944e-38, %v1998_v14 }
 0x153   : > { %vm1979_vm2 = vmor %vm1977_vm1, %vm1978_vm15 }
 0x154   : > { %v2727_v22 = vpop.eup %2726  ;;  %v1974_v51 = vsub.f32 1.0, %v1973_v46 }
 0x155   : > { %v2729_v17 = vpop.eup %2728  ;;  %v1896_v4 = vadd.f32 1.0, %v2727_v22 }
 0x156   : > { %v1975_v44 = vmul.f32 %v2725_v58, %v1974_v51  ;;  %v1988_v59 = vmul.f32 %v2729_v17, %v1895_v47  ;;  %vm1993_vm4 = vweird.f32 %v2729_v17 }
 0x157   : > { %2730 = vrcp.f32 %v1896_v4  ;;  %vm1994_vm6 = vmor %vm1992_vm5, %vm1993_vm4  ;;  %v2013_v13 = vand.u32 2147483648, %v1896_v4  ;;  %v2011_v9 = vand.u32 2147483647, %v1896_v4  ;;  %vm2007_vm9 = vweird.f32 %v1896_v4 }
 0x158   : > { %v1976_v43 = vadd.f32 %v2725_v58, %v1975_v44  ;;  %v1989_v60 = vsub.f32 1.0, %v1988_v59 }
 0x159   : > { %v2014_v48 = vor.u32 1.1754944e-38, %v2013_v13  ;;  %vm2012_vm11 = vcmp.eq.f32.partialorder %v2011_v9, 8.507059e+37 }
 0x15a   : > { %v1980_v7 = vsel %vm1979_vm2, %v2725_v58, %v1976_v43  ;;  %v1990_v63 = vmul.f32 %v2729_v17, %v1989_v60 }
 0x15b   : > { %v1985_v12 = vsel %vm1982_vm3, %v1984_v57, %v1980_v7 }
 0x15c   : > { %v2022_v5 = vmul.f32 %v1985_v12, %v3532_v62  ;;  %v1991_v8 = vadd.f32 %v2729_v17, %v1990_v63 }
 0x15d   : > { %v2731_v6 = vpop.eup %2730 }
 0x15e   : > { %v2627_v34 = vpack.c.bf16 %v2022_v5, %v2021_v1  ;;  %v2003_v50 = vmul.f32 %v2731_v6, %v1896_v4  ;;  %v1995_v19 = vsel %vm1994_vm6, %v2729_v17, %v1991_v8  ;;  %vm2008_vm7 = vweird.f32 %v2731_v6 }
 0x15f   : > { %v2000_v21 = vsel %vm1997_vm8, %v1999_v61, %v1995_v19  ;;  %vm2009_vm10 = vmor %vm2007_vm9, %vm2008_vm7 }
 0x160   : > { %2638 = vst [vmem:[%s3522_s14 + $0x10] sm:$0xff] %v2627_v34   ;;  %v2004_v18 = vsub.f32 1.0, %v2003_v50  ;;  %v2023_v39 = vmul.f32 %v2000_v21, %v3550_v28 }
 0x162   : > { %v2005_v33 = vmul.f32 %v2731_v6, %v2004_v18 }
 0x164   : > { %v2006_v62 = vadd.f32 %v2731_v6, %v2005_v33 }
 0x166   : > { %v2010_v38 = vsel %vm2009_vm10, %v2731_v6, %v2006_v62 }
 0x167   : > { %v2015_v3 = vsel %vm2012_vm11, %v2014_v48, %v2010_v38 }
 0x168   : > { %v2024_v35 = vmul.f32 %v2015_v3, %v3556_v42 }
 0x16a   : > { %v2632_v24 = vpack.c.bf16 %v2024_v35, %v2023_v39 }
 0x16c   : > { %2639 = vst [vmem:[%s3522_s14 + $0x18] sm:$0xff] %v2632_v24  }
 0x16d PF: > { %s17_s28 = sadd.s32 1, %s2770_s28   ;;  %s3615_s24 = smov %s2762_s26 }
 0x16e   : > { %p14_p13 = scmp.ge.s32.totalorder %s17_s28, 6   ;;  %s3616_s25 = smov %s2766_s27 }
 0x16f   : > { %s3617_s26 = smov %s3620_s29  ;;  %s3618_s27 = smov %s3624_s30 }
 0x170   :  { %16 = sbr.rel (!%p14_p13) target bundleno = 3 (0x3), region = 87 }

// kernel: upblock_forward.8
= control target key start
LH: loop header
LB: loop body
LE: loop exit
PB: predicated region body
PF: predicated region fallthrough
CT: control target
= control target key end

     0   :  { %s2934_s24 = smov 0   ;;  %s2936_s25 = smov 0   ;;  %s3702_s0 = inlined_call_operand.vmem [shape: bf16[2,8,16,128], index: 0, kind: input, shape index: {}, may-alias: {0,1,2}]   ;;  %s3703_s1 = inlined_call_operand.vmem [shape: bf16[2,8,16,128], index: 1, kind: input, shape index: {}, may-alias: {0,1,2}]   ;;  %s3704_s2 = inlined_call_operand.vmem [shape: bf16[2,8,16,128], index: 2, kind: input, shape index: {}, may-alias: {0,1,2}]   ;;  %s3705_s3 = inlined_call_operand.vmem [shape: bf16[2,8,16,128], index: 3, kind: input, shape index: {}]   ;;  %s3706_s4 = inlined_call_operand.vmem [shape: bf16[1280,128], index: 4, kind: input, shape index: {}]   ;;  %s3707_s5 = inlined_call_operand.vmem [shape: f32[1,128], index: 5, kind: input, shape index: {}]   ;;  %s3708_s6 = inlined_call_operand.vmem [shape: bf16[2,128,128], index: 6, kind: output, shape index: {0}]   ;;  %s3709_s7 = inlined_call_operand.vmem [shape: f32[4,2,128], index: 7, kind: output, shape index: {1}]  }
   0x1   :  { %s2938_s26 = smov 0   ;;  %s2940_s27 = smov 0  }
   0x2   :  { %s2942_s28 = smov 0  }
   0x3 LB: > { %s27_s29 = sadd.s32 1, %s2883_s26  ;;  %s30_s30 = sadd.s32 1, %s2887_s27  ;;  %s2891_s28 = sphi %s2942_s28, %s18_s28   ;;  %s2887_s27 = sphi %s2940_s27, %s3731_s27   ;;  %s2883_s26 = sphi %s2938_s26, %s3730_s26   ;;  %s2879_s25 = sphi %s2936_s25, %s3729_s25   ;;  %s2875_s24 = sphi %s2934_s24, %s3728_s24  }
   0x4   : > { %p28_p0 = scmp.ge.s32.totalorder %s27_s29, 2  ;;  %p2283_p1 = scmp.ge.s32.totalorder %s2891_s28, 1 }
   0x5   : > { %p348_p2 = scmp.lt.s32.totalorder %s2891_s28, 5 }
   0x6   : > { %s3733_s29 = smov (%p28_p0, %s27_s29), 0  ;;  %s3735_s30 = smov (!%p28_p0, %s30_s30), %s2887_s27 }
   0x7   : > { %p349_p3 = pnand %p2283_p1, %p348_p2  ;;  %p32_p4 = scmp.ge.s32.totalorder %s3735_s30, 2 }
   0x8   : > { %s2975_s12 = sshll.u32 (!%p349_p3), %s2875_s24, 2  ;;  %p432_p5 = scmp.lt.s32.totalorder (!%p349_p3), %s2879_s25, 1 }
   0x9   : > { %s3737_s30 = smov (%p32_p4, %s3735_s30), 0  ;;  %352 = sbr.rel (%p349_p3) target bundleno = 359 (0x167), region = 44 }
   0xa   : > { %p434_p6 = scmp.lt.s32.totalorder (!%p349_p3), %s2975_s12, 7  ;;  %s2980_s13 = sadd.s32 (!%p349_p3), 4294967295, %s2975_s12 }
   0xb   : > { %p444_p7 = scmp.gt.s32.totalorder (!%p349_p3), %s2980_s13, 0  ;;  %p508_p8 = scmp.ge.s32.totalorder (!%p349_p3), %s2975_s12, 1 }
   0xc   : > { %p2290_p9 = scmp.lt.s32.totalorder (!%p349_p3), %s2980_s13, 7  ;;  %s3488_s9 = sadd.s32 (!%p349_p3), 4, %s2975_s12 }
   0xd   : > { %p461_p10 = scmp.lt.s32.totalorder (!%p349_p3), %s3488_s9, 7  ;;  %p538_p11 = scmp.le.s32.totalorder (!%p349_p3), %s3488_s9, 7 }
   0xe   : > { %v2672_v0 = vld [vmem:[%s3706_s4 + $0x38] sm:$0xff]  ;;  %v546_v2 = vlaneseq  ;;  %v2671_v3 = vld [vmem:[%s3706_s4 + $0x30] sm:$0xff]  ;;  %s433_s18 = scalar_select %p432_p5, %s2879_s25, 1  ;;  %v2670_v6 = vld [vmem:[%s3706_s4 + $0x28] sm:$0xff]  ;;  %vm668_vm0 = vcmask 1040384   ;;  %v2893_v20 = vmov 0.0  }
   0xf   : > { %v2680_v1 = vld [vmem:[%s3706_s4 + $0x78] sm:$0xff]  ;;  %2795 = vmatpush.bf16.msra.mxu2 %v2672_v0  ;;  %v2679_v4 = vld [vmem:[%s3706_s4 + $0x70] sm:$0xff]  ;;  %1728 = vmatpush.bf16.msra.mxu0 %v2672_v0  ;;  %s435_s19 = scalar_select %p434_p6, %s2975_s12, 7  ;;  %v2678_v7 = vld [vmem:[%s3706_s4 + $0x68] sm:$0xff]  ;;  %v3043_v21 = vrot.slane %v2893_v20, 7  ;;  %vm710_vm6 = vcmask 1046528  }
  0x10   : > { %2803 = vmatpush.bf16.msra.mxu3 %v2680_v1  ;;  %1757 = vmatpush.bf16.msra.mxu1 %v2680_v1  ;;  %v2990_v5 = vshrl.u32 %v546_v2, 7  ;;  %s2992_s20 = sshll.u32 %s433_s18, 4  ;;  %v2669_v11 = vld [vmem:[%s3706_s4 + $0x20] sm:$0xff]  ;;  %v2668_v22 = vld [vmem:[%s3706_s4 + $0x18] sm:$0xff]  ;;  %v2667_v32 = vld [vmem:[%s3706_s4 + $0x10] sm:$0xff]  ;;  %s2309_s12 = sshll.u32 %s2875_s24, 3 }
  0x11   : > { %s2285_s21 = sshll.u32 %s435_s19, 1  ;;  %v2677_v12 = vld [vmem:[%s3706_s4 + $0x60] sm:$0xff]  ;;  %v2676_v23 = vld [vmem:[%s3706_s4 + $0x58] sm:$0xff]  ;;  %v2675_v33 = vld [vmem:[%s3706_s4 + $0x50] sm:$0xff]  ;;  %p490_p12 = scmp.lt.s32.totalorder %s2309_s12, 15 }
  0x12   : > { %s3002_s10 = sadd.s32 %s2992_s20, %s2285_s21  ;;  %v551_v8 = vadd.s32 32, %v2990_v5  ;;  %v559_v17 = vand.u32 15, %v2990_v5  ;;  %v2666_v47 = vld [vmem:[%s3706_s4 + $0x8] sm:$0xff]  ;;  %v553_v50 = vadd.s32 48, %v2990_v5  ;;  %v549_v51 = vadd.s32 16, %v2990_v5  ;;  %v2665_v0 = vld [vmem:[%s3706_s4] sm:$0xff] }
  0x13   : > { %2796 = vmatpush.bf16.msra.mxu2 %v2671_v3  ;;  %1729 = vmatpush.bf16.msra.mxu0 %v2671_v3  ;;  %s2287_s11 = sshll.u32 %s3002_s10, 2  ;;  %v2674_v48 = vld [vmem:[%s3706_s4 + $0x48] sm:$0xff]  ;;  %v2673_v1 = vld [vmem:[%s3706_s4 + $0x40] sm:$0xff]  ;;  %s3743_s12 = smov (!%p490_p12, %s2309_s12), 15 }
  0x14   : > { %2804 = vmatpush.bf16.msra.mxu3 %v2679_v4  ;;  %1758 = vmatpush.bf16.msra.mxu1 %v2679_v4  ;;  %s3013_s16 = scalar_lea.vmem %s3702_s0, %s2287_s11  ;;  %v587_v16 = vand.u32 15, %v551_v8  ;;  %vm3062_vm2 = vcmp.ge.s32.totalorder %v559_v17, 1  ;;  %v601_v4 = vand.u32 15, %v553_v50  ;;  %v2710_v50 = vld [vmem:[%s3706_s4 + $0x168] sm:$0xff]  ;;  %s493_s14 = sadd.s32 %s2992_s20, %s3743_s12 }
  0x15   : > { %v3016_v9 = vld [vmem:[%s3013_s16] sm:$0xff]   ;;  %v2789_v10 = vld [vmem:[%s3013_s16 + $0x8] sm:$0xff]   ;;  %s445_s17 = scalar_select %p444_p7, %s2980_s13, 0  ;;  %v2790_v42 = vld [vmem:[%s3013_s16 + $0x10] sm:$0xff]  }
  0x16   : > { %v3029_v13 = vunpack.c.h.bf16 %v3016_v9  ;;  %v3031_v14 = vunpack.c.l.bf16 %v2789_v10  ;;  %v3033_v15 = vunpack.c.h.bf16 %v2789_v10  ;;  %s511_s23 = scalar_select %p508_p8, 1, 0  ;;  %vm3053_vm1 = vcmp.ge.s32.totalorder %v587_v16, 1 }
  0x17   : > { %2797 = vmatpush.bf16.msra.mxu2 %v2670_v6  ;;  %1730 = vmatpush.bf16.msra.mxu0 %v2670_v6  ;;  %s3739_s17 = smov (!%p2290_p9, %s445_s17), 7  ;;  %v3113_v55 = vunpack.c.l.bf16 %v2790_v42  ;;  %v3118_v59 = vunpack.c.l.bf16 %v3016_v9  ;;  %v3128_v3 = vunpack.c.h.bf16 %v2790_v42  ;;  %v2688_v6 = vld [vmem:[%s3706_s4 + $0xb8] sm:$0xff]  ;;  %vm3150_vm4 = vcmp.ge.s32.totalorder %v601_v4, 1  ;;  %v2703_v42 = vld [vmem:[%s3706_s4 + $0x130] sm:$0xff] }
  0x18   : > { %2805 = vmatpush.bf16.msra.mxu3 %v2678_v7  ;;  %1759 = vmatpush.bf16.msra.mxu1 %v2678_v7  ;;  %v676_v18 = vrot.slane %v3029_v13, 7  ;;  %v678_v19 = vrot.slane %v3031_v14, 7  ;;  %s2295_s8 = sshll.u32 %s3739_s17, 1  ;;  %v680_v24 = vrot.slane %v3033_v15, 7  ;;  %v512_v25 = vstv %s511_s23 }
  0x19   : > { %s452_s18 = sadd.s32 %s2295_s8, %s2992_s20  ;;  %vm513_vm3 = vcmp.eq.s32.totalorder %v512_v25, 1  ;;  %v756_v38 = vpack.c.bf16 %v3031_v14, %v3031_v14  ;;  %v757_v39 = vpack.c.bf16 %v3033_v15, %v3033_v15  ;;  %v682_v10 = vrot.slane %v3113_v55, 7 }
  0x1a   : > { %v3060_v27 = vsel %vm668_vm0, %v676_v18, %v678_v19  ;;  %s2297_s17 = sshll.u32 %s452_s18, 2  ;;  %v822_v29 = vsel %vm668_vm0, %v3043_v21, %v678_v19  ;;  %v681_v34 = vsel %vm668_vm0, %v678_v19, %v680_v24  ;;  %v3138_v16 = vrot.slane %v3118_v59, 7 }
  0x1b   : > { %2798 = vmatpush.bf16.msra.mxu2 %v2669_v11  ;;  %1731 = vmatpush.bf16.msra.mxu0 %v2669_v11  ;;  %s454_s22 = scalar_lea.vmem %s3703_s1, %s2297_s17  ;;  %v3073_v30 = vsel %vm3062_vm2, %v822_v29, 0.0  ;;  %v698_v35 = vsel %vm3053_vm1, %v3060_v27, 0.0  ;;  %v749_v44 = vpack.c.bf16 %v681_v34, %v681_v34  ;;  %v916_v56 = vunpack.c.l.b16 %v756_v38  ;;  %v2696_v11 = vld [vmem:[%s3706_s4 + $0xf8] sm:$0xff]  ;;  %v2687_v34 = vld [vmem:[%s3706_s4 + $0xb0] sm:$0xff] }
  0x1c   : > { %2806 = vmatpush.bf16.msra.mxu3 %v2677_v12  ;;  %1760 = vmatpush.bf16.msra.mxu1 %v2677_v12  ;;  %v2746_v31 = vld [vmem:[%s454_s22] sm:$0xff]   ;;  %v748_v43 = vpack.c.bf16 %v698_v35, %v698_v35  ;;  %v917_v62 = vunpack.c.l.b16 %v757_v39  ;;  %v573_v12 = vand.u32 15, %v549_v51  ;;  %v684_v25 = vrot.slane %v3128_v3, 7  ;;  %v2704_v29 = vld [vmem:[%s3706_s4 + $0x138] sm:$0xff]  ;;  %v2695_v35 = vld [vmem:[%s3706_s4 + $0xf0] sm:$0xff]  ;;  %s462_s13 = scalar_select %p461_p10, %s3488_s9, 7 }
  0x1d   : > { %v2747_v36 = vunpack.c.l.bf16 %v2746_v31  ;;  %v2748_v37 = vunpack.c.h.bf16 %v2746_v31  ;;  %v3120_v61 = vunpack.c.l.b16 %v749_v44  ;;  %s541_s22 = scalar_select %p538_p11, 1, 0 }
  0x1e   : > { %v892_v60 = vunpack.c.l.b16 %v748_v43  ;;  %v3141_v19 = vpack.c.b16 %v917_v62, %v916_v56  ;;  %vm3165_vm5 = vcmp.ge.s32.totalorder %v573_v12, 1  ;;  %v685_v38 = vsel %vm668_vm0, %v682_v10, %v684_v25  ;;  %s3741_s13 = smov (!%p461_p10, %s462_s13), 7  ;;  %s3566_s9 = scalar_lea.vmem %s3705_s3, %s2287_s11 }
  0x1f   : > { %2799 = vmatpush.bf16.msra.mxu2 %v2668_v22  ;;  %1732 = vmatpush.bf16.msra.mxu0 %v2668_v22  ;;  %v3091_v40 = vsel %vm513_vm3, %v2747_v36, 0.0  ;;  %v3093_v41 = vsel %vm513_vm3, %v2748_v37, 0.0  ;;  %v677_v43 = vsel %vm668_vm0, %v3138_v16, %v676_v18  ;;  %v759_v18 = vpack.c.bf16 %v3128_v3, %v3128_v3  ;;  %s2302_s15 = sshll.u32 %s3741_s13, 1  ;;  %s2311_s13 = sshll.u32 %s493_s14, 2 }
  0x20   : > { %2807 = vmatpush.bf16.msra.mxu3 %v2676_v23  ;;  %1761 = vmatpush.bf16.msra.mxu1 %v2676_v23  ;;  %v670_v45 = vrot.slane %v3091_v40, 7  ;;  %v672_v46 = vrot.slane %v3093_v41, 7  ;;  %v752_v49 = vpack.c.bf16 %v3091_v40, %v3091_v40  ;;  %v753_v54 = vpack.c.bf16 %v3093_v41, %v3093_v41  ;;  %v2712_v23 = vld [vmem:[%s3706_s4 + $0x178] sm:$0xff]  ;;  %s469_s18 = sadd.s32 %s2302_s15, %s2992_s20  ;;  %s2312_s20 = sshll.u32 %s2879_s25, 1 }
  0x21   : > { %v898_v17 = vpack.c.b16 %v3120_v61, %v892_v60  ;;  %v755_v56 = vpack.c.bf16 %v3029_v13, %v3029_v13  ;;  %v2693_v60 = vld [vmem:[%s3706_s4 + $0xe0] sm:$0xff]  ;;  %v714_v12 = vrot.slane %v3118_v59, 1  ;;  %s2304_s17 = sshll.u32 %s469_s18, 2  ;;  %s498_s19 = sadd.s32 %s2875_s24, %s2312_s20 }
  0x22   : > { %v671_v52 = vsel %vm668_vm0, %v3043_v21, %v670_v45  ;;  %v673_v53 = vsel %vm668_vm0, %v670_v45, %v672_v46  ;;  %v912_v8 = vunpack.c.l.b16 %v752_v49  ;;  %v913_v9 = vunpack.c.l.b16 %v753_v54  ;;  %v2686_v45 = vld [vmem:[%s3706_s4 + $0xa8] sm:$0xff]  ;;  %s471_s21 = scalar_lea.vmem %s3704_s2, %s2304_s17  ;;  %s3658_s17 = scalar_lea.vmem %s3708_s6, %s2311_s13 }
  0x23   : > { %2800 = vmatpush.bf16.msra.mxu2 %v2667_v32  ;;  %1733 = vmatpush.bf16.msra.mxu0 %v2667_v32  ;;  %v694_v57 = vsel %vm3062_vm2, %v671_v52, 0.0  ;;  %v745_v58 = vpack.c.bf16 %v673_v53, %v673_v53  ;;  %v675_v37 = vsel %vm668_vm0, %v672_v46, %v3138_v16  ;;  %v2694_v46 = vld [vmem:[%s3706_s4 + $0xe8] sm:$0xff]  ;;  %v758_v49 = vpack.c.bf16 %v3113_v55, %v3113_v55  ;;  %v2852_v32 = vld [vmem:[%s3707_s5] ss:$0 sm:$0xff]  ;;  %p499_p13 = scmp.lt.s32.totalorder %s498_s19, 3 }
  0x24   : > { %2808 = vmatpush.bf16.msra.mxu3 %v2675_v33  ;;  %1762 = vmatpush.bf16.msra.mxu1 %v2675_v33  ;;  %v744_v63 = vpack.c.bf16 %v694_v57, %v694_v57  ;;  %v920_v31 = vpack.c.b16 %v913_v9, %v912_v8  ;;  %v3157_v33 = vsel %vm668_vm0, %v680_v24, %v682_v10  ;;  %v2711_v24 = vld [vmem:[%s3706_s4 + $0x170] sm:$0xff]  ;;  %v696_v44 = vsel %vm3165_vm5, %v675_v37, 0.0  ;;  %v2702_v54 = vld [vmem:[%s3706_s4 + $0x128] sm:$0xff]  ;;  %v2701_v8 = vld [vmem:[%s3706_s4 + $0x120] sm:$0xff] }
  0x25   : > { %v889_v2 = vunpack.c.l.b16 %v745_v58  ;;  %v700_v39 = vsel %vm3150_vm4, %v3157_v33, 0.0  ;;  %v746_v51 = vpack.c.bf16 %v696_v44, %v696_v44  ;;  %v747_v52 = vpack.c.bf16 %v677_v43, %v677_v43  ;;  %v2685_v58 = vld [vmem:[%s3706_s4 + $0xa0] sm:$0xff]  ;;  %v2700_v37 = vld [vmem:[%s3706_s4 + $0x118] sm:$0xff]  ;;  %s3745_s19 = smov (!%p499_p13, %s498_s19), 3 }
  0x26   : > { %v888_v7 = vunpack.c.l.b16 %v744_v63  ;;  %v754_v53 = vpack.c.bf16 %v3118_v59, %v3118_v59  ;;  %v548_v57 = vadd.s32 8, %v2990_v5  ;;  %v915_v9 = vunpack.c.l.b16 %v755_v56 }
  0x27   : > { %2801 = vmatpush.bf16.msra.mxu2 %v2666_v47  ;;  %1734 = vmatpush.bf16.msra.mxu0 %v2666_v47  ;;  %v750_v47 = vpack.c.bf16 %v700_v39, %v700_v39  ;;  %v890_v4 = vunpack.c.l.b16 %v746_v51  ;;  %v770_v39 = vsel %vm668_vm0, %v3043_v21, %v3138_v16  ;;  %v2707_v21 = vld [vmem:[%s3706_s4 + $0x150] sm:$0xff] }
  0x28   : > { %2809 = vmatpush.bf16.msra.mxu3 %v2674_v48  ;;  %1763 = vmatpush.bf16.msra.mxu1 %v2674_v48  ;;  %v896_v22 = vpack.c.b16 %v889_v2, %v888_v7  ;;  %v751_v48 = vpack.c.bf16 %v685_v38, %v685_v38  ;;  %v2709_v2 = vld [vmem:[%s3706_s4 + $0x160] sm:$0xff]  ;;  %v914_v7 = vunpack.c.l.b16 %v754_v53  ;;  %v566_v10 = vand.u32 15, %v548_v57 }
  0x29   : > { %v894_v62 = vunpack.c.l.b16 %v750_v47  ;;  %v2682_v47 = vld [vmem:[%s3706_s4 + $0x88] sm:$0xff]  ;;  %v550_v53 = vadd.s32 24, %v2990_v5 }
  0x2a   : > { %v3217_v63 = vunpack.c.l.b16 %v751_v48  ;;  %vm3250_vm7 = vcmp.le.s32.totalorder %v566_v10, 14  ;;  %v2690_v48 = vld [vmem:[%s3706_s4 + $0xc8] sm:$0xff] }
  0x2b   : > { %2802 = vmatpush.bf16.msra.mxu2 %v2665_v0  ;;  %1735 = vmatpush.bf16.msra.mxu0 %v2665_v0  ;;  %v918_v0 = vunpack.c.l.b16 %v758_v49 }
  0x2c   : > { %2810 = vmatpush.bf16.msra.mxu3 %v2673_v1  ;;  %1764 = vmatpush.bf16.msra.mxu1 %v2673_v1  ;;  %v919_v1 = vunpack.c.l.b16 %v759_v18 }
  0x2e   : > { %1746 = vmatmul.bf16.vlgmr.msra.gmra.mxu2 %v898_v17  ;;  %1736 = vmatmul.bf16.vlgmr.msra.gmra.mxu0 %v896_v22  ;;  %v2684_v17 = vld [vmem:[%s3706_s4 + $0x98] sm:$0xff] }
  0x2f   : > { %1786 = vmatpush.bf16.msrb.mxu2 %v2688_v6  ;;  %1775 = vmatmul.bf16.vlgmr.msra.gmra.mxu3 %v3141_v19  ;;  %v3222_v6 = vunpack.c.l.b16 %v747_v52  ;;  %v2692_v22 = vld [vmem:[%s3706_s4 + $0xd8] sm:$0xff]  ;;  %v2706_v52 = vld [vmem:[%s3706_s4 + $0x148] sm:$0xff] }
  0x30   : > { %1815 = vmatpush.bf16.msrb.mxu3 %v2696_v11  ;;  %1873 = vmatpush.bf16.msrb.mxu1 %v2712_v23  ;;  %v712_v11 = vrot.slane %v3093_v41, 1  ;;  %v899_v23 = vpack.c.b16 %v3217_v63, %v894_v62  ;;  %v718_v41 = vrot.slane %v3031_v14, 1 }
  0x31   : > { %1844 = vmatpush.bf16.msrb.mxu0 %v2704_v29  ;;  %1765 = vmatmul.bf16.vlgmr.msra.gmra.mxu1 %v920_v31  ;;  %v3236_v29 = vpack.c.b16 %v919_v1, %v918_v0  ;;  %v716_v31 = vrot.slane %v3029_v13, 1  ;;  %v897_v59 = vpack.c.b16 %v3222_v6, %v890_v4  ;;  %v2728_v4 = vld [vmem:[%s3706_s4 + $0x1f8] sm:$0xff] }
  0x32   : > { %v715_v38 = vsel %vm710_vm6, %v712_v11, %v714_v12 }
  0x33   : > { %1787 = vmatpush.bf16.msrb.mxu2 %v2687_v34  ;;  %v2708_v34 = vld [vmem:[%s3706_s4 + $0x158] sm:$0xff]  ;;  %v3268_v43 = vsel %vm710_vm6, %v716_v31, %v718_v41  ;;  %v737_v44 = vsel %vm3250_vm7, %v715_v38, 0.0  ;;  %v717_v28 = vsel %vm710_vm6, %v714_v12, %v716_v31  ;;  %v720_v31 = vrot.slane %v3033_v15, 1  ;;  %v2735_v15 = vld [vmem:[%s3706_s4 + $0x230] sm:$0xff] }
  0x34   : > { %1816 = vmatpush.bf16.msrb.mxu3 %v2695_v35  ;;  %1874 = vmatpush.bf16.msrb.mxu1 %v2711_v24  ;;  %v711_v35 = vrot.slane %v3091_v40, 1  ;;  %v3248_v24 = vpack.c.b16 %v915_v9, %v914_v7  ;;  %v2683_v40 = vld [vmem:[%s3706_s4 + $0x90] sm:$0xff]  ;;  %v795_v49 = vsel %vm3250_vm7, %v3268_v43, 0.0  ;;  %v762_v56 = vpack.c.bf16 %v717_v28, %v717_v28  ;;  %v2705_v7 = vld [vmem:[%s3706_s4 + $0x140] sm:$0xff]  ;;  %v2744_v12 = vld [vmem:[%s3706_s4 + $0x278] sm:$0xff] }
  0x35   : > { %1845 = vmatpush.bf16.msrb.mxu0 %v2703_v42  ;;  %v2691_v42 = vld [vmem:[%s3706_s4 + $0xd0] sm:$0xff]  ;;  %v813_v57 = vpack.c.bf16 %v795_v49, %v795_v49  ;;  %v2697_v9 = vld [vmem:[%s3706_s4 + $0x100] sm:$0xff] }
  0x36   : > { %v713_v16 = vsel %vm710_vm6, %v711_v35, %v712_v11  ;;  %v3317_v10 = vunpack.c.l.b16 %v762_v56  ;;  %v2743_v38 = vld [vmem:[%s3706_s4 + $0x270] sm:$0xff]  ;;  %v2741_v56 = vld [vmem:[%s3706_s4 + $0x260] sm:$0xff] }
  0x37   : > { %1788 = vmatpush.bf16.msrb.mxu2 %v2686_v45  ;;  %v778_v45 = vsel %vm3062_vm2, %v770_v39, 0.0  ;;  %v760_v18 = vpack.c.bf16 %v713_v16, %v713_v16  ;;  %v991_v11 = vunpack.c.l.b16 %v813_v57  ;;  %v2791_v16 = vld [vmem:[%s3013_s16 + $0x18] sm:$0xff]   ;;  %s2313_s16 = sshll.u32 %s3745_s19, 1 }
  0x38   : > { %1817 = vmatpush.bf16.msrb.mxu3 %v2694_v46  ;;  %1875 = vmatpush.bf16.msrb.mxu1 %v2710_v50  ;;  %v2699_v46 = vld [vmem:[%s3706_s4 + $0x110] sm:$0xff]  ;;  %v761_v50 = vpack.c.bf16 %v737_v44, %v737_v44  ;;  %v802_v51 = vpack.c.bf16 %v778_v45, %v778_v45  ;;  %v3381_v28 = vunpack.c.h.bf16 %v2791_v16  ;;  %s502_s24 = scalar_lea.vmem %s3709_s7, %s2313_s16 }
  0x39   : > { %1846 = vmatpush.bf16.msrb.mxu0 %v2702_v54  ;;  %v2698_v54 = vld [vmem:[%s3706_s4 + $0x108] sm:$0xff]  ;;  %v936_v62 = vunpack.c.l.b16 %v760_v18  ;;  %v2725_v18 = vld [vmem:[%s3706_s4 + $0x1e0] sm:$0xff] }
  0x3a   : > { %v937_v0 = vunpack.c.l.b16 %v761_v50  ;;  %v960_v1 = vunpack.c.l.b16 %v802_v51  ;;  %v552_v50 = vadd.s32 40, %v2990_v5  ;;  %v773_v57 = vrot.slane %v3381_v28, 7 }
  0x3b   : > { %1789 = vmatpush.bf16.msrb.mxu2 %v2685_v58  ;;  %v2681_v58 = vld [vmem:[%s3706_s4 + $0x80] sm:$0xff] }
  0x3c   : > { %1818 = vmatpush.bf16.msrb.mxu3 %v2693_v60  ;;  %1876 = vmatpush.bf16.msrb.mxu1 %v2709_v2  ;;  %v2689_v60 = vld [vmem:[%s3706_s4 + $0xc0] sm:$0xff]  ;;  %v2720_v2 = vld [vmem:[%s3706_s4 + $0x1b8] sm:$0xff] }
  0x3d   : > { %1847 = vmatpush.bf16.msrb.mxu0 %v2701_v8  ;;  %v580_v8 = vand.u32 15, %v550_v53 }
  0x3e   : > { %1751 = vmatmul.bf16.gmra.mxu2 %v899_v23  ;;  %1741 = vmatmul.bf16.gmra.mxu0 %v897_v59  ;;  %v968_v23 = vpack.c.b16 %v3222_v6, %v960_v1  ;;  %v722_v59 = vrot.slane %v3113_v55, 1  ;;  %v2727_v6 = vld [vmem:[%s3706_s4 + $0x1f0] sm:$0xff]  ;;  %v2713_v55 = vld [vmem:[%s3706_s4 + $0x180] sm:$0xff] }
  0x3f   : > { %1790 = vmatpush.bf16.msrb.mxu2 %v2684_v17  ;;  %1780 = vmatmul.bf16.gmra.mxu3 %v3236_v29  ;;  %v2736_v17 = vld [vmem:[%s3706_s4 + $0x238] sm:$0xff]  ;;  %vm3331_vm8 = vcmp.le.s32.totalorder %v580_v8, 14 }
  0x40   : > { %1819 = vmatpush.bf16.msrb.mxu3 %v2692_v22  ;;  %1877 = vmatpush.bf16.msrb.mxu1 %v2708_v34  ;;  %v944_v22 = vpack.c.b16 %v937_v0, %v936_v62  ;;  %v2719_v34 = vld [vmem:[%s3706_s4 + $0x1b0] sm:$0xff]  ;;  %v739_v39 = vsel %vm3331_vm8, %v3268_v43, 0.0  ;;  %v2726_v43 = vld [vmem:[%s3706_s4 + $0x1e8] sm:$0xff]  ;;  %v2716_v62 = vld [vmem:[%s3706_s4 + $0x198] sm:$0xff] }
  0x41   : > { %1848 = vmatpush.bf16.msrb.mxu0 %v2700_v37  ;;  %1770 = vmatmul.bf16.gmra.mxu1 %v3248_v24  ;;  %v998_v37 = vpack.c.b16 %v991_v11, %v3317_v10  ;;  %v763_v44 = vpack.c.bf16 %v739_v39, %v739_v39 }
  0x43   : > { %1791 = vmatpush.bf16.msrb.mxu2 %v2683_v40  ;;  %v780_v40 = vsel %vm3165_vm5, %v3060_v27, 0.0  ;;  %v721_v27 = vsel %vm710_vm6, %v718_v41, %v720_v31  ;;  %v2717_v41 = vld [vmem:[%s3706_s4 + $0x1a0] sm:$0xff] }
  0x44   : > { %1820 = vmatpush.bf16.msrb.mxu3 %v2691_v42  ;;  %1878 = vmatpush.bf16.msrb.mxu1 %v2707_v21  ;;  %v3354_v42 = vsel %vm710_vm6, %v720_v31, %v722_v59  ;;  %v2718_v21 = vld [vmem:[%s3706_s4 + $0x1a8] sm:$0xff]  ;;  %v804_v45 = vpack.c.bf16 %v780_v40, %v780_v40  ;;  %v764_v14 = vpack.c.bf16 %v721_v27, %v721_v27  ;;  %v782_v40 = vsel %vm3053_vm1, %v3157_v33, 0.0  ;;  %v2739_v27 = vld [vmem:[%s3706_s4 + $0x250] sm:$0xff] }
  0x45   : > { %1849 = vmatpush.bf16.msrb.mxu0 %v2699_v46  ;;  %v2734_v46 = vld [vmem:[%s3706_s4 + $0x228] sm:$0xff] }
  0x46   : > { %v962_v53 = vunpack.c.l.b16 %v804_v45 }
  0x47   : > { %1792 = vmatpush.bf16.msrb.mxu2 %v2682_v47  ;;  %v2742_v47 = vld [vmem:[%s3706_s4 + $0x268] sm:$0xff] }
  0x48   : > { %1821 = vmatpush.bf16.msrb.mxu3 %v2690_v48  ;;  %1879 = vmatpush.bf16.msrb.mxu1 %v2706_v52  ;;  %v3376_v48 = vunpack.c.l.bf16 %v2791_v16  ;;  %v939_v52 = vunpack.c.l.b16 %v763_v44  ;;  %v969_v11 = vpack.c.b16 %v3120_v61, %v962_v53  ;;  %v2731_v16 = vld [vmem:[%s3706_s4 + $0x210] sm:$0xff] }
  0x49   : > { %1850 = vmatpush.bf16.msrb.mxu0 %v2698_v54  ;;  %v2733_v54 = vld [vmem:[%s3706_s4 + $0x220] sm:$0xff] }
  0x4a   : > { %v771_v51 = vrot.slane %v3376_v48, 7 }
  0x4b   : > { %1793 = vmatpush.bf16.msrb.mxu2 %v2681_v58 }
  0x4c   : > { %1822 = vmatpush.bf16.msrb.mxu3 %v2689_v60  ;;  %1880 = vmatpush.bf16.msrb.mxu1 %v2705_v7  ;;  %v3398_v58 = vsel %vm668_vm0, %v684_v25, %v771_v51  ;;  %v3400_v60 = vunpack.c.l.b16 %v764_v14  ;;  %v774_v0 = vsel %vm668_vm0, %v771_v51, %v773_v57  ;;  %v2724_v25 = vld [vmem:[%s3706_s4 + $0x1d8] sm:$0xff]  ;;  %v2738_v14 = vld [vmem:[%s3706_s4 + $0x248] sm:$0xff] }
  0x4d   : > { %1851 = vmatpush.bf16.msrb.mxu0 %v2697_v9  ;;  %v784_v1 = vsel %vm3150_vm4, %v3398_v58, 0.0  ;;  %v809_v8 = vpack.c.bf16 %v774_v0, %v774_v0  ;;  %v945_v9 = vpack.c.b16 %v939_v52, %v3317_v10  ;;  %v2715_v10 = vld [vmem:[%s3706_s4 + $0x190] sm:$0xff] }
  0x4e   : > { %1794 = vmatmul.bf16.vlgmr.msrb.gmra.mxu2 %v944_v22  ;;  %v808_v7 = vpack.c.bf16 %v784_v1, %v784_v1  ;;  %v724_v22 = vrot.slane %v3128_v3, 1  ;;  %v2723_v3 = vld [vmem:[%s3706_s4 + $0x1d0] sm:$0xff]  ;;  %v788_v1 = vrot.slane %v3381_v28, 1 }
  0x4f   : > { %1902 = vmatpush.bf16.msra.mxu2 %v2720_v2  ;;  %1823 = vmatmul.bf16.vlgmr.msrb.gmra.mxu3 %v968_v23  ;;  %v786_v23 = vrot.slane %v3376_v48, 1 }
  0x50   : > { %1931 = vmatpush.bf16.msra.mxu3 %v2728_v4  ;;  %1989 = vmatpush.bf16.msra.mxu1 %v2744_v12  ;;  %v594_v4 = vand.u32 15, %v552_v50  ;;  %v2732_v12 = vld [vmem:[%s3706_s4 + $0x218] sm:$0xff]  ;;  %v3424_v31 = vunpack.c.l.b16 %v808_v7  ;;  %v725_v44 = vsel %vm710_vm6, %v722_v59, %v724_v22  ;;  %v2729_v50 = vld [vmem:[%s3706_s4 + $0x200] sm:$0xff] }
  0x51   : > { %1960 = vmatpush.bf16.msra.mxu0 %v2736_v17  ;;  %1881 = vmatmul.bf16.vlgmr.msrb.gmra.mxu1 %v998_v37  ;;  %v2740_v17 = vld [vmem:[%s3706_s4 + $0x258] sm:$0xff]  ;;  %v766_v59 = vpack.c.bf16 %v725_v44, %v725_v44  ;;  %v854_v44 = vpack.c.bf16 %v3073_v30, %v3073_v30  ;;  %v834_v30 = vsel %vm3053_vm1, %v3398_v58, 0.0  ;;  %v2661_v58 = vld [vmem:[%s3566_s9] sm:$0xff] }
  0x52   : > { %1852 = vmatmul.bf16.vlgmr.msrb.gmra.mxu0 %v3248_v24  ;;  %v797_v24 = vsel %vm3331_vm8, %v3354_v42, 0.0  ;;  %vm3432_vm9 = vcmp.le.s32.totalorder %v594_v4, 14 }
  0x53   : > { %1903 = vmatpush.bf16.msra.mxu2 %v2719_v34  ;;  %v815_v49 = vpack.c.bf16 %v797_v24, %v797_v24  ;;  %v3426_v34 = vunpack.c.l.b16 %v809_v8  ;;  %v741_v39 = vsel %vm3432_vm9, %v3354_v42, 0.0  ;;  %v2730_v24 = vld [vmem:[%s3706_s4 + $0x208] sm:$0xff] }
  0x54   : > { %1932 = vmatpush.bf16.msra.mxu3 %v2727_v6  ;;  %1990 = vmatpush.bf16.msra.mxu1 %v2743_v38  ;;  %v3444_v38 = vsel %vm710_vm6, %v724_v22, %v786_v23  ;;  %v832_v6 = vsel %vm3165_vm5, %v3157_v33, 0.0 }
  0x55   : > { %1961 = vmatpush.bf16.msra.mxu0 %v2735_v15  ;;  %v993_v2 = vunpack.c.l.b16 %v815_v49  ;;  %v971_v15 = vpack.c.b16 %v3426_v34, %v3424_v31  ;;  %v799_v45 = vsel %vm3432_vm9, %v3444_v38, 0.0  ;;  %v554_v49 = vadd.s32 56, %v2990_v5 }
  0x56   : > { %v3490_v5 = vunpack.c.l.b16 %v766_v59 }
  0x57   : > { %1904 = vmatpush.bf16.msra.mxu2 %v2718_v21  ;;  %v999_v37 = vpack.c.b16 %v993_v2, %v3400_v60  ;;  %v2714_v21 = vld [vmem:[%s3706_s4 + $0x188] sm:$0xff] }
  0x58   : > { %1933 = vmatpush.bf16.msra.mxu3 %v2726_v43  ;;  %1991 = vmatpush.bf16.msra.mxu1 %v2742_v47  ;;  %v2722_v43 = vld [vmem:[%s3706_s4 + $0x1c8] sm:$0xff]  ;;  %v806_v47 = vpack.c.bf16 %v782_v40, %v782_v40 }
  0x59   : > { %1962 = vmatpush.bf16.msra.mxu0 %v2734_v46  ;;  %v765_v46 = vpack.c.bf16 %v741_v39, %v741_v39 }
  0x5a   : > { %v964_v52 = vunpack.c.l.b16 %v806_v47 }
  0x5b   : > { %1905 = vmatpush.bf16.msra.mxu2 %v2717_v41  ;;  %v817_v41 = vpack.c.bf16 %v799_v45, %v799_v45  ;;  %v941_v51 = vunpack.c.l.b16 %v765_v46  ;;  %v2766_v45 = vld [vmem:[%s471_s21] sm:$0xff]  }
  0x5c   : > { %1934 = vmatpush.bf16.msra.mxu3 %v2725_v18  ;;  %1992 = vmatpush.bf16.msra.mxu1 %v2741_v56  ;;  %v2721_v18 = vld [vmem:[%s3706_s4 + $0x1c0] sm:$0xff]  ;;  %v3493_v56 = vrot.slane %v2893_v20, 1  ;;  %v970_v0 = vpack.c.b16 %v3217_v63, %v964_v52  ;;  %v2767_v31 = vunpack.c.l.bf16 %v2766_v45 }
  0x5d   : > { %1963 = vmatpush.bf16.msra.mxu0 %v2733_v54  ;;  %v995_v53 = vunpack.c.l.b16 %v817_v41  ;;  %v608_v54 = vand.u32 15, %v554_v49 }
  0x5e   : > { %1799 = vmatmul.bf16.gmra.mxu2 %v945_v9  ;;  %v727_v20 = vsel %vm710_vm6, %v724_v22, %v3493_v56  ;;  %v790_v7 = vsel %vm710_vm6, %v788_v1, %v3493_v56  ;;  %v789_v9 = vsel %vm710_vm6, %v786_v23, %v788_v1  ;;  %v811_v22 = vpack.c.bf16 %v3381_v28, %v3381_v28 }
  0x5f   : > { %1906 = vmatpush.bf16.msra.mxu2 %v2716_v62  ;;  %1828 = vmatmul.bf16.gmra.mxu3 %v969_v11  ;;  %v946_v62 = vpack.c.b16 %v941_v51, %v3400_v60  ;;  %v1000_v2 = vpack.c.b16 %v995_v53, %v3490_v5  ;;  %vm3500_vm10 = vcmp.le.s32.totalorder %v608_v54, 14  ;;  %v2768_v54 = vunpack.c.h.bf16 %v2766_v45 }
  0x60   : > { %1935 = vmatpush.bf16.msra.mxu3 %v2724_v25  ;;  %1993 = vmatpush.bf16.msra.mxu1 %v2740_v17  ;;  %v2737_v25 = vld [vmem:[%s3706_s4 + $0x240] sm:$0xff]  ;;  %v743_v8 = vsel %vm3500_vm10, %v727_v20, 0.0  ;;  %v801_v11 = vsel %vm3500_vm10, %v790_v7, 0.0  ;;  %v810_v17 = vpack.c.bf16 %v3376_v48, %v3376_v48  ;;  %v979_v40 = vunpack.c.l.b16 %v811_v22 }
  0x61   : > { %1964 = vmatpush.bf16.msra.mxu0 %v2732_v12  ;;  %1886 = vmatmul.bf16.gmra.mxu1 %v999_v37  ;;  %v767_v12 = vpack.c.bf16 %v743_v8, %v743_v8  ;;  %v819_v37 = vpack.c.bf16 %v801_v11, %v801_v11  ;;  %v2662_v11 = vld [vmem:[%s3566_s9 + $0x8] sm:$0xff] }
  0x62   : > { %1857 = vmatmul.bf16.gmra.mxu0 %v3141_v19  ;;  %v978_v39 = vunpack.c.l.b16 %v810_v17  ;;  %v2663_v17 = vld [vmem:[%s3566_s9 + $0x10] sm:$0xff] }
  0x63   : > { %1907 = vmatpush.bf16.msra.mxu2 %v2715_v10  ;;  %v818_v10 = vpack.c.bf16 %v789_v9, %v789_v9 }
  0x64   : > { %1936 = vmatpush.bf16.msra.mxu3 %v2723_v3  ;;  %1994 = vmatpush.bf16.msra.mxu1 %v2739_v27  ;;  %v943_v3 = vunpack.c.l.b16 %v767_v12  ;;  %v847_v27 = vsel %vm3250_vm7, %v3354_v42, 0.0 }
  0x65   : > { %1965 = vmatpush.bf16.msra.mxu0 %v2731_v16  ;;  %v3528_v23 = vunpack.c.l.b16 %v818_v10 }
  0x66   : > { %v947_v16 = vpack.c.b16 %v943_v3, %v3490_v5 }
  0x67   : > { %1908 = vmatpush.bf16.msra.mxu2 %v2714_v21  ;;  %v997_v21 = vunpack.c.l.b16 %v819_v37 }
  0x68   : > { %1937 = vmatpush.bf16.msra.mxu3 %v2722_v43  ;;  %1995 = vmatpush.bf16.msra.mxu1 %v2738_v14  ;;  %v3532_v43 = vpack.c.b16 %v979_v40, %v978_v39  ;;  %v1014_v14 = vunpack.c.l.b16 %v854_v44 }
  0x69   : > { %1966 = vmatpush.bf16.msra.mxu0 %v2730_v24  ;;  %v1001_v48 = vpack.c.b16 %v997_v21, %v3528_v23  ;;  %v865_v24 = vpack.c.bf16 %v847_v27, %v847_v27 }
  0x6a   : > { %v1022_v49 = vpack.c.b16 %v3120_v61, %v1014_v14  ;;  %v849_v61 = vsel %vm3331_vm8, %v3444_v38, 0.0 }
  0x6b   : > { %1909 = vmatpush.bf16.msra.mxu2 %v2713_v55  ;;  %v1045_v42 = vunpack.c.l.b16 %v865_v24  ;;  %v858_v55 = vpack.c.bf16 %v834_v30, %v834_v30 }
  0x6c   : > { %1938 = vmatpush.bf16.msra.mxu3 %v2721_v18  ;;  %1996 = vmatpush.bf16.msra.mxu1 %v2737_v25 }
  0x6d   : > { %1967 = vmatpush.bf16.msra.mxu0 %v2729_v50  ;;  %v1018_v18 = vunpack.c.l.b16 %v858_v55  ;;  %v1052_v26 = vpack.c.b16 %v1045_v42, %v3400_v60  ;;  %v856_v60 = vpack.c.bf16 %v832_v6, %v832_v6 }
  0x6e   : > { %1804 = vmatmul.bf16.gmra.mxu2 %v946_v62 }
  0x6f   : > { %1833 = vmatmul.bf16.gmra.mxu3 %v970_v0  ;;  %v1024_v51 = vpack.c.b16 %v3426_v34, %v1018_v18  ;;  %v867_v34 = vpack.c.bf16 %v849_v61, %v849_v61 }
  0x71   : > { %1891 = vmatmul.bf16.gmra.mxu1 %v1000_v2  ;;  %v1047_v36 = vunpack.c.l.b16 %v867_v34 }
  0x72   : > { %1862 = vmatmul.bf16.gmra.mxu0 %v3236_v29 }
  0x73   : > { %v1053_v9 = vpack.c.b16 %v1047_v36, %v3490_v5 }
  0x7e   : > { %1809 = vmatmul.bf16.gmra.mxu2 %v947_v16 }
  0x7f   : > { %1838 = vmatmul.bf16.gmra.mxu3 %v971_v15  ;;  %v542_v15 = vstv %s541_s22 }
  0x80   : > { %vm3548_vm11 = vcmp.eq.s32.totalorder %v542_v15, 1 }
  0x81   : > { %1896 = vmatmul.bf16.gmra.mxu1 %v1001_v48  ;;  %v3554_v47 = vsel %vm3548_vm11, %v2767_v31, 0.0  ;;  %v545_v62 = vsel %vm3548_vm11, %v2768_v54, 0.0 }
  0x82   : > { %1867 = vmatmul.bf16.gmra.mxu0 %v3532_v43  ;;  %v838_v13 = vrot.slane %v3554_v47, 1  ;;  %v825_v0 = vrot.slane %v545_v62, 7  ;;  %v840_v28 = vrot.slane %v545_v62, 1  ;;  %v863_v21 = vpack.c.bf16 %v545_v62, %v545_v62 }
  0x84   : > { %v839_v59 = vsel %vm710_vm6, %v788_v1, %v838_v13  ;;  %v1016_v1 = vunpack.c.l.b16 %v856_v60  ;;  %v842_v10 = vsel %vm710_vm6, %v840_v28, %v3493_v56  ;;  %v1033_v24 = vunpack.c.l.b16 %v863_v21 }
  0x85   : > { %v851_v41 = vsel %vm3432_vm9, %v839_v59, 0.0  ;;  %v853_v37 = vsel %vm3500_vm10, %v842_v10, 0.0  ;;  %v2664_v59 = vld [vmem:[%s3566_s9 + $0x18] sm:$0xff] }
  0x86   : > { %v869_v50 = vpack.c.bf16 %v851_v41, %v851_v41  ;;  %v1023_v25 = vpack.c.b16 %v3217_v63, %v1016_v1  ;;  %v871_v56 = vpack.c.bf16 %v853_v37, %v853_v37 }
  0x88   : > { %v1049_v52 = vunpack.c.l.b16 %v869_v50  ;;  %v1051_v15 = vunpack.c.l.b16 %v871_v56 }
  0x8a   : > { %v1054_v53 = vpack.c.b16 %v1049_v52, %v3528_v23  ;;  %v862_v23 = vpack.c.bf16 %v3554_v47, %v3554_v47 }
  0x8c   : > { %v1032_v45 = vunpack.c.l.b16 %v862_v23 }
  0x8e   : > { %1910 = vmatmul.bf16.vlgmr.msra.gmra.mxu2 %v1022_v49  ;;  %v1034_v42 = vpack.c.b16 %v1033_v24, %v1032_v45 }
  0x8f   : > { %1939 = vmatmul.bf16.vlgmr.msra.gmra.mxu3 %v3141_v19  ;;  %v823_v19 = vrot.slane %v3554_v47, 7 }
  0x91   : > { %1997 = vmatmul.bf16.vlgmr.msra.gmra.mxu1 %v2661_v58  ;;  %v824_v33 = vsel %vm668_vm0, %v773_v57, %v823_v19  ;;  %v826_v2 = vsel %vm668_vm0, %v823_v19, %v825_v0 }
  0x92   : > { %1968 = vmatmul.bf16.vlgmr.msra.gmra.mxu0 %v1052_v26  ;;  %v836_v35 = vsel %vm3150_vm4, %v824_v33, 0.0  ;;  %v861_v20 = vpack.c.bf16 %v826_v2, %v826_v2 }
  0x93   : > { %v860_v38 = vpack.c.bf16 %v836_v35, %v836_v35 }
  0x94   : > { %v1021_v8 = vunpack.c.l.b16 %v861_v20 }
  0x95   : > { %v1020_v7 = vunpack.c.l.b16 %v860_v38 }
  0x97   : > { %v1025_v12 = vpack.c.b16 %v1021_v8, %v1020_v7 }
  0x9e   : > { %1915 = vmatmul.bf16.gmra.mxu2 %v1023_v25 }
  0x9f   : > { %1944 = vmatmul.bf16.gmra.mxu3 %v3236_v29  ;;  %v841_v29 = vsel %vm710_vm6, %v838_v13, %v840_v28 }
  0xa0   : > { %v870_v16 = vpack.c.bf16 %v841_v29, %v841_v29 }
  0xa1   : > { %2002 = vmatmul.bf16.gmra.mxu1 %v2662_v11 }
  0xa2   : > { %1973 = vmatmul.bf16.gmra.mxu0 %v1053_v9  ;;  %v1050_v4 = vunpack.c.l.b16 %v870_v16 }
  0xa4   : > { %v1055_v47 = vpack.c.b16 %v1051_v15, %v1050_v4 }
  0xab   : > { %v1737_v57 = vpop.f32.mrf.mxu0 }
  0xac   : > { %v1738_v22 = vadd.f32 %v2852_v32, %v1737_v57 }
  0xae   : > { %v1766_v63 = vpop.f32.mrf.mxu1  ;;  %1920 = vmatmul.bf16.gmra.mxu2 %v1024_v51 }
  0xaf   : > { %1949 = vmatmul.bf16.gmra.mxu3 %v3532_v43  ;;  %v1767_v5 = vadd.f32 %v1766_v63, %v1738_v22 }
  0xb1   : > { %2007 = vmatmul.bf16.gmra.mxu1 %v2663_v17  ;;  %v1747_v3 = vpop.f32.mrf.mxu2 }
  0xb2   : > { %1978 = vmatmul.bf16.gmra.mxu0 %v1054_v53  ;;  %v1776_v39 = vpop.f32.mrf.mxu3  ;;  %v1748_v40 = vadd.f32 %v2852_v32, %v1747_v3 }
  0xb3   : > { %v1739_v43 = vpop.f32.mrf.mxu0 }
  0xb4   : > { %v3607_v48 = vadd.f32 %v1776_v39, %v1748_v40  ;;  %v1740_v27 = vadd.f32 %v2852_v32, %v1739_v43 }
  0xb6   : > { %v1768_v44 = vpop.f32.mrf.mxu1 }
  0xb7   : > { %v3609_v31 = vadd.f32 %v1768_v44, %v1740_v27 }
  0xb9   : > { %v1749_v46 = vpop.f32.mrf.mxu2 }
  0xba   : > { %v1778_v14 = vpop.f32.mrf.mxu3  ;;  %v1750_v13 = vadd.f32 %v2852_v32, %v1749_v46 }
  0xbb   : > { %v1742_v55 = vpop.f32.mrf.mxu0 }
  0xbc   : > { %v3611_v30 = vadd.f32 %v1778_v14, %v1750_v13  ;;  %v1743_v41 = vadd.f32 %v2852_v32, %v1742_v55 }
  0xbe   : > { %v1771_v49 = vpop.f32.mrf.mxu1  ;;  %1925 = vmatmul.bf16.gmra.mxu2 %v1025_v12 }
  0xbf   : > { %1954 = vmatmul.bf16.gmra.mxu3 %v1034_v42  ;;  %v1772_v18 = vadd.f32 %v1771_v49, %v1743_v41 }
  0xc1   : > { %2012 = vmatmul.bf16.gmra.mxu1 %v2664_v59  ;;  %v1752_v50 = vpop.f32.mrf.mxu2 }
  0xc2   : > { %1983 = vmatmul.bf16.gmra.mxu0 %v1055_v47  ;;  %v1781_v26 = vpop.f32.mrf.mxu3  ;;  %v1753_v58 = vadd.f32 %v2852_v32, %v1752_v50 }
  0xc3   : > { %v1744_v52 = vpop.f32.mrf.mxu0 }
  0xc4   : > { %v3614_v51 = vadd.f32 %v1781_v26, %v1753_v58  ;;  %v1745_v53 = vadd.f32 %v2852_v32, %v1744_v52 }
  0xc6   : > { %v1773_v6 = vpop.f32.mrf.mxu1 }
  0xc7   : > { %v3616_v61 = vadd.f32 %v1773_v6, %v1745_v53 }
  0xc9   : > { %v1754_v60 = vpop.f32.mrf.mxu2 }
  0xca   : > { %v1783_v54 = vpop.f32.mrf.mxu3  ;;  %v1755_v34 = vadd.f32 %v2852_v32, %v1754_v60 }
  0xcc   : > { %v3618_v62 = vadd.f32 %v1783_v54, %v1755_v34 }
  0xce   : > { %v1882_v0 = vpop.f32.mrf.mxu1 }
  0xcf   : > { %v1853_v19 = vpop.f32.mrf.mxu0 }
  0xd1   : > { %v1795_v1 = vpop.f32.mrf.mxu2 }
  0xd2   : > { %v1824_v33 = vpop.f32.mrf.mxu3  ;;  %v1796_v36 = vadd.f32 %v1795_v1, %v1767_v5 }
  0xd4   : > { %v1825_v2 = vadd.f32 %v1824_v33, %v1796_v36 }
  0xd6   : > { %v1884_v38 = vpop.f32.mrf.mxu1  ;;  %v1854_v20 = vadd.f32 %v1853_v19, %v1825_v2 }
  0xd7   : > { %v1855_v35 = vpop.f32.mrf.mxu0 }
  0xd8   : > { %v1883_v25 = vadd.f32 %v1882_v0, %v1854_v20 }
  0xd9   : > { %v1797_v7 = vpop.f32.mrf.mxu2 }
  0xda   : > { %v1826_v8 = vpop.f32.mrf.mxu3  ;;  %v1798_v47 = vadd.f32 %v1797_v7, %v3609_v31 }
  0xdc   : > { %v1827_v41 = vadd.f32 %v1826_v8, %v1798_v47 }
  0xde   : > { %v1887_v11 = vpop.f32.mrf.mxu1  ;;  %v1856_v26 = vadd.f32 %v1855_v35, %v1827_v41 }
  0xdf   : > { %v1858_v9 = vpop.f32.mrf.mxu0 }
  0xe0   : > { %v1885_v60 = vadd.f32 %v1884_v38, %v1856_v26 }
  0xe1   : > { %v1800_v12 = vpop.f32.mrf.mxu2 }
  0xe2   : > { %v1829_v28 = vpop.f32.mrf.mxu3  ;;  %v1801_v57 = vadd.f32 %v1800_v12, %v1772_v18 }
  0xe4   : > { %v1830_v32 = vadd.f32 %v1829_v28, %v1801_v57 }
  0xe6   : > { %v3622_v22 = vpop.f32.mrf.mxu1  ;;  %v1859_v63 = vadd.f32 %v1858_v9, %v1830_v32 }
  0xe7   : > { %v3620_v17 = vpop.f32.mrf.mxu0 }
  0xe8   : > { %v1888_v10 = vadd.f32 %v1887_v11, %v1859_v63 }
  0xe9   : > { %v1802_v5 = vpop.f32.mrf.mxu2 }
  0xea   : > { %v1831_v29 = vpop.f32.mrf.mxu3  ;;  %v1803_v0 = vadd.f32 %v1802_v5, %v3616_v61 }
  0xec   : > { %v1832_v35 = vadd.f32 %v1831_v29, %v1803_v0 }
  0xee   : > { %v1892_v3 = vpop.f32.mrf.mxu1  ;;  %v1861_v12 = vadd.f32 %v3620_v17, %v1832_v35 }
  0xef   : > { %v1863_v37 = vpop.f32.mrf.mxu0 }
  0xf1   : > { %v1805_v39 = vpop.f32.mrf.mxu2 }
  0xf2   : > { %v1834_v40 = vpop.f32.mrf.mxu3  ;;  %v1806_v23 = vadd.f32 %v1805_v39, %v3607_v48 }
  0xf4   : > { %v1835_v21 = vadd.f32 %v1834_v40, %v1806_v23  ;;  %v1890_v23 = vadd.f32 %v3622_v22, %v1861_v12 }
  0xf6   : > { %v3627_v56 = vpop.f32.mrf.mxu1  ;;  %v1864_v43 = vadd.f32 %v1863_v37, %v1835_v21 }
  0xf7   : > { %v3625_v16 = vpop.f32.mrf.mxu0 }
  0xf8   : > { %v3629_v27 = vadd.f32 %v1892_v3, %v1864_v43 }
  0xf9   : > { %v3631_v44 = vpop.f32.mrf.mxu2 }
  0xfa   : > { %v3633_v45 = vpop.f32.mrf.mxu3  ;;  %v1808_v17 = vadd.f32 %v3631_v44, %v3611_v30 }
  0xfc   : > { %v1837_v26 = vadd.f32 %v3633_v45, %v1808_v17 }
  0xfe   : > { %v3637_v4 = vpop.f32.mrf.mxu1  ;;  %v1866_v30 = vadd.f32 %v3625_v16, %v1837_v26 }
  0xff   : > { %v3635_v24 = vpop.f32.mrf.mxu0 }
 0x100   : > { %v1895_v35 = vadd.f32 %v3627_v56, %v1866_v30 }
 0x101   : > { %v3639_v15 = vpop.f32.mrf.mxu2 }
 0x102   : > { %v3641_v48 = vpop.f32.mrf.mxu3  ;;  %v1811_v44 = vadd.f32 %v3639_v15, %v3614_v51 }
 0x106   : > { %v3645_v14 = vpop.f32.mrf.mxu1 }
 0x107   : > { %v3643_v46 = vpop.f32.mrf.mxu0 }
 0x109   : > { %v3647_v13 = vpop.f32.mrf.mxu2 }
 0x10a   : > { %v3649_v42 = vpop.f32.mrf.mxu3  ;;  %v1813_v15 = vadd.f32 %v3647_v13, %v3618_v62 }
 0x10c   : > { %v1842_v12 = vadd.f32 %v3649_v42, %v1813_v15 }
 0x10e   : > { %v1998_v59 = vpop.f32.mrf.mxu1  ;;  %v1871_v62 = vadd.f32 %v3643_v46, %v1842_v12 }
 0x10f   : > { %v1969_v55 = vpop.f32.mrf.mxu0 }
 0x111   : > { %v1911_v49 = vpop.f32.mrf.mxu2 }
 0x112   : > { %v1940_v18 = vpop.f32.mrf.mxu3  ;;  %v1912_v50 = vadd.f32 %v1911_v49, %v1883_v25 }
 0x114   : > { %v1941_v58 = vadd.f32 %v1940_v18, %v1912_v50 }
 0x116   : > { %v2000_v53 = vpop.f32.mrf.mxu1  ;;  %v1970_v6 = vadd.f32 %v1969_v55, %v1941_v58 }
 0x117   : > { %v1971_v52 = vpop.f32.mrf.mxu0 }
 0x118   : > { %v1999_v19 = vadd.f32 %v1998_v59, %v1970_v6 }
 0x119   : > { %v1913_v54 = vpop.f32.mrf.mxu2 }
 0x11a   : > { %v1942_v34 = vpop.f32.mrf.mxu3  ;;  %v1914_v31 = vadd.f32 %v1913_v54, %v1885_v60  ;;  %v2018_v2 = vpack.c.bf16 %v1999_v19, %v1999_v19 }
 0x11c   : > { %v1943_v1 = vadd.f32 %v1942_v34, %v1914_v31  ;;  %v2034_v8 = vunpack.c.l.bf16 %v2018_v2 }
 0x11e   : > { %v2003_v36 = vpop.f32.mrf.mxu1  ;;  %v1972_v20 = vadd.f32 %v1971_v52, %v1943_v1  ;;  %v2056_v63 = vmul.f32 %v2034_v8, %v2034_v8 }
 0x11f   : > { %v1974_v33 = vpop.f32.mrf.mxu0 }
 0x120   : > { %v2001_v25 = vadd.f32 %v2000_v53, %v1972_v20 }
 0x121   : > { %v1916_v38 = vpop.f32.mrf.mxu2 }
 0x122   : > { %v1945_v7 = vpop.f32.mrf.mxu3  ;;  %v2019_v9 = vpack.c.bf16 %v2001_v25, %v2001_v25  ;;  %v2772_v11 = vpack.c.bf16 %v2001_v25, %v1999_v19  ;;  %v1917_v61 = vadd.f32 %v1916_v38, %v1888_v10 }
 0x124   : > { %2773 = vst [vmem:[%s3658_s17] sm:$0xff] %v2772_v11   ;;  %v2035_v28 = vunpack.c.l.bf16 %v2019_v9  ;;  %v1946_v57 = vadd.f32 %v1945_v7, %v1917_v61 }
 0x126   : > { %v2042_v5 = vadd.f32 %v2035_v28, %v2034_v8  ;;  %v2057_v29 = vmul.f32 %v2035_v28, %v2035_v28  ;;  %v1975_v37 = vadd.f32 %v1974_v33, %v1946_v57  ;;  %v2005_v3 = vpop.f32.mrf.mxu1  ;;  %v1840_v33 = vadd.f32 %v3641_v48, %v1811_v44 }
 0x127   : > { %v1976_v32 = vpop.f32.mrf.mxu0 }
 0x128   : > { %v2064_v39 = vadd.f32 %v2057_v29, %v2056_v63  ;;  %v2004_v40 = vadd.f32 %v2003_v36, %v1975_v37  ;;  %v1869_v51 = vadd.f32 %v3635_v24, %v1840_v33 }
 0x129   : > { %v1918_v21 = vpop.f32.mrf.mxu2 }
 0x12a   : > { %v1947_v43 = vpop.f32.mrf.mxu3  ;;  %v2020_v47 = vpack.c.bf16 %v2004_v40, %v2004_v40  ;;  %v1919_v55 = vadd.f32 %v1918_v21, %v1890_v23  ;;  %v1898_v57 = vadd.f32 %v3637_v4, %v1869_v51  ;;  %v1900_v4 = vadd.f32 %v3645_v14, %v1871_v62 }
 0x12c   : > { %v2036_v10 = vunpack.c.l.bf16 %v2020_v47  ;;  %v1948_v59 = vadd.f32 %v1947_v43, %v1919_v55 }
 0x12e   : > { %v2043_v41 = vadd.f32 %v2042_v5, %v2036_v10  ;;  %v2058_v49 = vmul.f32 %v2036_v10, %v2036_v10  ;;  %v1977_v18 = vadd.f32 %v1976_v32, %v1948_v59  ;;  %v2008_v53 = vpop.f32.mrf.mxu1 }
 0x12f   : > { %v1979_v50 = vpop.f32.mrf.mxu0 }
 0x130   : > { %v2065_v58 = vadd.f32 %v2064_v39, %v2058_v49  ;;  %v2006_v52 = vadd.f32 %v2005_v3, %v1977_v18 }
 0x131   : > { %v1921_v22 = vpop.f32.mrf.mxu2 }
 0x132   : > { %v1950_v6 = vpop.f32.mrf.mxu3  ;;  %v2021_v60 = vpack.c.bf16 %v2006_v52, %v2006_v52  ;;  %v2777_v54 = vpack.c.bf16 %v2006_v52, %v2004_v40  ;;  %v1922_v34 = vadd.f32 %v1921_v22, %v3629_v27 }
 0x134   : > { %2792 = vst [vmem:[%s3658_s17 + $0x8] sm:$0xff] %v2777_v54   ;;  %v2037_v19 = vunpack.c.l.bf16 %v2021_v60  ;;  %v1951_v31 = vadd.f32 %v1950_v6, %v1922_v34 }
 0x136   : > { %v2044_v0 = vadd.f32 %v2043_v41, %v2037_v19  ;;  %v2059_v1 = vmul.f32 %v2037_v19, %v2037_v19  ;;  %v1980_v45 = vadd.f32 %v1979_v50, %v1951_v31  ;;  %v2010_v7 = vpop.f32.mrf.mxu1 }
 0x137   : > { %v1981_v20 = vpop.f32.mrf.mxu0 }
 0x138   : > { %v2066_v36 = vadd.f32 %v2065_v58, %v2059_v1  ;;  %v2009_v2 = vadd.f32 %v2008_v53, %v1980_v45 }
 0x139   : > { %v1923_v25 = vpop.f32.mrf.mxu2 }
 0x13a   : > { %v1952_v27 = vpop.f32.mrf.mxu3  ;;  %v2022_v38 = vpack.c.bf16 %v2009_v2, %v2009_v2  ;;  %v1924_v16 = vadd.f32 %v1923_v25, %v1895_v35 }
 0x13c   : > { %v2038_v8 = vunpack.c.l.bf16 %v2022_v38  ;;  %v1953_v9 = vadd.f32 %v1952_v27, %v1924_v16 }
 0x13e   : > { %v2045_v11 = vadd.f32 %v2044_v0, %v2038_v8  ;;  %v2060_v48 = vmul.f32 %v2038_v8, %v2038_v8  ;;  %v1982_v61 = vadd.f32 %v1981_v20, %v1953_v9  ;;  %v2013_v39 = vpop.f32.mrf.mxu1 }
 0x13f   : > { %v1984_v37 = vpop.f32.mrf.mxu0 }
 0x140   : > { %v2067_v28 = vadd.f32 %v2066_v36, %v2060_v48  ;;  %v2011_v56 = vadd.f32 %v2010_v7, %v1982_v61 }
 0x141   : > { %v1926_v32 = vpop.f32.mrf.mxu2 }
 0x142   : > { %v1955_v63 = vpop.f32.mrf.mxu3  ;;  %v2023_v5 = vpack.c.bf16 %v2011_v56, %v2011_v56  ;;  %v2782_v29 = vpack.c.bf16 %v2011_v56, %v2009_v2  ;;  %v1927_v24 = vadd.f32 %v1926_v32, %v1898_v57 }
 0x144   : > { %2793 = vst [vmem:[%s3658_s17 + $0x10] sm:$0xff] %v2782_v29   ;;  %v2039_v13 = vunpack.c.l.bf16 %v2023_v5  ;;  %v1956_v3 = vadd.f32 %v1955_v63, %v1927_v24 }
 0x146   : > { %v2046_v40 = vadd.f32 %v2045_v11, %v2039_v13  ;;  %v2061_v23 = vmul.f32 %v2039_v13, %v2039_v13  ;;  %v1985_v21 = vadd.f32 %v1984_v37, %v1956_v3  ;;  %v2015_v26 = vpop.f32.mrf.mxu1 }
 0x147   : > { %v1986_v41 = vpop.f32.mrf.mxu0 }
 0x148   : > { %v2068_v42 = vadd.f32 %v2067_v28, %v2061_v23  ;;  %v2014_v43 = vadd.f32 %v2013_v39, %v1985_v21 }
 0x149   : > { %v1928_v47 = vpop.f32.mrf.mxu2 }
 0x14a   : > { %v2024_v55 = vpack.c.bf16 %v2014_v43, %v2014_v43  ;;  %v1929_v17 = vadd.f32 %v1928_v47, %v1900_v4  ;;  %v1957_v10 = vpop.f32.mrf.mxu3 }
 0x14c   : > { %v2040_v59 = vunpack.c.l.bf16 %v2024_v55  ;;  %v1958_v46 = vadd.f32 %v1957_v10, %v1929_v17 }
 0x14e   : > { %v2047_v49 = vadd.f32 %v2046_v40, %v2040_v59  ;;  %v2062_v18 = vmul.f32 %v2040_v59, %v2040_v59  ;;  %v1987_v50 = vadd.f32 %v1986_v41, %v1958_v46 }
 0x150   : > { %v2069_v58 = vadd.f32 %v2068_v42, %v2062_v18  ;;  %v2016_v52 = vadd.f32 %v2015_v26, %v1987_v50 }
 0x152   : > { %v2025_v53 = vpack.c.bf16 %v2016_v52, %v2016_v52  ;;  %v2787_v22 = vpack.c.bf16 %v2016_v52, %v2014_v43 }
 0x154   : > { %2794 = vst [vmem:[%s3658_s17 + $0x18] sm:$0xff] %v2787_v22   ;;  %v2041_v14 = vunpack.c.l.bf16 %v2025_v53 }
 0x156   : > { %v2048_v6 = vadd.f32 %v2047_v49, %v2041_v14  ;;  %v2063_v60 = vmul.f32 %v2041_v14, %v2041_v14 }
 0x158   : > { %v2049_v54 = vrot.slane %v2048_v6, 4  ;;  %v2070_v34 = vadd.f32 %v2069_v58, %v2063_v60 }
 0x15a   : > { %v2050_v30 = vadd.f32 %v2049_v54, %v2048_v6  ;;  %v2071_v44 = vrot.slane %v2070_v34, 4 }
 0x15c   : > { %v2051_v19 = vrot.slane %v2050_v30, 2  ;;  %v2072_v31 = vadd.f32 %v2071_v44, %v2070_v34 }
 0x15e   : > { %v2052_v0 = vadd.f32 %v2051_v19, %v2050_v30  ;;  %v2073_v1 = vrot.slane %v2072_v31, 2 }
 0x160   : > { %v2053_v45 = vrot.slane %v2052_v0, 1  ;;  %v2074_v33 = vadd.f32 %v2073_v1, %v2072_v31 }
 0x162   : > { %v2054_v36 = vadd.f32 %v2053_v45, %v2052_v0  ;;  %v2075_v2 = vrot.slane %v2074_v33, 1 }
 0x164   : > { %2055 = vst [vmem:[%s502_s24] sm:$0x1] %v2054_v36  ;;  %v2076_v20 = vadd.f32 %v2075_v2, %v2074_v33 }
 0x166   : > { %2077 = vst [vmem:[%s502_s24 + $0x1] sm:$0x1] %v2076_v20 }
 0x167 PF: > { %s18_s28 = sadd.s32 1, %s2891_s28   ;;  %s3728_s24 = smov %s2883_s26 }
 0x168   : > { %p15_p0 = scmp.ge.s32.totalorder %s18_s28, 6   ;;  %s3729_s25 = smov %s2887_s27 }
 0x169   : > { %s3730_s26 = smov %s3733_s29  ;;  %s3731_s27 = smov %s3737_s30 }
 0x16a   :  { %17 = sbr.rel (!%p15_p0) target bundleno = 3 (0x3), region = 98 }

// kernel: upblock_forward.9
= control target key start
LH: loop header
LB: loop body
LE: loop exit
PB: predicated region body
PF: predicated region fallthrough
CT: control target
= control target key end

     0   :  { %s327_s0 = inlined_call_operand.vmem [shape: bf16[256,128], index: 0, kind: input, shape index: {}]   ;;  %s328_s1 = inlined_call_operand.vmem [shape: f32[1,2,128], index: 1, kind: output, shape index: {}]  }
   0x1   :  { %v185_v0 = vld [vmem:[%s327_s0] sm:$0xff]   ;;  %v248_v1 = vld [vmem:[%s327_s0 + $0x8] sm:$0xff]   ;;  %v249_v5 = vld [vmem:[%s327_s0 + $0x10] sm:$0xff]  }
   0x2   :  { %v186_v2 = vunpack.c.l.bf16 %v185_v0  ;;  %v187_v3 = vunpack.c.h.bf16 %v185_v0  ;;  %v190_v4 = vunpack.c.l.bf16 %v248_v1  ;;  %v191_v7 = vunpack.c.h.bf16 %v248_v1  ;;  %v250_v13 = vld [vmem:[%s327_s0 + $0x18] sm:$0xff]   ;;  %v251_v22 = vld [vmem:[%s327_s0 + $0x20] sm:$0xff]   ;;  %v252_v31 = vld [vmem:[%s327_s0 + $0x28] sm:$0xff]  }
   0x3   :  { %v194_v11 = vunpack.c.l.bf16 %v249_v5  ;;  %v195_v15 = vunpack.c.h.bf16 %v249_v5  ;;  %v198_v19 = vunpack.c.l.bf16 %v250_v13  ;;  %v199_v24 = vunpack.c.h.bf16 %v250_v13  ;;  %v253_v40 = vld [vmem:[%s327_s0 + $0x30] sm:$0xff]   ;;  %v254_v49 = vld [vmem:[%s327_s0 + $0x38] sm:$0xff]   ;;  %v255_v58 = vld [vmem:[%s327_s0 + $0x40] sm:$0xff]  }
   0x4   :  { %v72_v6 = vadd.f32 %v187_v3, %v186_v2  ;;  %v110_v8 = vmul.f32 %v186_v2, %v186_v2  ;;  %v111_v9 = vmul.f32 %v187_v3, %v187_v3  ;;  %v112_v12 = vmul.f32 %v190_v4, %v190_v4  ;;  %v256_v3 = vld [vmem:[%s327_s0 + $0x48] sm:$0xff]  }
   0x5   :  { %v113_v16 = vmul.f32 %v191_v7, %v191_v7  ;;  %v114_v20 = vmul.f32 %v194_v11, %v194_v11  ;;  %v115_v25 = vmul.f32 %v195_v15, %v195_v15  ;;  %v202_v28 = vunpack.c.l.bf16 %v251_v22 }
   0x6   :  { %v73_v10 = vadd.f32 %v190_v4, %v72_v6  ;;  %v142_v17 = vadd.f32 %v111_v9, %v110_v8  ;;  %v116_v29 = vmul.f32 %v198_v19, %v198_v19  ;;  %v203_v33 = vunpack.c.h.bf16 %v251_v22 }
   0x7   :  { %v117_v34 = vmul.f32 %v199_v24, %v199_v24  ;;  %v206_v37 = vunpack.c.l.bf16 %v252_v31  ;;  %v118_v38 = vmul.f32 %v202_v28, %v202_v28  ;;  %v207_v42 = vunpack.c.h.bf16 %v252_v31 }
   0x8   :  { %v74_v14 = vadd.f32 %v191_v7, %v73_v10  ;;  %v143_v21 = vadd.f32 %v142_v17, %v112_v12  ;;  %v119_v43 = vmul.f32 %v203_v33, %v203_v33  ;;  %v210_v46 = vunpack.c.l.bf16 %v253_v40  ;;  %v257_v12 = vld [vmem:[%s327_s0 + $0x50] sm:$0xff]  }
   0x9   :  { %v120_v47 = vmul.f32 %v206_v37, %v206_v37  ;;  %v211_v51 = vunpack.c.h.bf16 %v253_v40  ;;  %v121_v52 = vmul.f32 %v207_v42, %v207_v42  ;;  %v214_v55 = vunpack.c.l.bf16 %v254_v49 }
   0xa   :  { %v75_v18 = vadd.f32 %v194_v11, %v74_v14  ;;  %v144_v26 = vadd.f32 %v143_v21, %v113_v16  ;;  %v122_v56 = vmul.f32 %v210_v46, %v210_v46  ;;  %v215_v60 = vunpack.c.h.bf16 %v254_v49  ;;  %v258_v21 = vld [vmem:[%s327_s0 + $0x58] sm:$0xff]  }
   0xb   :  { %v123_v61 = vmul.f32 %v211_v51, %v211_v51  ;;  %v218_v0 = vunpack.c.l.bf16 %v255_v58  ;;  %v124_v1 = vmul.f32 %v214_v55, %v214_v55  ;;  %v219_v5 = vunpack.c.h.bf16 %v255_v58 }
   0xc   :  { %v76_v23 = vadd.f32 %v195_v15, %v75_v18  ;;  %v145_v30 = vadd.f32 %v144_v26, %v114_v20  ;;  %v125_v6 = vmul.f32 %v215_v60, %v215_v60  ;;  %v222_v9 = vunpack.c.l.bf16 %v256_v3 }
   0xd   :  { %v126_v10 = vmul.f32 %v218_v0, %v218_v0  ;;  %v223_v14 = vunpack.c.h.bf16 %v256_v3  ;;  %v127_v15 = vmul.f32 %v219_v5, %v219_v5  ;;  %v226_v18 = vunpack.c.l.bf16 %v257_v12 }
   0xe   :  { %v77_v27 = vadd.f32 %v198_v19, %v76_v23  ;;  %v146_v35 = vadd.f32 %v145_v30, %v115_v25  ;;  %v128_v19 = vmul.f32 %v222_v9, %v222_v9  ;;  %v227_v23 = vunpack.c.h.bf16 %v257_v12  ;;  %v259_v30 = vld [vmem:[%s327_s0 + $0x60] sm:$0xff]  }
  0x10   :  { %v78_v32 = vadd.f32 %v199_v24, %v77_v27  ;;  %v147_v39 = vadd.f32 %v146_v35, %v116_v29  ;;  %v129_v24 = vmul.f32 %v223_v14, %v223_v14  ;;  %v230_v27 = vunpack.c.l.bf16 %v258_v21 }
  0x12   :  { %v79_v36 = vadd.f32 %v202_v28, %v78_v32  ;;  %v148_v44 = vadd.f32 %v147_v39, %v117_v34  ;;  %v130_v28 = vmul.f32 %v226_v18, %v226_v18  ;;  %v231_v32 = vunpack.c.h.bf16 %v258_v21  ;;  %v260_v39 = vld [vmem:[%s327_s0 + $0x68] sm:$0xff]  }
  0x14   :  { %v80_v41 = vadd.f32 %v203_v33, %v79_v36  ;;  %v149_v48 = vadd.f32 %v148_v44, %v118_v38  ;;  %v131_v33 = vmul.f32 %v227_v23, %v227_v23  ;;  %v234_v36 = vunpack.c.l.bf16 %v259_v30 }
  0x16   :  { %v81_v45 = vadd.f32 %v206_v37, %v80_v41  ;;  %v150_v53 = vadd.f32 %v149_v48, %v119_v43  ;;  %v132_v37 = vmul.f32 %v230_v27, %v230_v27  ;;  %v235_v41 = vunpack.c.h.bf16 %v259_v30  ;;  %v261_v48 = vld [vmem:[%s327_s0 + $0x70] sm:$0xff]  }
  0x18   :  { %v82_v50 = vadd.f32 %v207_v42, %v81_v45  ;;  %v151_v57 = vadd.f32 %v150_v53, %v120_v47  ;;  %v133_v42 = vmul.f32 %v231_v32, %v231_v32  ;;  %v238_v45 = vunpack.c.l.bf16 %v260_v39 }
  0x1a   :  { %v83_v54 = vadd.f32 %v210_v46, %v82_v50  ;;  %v152_v62 = vadd.f32 %v151_v57, %v121_v52  ;;  %v134_v46 = vmul.f32 %v234_v36, %v234_v36  ;;  %v239_v50 = vunpack.c.h.bf16 %v260_v39  ;;  %v262_v57 = vld [vmem:[%s327_s0 + $0x78] sm:$0xff]  }
  0x1b   :  { %v247_v3 = vunpack.c.h.bf16 %v262_v57 }
  0x1c   :  { %v84_v59 = vadd.f32 %v211_v51, %v83_v54  ;;  %v153_v2 = vadd.f32 %v152_v62, %v122_v56  ;;  %v135_v51 = vmul.f32 %v235_v41, %v235_v41  ;;  %v242_v54 = vunpack.c.l.bf16 %v261_v48 }
  0x1e   :  { %v85_v63 = vadd.f32 %v214_v55, %v84_v59  ;;  %v154_v7 = vadd.f32 %v153_v2, %v123_v61  ;;  %v136_v55 = vmul.f32 %v238_v45, %v238_v45  ;;  %v243_v59 = vunpack.c.h.bf16 %v261_v48 }
  0x20   :  { %v86_v4 = vadd.f32 %v215_v60, %v85_v63  ;;  %v155_v11 = vadd.f32 %v154_v7, %v124_v1  ;;  %v137_v60 = vmul.f32 %v239_v50, %v239_v50  ;;  %v246_v63 = vunpack.c.l.bf16 %v262_v57 }
  0x22   :  { %v87_v8 = vadd.f32 %v218_v0, %v86_v4  ;;  %v156_v16 = vadd.f32 %v155_v11, %v125_v6  ;;  %v138_v0 = vmul.f32 %v242_v54, %v242_v54  ;;  %v139_v4 = vmul.f32 %v243_v59, %v243_v59 }
  0x23   :  { %v140_v7 = vmul.f32 %v246_v63, %v246_v63 }
  0x24   :  { %v88_v13 = vadd.f32 %v219_v5, %v87_v8  ;;  %v157_v20 = vadd.f32 %v156_v16, %v126_v10  ;;  %v141_v10 = vmul.f32 %v247_v3, %v247_v3 }
  0x26   :  { %v89_v17 = vadd.f32 %v222_v9, %v88_v13  ;;  %v158_v25 = vadd.f32 %v157_v20, %v127_v15 }
  0x28   :  { %v90_v22 = vadd.f32 %v223_v14, %v89_v17  ;;  %v159_v29 = vadd.f32 %v158_v25, %v128_v19 }
  0x2a   :  { %v91_v26 = vadd.f32 %v226_v18, %v90_v22  ;;  %v160_v34 = vadd.f32 %v159_v29, %v129_v24 }
  0x2c   :  { %v92_v31 = vadd.f32 %v227_v23, %v91_v26  ;;  %v161_v38 = vadd.f32 %v160_v34, %v130_v28 }
  0x2e   :  { %v93_v35 = vadd.f32 %v230_v27, %v92_v31  ;;  %v162_v43 = vadd.f32 %v161_v38, %v131_v33 }
  0x30   :  { %v94_v40 = vadd.f32 %v231_v32, %v93_v35  ;;  %v163_v47 = vadd.f32 %v162_v43, %v132_v37 }
  0x32   :  { %v95_v44 = vadd.f32 %v234_v36, %v94_v40  ;;  %v164_v52 = vadd.f32 %v163_v47, %v133_v42 }
  0x34   :  { %v96_v49 = vadd.f32 %v235_v41, %v95_v44  ;;  %v165_v56 = vadd.f32 %v164_v52, %v134_v46 }
  0x36   :  { %v97_v53 = vadd.f32 %v238_v45, %v96_v49  ;;  %v166_v61 = vadd.f32 %v165_v56, %v135_v51 }
  0x38   :  { %v98_v58 = vadd.f32 %v239_v50, %v97_v53  ;;  %v167_v1 = vadd.f32 %v166_v61, %v136_v55 }
  0x3a   :  { %v99_v62 = vadd.f32 %v242_v54, %v98_v58  ;;  %v168_v5 = vadd.f32 %v167_v1, %v137_v60 }
  0x3c   :  { %v100_v2 = vadd.f32 %v243_v59, %v99_v62  ;;  %v169_v8 = vadd.f32 %v168_v5, %v138_v0 }
  0x3e   :  { %v101_v6 = vadd.f32 %v246_v63, %v100_v2  ;;  %v170_v11 = vadd.f32 %v169_v8, %v139_v4 }
  0x40   :  { %v102_v9 = vadd.f32 %v247_v3, %v101_v6  ;;  %v171_v13 = vadd.f32 %v170_v11, %v140_v7 }
  0x42   :  { %v103_v12 = vrot.slane %v102_v9, 4  ;;  %v172_v15 = vadd.f32 %v171_v13, %v141_v10 }
  0x44   :  { %v104_v14 = vadd.f32 %v103_v12, %v102_v9  ;;  %v173_v17 = vrot.slane %v172_v15, 4 }
  0x46   :  { %v105_v16 = vrot.slane %v104_v14, 2  ;;  %v174_v19 = vadd.f32 %v173_v17, %v172_v15 }
  0x48   :  { %v106_v18 = vadd.f32 %v105_v16, %v104_v14  ;;  %v175_v21 = vrot.slane %v174_v19, 2 }
  0x4a   :  { %v107_v20 = vrot.slane %v106_v18, 1  ;;  %v176_v23 = vadd.f32 %v175_v21, %v174_v19 }
  0x4c   :  { %v108_v22 = vadd.f32 %v107_v20, %v106_v18  ;;  %v177_v24 = vrot.slane %v176_v23, 1 }
  0x4e   :  { %109 = vst [vmem:[%s328_s1] sm:$0x1] %v108_v22  ;;  %v178_v25 = vadd.f32 %v177_v24, %v176_v23 }
  0x50   :  { %179 = vst [vmem:[%s328_s1 + $0x1] sm:$0x1] %v178_v25 }

// kernel: upblock_forward.11
= control target key start
LH: loop header
LB: loop body
LE: loop exit
PB: predicated region body
PF: predicated region fallthrough
CT: control target
= control target key end

     0   :  { %s2973_s21 = smov 0   ;;  %s2975_s22 = smov 0   ;;  %s3760_s0 = inlined_call_operand.vmem [shape: bf16[2,8,16,128], index: 0, kind: input, shape index: {}, may-alias: {0,1,2}]   ;;  %s3761_s1 = inlined_call_operand.vmem [shape: bf16[2,8,16,128], index: 1, kind: input, shape index: {}, may-alias: {0,1,2}]   ;;  %s3762_s2 = inlined_call_operand.vmem [shape: bf16[2,8,16,128], index: 2, kind: input, shape index: {}, may-alias: {0,1,2}]   ;;  %s3763_s3 = inlined_call_operand.vmem [shape: bf16[2,8,16,256], index: 3, kind: input, shape index: {}]   ;;  %s3764_s4 = inlined_call_operand.vmem [shape: bf16[1408,128], index: 4, kind: input, shape index: {}]   ;;  %s3765_s5 = inlined_call_operand.vmem [shape: f32[1,128], index: 5, kind: input, shape index: {}]   ;;  %s3766_s6 = inlined_call_operand.vmem [shape: bf16[2,128,128], index: 6, kind: output, shape index: {}]  }
   0x1   :  { %s2977_s23 = smov 0   ;;  %s2979_s24 = smov 0  }
   0x2   :  { %s2981_s25 = smov 0  }
   0x3 LB: > { %s25_s26 = sadd.s32 1, %s2927_s23  ;;  %s28_s27 = sadd.s32 1, %s2931_s24  ;;  %s2935_s25 = sphi %s2981_s25, %s16_s25   ;;  %s2931_s24 = sphi %s2979_s24, %s3788_s24   ;;  %s2927_s23 = sphi %s2977_s23, %s3787_s23   ;;  %s2923_s22 = sphi %s2975_s22, %s3786_s22   ;;  %s2919_s21 = sphi %s2973_s21, %s3785_s21  }
   0x4   : > { %p26_p0 = scmp.ge.s32.totalorder %s25_s26, 2  ;;  %p2261_p1 = scmp.ge.s32.totalorder %s2935_s25, 1 }
   0x5   : > { %p316_p2 = scmp.lt.s32.totalorder %s2935_s25, 5 }
   0x6   : > { %s3790_s26 = smov (%p26_p0, %s25_s26), 0  ;;  %s3792_s27 = smov (!%p26_p0, %s28_s27), %s2931_s24 }
   0x7   : > { %p317_p3 = pnand %p2261_p1, %p316_p2  ;;  %p30_p4 = scmp.ge.s32.totalorder %s3792_s27, 2 }
   0x8   : > { %s3015_s10 = sshll.u32 (!%p317_p3), %s2919_s21, 2  ;;  %p392_p5 = scmp.lt.s32.totalorder (!%p317_p3), %s2923_s22, 1 }
   0x9   : > { %s3794_s27 = smov (%p30_p4, %s3792_s27), 0  ;;  %320 = sbr.rel (%p317_p3) target bundleno = 353 (0x161), region = 44 }
   0xa   : > { %s2267_s11 = sadd.s32 (!%p317_p3), 4294967295, %s3015_s10  ;;  %p460_p6 = scmp.ge.s32.totalorder (!%p317_p3), %s3015_s10, 1 }
   0xb   : > { %p404_p7 = scmp.gt.s32.totalorder (!%p317_p3), %s2267_s11, 0  ;;  %p2268_p8 = scmp.lt.s32.totalorder (!%p317_p3), %s2267_s11, 7 }
   0xc   : > { %p394_p9 = scmp.lt.s32.totalorder (!%p317_p3), %s3015_s10, 7 }
   0xe   : > { %v2700_v0 = vld [vmem:[%s3764_s4 + $0x38] sm:$0xff]  ;;  %v498_v3 = vlaneseq  ;;  %v2699_v4 = vld [vmem:[%s3764_s4 + $0x30] sm:$0xff]  ;;  %s3796_s22 = smov (!%p392_p5, %s2923_s22), 1  ;;  %s3798_s11 = smov (!%p404_p7, %s2267_s11), 0  ;;  %v2698_v8 = vld [vmem:[%s3764_s4 + $0x28] sm:$0xff]  ;;  %vm620_vm1 = vcmask 1040384  }
   0xf   : > { %v2708_v1 = vld [vmem:[%s3764_s4 + $0x78] sm:$0xff]  ;;  %1760 = vmatpush.bf16.msra.mxu0 %v2700_v0  ;;  %2831 = vmatpush.bf16.msra.mxu3 %v2700_v0  ;;  %v2707_v5 = vld [vmem:[%s3764_s4 + $0x70] sm:$0xff]  ;;  %s3031_s18 = sshll.u32 %s3796_s22, 4  ;;  %v2706_v9 = vld [vmem:[%s3764_s4 + $0x68] sm:$0xff]  ;;  %s3800_s11 = smov (!%p2268_p8, %s3798_s11), 7  ;;  %v2937_v27 = vmov 0.0  }
  0x10   : > { %v2716_v2 = vld [vmem:[%s3764_s4 + $0xb8] sm:$0xff]  ;;  %1789 = vmatpush.bf16.msra.mxu1 %v2708_v1  ;;  %v2715_v6 = vld [vmem:[%s3764_s4 + $0xb0] sm:$0xff]  ;;  %v3033_v7 = vshrl.u32 %v498_v3, 7  ;;  %s463_s28 = scalar_select %p460_p6, 1, 0  ;;  %v2714_v10 = vld [vmem:[%s3764_s4 + $0xa8] sm:$0xff] }
  0x11   : > { %1818 = vmatpush.bf16.msra.mxu2 %v2716_v2  ;;  %s2273_s9 = sshll.u32 %s3800_s11, 1  ;;  %v2697_v12 = vld [vmem:[%s3764_s4 + $0x20] sm:$0xff]  ;;  %s2285_s7 = sshll.u32 %s3796_s22, 5  ;;  %v2696_v21 = vld [vmem:[%s3764_s4 + $0x18] sm:$0xff]  ;;  %v3081_v28 = vrot.slane %v2937_v27, 7  ;;  %vm662_vm3 = vcmask 1046528  }
  0x12   : > { %v503_v11 = vadd.s32 32, %v3033_v7  ;;  %s412_s14 = sadd.s32 %s2273_s9, %s3031_s18  ;;  %v464_v13 = vstv %s463_s28  ;;  %v500_v14 = vadd.s32 8, %v3033_v7  ;;  %v2705_v15 = vld [vmem:[%s3764_s4 + $0x60] sm:$0xff]  ;;  %v511_v17 = vand.u32 15, %v3033_v7  ;;  %v2704_v25 = vld [vmem:[%s3764_s4 + $0x58] sm:$0xff]  ;;  %v2695_v37 = vld [vmem:[%s3764_s4 + $0x10] sm:$0xff] }
  0x13   : > { %1761 = vmatpush.bf16.msra.mxu0 %v2699_v4  ;;  %2832 = vmatpush.bf16.msra.mxu3 %v2699_v4  ;;  %v2713_v16 = vld [vmem:[%s3764_s4 + $0xa0] sm:$0xff]  ;;  %s2275_s19 = sshll.u32 %s412_s14, 2  ;;  %vm3064_vm0 = vcmp.eq.s32.totalorder %v464_v13, 1  ;;  %v2712_v26 = vld [vmem:[%s3764_s4 + $0x98] sm:$0xff]  ;;  %v3084_v29 = vadd.s32 16, %v3033_v7  ;;  %v3105_v36 = vadd.s32 48, %v3033_v7 }
  0x14   : > { %1790 = vmatpush.bf16.msra.mxu1 %v2707_v5  ;;  %s414_s30 = scalar_lea.vmem %s3761_s1, %s2275_s19  ;;  %v539_v20 = vand.u32 15, %v503_v11  ;;  %v518_v24 = vand.u32 15, %v500_v14  ;;  %vm3092_vm2 = vcmp.ge.s32.totalorder %v511_v17, 1  ;;  %v2703_v38 = vld [vmem:[%s3764_s4 + $0x50] sm:$0xff]  ;;  %v3148_v58 = vadd.s32 24, %v3033_v7  ;;  %v2694_v59 = vld [vmem:[%s3764_s4 + $0x8] sm:$0xff] }
  0x15   : > { %1819 = vmatpush.bf16.msra.mxu2 %v2715_v6  ;;  %v2782_v18 = vld [vmem:[%s414_s30] sm:$0xff]   ;;  %s395_s28 = scalar_select %p394_p9, %s3015_s10, 7  ;;  %v2711_v43 = vld [vmem:[%s3764_s4 + $0x90] sm:$0xff]  ;;  %v525_v49 = vand.u32 15, %v3084_v29  ;;  %v2702_v0 = vld [vmem:[%s3764_s4 + $0x48] sm:$0xff] }
  0x16   : > { %v2783_v22 = vunpack.c.l.bf16 %v2782_v18  ;;  %v2784_v23 = vunpack.c.h.bf16 %v2782_v18  ;;  %vm3100_vm4 = vcmp.ge.s32.totalorder %v539_v20, 1  ;;  %vm3118_vm5 = vcmp.le.s32.totalorder %v518_v24, 14  ;;  %v2710_v1 = vld [vmem:[%s3764_s4 + $0x88] sm:$0xff]  ;;  %v2701_v20 = vld [vmem:[%s3764_s4 + $0x40] sm:$0xff]  ;;  %v2763_v32 = vld [vmem:[%s3764_s4 + $0x230] sm:$0xff]  ;;  %s3495_s14 = sadd.s32 4, %s3015_s10 }
  0x17   : > { %1762 = vmatpush.bf16.msra.mxu0 %v2698_v8  ;;  %2833 = vmatpush.bf16.msra.mxu3 %v2698_v8  ;;  %s2263_s15 = sshll.u32 %s395_s28, 1  ;;  %s2284_s16 = sshll.u32 %s395_s28, 2  ;;  %v553_v24 = vand.u32 15, %v3105_v36  ;;  %vm3210_vm6 = vcmp.ge.s32.totalorder %v525_v49, 1  ;;  %v532_v36 = vand.u32 15, %v3148_v58  ;;  %v2747_v49 = vld [vmem:[%s3764_s4 + $0x1b0] sm:$0xff] }
  0x18   : > { %1791 = vmatpush.bf16.msra.mxu1 %v2706_v9  ;;  %v466_v30 = vsel %vm3064_vm0, %v2783_v22, 0.0  ;;  %v3090_v31 = vsel %vm3064_vm0, %v2784_v23, 0.0  ;;  %s398_s11 = sadd.s32 %s3031_s18, %s2263_s15  ;;  %s3097_s17 = sadd.s32 %s2285_s7, %s2284_s16  ;;  %v2770_v40 = vld [vmem:[%s3764_s4 + $0x268] sm:$0xff] }
  0x19   : > { %1820 = vmatpush.bf16.msra.mxu2 %v2714_v10  ;;  %v622_v33 = vrot.slane %v466_v30, 7  ;;  %v624_v34 = vrot.slane %v3090_v31, 7  ;;  %s2265_s19 = sshll.u32 %s398_s11, 2  ;;  %v704_v39 = vpack.c.bf16 %v466_v30, %v466_v30  ;;  %v663_v41 = vrot.slane %v466_v30, 1  ;;  %v2724_v30 = vld [vmem:[%s3764_s4 + $0xf8] sm:$0xff]  ;;  %p421_p10 = scmp.lt.s32.totalorder %s3495_s14, 7 }
  0x1a   : > { %s3116_s9 = scalar_lea.vmem %s3760_s0, %s2265_s19  ;;  %v664_v42 = vrot.slane %v3090_v31, 1  ;;  %v705_v48 = vpack.c.bf16 %v3090_v31, %v3090_v31  ;;  %vm3228_vm7 = vcmp.ge.s32.totalorder %v553_v24, 1  ;;  %vm3248_vm8 = vcmp.le.s32.totalorder %v532_v36, 14  ;;  %p490_p11 = scmp.le.s32.totalorder %s3495_s14, 7 }
  0x1b   : > { %1763 = vmatpush.bf16.msra.mxu0 %v2697_v12  ;;  %2834 = vmatpush.bf16.msra.mxu3 %v2697_v12  ;;  %v623_v44 = vsel %vm620_vm1, %v3081_v28, %v622_v33  ;;  %v625_v45 = vsel %vm620_vm1, %v622_v33, %v624_v34  ;;  %v2786_v46 = vld [vmem:[%s3116_s9] sm:$0xff]   ;;  %v2825_v47 = vld [vmem:[%s3116_s9 + $0x8] sm:$0xff]   ;;  %v2826_v57 = vld [vmem:[%s3116_s9 + $0x10] sm:$0xff]   ;;  %v3157_v62 = vunpack.c.l.b16 %v704_v39  ;;  %s422_s7 = scalar_select %p421_p10, %s3495_s14, 7 }
  0x1c   : > { %1792 = vmatpush.bf16.msra.mxu1 %v2705_v15  ;;  %v646_v50 = vsel %vm3092_vm2, %v623_v44, 0.0  ;;  %v697_v51 = vpack.c.bf16 %v625_v45, %v625_v45  ;;  %v3138_v52 = vunpack.c.h.bf16 %v2786_v46  ;;  %v3140_v53 = vunpack.c.l.bf16 %v2825_v47  ;;  %v2693_v15 = vld [vmem:[%s3764_s4] sm:$0xff]  ;;  %v2748_v33 = vld [vmem:[%s3764_s4 + $0x1b8] sm:$0xff]  ;;  %v2759_v39 = vld [vmem:[%s3764_s4 + $0x210] sm:$0xff]  ;;  %s493_s14 = scalar_select %p490_p11, 1, 0 }
  0x1d   : > { %1821 = vmatpush.bf16.msra.mxu2 %v2713_v16  ;;  %v696_v54 = vpack.c.bf16 %v646_v50, %v646_v50  ;;  %v3142_v55 = vunpack.c.h.bf16 %v2825_v47  ;;  %v3144_v56 = vunpack.c.l.bf16 %v2786_v46  ;;  %v665_v63 = vsel %vm662_vm3, %v663_v41, %v664_v42  ;;  %v2732_v46 = vld [vmem:[%s3764_s4 + $0x138] sm:$0xff]  ;;  %s3802_s7 = smov (!%p421_p10, %s422_s7), 7  ;;  %s2286_s16 = sshll.u32 %s3097_s17, 2 }
  0x1e   : > { %v628_v60 = vrot.slane %v3138_v52, 7  ;;  %v3155_v61 = vrot.slane %v3140_v53, 7  ;;  %v865_v3 = vunpack.c.l.b16 %v705_v48  ;;  %v712_v5 = vpack.c.bf16 %v665_v63, %v665_v63  ;;  %v2740_v47 = vld [vmem:[%s3764_s4 + $0x178] sm:$0xff]  ;;  %v2739_v63 = vld [vmem:[%s3764_s4 + $0x170] sm:$0xff]  ;;  %s2280_s22 = sshll.u32 %s3802_s7, 1  ;;  %s3686_s19 = scalar_lea.vmem %s3763_s3, %s2286_s16 }
  0x1f   : > { %1764 = vmatpush.bf16.msra.mxu0 %v2696_v21  ;;  %2835 = vmatpush.bf16.msra.mxu3 %v2696_v21  ;;  %v632_v2 = vrot.slane %v3142_v55, 7  ;;  %v666_v4 = vrot.slane %v3144_v56, 1  ;;  %v840_v6 = vunpack.c.l.b16 %v696_v54  ;;  %v841_v8 = vunpack.c.l.b16 %v697_v51  ;;  %v2709_v21 = vld [vmem:[%s3764_s4 + $0x80] sm:$0xff]  ;;  %s429_s12 = sadd.s32 %s2280_s22, %s3031_s18  ;;  %s2287_s17 = sshll.u32 %s2919_s21, 3 }
  0x20   : > { %1793 = vmatpush.bf16.msra.mxu1 %v2704_v25  ;;  %v3172_v9 = vsel %vm620_vm1, %v628_v60, %v3155_v61  ;;  %v3174_v10 = vunpack.c.l.bf16 %v2826_v57  ;;  %v3185_v14 = vrot.slane %v3144_v56, 7  ;;  %v3192_v19 = vunpack.c.h.bf16 %v2826_v57  ;;  %s2282_s7 = sshll.u32 %s429_s12, 2  ;;  %p450_p12 = scmp.lt.s32.totalorder %s2287_s17, 15 }
  0x21   : > { %1822 = vmatpush.bf16.msra.mxu2 %v2712_v26  ;;  %v633_v11 = vsel %vm620_vm1, %v3155_v61, %v632_v2  ;;  %v650_v12 = vsel %vm3100_vm4, %v3172_v9, 0.0  ;;  %v667_v13 = vsel %vm662_vm3, %v664_v42, %v666_v4  ;;  %v888_v23 = vunpack.c.l.b16 %v712_v5  ;;  %s431_s15 = scalar_lea.vmem %s3762_s2, %s2282_s7 }
  0x22   : > { %v700_v16 = vpack.c.bf16 %v650_v12, %v650_v12  ;;  %v701_v17 = vpack.c.bf16 %v633_v11, %v633_v11  ;;  %v689_v18 = vsel %vm3118_vm5, %v667_v13, 0.0  ;;  %v634_v25 = vrot.slane %v3174_v10, 7  ;;  %s3804_s17 = smov (!%p450_p12, %s2287_s17), 15 }
  0x23   : > { %1765 = vmatpush.bf16.msra.mxu0 %v2695_v37  ;;  %2836 = vmatpush.bf16.msra.mxu3 %v2695_v37  ;;  %v713_v22 = vpack.c.bf16 %v689_v18, %v689_v18  ;;  %v848_v37 = vpack.c.b16 %v841_v8, %v840_v6  ;;  %v872_v42 = vpack.c.b16 %v865_v3, %v3157_v62  ;;  %v636_v44 = vrot.slane %v3192_v19, 7  ;;  %s453_s30 = sadd.s32 %s3031_s18, %s3804_s17 }
  0x24   : > { %1794 = vmatpush.bf16.msra.mxu1 %v2703_v38  ;;  %v844_v26 = vunpack.c.l.b16 %v700_v16  ;;  %v3202_v29 = vunpack.c.l.b16 %v701_v17  ;;  %v3233_v31 = vsel %vm620_vm1, %v632_v2, %v634_v25  ;;  %v668_v50 = vrot.slane %v3138_v52, 1  ;;  %v2722_v2 = vld [vmem:[%s3764_s4 + $0xe8] sm:$0xff]  ;;  %s2289_s28 = sshll.u32 %s453_s30, 2 }
  0x25   : > { %1823 = vmatpush.bf16.msra.mxu2 %v2711_v43  ;;  %v889_v38 = vunpack.c.l.b16 %v713_v22  ;;  %v627_v43 = vsel %vm620_vm1, %v624_v34, %v3185_v14  ;;  %v2723_v34 = vld [vmem:[%s3764_s4 + $0xf0] sm:$0xff]  ;;  %v629_v51 = vsel %vm620_vm1, %v3185_v14, %v628_v60  ;;  %v670_v58 = vrot.slane %v3140_v53, 1  ;;  %v2745_v22 = vld [vmem:[%s3764_s4 + $0x1a0] sm:$0xff]  ;;  %s3737_s22 = scalar_lea.vmem %s3766_s6, %s2289_s28 }
  0x26   : > { %v850_v41 = vpack.c.b16 %v3202_v29, %v844_v26  ;;  %v648_v54 = vsel %vm3210_vm6, %v627_v43, 0.0  ;;  %v652_v62 = vsel %vm3228_vm7, %v3233_v31, 0.0  ;;  %v2731_v60 = vld [vmem:[%s3764_s4 + $0x130] sm:$0xff]  ;;  %v699_v5 = vpack.c.bf16 %v629_v51, %v629_v51  ;;  %v2737_v43 = vld [vmem:[%s3764_s4 + $0x160] sm:$0xff] }
  0x27   : > { %1766 = vmatpush.bf16.msra.mxu0 %v2694_v59  ;;  %2837 = vmatpush.bf16.msra.mxu3 %v2694_v59  ;;  %v896_v45 = vpack.c.b16 %v889_v38, %v888_v23  ;;  %v637_v59 = vsel %vm620_vm1, %v634_v25, %v636_v44  ;;  %v698_v3 = vpack.c.bf16 %v648_v54, %v648_v54  ;;  %v672_v17 = vrot.slane %v3142_v55, 1  ;;  %v2728_v54 = vld [vmem:[%s3764_s4 + $0x118] sm:$0xff] }
  0x28   : > { %1795 = vmatpush.bf16.msra.mxu1 %v2702_v0  ;;  %v669_v0 = vsel %vm662_vm3, %v666_v4, %v668_v50  ;;  %v2746_v4 = vld [vmem:[%s3764_s4 + $0x1a8] sm:$0xff]  ;;  %v702_v8 = vpack.c.bf16 %v652_v62, %v652_v62  ;;  %v703_v11 = vpack.c.bf16 %v637_v59, %v637_v59  ;;  %v706_v12 = vpack.c.bf16 %v3144_v56, %v3144_v56  ;;  %v2736_v62 = vld [vmem:[%s3764_s4 + $0x158] sm:$0xff] }
  0x29   : > { %1824 = vmatpush.bf16.msra.mxu2 %v2710_v1  ;;  %v3271_v1 = vsel %vm662_vm3, %v668_v50, %v670_v58  ;;  %v707_v13 = vpack.c.bf16 %v3138_v52, %v3138_v52  ;;  %v674_v18 = vrot.slane %v3174_v10, 1  ;;  %v2721_v52 = vld [vmem:[%s3764_s4 + $0xe0] sm:$0xff]  ;;  %v3297_v56 = vunpack.c.l.b16 %v699_v5 }
  0x2a   : > { %v691_v6 = vsel %vm3248_vm8, %v3271_v1, 0.0  ;;  %v504_v23 = vadd.s32 40, %v3033_v7  ;;  %v842_v25 = vunpack.c.l.b16 %v698_v3  ;;  %v846_v26 = vunpack.c.l.b16 %v702_v8  ;;  %v2742_v8 = vld [vmem:[%s3764_s4 + $0x188] sm:$0xff] }
  0x2b   : > { %1767 = vmatpush.bf16.msra.mxu0 %v2693_v15  ;;  %2838 = vmatpush.bf16.msra.mxu3 %v2693_v15  ;;  %v714_v15 = vpack.c.bf16 %v669_v0, %v669_v0  ;;  %v715_v16 = vpack.c.bf16 %v691_v6, %v691_v6  ;;  %v3306_v24 = vsel %vm662_vm3, %v672_v17, %v674_v18  ;;  %v867_v38 = vunpack.c.l.b16 %v707_v13  ;;  %v2743_v0 = vld [vmem:[%s3764_s4 + $0x190] sm:$0xff] }
  0x2c   : > { %1796 = vmatpush.bf16.msra.mxu1 %v2701_v20  ;;  %v2730_v20 = vld [vmem:[%s3764_s4 + $0x128] sm:$0xff]  ;;  %v722_v59 = vsel %vm620_vm1, %v3081_v28, %v3185_v14  ;;  %v673_v3 = vsel %vm662_vm3, %v670_v58, %v672_v17  ;;  %v2735_v6 = vld [vmem:[%s3764_s4 + $0x150] sm:$0xff] }
  0x2d   : > { %1825 = vmatpush.bf16.msra.mxu2 %v2709_v21  ;;  %v2738_v21 = vld [vmem:[%s3764_s4 + $0x168] sm:$0xff]  ;;  %v3315_v36 = vunpack.c.l.b16 %v714_v15  ;;  %v730_v14 = vsel %vm3092_vm2, %v722_v59, 0.0  ;;  %v716_v13 = vpack.c.bf16 %v673_v3, %v673_v3  ;;  %v732_v59 = vsel %vm3210_vm6, %v3172_v9, 0.0 }
  0x2e   : > { %1768 = vmatmul.bf16.vlgmr.msra.gmra.mxu0 %v848_v37  ;;  %1778 = vmatmul.bf16.vlgmr.msra.gmra.mxu3 %v850_v41  ;;  %v866_v37 = vunpack.c.l.b16 %v706_v12  ;;  %v891_v41 = vunpack.c.l.b16 %v715_v16  ;;  %v754_v58 = vpack.c.bf16 %v730_v14, %v730_v14  ;;  %v709_v12 = vpack.c.bf16 %v3142_v55, %v3142_v55  ;;  %v2726_v16 = vld [vmem:[%s3764_s4 + $0x108] sm:$0xff]  ;;  %v2741_v55 = vld [vmem:[%s3764_s4 + $0x180] sm:$0xff]  ;;  %v3454_v14 = vld [vmem:[%s3764_s4 + $0x2b8] sm:$0xff] }
  0x2f   : > { %1847 = vmatpush.bf16.msrb.mxu3 %v2724_v30  ;;  %1797 = vmatmul.bf16.vlgmr.msra.gmra.mxu1 %v872_v42  ;;  %v3308_v30 = vunpack.c.l.b16 %v703_v11  ;;  %v2729_v42 = vld [vmem:[%s3764_s4 + $0x120] sm:$0xff]  ;;  %v708_v11 = vpack.c.bf16 %v3140_v53, %v3140_v53  ;;  %v2734_v17 = vld [vmem:[%s3764_s4 + $0x148] sm:$0xff]  ;;  %v756_v3 = vpack.c.bf16 %v732_v59, %v732_v59 }
  0x30   : > { %1826 = vmatmul.bf16.vlgmr.msra.gmra.mxu2 %v896_v45  ;;  %1876 = vmatpush.bf16.msrb.mxu0 %v2732_v46  ;;  %v2720_v45 = vld [vmem:[%s3764_s4 + $0xd8] sm:$0xff]  ;;  %v546_v46 = vand.u32 15, %v504_v23  ;;  %v3331_v50 = vpack.c.b16 %v867_v38, %v866_v37  ;;  %v897_v51 = vpack.c.b16 %v891_v41, %v3315_v36  ;;  %v2717_v53 = vld [vmem:[%s3764_s4 + $0xc0] sm:$0xff]  ;;  %v869_v23 = vunpack.c.l.b16 %v709_v12  ;;  %v2762_v9 = vld [vmem:[%s3764_s4 + $0x228] sm:$0xff] }
  0x31   : > { %1934 = vmatpush.bf16.msrb.mxu2 %v2748_v33  ;;  %1905 = vmatpush.bf16.msrb.mxu1 %v2740_v47  ;;  %v3313_v33 = vsel %vm3118_vm5, %v3306_v24, 0.0  ;;  %v2744_v47 = vld [vmem:[%s3764_s4 + $0x198] sm:$0xff]  ;;  %v2733_v37 = vld [vmem:[%s3764_s4 + $0x140] sm:$0xff]  ;;  %v774_v38 = vsel %vm620_vm1, %v3081_v28, %v3155_v61 }
  0x32   : > { %vm3346_vm9 = vcmp.le.s32.totalorder %v546_v46, 14  ;;  %v2764_v41 = vld [vmem:[%s3764_s4 + $0x238] sm:$0xff]  ;;  %v782_v46 = vsel %vm3092_vm2, %v774_v38, 0.0  ;;  %v2753_v12 = vld [vmem:[%s3764_s4 + $0x1e0] sm:$0xff] }
  0x33   : > { %1848 = vmatpush.bf16.msrb.mxu3 %v2723_v34  ;;  %v849_v34 = vpack.c.b16 %v3297_v56, %v842_v25  ;;  %v693_v5 = vsel %vm3346_vm9, %v3306_v24, 0.0  ;;  %v3394_v25 = vunpack.c.l.b16 %v716_v13  ;;  %v806_v28 = vpack.c.bf16 %v782_v46, %v782_v46  ;;  %v2761_v13 = vld [vmem:[%s3764_s4 + $0x220] sm:$0xff] }
  0x34   : > { %1877 = vmatpush.bf16.msrb.mxu0 %v2731_v60  ;;  %v2719_v60 = vld [vmem:[%s3764_s4 + $0xd0] sm:$0xff]  ;;  %v717_v15 = vpack.c.bf16 %v693_v5, %v693_v5 }
  0x35   : > { %1935 = vmatpush.bf16.msrb.mxu2 %v2747_v49  ;;  %1906 = vmatpush.bf16.msrb.mxu1 %v2739_v63  ;;  %v851_v49 = vpack.c.b16 %v3308_v30, %v846_v26  ;;  %v3472_v5 = vld [vmem:[%s3764_s4 + $0x2b0] sm:$0xff] }
  0x36   : > { %v893_v26 = vunpack.c.l.b16 %v717_v15 }
  0x37   : > { %1849 = vmatpush.bf16.msrb.mxu3 %v2722_v2  ;;  %v2727_v2 = vld [vmem:[%s3764_s4 + $0x110] sm:$0xff] }
  0x38   : > { %1878 = vmatpush.bf16.msrb.mxu0 %v2730_v20  ;;  %v506_v20 = vadd.s32 56, %v3033_v7  ;;  %v2725_v7 = vld [vmem:[%s3764_s4 + $0x100] sm:$0xff] }
  0x39   : > { %1936 = vmatpush.bf16.msrb.mxu2 %v2746_v4  ;;  %1907 = vmatpush.bf16.msrb.mxu1 %v2738_v21  ;;  %v2718_v4 = vld [vmem:[%s3764_s4 + $0xc8] sm:$0xff]  ;;  %v912_v21 = vunpack.c.l.b16 %v754_v58 }
  0x3b   : > { %1850 = vmatpush.bf16.msrb.mxu3 %v2721_v52  ;;  %v2756_v52 = vld [vmem:[%s3764_s4 + $0x1f8] sm:$0xff] }
  0x3c   : > { %1879 = vmatpush.bf16.msrb.mxu0 %v2729_v42  ;;  %v560_v42 = vand.u32 15, %v506_v20  ;;  %v914_v20 = vunpack.c.l.b16 %v756_v3  ;;  %v2749_v3 = vld [vmem:[%s3764_s4 + $0x1c0] sm:$0xff] }
  0x3d   : > { %1937 = vmatpush.bf16.msrb.mxu2 %v2745_v22  ;;  %1908 = vmatpush.bf16.msrb.mxu1 %v2737_v43  ;;  %v868_v22 = vunpack.c.l.b16 %v708_v11  ;;  %v3409_v43 = vrot.slane %v3192_v19, 1 }
  0x3e   : > { %1773 = vmatmul.bf16.gmra.mxu0 %v849_v34  ;;  %1783 = vmatmul.bf16.gmra.mxu3 %v851_v49  ;;  %v898_v34 = vpack.c.b16 %v893_v26, %v3394_v25  ;;  %v2755_v49 = vld [vmem:[%s3764_s4 + $0x1f0] sm:$0xff]  ;;  %vm3428_vm10 = vcmp.le.s32.totalorder %v560_v42, 14  ;;  %v921_v38 = vpack.c.b16 %v3202_v29, %v914_v20 }
  0x3f   : > { %1851 = vmatpush.bf16.msrb.mxu3 %v2720_v45  ;;  %1802 = vmatmul.bf16.gmra.mxu1 %v3331_v50  ;;  %v3412_v45 = vrot.slane %v2937_v27, 1  ;;  %v3417_v61 = vpack.c.b16 %v869_v23, %v868_v22  ;;  %v3423_v27 = vunpack.c.l.b16 %v806_v28  ;;  %v2752_v23 = vld [vmem:[%s3764_s4 + $0x1d8] sm:$0xff] }
  0x40   : > { %1831 = vmatmul.bf16.gmra.mxu2 %v897_v51  ;;  %1880 = vmatpush.bf16.msrb.mxu0 %v2728_v54 }
  0x41   : > { %1938 = vmatpush.bf16.msrb.mxu2 %v2744_v47  ;;  %1909 = vmatpush.bf16.msrb.mxu1 %v2736_v62  ;;  %v920_v47 = vpack.c.b16 %v3297_v56, %v912_v21  ;;  %v679_v51 = vsel %vm662_vm3, %v3409_v43, %v3412_v45  ;;  %v974_v54 = vpack.c.b16 %v3202_v29, %v3423_v27  ;;  %v2775_v29 = vld [vmem:[%s3764_s4 + $0x290] sm:$0xff] }
  0x42   : > { %v677_v62 = vsel %vm662_vm3, %v674_v18, %v3409_v43  ;;  %v3462_v18 = vld [vmem:[%s3764_s4 + $0x278] sm:$0xff]  ;;  %v2767_v27 = vld [vmem:[%s3764_s4 + $0x250] sm:$0xff] }
  0x43   : > { %1852 = vmatpush.bf16.msrb.mxu3 %v2719_v60  ;;  %v695_v60 = vsel %vm3428_vm10, %v679_v51, 0.0  ;;  %v734_v51 = vsel %vm3100_vm4, %v3233_v31, 0.0 }
  0x44   : > { %1881 = vmatpush.bf16.msrb.mxu0 %v2727_v2  ;;  %v711_v2 = vpack.c.bf16 %v3192_v19, %v3192_v19  ;;  %v2760_v19 = vld [vmem:[%s3764_s4 + $0x218] sm:$0xff] }
  0x45   : > { %1939 = vmatpush.bf16.msrb.mxu2 %v2743_v0  ;;  %1910 = vmatpush.bf16.msrb.mxu1 %v2735_v6  ;;  %v2754_v0 = vld [vmem:[%s3764_s4 + $0x1e8] sm:$0xff]  ;;  %v2827_v6 = vld [vmem:[%s3116_s9 + $0x18] sm:$0xff]  }
  0x46   : > { %v3481_v58 = vunpack.c.l.bf16 %v2827_v6  ;;  %v3483_v11 = vunpack.c.h.bf16 %v2827_v6  ;;  %v2757_v6 = vld [vmem:[%s3764_s4 + $0x200] sm:$0xff] }
  0x47   : > { %1853 = vmatpush.bf16.msrb.mxu3 %v2718_v4  ;;  %v718_v4 = vpack.c.bf16 %v677_v62, %v677_v62  ;;  %v747_v62 = vsel %vm3118_vm5, %v3271_v1, 0.0  ;;  %v758_v1 = vpack.c.bf16 %v734_v51, %v734_v51 }
  0x48   : > { %1882 = vmatpush.bf16.msrb.mxu0 %v2726_v16  ;;  %v723_v15 = vrot.slane %v3481_v58, 7  ;;  %v725_v16 = vrot.slane %v3483_v11, 7 }
  0x49   : > { %1940 = vmatpush.bf16.msrb.mxu2 %v2742_v8  ;;  %1911 = vmatpush.bf16.msrb.mxu1 %v2734_v17  ;;  %v719_v8 = vpack.c.bf16 %v695_v60, %v695_v60  ;;  %v2750_v60 = vld [vmem:[%s3764_s4 + $0x1c8] sm:$0xff] }
  0x4a   : > { %v726_v22 = vsel %vm620_vm1, %v723_v15, %v725_v16 }
  0x4b   : > { %1854 = vmatpush.bf16.msrb.mxu3 %v2717_v53  ;;  %v871_v53 = vunpack.c.l.b16 %v711_v2  ;;  %v895_v21 = vunpack.c.l.b16 %v719_v8  ;;  %v2769_v2 = vld [vmem:[%s3764_s4 + $0x260] sm:$0xff] }
  0x4c   : > { %1883 = vmatpush.bf16.msrb.mxu0 %v2725_v7  ;;  %v761_v7 = vpack.c.bf16 %v726_v22, %v726_v22  ;;  %v763_v22 = vpack.c.bf16 %v3483_v11, %v3483_v11 }
  0x4d   : > { %1941 = vmatpush.bf16.msrb.mxu2 %v2741_v55  ;;  %1912 = vmatpush.bf16.msrb.mxu1 %v2733_v37  ;;  %v3497_v55 = vunpack.c.l.b16 %v718_v4  ;;  %v784_v37 = vsel %vm3210_vm6, %v3233_v31, 0.0  ;;  %v2758_v31 = vld [vmem:[%s3764_s4 + $0x208] sm:$0xff]  ;;  %v916_v4 = vunpack.c.l.b16 %v758_v1 }
  0x4e   : > { %1855 = vmatmul.bf16.vlgmr.msrb.gmra.mxu3 %v920_v47  ;;  %v808_v28 = vpack.c.bf16 %v784_v37, %v784_v37 }
  0x4f   : > { %1963 = vmatpush.bf16.msra.mxu3 %v2756_v52  ;;  %1807 = vmatmul.bf16.gmra.mxu1 %v3417_v61  ;;  %v724_v52 = vsel %vm620_vm1, %v636_v44, %v723_v15  ;;  %v899_v46 = vpack.c.b16 %v895_v21, %v3497_v55  ;;  %v922_v15 = vpack.c.b16 %v3308_v30, %v916_v4 }
  0x50   : > { %1992 = vmatpush.bf16.msra.mxu0 %v2764_v41  ;;  %1836 = vmatmul.bf16.gmra.mxu2 %v898_v34  ;;  %v736_v26 = vsel %vm3228_vm7, %v724_v52, 0.0  ;;  %v3519_v41 = vunpack.c.l.b16 %v761_v7  ;;  %v2751_v34 = vld [vmem:[%s3764_s4 + $0x1d0] sm:$0xff] }
  0x51   : > { %1884 = vmatmul.bf16.vlgmr.msrb.gmra.mxu0 %v3331_v50  ;;  %v710_v50 = vpack.c.bf16 %v3174_v10, %v3174_v10  ;;  %2050 = vmatpush.bf16.msra.mxu2 %v3454_v14  ;;  %v3479_v10 = vld [vmem:[%s3764_s4 + $0x270] sm:$0xff]  ;;  %v760_v44 = vpack.c.bf16 %v736_v26, %v736_v26 }
  0x52   : > { %2839 = vmatpush.bf16.msra.mxu1 %v3462_v18 }
  0x53   : > { %1964 = vmatpush.bf16.msra.mxu3 %v2755_v49  ;;  %v870_v17 = vunpack.c.l.b16 %v710_v50  ;;  %v3524_v47 = vunpack.c.l.b16 %v760_v44  ;;  %v765_v50 = vpack.c.bf16 %v747_v62, %v747_v62 }
  0x54   : > { %1993 = vmatpush.bf16.msra.mxu0 %v2763_v32  ;;  %v3534_v32 = vunpack.c.l.b16 %v808_v28  ;;  %v931_v28 = vunpack.c.l.b16 %v763_v22 }
  0x55   : > { %2051 = vmatpush.bf16.msra.mxu2 %v3472_v5  ;;  %v3521_v42 = vpack.c.b16 %v871_v53, %v870_v17  ;;  %v923_v49 = vpack.c.b16 %v3519_v41, %v3524_v47  ;;  %v943_v8 = vunpack.c.l.b16 %v765_v50  ;;  %v2766_v47 = vld [vmem:[%s3764_s4 + $0x248] sm:$0xff] }
  0x56   : > { %2840 = vmatpush.bf16.msra.mxu1 %v3479_v10  ;;  %v975_v59 = vpack.c.b16 %v3308_v30, %v3534_v32  ;;  %v2773_v30 = vld [vmem:[%s3764_s4 + $0x280] sm:$0xff] }
  0x57   : > { %1965 = vmatpush.bf16.msra.mxu3 %v2754_v0  ;;  %v2778_v0 = vld [vmem:[%s3764_s4 + $0x2a8] sm:$0xff]  ;;  %v950_v53 = vpack.c.b16 %v943_v8, %v3315_v36  ;;  %v749_v36 = vsel %vm3248_vm8, %v3306_v24, 0.0  ;;  %v2802_v24 = vld [vmem:[%s431_s15] sm:$0xff]  }
  0x58   : > { %1994 = vmatpush.bf16.msra.mxu0 %v2762_v9  ;;  %v2777_v9 = vld [vmem:[%s3764_s4 + $0x2a0] sm:$0xff]  ;;  %v2803_v21 = vunpack.c.l.bf16 %v2802_v24  ;;  %v2804_v26 = vunpack.c.h.bf16 %v2802_v24 }
  0x59   : > { %2052 = vmatpush.bf16.msra.mxu2 %v2778_v0  ;;  %v2765_v32 = vld [vmem:[%s3764_s4 + $0x240] sm:$0xff] }
  0x5a   : > { %2841 = vmatpush.bf16.msra.mxu1 %v2770_v40 }
  0x5b   : > { %1966 = vmatpush.bf16.msra.mxu3 %v2753_v12  ;;  %v817_v12 = vpack.c.bf16 %v3313_v33, %v3313_v33 }
  0x5c   : > { %1995 = vmatpush.bf16.msra.mxu0 %v2761_v13  ;;  %v786_v13 = vsel %vm3100_vm4, %v724_v52, 0.0  ;;  %v494_v52 = vstv %s493_s14 }
  0x5d   : > { %2053 = vmatpush.bf16.msra.mxu2 %v2777_v9  ;;  %v810_v17 = vpack.c.bf16 %v786_v13, %v786_v13  ;;  %v3587_v33 = vunpack.c.l.b16 %v817_v12  ;;  %vm495_vm11 = vcmp.eq.s32.totalorder %v494_v52, 1 }
  0x5e   : > { %1860 = vmatmul.bf16.gmra.mxu3 %v921_v38  ;;  %2842 = vmatpush.bf16.msra.mxu1 %v2769_v2  ;;  %v3622_v7 = vsel %vm495_vm11, %v2803_v21, 0.0 }
  0x5f   : > { %1967 = vmatpush.bf16.msra.mxu3 %v2752_v23  ;;  %1812 = vmatmul.bf16.gmra.mxu1 %v3521_v42  ;;  %v3585_v20 = vunpack.c.l.b16 %v810_v17  ;;  %v738_v23 = vrot.slane %v3481_v58, 1  ;;  %v775_v44 = vrot.slane %v3622_v7, 7 }
  0x60   : > { %1996 = vmatpush.bf16.msra.mxu0 %v2760_v19  ;;  %1841 = vmatmul.bf16.gmra.mxu2 %v899_v46  ;;  %v3624_v19 = vsel %vm495_vm11, %v2804_v26, 0.0 }
  0x61   : > { %1889 = vmatmul.bf16.gmra.mxu0 %v3417_v61  ;;  %v976_v35 = vpack.c.b16 %v3519_v41, %v3585_v20  ;;  %v777_v38 = vrot.slane %v3624_v19, 7  ;;  %v2688_v41 = vld [vmem:[%s3686_s19 + $0x14] sm:$0xf0]  ;;  %v2301_v20 = vld [vmem:[%s3686_s19 + $0x8] sm:$0xf0] }
  0x63   : > { %1968 = vmatpush.bf16.msra.mxu3 %v2751_v34  ;;  %v776_v34 = vsel %vm620_vm1, %v725_v16, %v775_v44 }
  0x64   : > { %1997 = vmatpush.bf16.msra.mxu0 %v2759_v39  ;;  %v778_v39 = vsel %vm620_vm1, %v775_v44, %v777_v38  ;;  %v788_v51 = vsel %vm3228_vm7, %v776_v34, 0.0  ;;  %v814_v44 = vpack.c.bf16 %v3622_v7, %v3622_v7 }
  0x66   : > { %v984_v56 = vunpack.c.l.b16 %v814_v44 }
  0x67   : > { %1969 = vmatpush.bf16.msra.mxu3 %v2750_v60  ;;  %v812_v60 = vpack.c.bf16 %v788_v51, %v788_v51 }
  0x68   : > { %1998 = vmatpush.bf16.msra.mxu0 %v2758_v31 }
  0x69   : > { %v972_v1 = vunpack.c.l.b16 %v812_v60 }
  0x6b   : > { %1970 = vmatpush.bf16.msra.mxu3 %v2749_v3 }
  0x6c   : > { %1999 = vmatpush.bf16.msra.mxu0 %v2757_v6 }
  0x6e   : > { %1865 = vmatmul.bf16.gmra.mxu3 %v922_v15 }
  0x6f   : > { %2847 = vmatpush.bf16.msrb.mxu3 %v3454_v14  ;;  %v1004_v14 = vpack.c.b16 %v3587_v33, %v3394_v25  ;;  %1913 = vmatmul.bf16.vlgmr.msrb.gmra.mxu1 %v950_v53  ;;  %v792_v33 = vrot.slane %v3624_v19, 1 }
  0x70   : > { %2021 = vmatpush.bf16.msrb.mxu0 %v3462_v18  ;;  %1942 = vmatmul.bf16.vlgmr.msrb.gmra.mxu2 %v974_v54  ;;  %v2776_v18 = vld [vmem:[%s3764_s4 + $0x298] sm:$0xff]  ;;  %v762_v54 = vpack.c.bf16 %v3481_v58, %v3481_v58  ;;  %v739_v58 = vsel %vm662_vm3, %v3409_v43, %v738_v23 }
  0x71   : > { %1894 = vmatmul.bf16.gmra.mxu0 %v3521_v42  ;;  %2054 = vmatpush.bf16.msra.mxu2 %v2776_v18  ;;  %v801_v62 = vsel %vm3248_vm8, %v739_v58, 0.0  ;;  %v751_v50 = vsel %vm3346_vm9, %v739_v58, 0.0  ;;  %v794_v21 = vsel %vm662_vm3, %v792_v33, %v3412_v45 }
  0x72   : > { %v930_v46 = vunpack.c.l.b16 %v762_v54  ;;  %v819_v31 = vpack.c.bf16 %v801_v62, %v801_v62  ;;  %v2315_v62 = vld [vmem:[%s3686_s19 + $0x20] sm:$0xf] }
  0x73   : > { %2848 = vmatpush.bf16.msrb.mxu3 %v3472_v5  ;;  %v2768_v5 = vld [vmem:[%s3764_s4 + $0x258] sm:$0xff] }
  0x74   : > { %2022 = vmatpush.bf16.msrb.mxu0 %v3479_v10  ;;  %2843 = vmatpush.bf16.msra.mxu1 %v2768_v5  ;;  %v767_v10 = vpack.c.bf16 %v749_v36, %v749_v36  ;;  %v3639_v43 = vpack.c.b16 %v931_v28, %v930_v46  ;;  %v999_v16 = vunpack.c.l.b16 %v819_v31  ;;  %v2690_v31 = vld [vmem:[%s3686_s19 + $0x24] sm:$0xf0] }
  0x75   : > { %2055 = vmatpush.bf16.msra.mxu2 %v2775_v29 }
  0x76   : > { %v945_v37 = vunpack.c.l.b16 %v767_v10  ;;  %v1005_v57 = vpack.c.b16 %v999_v16, %v3497_v55 }
  0x77   : > { %2849 = vmatpush.bf16.msrb.mxu3 %v2778_v0  ;;  %v813_v0 = vpack.c.bf16 %v778_v39, %v778_v39 }
  0x78   : > { %2023 = vmatpush.bf16.msrb.mxu0 %v2770_v40  ;;  %2844 = vmatpush.bf16.msra.mxu1 %v2767_v27  ;;  %v951_v40 = vpack.c.b16 %v945_v37, %v3394_v25  ;;  %v3691_v25 = vld [vmem:[%s3765_s5] ss:$0 sm:$0xff] }
  0x7b   : > { %2850 = vmatpush.bf16.msrb.mxu3 %v2777_v9  ;;  %v973_v9 = vunpack.c.l.b16 %v813_v0 }
  0x7c   : > { %2024 = vmatpush.bf16.msrb.mxu0 %v2769_v2  ;;  %v2774_v2 = vld [vmem:[%s3764_s4 + $0x288] sm:$0xff]  ;;  %2845 = vmatpush.bf16.msra.mxu1 %v2766_v47 }
  0x7d   : > { %v977_v48 = vpack.c.b16 %v973_v9, %v972_v1  ;;  %2056 = vmatpush.bf16.msra.mxu2 %v2774_v2 }
  0x7e   : > { %1870 = vmatmul.bf16.gmra.mxu3 %v923_v49  ;;  %v740_v49 = vrot.slane %v3483_v11, 1  ;;  %v790_v11 = vrot.slane %v3622_v7, 1  ;;  %v2309_v7 = vld [vmem:[%s3686_s19 + $0x18] sm:$0xf0] }
  0x7f   : > { %2851 = vmatpush.bf16.msrb.mxu3 %v2776_v18  ;;  %1918 = vmatmul.bf16.gmra.mxu1 %v951_v40  ;;  %v2687_v40 = vld [vmem:[%s3686_s19 + $0x14] sm:$0xf] }
  0x80   : > { %2025 = vmatpush.bf16.msrb.mxu0 %v2768_v5  ;;  %1947 = vmatmul.bf16.gmra.mxu2 %v975_v59  ;;  %v769_v59 = vpack.c.bf16 %v751_v50, %v751_v50  ;;  %v741_v3 = vsel %vm662_vm3, %v738_v23, %v740_v49  ;;  %v791_v8 = vsel %vm662_vm3, %v740_v49, %v790_v11  ;;  %v805_v23 = vsel %vm3428_vm10, %v794_v21, 0.0 }
  0x81   : > { %1899 = vmatmul.bf16.gmra.mxu0 %v3639_v43  ;;  %2057 = vmatpush.bf16.msra.mxu2 %v2773_v30  ;;  %v770_v4 = vpack.c.bf16 %v741_v3, %v741_v3  ;;  %v803_v12 = vsel %vm3346_vm9, %v791_v8, 0.0  ;;  %v742_v36 = vsel %vm662_vm3, %v740_v49, %v3412_v45  ;;  %v793_v22 = vsel %vm662_vm3, %v790_v11, %v792_v33  ;;  %v2323_v8 = vld [vmem:[%s3686_s19 + $0x30] sm:$0xf] }
  0x82   : > { %2846 = vmatpush.bf16.msra.mxu1 %v2765_v32  ;;  %v947_v6 = vunpack.c.l.b16 %v769_v59  ;;  %v821_v13 = vpack.c.bf16 %v803_v12, %v803_v12  ;;  %v753_v63 = vsel %vm3428_vm10, %v742_v36, 0.0  ;;  %v815_v45 = vpack.c.bf16 %v3624_v19, %v3624_v19  ;;  %v2691_v12 = vld [vmem:[%s3686_s19 + $0x34] sm:$0xf] }
  0x83   : > { %2852 = vmatpush.bf16.msrb.mxu3 %v2775_v29  ;;  %v948_v17 = vunpack.c.l.b16 %v770_v4  ;;  %v822_v58 = vpack.c.bf16 %v793_v22, %v793_v22  ;;  %v823_v34 = vpack.c.bf16 %v805_v23, %v805_v23 }
  0x84   : > { %2026 = vmatpush.bf16.msrb.mxu0 %v2767_v27  ;;  %v952_v15 = vpack.c.b16 %v947_v6, %v3497_v55  ;;  %v1001_v53 = vunpack.c.l.b16 %v821_v13  ;;  %v771_v55 = vpack.c.bf16 %v753_v63, %v753_v63  ;;  %v985_v51 = vunpack.c.l.b16 %v815_v45  ;;  %v2325_v13 = vld [vmem:[%s3686_s19 + $0x38] sm:$0xf0]  ;;  %v2686_v63 = vld [vmem:[%s3686_s19 + $0x4] sm:$0xf0] }
  0x85   : > { %v1002_v60 = vunpack.c.l.b16 %v822_v58  ;;  %v1003_v0 = vunpack.c.l.b16 %v823_v34 }
  0x86   : > { %v1006_v18 = vpack.c.b16 %v1001_v53, %v948_v17  ;;  %v949_v5 = vunpack.c.l.b16 %v771_v55  ;;  %v986_v9 = vpack.c.b16 %v985_v51, %v984_v56  ;;  %v2317_v53 = vld [vmem:[%s3686_s19 + $0x28] sm:$0xf0] }
  0x87   : > { %2853 = vmatpush.bf16.msrb.mxu3 %v2774_v2 }
  0x88   : > { %2027 = vmatpush.bf16.msrb.mxu0 %v2766_v47  ;;  %v953_v29 = vpack.c.b16 %v949_v5, %v948_v17  ;;  %v1007_v47 = vpack.c.b16 %v1003_v0, %v1002_v60  ;;  %v2689_v17 = vld [vmem:[%s3686_s19 + $0x24] sm:$0xf]  ;;  %v2328_v5 = vor.u32 %v2691_v12, %v2325_v13 }
  0x8b   : > { %2854 = vmatpush.bf16.msrb.mxu3 %v2773_v30 }
  0x8c   : > { %2028 = vmatpush.bf16.msrb.mxu0 %v2765_v32 }
  0x8e   : > { %1971 = vmatmul.bf16.vlgmr.msra.gmra.mxu3 %v3417_v61  ;;  %v2307_v61 = vld [vmem:[%s3686_s19 + $0x10] sm:$0xf] }
  0x8f   : > { %1923 = vmatmul.bf16.gmra.mxu1 %v952_v15  ;;  %v2692_v15 = vld [vmem:[%s3686_s19 + $0x34] sm:$0xf0] }
  0x90   : > { %1952 = vmatmul.bf16.gmra.mxu2 %v976_v35 }
  0x91   : > { %2000 = vmatmul.bf16.vlgmr.msra.gmra.mxu0 %v1004_v14  ;;  %v2308_v14 = vor.u32 %v2688_v41, %v2307_v61  ;;  %v2324_v41 = vor.u32 %v2692_v15, %v2323_v8 }
  0x9e   : > { %1976 = vmatmul.bf16.gmra.mxu3 %v3521_v42  ;;  %v2685_v42 = vld [vmem:[%s3686_s19 + $0x4] sm:$0xf] }
  0x9f   : > { %1928 = vmatmul.bf16.gmra.mxu1 %v953_v29  ;;  %v2304_v27 = vor.u32 %v2685_v42, %v2301_v20  ;;  %v2320_v42 = vor.u32 %v2689_v17, %v2317_v53 }
  0xa0   : > { %1957 = vmatmul.bf16.gmra.mxu2 %v977_v48  ;;  %v2316_v48 = vor.u32 %v2690_v31, %v2315_v62 }
  0xa1   : > { %2005 = vmatmul.bf16.gmra.mxu0 %v1005_v57  ;;  %v2312_v57 = vor.u32 %v2687_v40, %v2309_v7 }
  0xab   : > { %v1769_v35 = vpop.f32.mrf.mxu0 }
  0xac   : > { %v1770_v24 = vadd.f32 %v3691_v25, %v1769_v35  ;;  %v1798_v54 = vpop.f32.mrf.mxu1 }
  0xae   : > { %v1799_v10 = vadd.f32 %v1798_v54, %v1770_v24  ;;  %1981 = vmatmul.bf16.gmra.mxu3 %v3639_v43 }
  0xaf   : > { %2034 = vmatmul.bf16.vlgmr.msra.gmra.mxu1 %v2308_v14 }
  0xb0   : > { %2058 = vmatmul.bf16.vlgmr.msra.gmra.mxu2 %v2304_v27 }
  0xb1   : > { %2010 = vmatmul.bf16.gmra.mxu0 %v1006_v18  ;;  %v1779_v52 = vpop.f32.mrf.mxu3  ;;  %v2299_v18 = vld [vmem:[%s3686_s19] sm:$0xf] }
  0xb2   : > { %v1780_v29 = vadd.f32 %v3691_v25, %v1779_v52  ;;  %v2300_v33 = vor.u32 %v2686_v63, %v2299_v18 }
  0xb3   : > { %v1827_v26 = vpop.f32.mrf.mxu2  ;;  %v1771_v38 = vpop.f32.mrf.mxu0 }
  0xb4   : > { %v1828_v37 = vadd.f32 %v1827_v26, %v1799_v10  ;;  %v1772_v46 = vadd.f32 %v3691_v25, %v1771_v38  ;;  %v1800_v28 = vpop.f32.mrf.mxu1 }
  0xb6   : > { %v1801_v39 = vadd.f32 %v1800_v28, %v1772_v46 }
  0xb9   : > { %v1781_v43 = vpop.f32.mrf.mxu3 }
  0xba   : > { %v1782_v10 = vadd.f32 %v3691_v25, %v1781_v43 }
  0xbb   : > { %v1829_v1 = vpop.f32.mrf.mxu2  ;;  %v1774_v16 = vpop.f32.mrf.mxu0 }
  0xbc   : > { %v1830_v19 = vadd.f32 %v1829_v1, %v1801_v39  ;;  %v1775_v50 = vadd.f32 %v3691_v25, %v1774_v16  ;;  %v1803_v2 = vpop.f32.mrf.mxu1 }
  0xbe   : > { %v1804_v49 = vadd.f32 %v1803_v2, %v1775_v50  ;;  %1986 = vmatmul.bf16.gmra.mxu3 %v986_v9 }
  0xbf   : > { %2039 = vmatmul.bf16.gmra.mxu1 %v2316_v48 }
  0xc0   : > { %2063 = vmatmul.bf16.gmra.mxu2 %v2312_v57 }
  0xc1   : > { %2015 = vmatmul.bf16.gmra.mxu0 %v1007_v47  ;;  %v1784_v30 = vpop.f32.mrf.mxu3 }
  0xc2   : > { %v1785_v46 = vadd.f32 %v3691_v25, %v1784_v30 }
  0xc3   : > { %v1832_v32 = vpop.f32.mrf.mxu2  ;;  %v1776_v3 = vpop.f32.mrf.mxu0 }
  0xc4   : > { %v1833_v59 = vadd.f32 %v1832_v32, %v1804_v49  ;;  %v1777_v11 = vadd.f32 %v3691_v25, %v1776_v3  ;;  %v1805_v6 = vpop.f32.mrf.mxu1 }
  0xc6   : > { %v1806_v4 = vadd.f32 %v1805_v6, %v1777_v11 }
  0xc9   : > { %v1786_v36 = vpop.f32.mrf.mxu3 }
  0xca   : > { %v1787_v60 = vadd.f32 %v3691_v25, %v1786_v36 }
  0xcb   : > { %v1834_v55 = vpop.f32.mrf.mxu2 }
  0xcc   : > { %v1835_v61 = vadd.f32 %v1834_v55, %v1806_v4  ;;  %v1808_v20 = vpop.f32.mrf.mxu1 }
  0xcd   : > { %v1809_v35 = vadd.f32 %v1808_v20, %v1780_v29 }
  0xce   : > { %v1885_v14 = vpop.f32.mrf.mxu0  ;;  %2073 = vmatmul.bf16.vlgmr.msrb.gmra.mxu3 %v2328_v5 }
  0xcf   : > { %2044 = vmatmul.bf16.gmra.mxu1 %v2324_v41 }
  0xd0   : > { %2068 = vmatmul.bf16.gmra.mxu2 %v2320_v42 }
  0xd1   : > { %2029 = vmatmul.bf16.vlgmr.msrb.gmra.mxu0 %v2300_v33  ;;  %v1856_v27 = vpop.f32.mrf.mxu3 }
  0xd2   : > { %v1857_v54 = vadd.f32 %v1856_v27, %v1828_v37 }
  0xd3   : > { %v1837_v24 = vpop.f32.mrf.mxu2 }
  0xd4   : > { %v1838_v21 = vadd.f32 %v1837_v24, %v1809_v35  ;;  %v1810_v22 = vpop.f32.mrf.mxu1  ;;  %v1886_v23 = vadd.f32 %v1885_v14, %v1857_v54 }
  0xd5   : > { %v1811_v52 = vadd.f32 %v1810_v22, %v1782_v10 }
  0xd6   : > { %v1887_v26 = vpop.f32.mrf.mxu0 }
  0xd9   : > { %v1858_v44 = vpop.f32.mrf.mxu3 }
  0xda   : > { %v1859_v38 = vadd.f32 %v1858_v44, %v1830_v19 }
  0xdb   : > { %v1839_v45 = vpop.f32.mrf.mxu2 }
  0xdc   : > { %v1840_v28 = vadd.f32 %v1839_v45, %v1811_v52  ;;  %v1813_v58 = vpop.f32.mrf.mxu1  ;;  %v1888_v34 = vadd.f32 %v1887_v26, %v1859_v38 }
  0xdd   : > { %v1814_v39 = vadd.f32 %v1813_v58, %v1785_v46 }
  0xde   : > { %v1890_v56 = vpop.f32.mrf.mxu0 }
  0xe1   : > { %v1861_v51 = vpop.f32.mrf.mxu3 }
  0xe2   : > { %v1862_v37 = vadd.f32 %v1861_v51, %v1833_v59 }
  0xe3   : > { %v1842_v62 = vpop.f32.mrf.mxu2 }
  0xe4   : > { %v1843_v0 = vadd.f32 %v1842_v62, %v1814_v39  ;;  %v1815_v31 = vpop.f32.mrf.mxu1  ;;  %v1891_v40 = vadd.f32 %v1890_v56, %v1862_v37 }
  0xe5   : > { %v1816_v7 = vadd.f32 %v1815_v31, %v1787_v60 }
  0xe6   : > { %v1892_v43 = vpop.f32.mrf.mxu0 }
  0xe9   : > { %v1863_v1 = vpop.f32.mrf.mxu3 }
  0xea   : > { %v1864_v19 = vadd.f32 %v1863_v1, %v1835_v61 }
  0xeb   : > { %v1844_v9 = vpop.f32.mrf.mxu2 }
  0xec   : > { %v1845_v16 = vadd.f32 %v1844_v9, %v1816_v7  ;;  %v1914_v48 = vpop.f32.mrf.mxu1  ;;  %v1893_v57 = vadd.f32 %v1892_v43, %v1864_v19 }
  0xed   : > { %v1915_v2 = vadd.f32 %v1914_v48, %v1886_v23 }
  0xee   : > { %v1895_v50 = vpop.f32.mrf.mxu0 }
  0xf1   : > { %v1866_v47 = vpop.f32.mrf.mxu3 }
  0xf2   : > { %v1867_v49 = vadd.f32 %v1866_v47, %v1838_v21 }
  0xf3   : > { %v1943_v30 = vpop.f32.mrf.mxu2 }
  0xf4   : > { %v1944_v32 = vadd.f32 %v1943_v30, %v1915_v2  ;;  %v1916_v59 = vpop.f32.mrf.mxu1  ;;  %v1896_v3 = vadd.f32 %v1895_v50, %v1867_v49 }
  0xf5   : > { %v1917_v11 = vadd.f32 %v1916_v59, %v1888_v34 }
  0xf6   : > { %v1897_v25 = vpop.f32.mrf.mxu0 }
  0xf9   : > { %v1868_v6 = vpop.f32.mrf.mxu3 }
  0xfa   : > { %v1869_v4 = vadd.f32 %v1868_v6, %v1840_v28 }
  0xfb   : > { %v1945_v8 = vpop.f32.mrf.mxu2 }
  0xfc   : > { %v3728_v12 = vadd.f32 %v1945_v8, %v1917_v11  ;;  %v1919_v13 = vpop.f32.mrf.mxu1  ;;  %v3730_v15 = vadd.f32 %v1897_v25, %v1869_v4 }
  0xfd   : > { %v1920_v53 = vadd.f32 %v1919_v13, %v1891_v40 }
  0xfe   : > { %v1900_v17 = vpop.f32.mrf.mxu0 }
 0x101   : > { %v1871_v36 = vpop.f32.mrf.mxu3 }
 0x102   : > { %v1872_v18 = vadd.f32 %v1871_v36, %v1843_v0 }
 0x103   : > { %v1948_v63 = vpop.f32.mrf.mxu2 }
 0x104   : > { %v1949_v55 = vadd.f32 %v1948_v63, %v1920_v53  ;;  %v1921_v5 = vpop.f32.mrf.mxu1  ;;  %v1901_v29 = vadd.f32 %v1900_v17, %v1872_v18 }
 0x105   : > { %v1922_v9 = vadd.f32 %v1921_v5, %v1893_v57 }
 0x106   : > { %v1902_v61 = vpop.f32.mrf.mxu0 }
 0x109   : > { %v1873_v41 = vpop.f32.mrf.mxu3 }
 0x10a   : > { %v1874_v42 = vadd.f32 %v1873_v41, %v1845_v16 }
 0x10b   : > { %v1950_v20 = vpop.f32.mrf.mxu2 }
 0x10c   : > { %v1924_v33 = vpop.f32.mrf.mxu1  ;;  %v1903_v35 = vadd.f32 %v1902_v61, %v1874_v42  ;;  %v1951_v19 = vadd.f32 %v1950_v20, %v1922_v9 }
 0x10d   : > { %v1925_v14 = vadd.f32 %v1924_v33, %v1896_v3 }
 0x10e   : > { %v2001_v27 = vpop.f32.mrf.mxu0 }
 0x111   : > { %v1972_v24 = vpop.f32.mrf.mxu3 }
 0x112   : > { %v1973_v10 = vadd.f32 %v1972_v24, %v1944_v32 }
 0x113   : > { %v1953_v54 = vpop.f32.mrf.mxu2 }
 0x114   : > { %v1954_v21 = vadd.f32 %v1953_v54, %v1925_v14  ;;  %v1926_v22 = vpop.f32.mrf.mxu1  ;;  %v2002_v23 = vadd.f32 %v2001_v27, %v1973_v10 }
 0x115   : > { %v1927_v36 = vadd.f32 %v1926_v22, %v3730_v15 }
 0x116   : > { %v2003_v52 = vpop.f32.mrf.mxu0 }
 0x119   : > { %v1974_v26 = vpop.f32.mrf.mxu3 }
 0x11a   : > { %v1975_v18 = vadd.f32 %v1974_v26, %v3728_v12 }
 0x11b   : > { %v1955_v44 = vpop.f32.mrf.mxu2 }
 0x11c   : > { %v1929_v45 = vpop.f32.mrf.mxu1  ;;  %v1956_v5 = vadd.f32 %v1955_v44, %v1927_v36  ;;  %v2004_v24 = vadd.f32 %v2003_v52, %v1975_v18 }
 0x11d   : > { %v1930_v17 = vadd.f32 %v1929_v45, %v1901_v29 }
 0x11e   : > { %v2006_v38 = vpop.f32.mrf.mxu0 }
 0x121   : > { %v1977_v46 = vpop.f32.mrf.mxu3 }
 0x122   : > { %v1978_v50 = vadd.f32 %v1977_v46, %v1949_v55 }
 0x123   : > { %v1958_v28 = vpop.f32.mrf.mxu2 }
 0x124   : > { %v1931_v58 = vpop.f32.mrf.mxu1  ;;  %v2007_v30 = vadd.f32 %v2006_v38, %v1978_v50  ;;  %v1959_v63 = vadd.f32 %v1958_v28, %v1930_v17 }
 0x125   : > { %v1932_v53 = vadd.f32 %v1931_v58, %v1903_v35 }
 0x126   : > { %v2008_v34 = vpop.f32.mrf.mxu0 }
 0x129   : > { %v1979_v39 = vpop.f32.mrf.mxu3 }
 0x12a   : > { %v1980_v2 = vadd.f32 %v1979_v39, %v1951_v19 }
 0x12b   : > { %v1960_v56 = vpop.f32.mrf.mxu2 }
 0x12c   : > { %v2035_v51 = vpop.f32.mrf.mxu1  ;;  %v2009_v32 = vadd.f32 %v2008_v34, %v1980_v2  ;;  %v1961_v55 = vadd.f32 %v1960_v56, %v1932_v53 }
 0x12d   : > { %v2036_v59 = vadd.f32 %v2035_v51, %v2007_v30 }
 0x12e   : > { %v2011_v62 = vpop.f32.mrf.mxu0 }
 0x131   : > { %v1982_v37 = vpop.f32.mrf.mxu3 }
 0x132   : > { %v1983_v33 = vadd.f32 %v1982_v37, %v1954_v21 }
 0x133   : > { %v2059_v60 = vpop.f32.mrf.mxu2 }
 0x134   : > { %v2037_v0 = vpop.f32.mrf.mxu1  ;;  %v2012_v15 = vadd.f32 %v2011_v62, %v1983_v33 }
 0x135   : > { %v2038_v3 = vadd.f32 %v2037_v0, %v2009_v32 }
 0x136   : > { %v2013_v31 = vpop.f32.mrf.mxu0 }
 0x139   : > { %v1984_v40 = vpop.f32.mrf.mxu3 }
 0x13a   : > { %v1985_v14 = vadd.f32 %v1984_v40, %v1956_v5 }
 0x13b   : > { %v2061_v7 = vpop.f32.mrf.mxu2 }
 0x13c   : > { %v2040_v43 = vpop.f32.mrf.mxu1  ;;  %v2014_v22 = vadd.f32 %v2013_v31, %v1985_v14 }
 0x13d   : > { %v2041_v46 = vadd.f32 %v2040_v43, %v2012_v15 }
 0x13e   : > { %v2016_v1 = vpop.f32.mrf.mxu0 }
 0x141   : > { %v1987_v16 = vpop.f32.mrf.mxu3 }
 0x142   : > { %v1988_v41 = vadd.f32 %v1987_v16, %v1959_v63 }
 0x143   : > { %v2064_v48 = vpop.f32.mrf.mxu2 }
 0x144   : > { %v2042_v47 = vpop.f32.mrf.mxu1  ;;  %v2065_v6 = vadd.f32 %v2064_v48, %v2036_v59  ;;  %v2017_v29 = vadd.f32 %v2016_v1, %v1988_v41 }
 0x145   : > { %v2043_v28 = vadd.f32 %v2042_v47, %v2014_v22 }
 0x146   : > { %v2018_v49 = vpop.f32.mrf.mxu0 }
 0x149   : > { %v1989_v25 = vpop.f32.mrf.mxu3 }
 0x14a   : > { %v1990_v42 = vadd.f32 %v1989_v25, %v1961_v55 }
 0x14b   : > { %v2066_v11 = vpop.f32.mrf.mxu2 }
 0x14c   : > { %v2067_v4 = vadd.f32 %v2066_v11, %v2038_v3  ;;  %v2045_v57 = vpop.f32.mrf.mxu1  ;;  %v2019_v45 = vadd.f32 %v2018_v49, %v1990_v42 }
 0x14d   : > { %v2046_v26 = vadd.f32 %v2045_v57, %v2017_v29 }
 0x14e   : > { %v2813_v8 = vpack.c.bf16 %v2067_v4, %v2065_v6  ;;  %v2030_v13 = vpop.f32.mrf.mxu0 }
 0x14f   : > { %v2031_v27 = vadd.f32 %v2030_v13, %v2002_v23 }
 0x150   : > { %2828 = vst [vmem:[%s3737_s22 + $0x8] sm:$0xff] %v2813_v8  }
 0x151   : > { %v2074_v61 = vpop.f32.mrf.mxu3  ;;  %v2060_v12 = vadd.f32 %v2059_v60, %v2031_v27 }
 0x152   : > { %v2075_v58 = vadd.f32 %v2074_v61, %v2046_v26 }
 0x153   : > { %v2069_v20 = vpop.f32.mrf.mxu2 }
 0x154   : > { %v2047_v10 = vpop.f32.mrf.mxu1  ;;  %v2070_v39 = vadd.f32 %v2069_v20, %v2041_v46 }
 0x155   : > { %v2048_v38 = vadd.f32 %v2047_v10, %v2019_v45 }
 0x156   : > { %v2032_v54 = vpop.f32.mrf.mxu0 }
 0x157   : > { %v2033_v35 = vadd.f32 %v2032_v54, %v2004_v24 }
 0x159   : > { %v2062_v44 = vadd.f32 %v2061_v7, %v2033_v35  ;;  %v2076_v21 = vpop.f32.mrf.mxu3 }
 0x15a   : > { %v2077_v34 = vadd.f32 %v2076_v21, %v2048_v38 }
 0x15b   : > { %v2808_v23 = vpack.c.bf16 %v2062_v44, %v2060_v12  ;;  %v2071_v52 = vpop.f32.mrf.mxu2 }
 0x15c   : > { %v2072_v56 = vadd.f32 %v2071_v52, %v2043_v28  ;;  %v2823_v51 = vpack.c.bf16 %v2077_v34, %v2075_v58 }
 0x15d   : > { %2809 = vst [vmem:[%s3737_s22] sm:$0xff] %v2808_v23  }
 0x15e   : > { %v2818_v37 = vpack.c.bf16 %v2072_v56, %v2070_v39  ;;  %2830 = vst [vmem:[%s3737_s22 + $0x18] sm:$0xff] %v2823_v51  }
 0x160   : > { %2829 = vst [vmem:[%s3737_s22 + $0x10] sm:$0xff] %v2818_v37  }
 0x161 PF: > { %s16_s25 = sadd.s32 1, %s2935_s25   ;;  %s3785_s21 = smov %s2927_s23 }
 0x162   : > { %p13_p13 = scmp.ge.s32.totalorder %s16_s25, 6   ;;  %s3786_s22 = smov %s2931_s24 }
 0x163   : > { %s3787_s23 = smov %s3790_s26  ;;  %s3788_s24 = smov %s3794_s27 }
 0x164   :  { %15 = sbr.rel (!%p13_p13) target bundleno = 3 (0x3), region = 86 }

// kernel: upblock_forward.10
= control target key start
LH: loop header
LB: loop body
LE: loop exit
PB: predicated region body
PF: predicated region fallthrough
CT: control target
= control target key end

     0   :  { %s4285_s24 = smov 0   ;;  %s4287_s25 = smov 0   ;;  %s5773_s0 = inlined_call_operand.vmem [shape: bf16[2,8,16,256], index: 0, kind: input, shape index: {}, may-alias: {0,1,2}]   ;;  %s5774_s1 = inlined_call_operand.vmem [shape: bf16[2,8,16,256], index: 1, kind: input, shape index: {}, may-alias: {0,1,2}]   ;;  %s5775_s2 = inlined_call_operand.vmem [shape: bf16[2,8,16,256], index: 2, kind: input, shape index: {}, may-alias: {0,1,2}]   ;;  %s5776_s3 = inlined_call_operand.vmem [shape: f32[1,256], index: 3, kind: input, shape index: {}]   ;;  %s5777_s4 = inlined_call_operand.vmem [shape: f32[1,256], index: 4, kind: input, shape index: {}]   ;;  %s5778_s5 = inlined_call_operand.vmem [shape: bf16[2304,128], index: 5, kind: input, shape index: {}]   ;;  %s5779_s6 = inlined_call_operand.vmem [shape: f32[1,128], index: 6, kind: input, shape index: {}]   ;;  %s5780_s7 = inlined_call_operand.vmem [shape: bf16[2,128,128], index: 7, kind: output, shape index: {}]  }
   0x1   :  { %s4289_s26 = smov 0   ;;  %s4291_s27 = smov 0  }
   0x2   :  { %s4293_s28 = smov 0  }
   0x3 LB: > { %s26_s29 = sadd.s32 1, %s4234_s26  ;;  %s29_s30 = sadd.s32 1, %s4238_s27  ;;  %s4242_s28 = sphi %s4293_s28, %s17_s28   ;;  %s4238_s27 = sphi %s4291_s27, %s5848_s27   ;;  %s4234_s26 = sphi %s4289_s26, %s5847_s26   ;;  %s4230_s25 = sphi %s4287_s25, %s5846_s25   ;;  %s4226_s24 = sphi %s4285_s24, %s5845_s24  }
   0x4   : > { %p27_p0 = scmp.ge.s32.totalorder %s26_s29, 2  ;;  %p3327_p1 = scmp.ge.s32.totalorder %s4242_s28, 1 }
   0x5   : > { %p323_p2 = scmp.lt.s32.totalorder %s4242_s28, 5 }
   0x6   : > { %s5850_s29 = smov (%p27_p0, %s26_s29), 0  ;;  %s5852_s30 = smov (!%p27_p0, %s29_s30), %s4238_s27 }
   0x7   : > { %p324_p3 = pnand %p3327_p1, %p323_p2  ;;  %p31_p4 = scmp.ge.s32.totalorder %s5852_s30, 2 }
   0x9   : > { %s5854_s30 = smov (%p31_p4, %s5852_s30), 0  ;;  %327 = sbr.rel (%p324_p3) target bundleno = 499 (0x1f3), region = 48 }
   0xe   : > { %v3954_v0 = vld [vmem:[%s5778_s5 + $0x38] sm:$0xff]  ;;  %s4324_s12 = sshll.u32 %s4226_s24, 2  ;;  %p391_p5 = scmp.lt.s32.totalorder %s4230_s25, 1  ;;  %v562_v2 = vlaneseq  ;;  %v3953_v3 = vld [vmem:[%s5778_s5 + $0x30] sm:$0xff]  ;;  %v446_v7 = vld [vmem:[%s5776_s3] sm:$0x3] }
   0xf   : > { %v3962_v1 = vld [vmem:[%s5778_s5 + $0x78] sm:$0xff]  ;;  %p393_p6 = scmp.lt.s32.totalorder %s4324_s12, 7  ;;  %s4328_s13 = sadd.s32 4294967295, %s4324_s12  ;;  %4114 = vmatpush.bf16.msra.mxu2 %v3954_v0  ;;  %v3961_v4 = vld [vmem:[%s5778_s5 + $0x70] sm:$0xff]  ;;  %2484 = vmatpush.bf16.msra.mxu0 %v3954_v0  ;;  %v447_v8 = vld [vmem:[%s5777_s4] sm:$0x3] }
  0x10   : > { %4122 = vmatpush.bf16.msra.mxu3 %v3962_v1  ;;  %s5856_s25 = smov (!%p391_p5, %s4230_s25), 1  ;;  %v4338_v5 = vshrl.u32 %v562_v2, 7  ;;  %2513 = vmatpush.bf16.msra.mxu1 %v3962_v1  ;;  %p403_p7 = scmp.gt.s32.totalorder %s4328_s13, 0  ;;  %v3952_v9 = vld [vmem:[%s5778_s5 + $0x28] sm:$0xff]  ;;  %v4359_v11 = vperm.slane %v446_v7, 0  ;;  %v4361_v12 = vperm.slane %v446_v7, 1 }
  0x11   : > { %s394_s18 = scalar_select %p393_p6, %s4324_s12, 7  ;;  %v3960_v10 = vld [vmem:[%s5778_s5 + $0x68] sm:$0xff]  ;;  %vm692_vm0 = vcmask 1040384   ;;  %v5783_v14 = vmov 0.0   ;;  %v4372_v16 = vperm.slane %v447_v8, 0  ;;  %v4374_v17 = vperm.slane %v447_v8, 1 }
  0x12   : > { %s4342_s19 = sshll.u32 %s5856_s25, 5  ;;  %v567_v6 = vadd.s32 32, %v4338_v5  ;;  %p3334_p8 = scmp.lt.s32.totalorder %s4328_s13, 7  ;;  %v4365_v15 = vrot.slane %v5783_v14, 7  ;;  %v4378_v18 = vadd.s32 48, %v4338_v5  ;;  %v4381_v19 = vadd.s32 16, %v4338_v5 }
  0x13   : > { %s3329_s20 = sshll.u32 %s394_s18, 2  ;;  %4115 = vmatpush.bf16.msra.mxu2 %v3953_v3  ;;  %2485 = vmatpush.bf16.msra.mxu0 %v3953_v3  ;;  %p450_p9 = scmp.ge.s32.totalorder %s4324_s12, 1  ;;  %v575_v24 = vand.u32 15, %v4338_v5  ;;  %v3951_v25 = vld [vmem:[%s5778_s5 + $0x20] sm:$0xff]  ;;  %v3950_v45 = vld [vmem:[%s5778_s5 + $0x18] sm:$0xff]  ;;  %v3949_v1 = vld [vmem:[%s5778_s5 + $0x10] sm:$0xff] }
  0x14   : > { %4123 = vmatpush.bf16.msra.mxu3 %v3961_v4  ;;  %s397_s15 = sadd.s32 %s4342_s19, %s3329_s20  ;;  %2514 = vmatpush.bf16.msra.mxu1 %v3961_v4  ;;  %v603_v13 = vand.u32 15, %v567_v6  ;;  %5799 = vst [vmem:[#allocation2_spill] sm:$0xff] %v4365_v15  ;;  %v3959_v26 = vld [vmem:[%s5778_s5 + $0x60] sm:$0xff]  ;;  %v617_v33 = vand.u32 15, %v4378_v18  ;;  %v589_v34 = vand.u32 15, %v4381_v19  ;;  %v3958_v46 = vld [vmem:[%s5778_s5 + $0x58] sm:$0xff] }
  0x15   : > { %s3331_s16 = sshll.u32 %s397_s15, 2  ;;  %v3957_v2 = vld [vmem:[%s5778_s5 + $0x50] sm:$0xff]  ;;  %vm4476_vm3 = vcmp.ge.s32.totalorder %v575_v24, 1  ;;  %v5805_v8 = vmov 0  ;;  %vm766_vm6 = vcmask 1046528   ;;  %s3349_s15 = sshll.u32 %s4226_s24, 3 }
  0x16   : > { %s4370_s20 = scalar_lea.vmem %s5773_s0, %s3331_s16  ;;  %vm4386_vm1 = vcmp.ge.s32.totalorder %v603_v13, 1  ;;  %v5806_v8 = vsel %vm4476_vm3, 4294967295, %v5805_v8  ;;  %vm4591_vm4 = vcmp.ge.s32.totalorder %v617_v33, 1  ;;  %vm4660_vm5 = vcmp.ge.s32.totalorder %v589_v34, 1  ;;  %p5661_p12 = scmp.lt.s32.totalorder %s3349_s15, 15 }
  0x17   : > { %v481_v20 = vld [vmem:[%s4370_s20 + $0x8] sm:$0xff]  ;;  %v3353_v21 = vld [vmem:[%s4370_s20 + $0x10] sm:$0xff]  ;;  %v3354_v22 = vld [vmem:[%s4370_s20 + $0x18] sm:$0xff]  ;;  %s404_s21 = scalar_select %p403_p7, %s4328_s13, 0  ;;  %4116 = vmatpush.bf16.msra.mxu2 %v3952_v9  ;;  %2486 = vmatpush.bf16.msra.mxu0 %v3952_v9  ;;  %5807 = vst [vmem:[#allocation4_spill] sm:$0xff] %v5806_v8 }
  0x18   : > { %4124 = vmatpush.bf16.msra.mxu3 %v3960_v10  ;;  %v484_v27 = vunpack.c.l.bf16 %v481_v20  ;;  %v485_v28 = vunpack.c.h.bf16 %v481_v20  ;;  %v497_v29 = vunpack.c.l.bf16 %v3353_v21  ;;  %v498_v30 = vunpack.c.h.bf16 %v3353_v21  ;;  %s473_s10 = scalar_select %p450_p9, 1, 0  ;;  %2515 = vmatpush.bf16.msra.mxu1 %v3960_v10  ;;  %v4411_v39 = vld [vmem:[%s4370_s20 + $0x20] sm:$0xff]  ;;  %v4416_v43 = vld [vmem:[%s4370_s20 + $0x28] sm:$0xff] }
  0x19   : > { %v499_v31 = vunpack.c.l.bf16 %v3354_v22  ;;  %v500_v32 = vunpack.c.h.bf16 %v3354_v22  ;;  %s5858_s21 = smov (!%p3334_p8, %s404_s21), 7  ;;  %v512_v44 = vunpack.c.l.bf16 %v4411_v39  ;;  %v513_v54 = vunpack.c.h.bf16 %v4411_v39  ;;  %s5862_s15 = smov (!%p5661_p12, %s3349_s15), 15 }
  0x1a   : > { %v488_v35 = vmul.f32 %v484_v27, %v4359_v11  ;;  %v489_v36 = vmul.f32 %v485_v28, %v4361_v12  ;;  %v501_v37 = vmul.f32 %v497_v29, %v4359_v11  ;;  %v502_v38 = vmul.f32 %v498_v30, %v4361_v12  ;;  %s3339_s13 = sshll.u32 %s5858_s21, 2  ;;  %v3948_v30 = vld [vmem:[%s5778_s5 + $0x8] sm:$0xff]  ;;  %s3350_s24 = sshll.u32 %s5856_s25, 4 }
  0x1b   : > { %v503_v40 = vmul.f32 %v499_v31, %v4359_v11  ;;  %v504_v41 = vmul.f32 %v500_v32, %v4361_v12  ;;  %v474_v42 = vstv %s473_s10  ;;  %4117 = vmatpush.bf16.msra.mxu2 %v3951_v25  ;;  %s411_s17 = sadd.s32 %s3339_s13, %s4342_s19  ;;  %2487 = vmatpush.bf16.msra.mxu0 %v3951_v25  ;;  %v514_v58 = vunpack.c.l.bf16 %v4416_v43  ;;  %v3956_v31 = vld [vmem:[%s5778_s5 + $0x48] sm:$0xff]  ;;  %s5688_s25 = sadd.s32 %s3350_s24, %s5862_s15 }
  0x1c   : > { %4125 = vmatpush.bf16.msra.mxu3 %v3959_v26  ;;  %v4426_v47 = vadd.f32 %v488_v35, %v4372_v16  ;;  %v4429_v48 = vadd.f32 %v489_v36, %v4374_v17  ;;  %v4432_v49 = vadd.f32 %v501_v37, %v4372_v16  ;;  %vm4435_vm2 = vcmp.eq.s32.totalorder %v474_v42, 1  ;;  %2516 = vmatpush.bf16.msra.mxu1 %v3959_v26  ;;  %s3341_s18 = sshll.u32 %s411_s17, 2 }
  0x1d   : > { %v4440_v51 = vadd.f32 %v502_v38, %v4374_v17  ;;  %v4443_v52 = vadd.f32 %v503_v40, %v4372_v16  ;;  %v4446_v53 = vadd.f32 %v504_v41, %v4374_v17  ;;  %s413_s23 = scalar_lea.vmem %s5774_s1, %s3341_s18  ;;  %v515_v0 = vunpack.c.h.bf16 %v4416_v43  ;;  %s5259_s18 = sadd.s32 4, %s4324_s12 }
  0x1e   : > { %v706_v55 = vrot.slane %v4426_v47, 7  ;;  %v708_v56 = vrot.slane %v4429_v48, 7  ;;  %v4452_v57 = vrot.slane %v4432_v49, 7  ;;  %v448_v62 = vld [vmem:[%s413_s23] sm:$0xff]  ;;  %v449_v63 = vld [vmem:[%s413_s23 + $0x8] sm:$0xff]  ;;  %v516_v29 = vmul.f32 %v512_v44, %v4359_v11  ;;  %p420_p10 = scmp.lt.s32.totalorder %s5259_s18, 7 }
  0x1f   : > { %v4459_v59 = vrot.slane %v4440_v51, 7  ;;  %v714_v60 = vrot.slane %v4443_v52, 7  ;;  %v716_v61 = vrot.slane %v4446_v53, 7  ;;  %4118 = vmatpush.bf16.msra.mxu2 %v3950_v45  ;;  %v451_v4 = vunpack.c.l.bf16 %v448_v62  ;;  %2488 = vmatpush.bf16.msra.mxu0 %v3950_v45  ;;  %p542_p11 = scmp.le.s32.totalorder %s5259_s18, 7 }
  0x20   : > { %4126 = vmatpush.bf16.msra.mxu3 %v3958_v46  ;;  %v4474_v3 = vsel %vm692_vm0, %v706_v55, %v4452_v57  ;;  %v452_v6 = vunpack.c.h.bf16 %v448_v62  ;;  %v453_v7 = vunpack.c.l.bf16 %v449_v63  ;;  %2517 = vmatpush.bf16.msra.mxu1 %v3958_v46  ;;  %v454_v24 = vunpack.c.h.bf16 %v449_v63  ;;  %s421_s8 = scalar_select %p420_p10, %s5259_s18, 7 }
  0x21   : > { %5804 = vst [vmem:[#allocation3_spill] sm:$0xff] %v4459_v59  ;;  %v4484_v9 = vsel %vm692_vm0, %v708_v56, %v4459_v59  ;;  %v715_v10 = vsel %vm692_vm0, %v4452_v57, %v714_v60  ;;  %v717_v13 = vsel %vm692_vm0, %v4459_v59, %v716_v61  ;;  %v750_v20 = vsel %vm4386_vm1, %v4474_v3, 0.0  ;;  %s555_s11 = scalar_select %p542_p11, 1, 0 }
  0x22   : > { %v751_v21 = vsel %vm4386_vm1, %v4484_v9, 0.0  ;;  %v837_v22 = vpack.c.bf16 %v717_v13, %v715_v10  ;;  %v460_v25 = vmul.f32 %v4359_v11, %v451_v4  ;;  %v461_v27 = vmul.f32 %v4361_v12, %v452_v6  ;;  %v3970_v10 = vld [vmem:[%s5778_s5 + $0xb8] sm:$0xff]  ;;  %s5860_s8 = smov (!%p420_p10, %s421_s8), 7 }
  0x23   : > { %v836_v26 = vpack.c.bf16 %v751_v21, %v750_v20  ;;  %v462_v28 = vmul.f32 %v4359_v11, %v453_v7  ;;  %4119 = vmatpush.bf16.msra.mxu2 %v3949_v1  ;;  %v463_v36 = vmul.f32 %v4361_v12, %v454_v24  ;;  %2489 = vmatpush.bf16.msra.mxu0 %v3949_v1  ;;  %v787_v8 = vrot.slane %v4446_v53, 1  ;;  %s3346_s17 = sshll.u32 %s5860_s8, 2 }
  0x24   : > { %4127 = vmatpush.bf16.msra.mxu3 %v3957_v2  ;;  %v4510_v32 = vunpack.c.l.b16 %v837_v22  ;;  %v4512_v35 = vunpack.c.h.b16 %v837_v22  ;;  %v469_v37 = vadd.f32 %v4372_v16, %v460_v25  ;;  %2518 = vmatpush.bf16.msra.mxu1 %v3957_v2  ;;  %v470_v40 = vadd.f32 %v4374_v17, %v461_v27  ;;  %v3978_v22 = vld [vmem:[%s5778_s5 + $0xf8] sm:$0xff]  ;;  %v480_v27 = vld [vmem:[%s4370_s20] sm:$0xff]  ;;  %s5328_s8 = sadd.s32 %s3346_s17, %s4342_s19  ;;  %s3351_s17 = sshll.u32 %s5688_s25, 2 }
  0x25   : > { %v1044_v38 = vunpack.c.l.b16 %v836_v26  ;;  %v1045_v39 = vunpack.c.h.b16 %v836_v26  ;;  %v471_v41 = vadd.f32 %v4372_v16, %v462_v28  ;;  %v472_v42 = vadd.f32 %v4374_v17, %v463_v36  ;;  %s3348_s19 = sshll.u32 %s5328_s8, 2  ;;  %s5710_s22 = scalar_lea.vmem %s5780_s7, %s3351_s17 }
  0x26   : > { %v4521_v43 = vsel %vm4435_vm2, %v469_v37, 0.0  ;;  %v517_v44 = vmul.f32 %v513_v54, %v4361_v12  ;;  %v518_v45 = vmul.f32 %v514_v58, %v4359_v11  ;;  %v4529_v63 = vsel %vm4435_vm2, %v470_v40, 0.0  ;;  %v3947_v54 = vld [vmem:[%s5778_s5] sm:$0xff]  ;;  %s430_s23 = scalar_lea.vmem %s5775_s2, %s3348_s19 }
  0x27   : > { %v1056_v46 = vpack.c.b16 %v4510_v32, %v1044_v38  ;;  %v1057_v62 = vpack.c.b16 %v4512_v35, %v1045_v39  ;;  %v4533_v1 = vsel %vm4435_vm2, %v471_v41, 0.0  ;;  %4120 = vmatpush.bf16.msra.mxu2 %v3948_v30  ;;  %v3955_v58 = vld [vmem:[%s5778_s5 + $0x40] sm:$0xff]  ;;  %v4543_v2 = vsel %vm4435_vm2, %v472_v42, 0.0  ;;  %2490 = vmatpush.bf16.msra.mxu0 %v3948_v30  ;;  %v3986_v38 = vld [vmem:[%s5778_s5 + $0x138] sm:$0xff]  ;;  %v3969_v42 = vld [vmem:[%s5778_s5 + $0xb0] sm:$0xff] }
  0x28   : > { %4128 = vmatpush.bf16.msra.mxu3 %v3956_v31  ;;  %v694_v4 = vrot.slane %v4521_v43, 7  ;;  %v696_v6 = vrot.slane %v4529_v63, 7  ;;  %v698_v7 = vrot.slane %v4533_v1, 7  ;;  %2519 = vmatpush.bf16.msra.mxu1 %v3956_v31  ;;  %v700_v13 = vrot.slane %v4543_v2, 7  ;;  %v3994_v39 = vld [vmem:[%s5778_s5 + $0x178] sm:$0xff] }
  0x29   : > { %v519_v20 = vmul.f32 %v515_v0, %v4361_v12  ;;  %v4554_v50 = vadd.f32 %v516_v29, %v4372_v16  ;;  %v4557_v21 = vadd.f32 %v517_v44, %v4374_v17  ;;  %v4570_v26 = vadd.f32 %v518_v45, %v4372_v16 }
  0x2a   : > { %v695_v24 = vsel %vm692_vm0, %v4365_v15, %v694_v4  ;;  %v697_v25 = vsel %vm692_vm0, %v4365_v15, %v696_v6  ;;  %v699_v0 = vsel %vm692_vm0, %v694_v4, %v698_v7  ;;  %v701_v28 = vsel %vm692_vm0, %v696_v6, %v700_v13 }
  0x2b   : > { %v742_v29 = vsel %vm4476_vm3, %v695_v24, 0.0  ;;  %v743_v30 = vsel %vm4476_vm3, %v697_v25, 0.0  ;;  %v4581_v31 = vadd.f32 %v519_v20, %v4374_v17  ;;  %4121 = vmatpush.bf16.msra.mxu2 %v3947_v54  ;;  %v833_v37 = vpack.c.bf16 %v701_v28, %v699_v0  ;;  %2491 = vmatpush.bf16.msra.mxu0 %v3947_v54  ;;  %v3977_v54 = vld [vmem:[%s5778_s5 + $0xf0] sm:$0xff]  ;;  %v3968_v28 = vld [vmem:[%s5778_s5 + $0xa8] sm:$0xff] }
  0x2c   : > { %4129 = vmatpush.bf16.msra.mxu3 %v3955_v58  ;;  %v832_v36 = vpack.c.bf16 %v743_v30, %v742_v29  ;;  %v718_v41 = vrot.slane %v4554_v50, 7  ;;  %v720_v44 = vrot.slane %v4557_v21, 7  ;;  %v5782_v45 = vrot.slane %v4570_v26, 7  ;;  %2520 = vmatpush.bf16.msra.mxu1 %v3955_v58  ;;  %v3985_v0 = vld [vmem:[%s5778_s5 + $0x130] sm:$0xff] }
  0x2d   : > { %v5781_v4 = vrot.slane %v4581_v31, 7  ;;  %v482_v6 = vunpack.c.l.bf16 %v480_v27  ;;  %v1038_v33 = vunpack.c.l.b16 %v833_v37  ;;  %v1039_v24 = vunpack.c.h.b16 %v833_v37 }
  0x2e   : > { %v1036_v18 = vunpack.c.l.b16 %v832_v36  ;;  %v1037_v20 = vunpack.c.h.b16 %v832_v36  ;;  %2502 = vmatmul.bf16.vlgmr.msra.gmra.mxu2 %v1056_v46  ;;  %v4613_v58 = vsel %vm692_vm0, %v716_v61, %v720_v44  ;;  %v483_v46 = vunpack.c.h.bf16 %v480_v27 }
  0x2f   : > { %2542 = vmatpush.bf16.msrb.mxu2 %v3970_v10  ;;  %2531 = vmatmul.bf16.vlgmr.msra.gmra.mxu3 %v1057_v62  ;;  %v4608_v10 = vsel %vm692_vm0, %v714_v60, %v718_v41  ;;  %v3993_v60 = vld [vmem:[%s5778_s5 + $0x170] sm:$0xff]  ;;  %v725_v61 = vsel %vm692_vm0, %v720_v44, %v5781_v4  ;;  %v755_v29 = vsel %vm4591_vm4, %v4613_v58, 0.0  ;;  %v486_v36 = vmul.f32 %v482_v6, %v4359_v11  ;;  %v3984_v44 = vld [vmem:[%s5778_s5 + $0x128] sm:$0xff] }
  0x30   : > { %2571 = vmatpush.bf16.msrb.mxu3 %v3978_v22  ;;  %v723_v22 = vsel %vm692_vm0, %v718_v41, %v5782_v45  ;;  %v1052_v62 = vpack.c.b16 %v1038_v33, %v1036_v18  ;;  %2600 = vmatpush.bf16.msrb.mxu0 %v3986_v38  ;;  %v1053_v25 = vpack.c.b16 %v1039_v24, %v1037_v20  ;;  %v754_v27 = vsel %vm4591_vm4, %v4608_v10, 0.0  ;;  %v3992_v6 = vld [vmem:[%s5778_s5 + $0x168] sm:$0xff]  ;;  %v3967_v18 = vld [vmem:[%s5778_s5 + $0xa0] sm:$0xff] }
  0x31   : > { %2629 = vmatpush.bf16.msrb.mxu1 %v3994_v39  ;;  %v839_v30 = vpack.c.bf16 %v725_v61, %v723_v22  ;;  %v487_v37 = vmul.f32 %v483_v46, %v4361_v12  ;;  %v838_v38 = vpack.c.bf16 %v755_v29, %v754_v27  ;;  %v3976_v39 = vld [vmem:[%s5778_s5 + $0xe8] sm:$0xff]  ;;  %v4642_v41 = vadd.f32 %v486_v36, %v4372_v16  ;;  %v3983_v27 = vld [vmem:[%s5778_s5 + $0x120] sm:$0xff]  ;;  %v3966_v29 = vld [vmem:[%s5778_s5 + $0x98] sm:$0xff] }
  0x32   : > { %2492 = vmatmul.bf16.vlgmr.msra.gmra.mxu0 %v1052_v62  ;;  %2521 = vmatmul.bf16.vlgmr.msra.gmra.mxu1 %v1053_v25  ;;  %v564_v25 = vadd.s32 8, %v4338_v5  ;;  %v4087_v20 = vld [vmem:[%s5778_s5 + $0x460] sm:$0xff] }
  0x33   : > { %2543 = vmatpush.bf16.msrb.mxu2 %v3969_v42  ;;  %v4645_v42 = vadd.f32 %v487_v37, %v4374_v17  ;;  %v4656_v33 = vunpack.c.l.b16 %v839_v30  ;;  %v702_v24 = vrot.slane %v4642_v41, 7  ;;  %v1048_v22 = vunpack.c.l.b16 %v838_v38 }
  0x34   : > { %2572 = vmatpush.bf16.msrb.mxu3 %v3977_v54  ;;  %2601 = vmatpush.bf16.msrb.mxu0 %v3985_v0  ;;  %v1049_v46 = vunpack.c.h.b16 %v838_v38  ;;  %v4666_v62 = vunpack.c.h.b16 %v839_v30  ;;  %v3975_v0 = vld [vmem:[%s5778_s5 + $0xe0] sm:$0xff]  ;;  %v4705_v38 = vpack.c.bf16 %v4529_v63, %v4521_v43 }
  0x35   : > { %2630 = vmatpush.bf16.msrb.mxu1 %v3993_v60  ;;  %v704_v54 = vrot.slane %v4645_v42, 7  ;;  %v703_v19 = vsel %vm692_vm0, %v698_v7, %v702_v24  ;;  %v707_v60 = vsel %vm692_vm0, %v702_v24, %v706_v55  ;;  %v3991_v7 = vld [vmem:[%s5778_s5 + $0x160] sm:$0xff] }
  0x37   : > { %2544 = vmatpush.bf16.msrb.mxu2 %v3968_v28  ;;  %v705_v34 = vsel %vm692_vm0, %v700_v13, %v704_v54  ;;  %v709_v61 = vsel %vm692_vm0, %v704_v54, %v708_v56  ;;  %v746_v13 = vsel %vm4660_vm5, %v703_v19, 0.0  ;;  %v860_v56 = vsel %vm692_vm0, %v4365_v15, %v702_v24 }
  0x38   : > { %2573 = vmatpush.bf16.msrb.mxu3 %v3976_v39  ;;  %2602 = vmatpush.bf16.msrb.mxu0 %v3984_v44  ;;  %v747_v55 = vsel %vm4660_vm5, %v705_v34, 0.0  ;;  %v835_v28 = vpack.c.bf16 %v709_v61, %v707_v60  ;;  %v861_v36 = vsel %vm692_vm0, %v4365_v15, %v704_v54  ;;  %v876_v37 = vsel %vm4476_vm3, %v860_v56, 0.0  ;;  %v3974_v60 = vld [vmem:[%s5778_s5 + $0xd8] sm:$0xff] }
  0x39   : > { %2631 = vmatpush.bf16.msrb.mxu1 %v3992_v6  ;;  %v834_v30 = vpack.c.bf16 %v747_v55, %v746_v13  ;;  %v1058_v39 = vpack.c.b16 %v4656_v33, %v1048_v22  ;;  %v877_v44 = vsel %vm4476_vm3, %v861_v36, 0.0  ;;  %v1059_v24 = vpack.c.b16 %v4666_v62, %v1049_v46  ;;  %v3982_v22 = vld [vmem:[%s5778_s5 + $0x118] sm:$0xff] }
  0x3a   : > { %v1042_v6 = vunpack.c.l.b16 %v835_v28  ;;  %v924_v19 = vpack.c.bf16 %v877_v44, %v876_v37  ;;  %v582_v61 = vand.u32 15, %v564_v25  ;;  %v767_v13 = vrot.slane %v4521_v43, 1 }
  0x3b   : > { %2545 = vmatpush.bf16.msrb.mxu2 %v3967_v18  ;;  %v1043_v18 = vunpack.c.h.b16 %v835_v28  ;;  %v1040_v34 = vunpack.c.l.b16 %v834_v30  ;;  %v1041_v54 = vunpack.c.h.b16 %v834_v30  ;;  %v770_v56 = vrot.slane %v4529_v63, 1  ;;  %v3973_v63 = vld [vmem:[%s5778_s5 + $0xd0] sm:$0xff] }
  0x3c   : > { %2574 = vmatpush.bf16.msrb.mxu3 %v3975_v0  ;;  %2603 = vmatpush.bf16.msrb.mxu0 %v3983_v27  ;;  %v768_v0 = vrot.slane %v4533_v1, 1  ;;  %v1156_v55 = vunpack.c.l.b16 %v924_v19  ;;  %v1157_v28 = vunpack.c.h.b16 %v924_v19  ;;  %v3965_v27 = vld [vmem:[%s5778_s5 + $0x90] sm:$0xff]  ;;  %v771_v30 = vrot.slane %v4543_v2, 1 }
  0x3d   : > { %2632 = vmatpush.bf16.msrb.mxu1 %v3991_v7  ;;  %v1054_v46 = vpack.c.b16 %v1042_v6, %v1040_v34  ;;  %v3990_v7 = vld [vmem:[%s5778_s5 + $0x158] sm:$0xff]  ;;  %v1055_v25 = vpack.c.b16 %v1043_v18, %v1041_v54  ;;  %v773_v43 = vrot.slane %v4642_v41, 1  ;;  %v4735_v44 = vpack.c.bf16 %v4543_v2, %v4533_v1  ;;  %v3981_v19 = vld [vmem:[%s5778_s5 + $0x110] sm:$0xff]  ;;  %v3964_v1 = vld [vmem:[%s5778_s5 + $0x88] sm:$0xff] }
  0x3e   : > { %2507 = vmatmul.bf16.gmra.mxu2 %v1058_v39  ;;  %v4729_v36 = vpack.c.b16 %v1042_v6, %v1156_v55  ;;  %v4731_v37 = vpack.c.b16 %v1043_v18, %v1157_v28  ;;  %vm4743_vm7 = vcmp.le.s32.totalorder %v582_v61, 14  ;;  %v5812_v39 = vmov 0  ;;  %v3989_v2 = vld [vmem:[%s5778_s5 + $0x150] sm:$0xff]  ;;  %v3963_v28 = vld [vmem:[%s5778_s5 + $0x80] sm:$0xff] }
  0x3f   : > { %2546 = vmatpush.bf16.msrb.mxu2 %v3966_v29  ;;  %v775_v29 = vrot.slane %v4645_v42, 1  ;;  %2536 = vmatmul.bf16.gmra.mxu3 %v1059_v24  ;;  %v5813_v39 = vsel %vm4743_vm7, 4294967295, %v5812_v39  ;;  %v774_v6 = vsel %vm766_vm6, %v768_v0, %v773_v43  ;;  %v777_v24 = vrot.slane %v4426_v47, 1 }
  0x40   : > { %2575 = vmatpush.bf16.msrb.mxu3 %v3974_v60  ;;  %2604 = vmatpush.bf16.msrb.mxu0 %v3982_v22  ;;  %5814 = vst [vmem:[#allocation5_spill] sm:$0xff] %v5813_v39  ;;  %v769_v34 = vsel %vm766_vm6, %v767_v13, %v768_v0  ;;  %v772_v54 = vsel %vm766_vm6, %v770_v56, %v771_v30  ;;  %v1076_v60 = vunpack.c.l.b16 %v4705_v38  ;;  %v1078_v22 = vunpack.c.l.b16 %v4735_v44  ;;  %v3980_v13 = vld [vmem:[%s5778_s5 + $0x108] sm:$0xff] }
  0x41   : > { %v776_v18 = vsel %vm766_vm6, %v771_v30, %v775_v29  ;;  %2633 = vmatpush.bf16.msrb.mxu1 %v3990_v7  ;;  %v818_v61 = vsel %vm4743_vm7, %v774_v6, 0.0  ;;  %v1077_v0 = vunpack.c.h.b16 %v4705_v38  ;;  %v848_v7 = vpack.c.bf16 %v772_v54, %v769_v34  ;;  %v4002_v38 = vld [vmem:[%s5778_s5 + $0x1b8] sm:$0xff]  ;;  %v3979_v54 = vld [vmem:[%s5778_s5 + $0x100] sm:$0xff] }
  0x42   : > { %2497 = vmatmul.bf16.gmra.mxu0 %v1054_v46  ;;  %2526 = vmatmul.bf16.gmra.mxu1 %v1055_v25  ;;  %v819_v55 = vsel %vm4743_vm7, %v776_v18, 0.0  ;;  %v3972_v46 = vld [vmem:[%s5778_s5 + $0xc8] sm:$0xff]  ;;  %v778_v56 = vsel %vm766_vm6, %v773_v43, %v777_v24  ;;  %v779_v25 = vrot.slane %v4429_v48, 1  ;;  %v781_v30 = vrot.slane %v4432_v49, 1 }
  0x43   : > { %2547 = vmatpush.bf16.msrb.mxu2 %v3965_v27  ;;  %v3988_v27 = vld [vmem:[%s5778_s5 + $0x148] sm:$0xff]  ;;  %v783_v6 = vrot.slane %v4440_v51, 1  ;;  %v844_v18 = vpack.c.bf16 %v4440_v51, %v4432_v49  ;;  %v845_v34 = vpack.c.bf16 %v4446_v53, %v4443_v52  ;;  %v566_v49 = vadd.s32 24, %v4338_v5  ;;  %v4013_v53 = vld [vmem:[%s5778_s5 + $0x210] sm:$0xff] }
  0x44   : > { %2576 = vmatpush.bf16.msrb.mxu3 %v3973_v63  ;;  %2605 = vmatpush.bf16.msrb.mxu0 %v3981_v19  ;;  %v1079_v63 = vunpack.c.h.b16 %v4735_v44  ;;  %v849_v19 = vpack.c.bf16 %v819_v55, %v818_v61  ;;  %v4789_v43 = vsel %vm766_vm6, %v777_v24, %v781_v30  ;;  %v3971_v44 = vld [vmem:[%s5778_s5 + $0xc0] sm:$0xff]  ;;  %v4010_v61 = vld [vmem:[%s5778_s5 + $0x1f8] sm:$0xff]  ;;  %v785_v39 = vrot.slane %v4443_v52, 1  ;;  %v4004_v52 = vld [vmem:[%s5778_s5 + $0x1c8] sm:$0xff] }
  0x45   : > { %2634 = vmatpush.bf16.msrb.mxu1 %v3989_v2  ;;  %v780_v2 = vsel %vm766_vm6, %v775_v29, %v779_v25  ;;  %v4801_v51 = vsel %vm766_vm6, %v779_v25, %v783_v6  ;;  %v910_v24 = vsel %vm4743_vm7, %v4789_v43, 0.0  ;;  %v1117_v25 = vunpack.c.h.b16 %v848_v7 }
  0x46   : > { %v4803_v29 = vpack.c.bf16 %v780_v2, %v778_v56  ;;  %v911_v55 = vsel %vm4743_vm7, %v4801_v51, 0.0  ;;  %v1118_v56 = vunpack.c.l.b16 %v849_v19  ;;  %v4018_v2 = vld [vmem:[%s5778_s5 + $0x238] sm:$0xff]  ;;  %v1093_v45 = vpack.c.b16 %v1079_v63, %v1077_v0  ;;  %v4009_v0 = vld [vmem:[%s5778_s5 + $0x1f0] sm:$0xff] }
  0x47   : > { %2548 = vmatpush.bf16.msrb.mxu2 %v3964_v1  ;;  %v1092_v1 = vpack.c.b16 %v1078_v22, %v1076_v60  ;;  %v3987_v60 = vld [vmem:[%s5778_s5 + $0x140] sm:$0xff]  ;;  %v1116_v22 = vunpack.c.l.b16 %v848_v7  ;;  %v935_v4 = vpack.c.bf16 %v911_v55, %v910_v24  ;;  %v4026_v7 = vld [vmem:[%s5778_s5 + $0x278] sm:$0xff]  ;;  %v1085_v24 = vunpack.c.h.b16 %v844_v18 }
  0x48   : > { %2577 = vmatpush.bf16.msrb.mxu3 %v3972_v46  ;;  %2606 = vmatpush.bf16.msrb.mxu0 %v3980_v13  ;;  %v1084_v46 = vunpack.c.l.b16 %v844_v18  ;;  %v1086_v13 = vunpack.c.l.b16 %v845_v34  ;;  %v1121_v63 = vunpack.c.h.b16 %v4803_v29  ;;  %v4017_v18 = vld [vmem:[%s5778_s5 + $0x230] sm:$0xff] }
  0x49   : > { %2635 = vmatpush.bf16.msrb.mxu1 %v3988_v27  ;;  %v4001_v27 = vld [vmem:[%s5778_s5 + $0x1b0] sm:$0xff]  ;;  %v1208_v59 = vunpack.c.l.b16 %v935_v4  ;;  %v1209_v15 = vunpack.c.h.b16 %v935_v4  ;;  %v1132_v55 = vpack.c.b16 %v1118_v56, %v1116_v22  ;;  %v3999_v56 = vld [vmem:[%s5778_s5 + $0x1a0] sm:$0xff] }
  0x4a   : > { %v4823_v14 = vpack.c.b16 %v1086_v13, %v1084_v46 }
  0x4b   : > { %2549 = vmatpush.bf16.msrb.mxu2 %v3963_v28  ;;  %v1119_v28 = vunpack.c.h.b16 %v849_v19  ;;  %v1120_v19 = vunpack.c.l.b16 %v4803_v29 }
  0x4c   : > { %2578 = vmatpush.bf16.msrb.mxu3 %v3971_v44  ;;  %2607 = vmatpush.bf16.msrb.mxu0 %v3979_v54  ;;  %v1087_v44 = vunpack.c.h.b16 %v845_v34  ;;  %v786_v54 = vsel %vm766_vm6, %v781_v30, %v785_v39  ;;  %v4850_v30 = vpack.c.b16 %v1209_v15, %v1121_v63  ;;  %v4008_v15 = vld [vmem:[%s5778_s5 + $0x1e8] sm:$0xff] }
  0x4d   : > { %2636 = vmatpush.bf16.msrb.mxu1 %v3987_v60  ;;  %v4840_v4 = vpack.c.b16 %v1208_v59, %v1120_v19  ;;  %v4000_v60 = vld [vmem:[%s5778_s5 + $0x1a8] sm:$0xff]  ;;  %v788_v59 = vsel %vm766_vm6, %v783_v6, %v787_v8  ;;  %v842_v6 = vpack.c.bf16 %v4645_v42, %v4642_v41  ;;  %v847_v42 = vpack.c.bf16 %v4581_v31, %v4570_v26 }
  0x4e   : > { %2550 = vmatmul.bf16.vlgmr.msrb.gmra.mxu2 %v1092_v1  ;;  %v4852_v34 = vpack.c.b16 %v1087_v44, %v1085_v24  ;;  %v4025_v1 = vld [vmem:[%s5778_s5 + $0x270] sm:$0xff]  ;;  %v4864_v22 = vpack.c.bf16 %v788_v59, %v786_v54  ;;  %v4016_v41 = vld [vmem:[%s5778_s5 + $0x228] sm:$0xff]  ;;  %v568_v24 = vadd.s32 40, %v4338_v5  ;;  %v4015_v44 = vld [vmem:[%s5778_s5 + $0x220] sm:$0xff] }
  0x4f   : > { %2658 = vmatpush.bf16.msra.mxu2 %v4002_v38  ;;  %v596_v38 = vand.u32 15, %v566_v49  ;;  %v1133_v49 = vpack.c.b16 %v1119_v28, %v1117_v25  ;;  %2579 = vmatmul.bf16.vlgmr.msrb.gmra.mxu3 %v1093_v45  ;;  %v4023_v54 = vld [vmem:[%s5778_s5 + $0x260] sm:$0xff] }
  0x50   : > { %2687 = vmatpush.bf16.msra.mxu3 %v4010_v61  ;;  %2716 = vmatpush.bf16.msra.mxu0 %v4018_v2  ;;  %v843_v61 = vpack.c.bf16 %v4429_v48, %v4426_v47  ;;  %v846_v47 = vpack.c.bf16 %v4557_v21, %v4554_v50  ;;  %v4024_v48 = vld [vmem:[%s5778_s5 + $0x268] sm:$0xff] }
  0x51   : > { %2745 = vmatpush.bf16.msra.mxu1 %v4026_v7  ;;  %vm4857_vm8 = vcmp.le.s32.totalorder %v596_v38, 14  ;;  %v1081_v7 = vunpack.c.h.b16 %v842_v6 }
  0x52   : > { %2608 = vmatmul.bf16.vlgmr.msrb.gmra.mxu0 %v1132_v55  ;;  %2637 = vmatmul.bf16.vlgmr.msrb.gmra.mxu1 %v1133_v49  ;;  %v822_v46 = vsel %vm4857_vm8, %v4789_v43, 0.0  ;;  %v823_v13 = vsel %vm4857_vm8, %v4801_v51, 0.0  ;;  %v4007_v43 = vld [vmem:[%s5778_s5 + $0x1e0] sm:$0xff]  ;;  %v1080_v51 = vunpack.c.l.b16 %v842_v6  ;;  %v1088_v28 = vunpack.c.l.b16 %v846_v47  ;;  %v4006_v49 = vld [vmem:[%s5778_s5 + $0x1d8] sm:$0xff] }
  0x53   : > { %2659 = vmatpush.bf16.msra.mxu2 %v4001_v27  ;;  %v851_v25 = vpack.c.bf16 %v823_v13, %v822_v46  ;;  %v1090_v27 = vunpack.c.l.b16 %v847_v42  ;;  %v1082_v2 = vunpack.c.l.b16 %v843_v61  ;;  %v1083_v38 = vunpack.c.h.b16 %v843_v61  ;;  %v3997_v46 = vld [vmem:[%s5778_s5 + $0x190] sm:$0xff]  ;;  %v4014_v13 = vld [vmem:[%s5778_s5 + $0x218] sm:$0xff] }
  0x54   : > { %2688 = vmatpush.bf16.msra.mxu3 %v4009_v0  ;;  %2717 = vmatpush.bf16.msra.mxu0 %v4017_v18  ;;  %v3998_v0 = vld [vmem:[%s5778_s5 + $0x198] sm:$0xff]  ;;  %v789_v6 = vrot.slane %v4554_v50, 1  ;;  %v791_v61 = vrot.slane %v4557_v21, 1  ;;  %v4041_v21 = vld [vmem:[%s5778_s5 + $0x2f0] sm:$0xff] }
  0x55   : > { %2746 = vmatpush.bf16.msra.mxu1 %v4025_v1  ;;  %v4905_v55 = vpack.c.b16 %v1090_v27, %v1088_v28  ;;  %v1123_v18 = vunpack.c.h.b16 %v851_v25  ;;  %v4910_v59 = vpack.c.b16 %v1082_v2, %v1080_v51  ;;  %v4912_v1 = vpack.c.b16 %v1083_v38, %v1081_v7  ;;  %v3995_v27 = vld [vmem:[%s5778_s5 + $0x180] sm:$0xff]  ;;  %v4012_v2 = vld [vmem:[%s5778_s5 + $0x208] sm:$0xff]  ;;  %v4058_v50 = vld [vmem:[%s5778_s5 + $0x378] sm:$0xff] }
  0x56   : > { %v4952_v29 = vsel %vm766_vm6, %v787_v8, %v791_v61  ;;  %v4021_v8 = vld [vmem:[%s5778_s5 + $0x250] sm:$0xff]  ;;  %v4003_v7 = vld [vmem:[%s5778_s5 + $0x1c0] sm:$0xff]  ;;  %v4020_v38 = vld [vmem:[%s5778_s5 + $0x248] sm:$0xff] }
  0x57   : > { %2660 = vmatpush.bf16.msra.mxu2 %v4000_v60  ;;  %v1122_v60 = vunpack.c.l.b16 %v851_v25  ;;  %v1135_v25 = vpack.c.b16 %v1123_v18, %v1121_v63 }
  0x58   : > { %2689 = vmatpush.bf16.msra.mxu3 %v4008_v15  ;;  %2718 = vmatpush.bf16.msra.mxu0 %v4016_v41  ;;  %v610_v15 = vand.u32 15, %v568_v24  ;;  %v1091_v41 = vunpack.c.h.b16 %v847_v42  ;;  %v4945_v42 = vsel %vm766_vm6, %v785_v39, %v789_v6  ;;  %v570_v24 = vadd.s32 56, %v4338_v5 }
  0x59   : > { %2747 = vmatpush.bf16.msra.mxu1 %v4024_v48  ;;  %v4005_v48 = vld [vmem:[%s5778_s5 + $0x1d0] sm:$0xff]  ;;  %v1134_v51 = vpack.c.b16 %v1122_v60, %v1120_v19  ;;  %v3996_v19 = vld [vmem:[%s5778_s5 + $0x188] sm:$0xff]  ;;  %v4992_v60 = vunpack.c.h.b16 %v4864_v22  ;;  %v4998_v5 = vrot.slane %v4581_v31, 1 }
  0x5a   : > { %vm4936_vm9 = vcmp.le.s32.totalorder %v610_v15, 14  ;;  %v624_v15 = vand.u32 15, %v570_v24 }
  0x5b   : > { %2661 = vmatpush.bf16.msra.mxu2 %v3999_v56  ;;  %v1089_v56 = vunpack.c.h.b16 %v846_v47  ;;  %v826_v39 = vsel %vm4936_vm9, %v4945_v42, 0.0  ;;  %v827_v63 = vsel %vm4936_vm9, %v4952_v29, 0.0 }
  0x5c   : > { %2690 = vmatpush.bf16.msra.mxu3 %v4007_v43  ;;  %2719 = vmatpush.bf16.msra.mxu0 %v4015_v44  ;;  %v4022_v43 = vld [vmem:[%s5778_s5 + $0x258] sm:$0xff]  ;;  %v4011_v44 = vld [vmem:[%s5778_s5 + $0x200] sm:$0xff]  ;;  %vm5013_vm10 = vcmp.le.s32.totalorder %v624_v15, 14  ;;  %v4040_v15 = vld [vmem:[%s5778_s5 + $0x2e8] sm:$0xff] }
  0x5d   : > { %2748 = vmatpush.bf16.msra.mxu1 %v4023_v54  ;;  %v4932_v28 = vpack.c.b16 %v1091_v41, %v1089_v56  ;;  %v4989_v54 = vunpack.c.l.b16 %v4864_v22  ;;  %v4034_v22 = vld [vmem:[%s5778_s5 + $0x2b8] sm:$0xff] }
  0x5e   : > { %2555 = vmatmul.bf16.gmra.mxu2 %v4910_v59 }
  0x5f   : > { %2662 = vmatpush.bf16.msra.mxu2 %v3998_v0  ;;  %2584 = vmatmul.bf16.gmra.mxu3 %v4912_v1  ;;  %v853_v0 = vpack.c.bf16 %v827_v63, %v826_v39  ;;  %v796_v39 = vsel %vm766_vm6, %v791_v61, %v4998_v5 }
  0x60   : > { %2691 = vmatpush.bf16.msra.mxu3 %v4006_v49  ;;  %2720 = vmatpush.bf16.msra.mxu0 %v4014_v13  ;;  %v5819_v13 = vmov 0.0  }
  0x61   : > { %2749 = vmatpush.bf16.msra.mxu1 %v4022_v43  ;;  %v1126_v49 = vunpack.c.l.b16 %v853_v0  ;;  %v1127_v18 = vunpack.c.h.b16 %v853_v0  ;;  %v5001_v56 = vrot.slane %v5819_v13, 1  ;;  %v4019_v43 = vld [vmem:[%s5778_s5 + $0x240] sm:$0xff]  ;;  %v4049_v13 = vld [vmem:[%s5778_s5 + $0x330] sm:$0xff] }
  0x62   : > { %2613 = vmatmul.bf16.gmra.mxu0 %v1134_v51  ;;  %2642 = vmatmul.bf16.gmra.mxu1 %v1135_v25 }
  0x63   : > { %2663 = vmatpush.bf16.msra.mxu2 %v3997_v46  ;;  %v4995_v46 = vrot.slane %v4570_v26, 1  ;;  %5820 = vst [vmem:[#allocation6_spill] sm:$0xff] %v5001_v56  ;;  %v1136_v41 = vpack.c.b16 %v1126_v49, %v4989_v54 }
  0x64   : > { %2692 = vmatpush.bf16.msra.mxu3 %v4005_v48  ;;  %2721 = vmatpush.bf16.msra.mxu0 %v4013_v53  ;;  %v1137_v48 = vpack.c.b16 %v1127_v18, %v4992_v60  ;;  %v4033_v53 = vld [vmem:[%s5778_s5 + $0x2b0] sm:$0xff]  ;;  %v4032_v18 = vld [vmem:[%s5778_s5 + $0x2a8] sm:$0xff] }
  0x65   : > { %2750 = vmatpush.bf16.msra.mxu1 %v4021_v8  ;;  %v798_v25 = vsel %vm766_vm6, %v4995_v46, %v5001_v56  ;;  %v794_v8 = vsel %vm766_vm6, %v789_v6, %v4995_v46 }
  0x66   : > { %v830_v63 = vsel %vm5013_vm10, %v798_v25, 0.0  ;;  %v854_v6 = vpack.c.bf16 %v796_v39, %v794_v8  ;;  %v4056_v25 = vld [vmem:[%s5778_s5 + $0x368] sm:$0xff]  ;;  %v4037_v39 = vld [vmem:[%s5778_s5 + $0x2d0] sm:$0xff] }
  0x67   : > { %2664 = vmatpush.bf16.msra.mxu2 %v3996_v19  ;;  %v799_v19 = vsel %vm766_vm6, %v4998_v5, %v5001_v56 }
  0x68   : > { %2693 = vmatpush.bf16.msra.mxu3 %v4004_v52  ;;  %2722 = vmatpush.bf16.msra.mxu0 %v4012_v2  ;;  %v4042_v52 = vld [vmem:[%s5778_s5 + $0x2f8] sm:$0xff]  ;;  %v5052_v0 = vunpack.c.h.b16 %v854_v6 }
  0x69   : > { %2751 = vmatpush.bf16.msra.mxu1 %v4020_v38  ;;  %v4050_v2 = vld [vmem:[%s5778_s5 + $0x338] sm:$0xff] }
  0x6b   : > { %2665 = vmatpush.bf16.msra.mxu2 %v3995_v27  ;;  %v831_v27 = vsel %vm5013_vm10, %v799_v19, 0.0  ;;  %v880_v19 = vsel %vm4660_vm5, %v4474_v3, 0.0  ;;  %v4047_v3 = vld [vmem:[%s5778_s5 + $0x320] sm:$0xff] }
  0x6c   : > { %2694 = vmatpush.bf16.msra.mxu3 %v4003_v7  ;;  %2723 = vmatpush.bf16.msra.mxu0 %v4011_v44  ;;  %v855_v61 = vpack.c.bf16 %v831_v27, %v830_v63  ;;  %v5050_v7 = vunpack.c.l.b16 %v854_v6  ;;  %v4046_v63 = vld [vmem:[%s5778_s5 + $0x318] sm:$0xff]  ;;  %v3357_v27 = vld [vmem:[%s4370_s20 + $0x30] sm:$0xff] }
  0x6d   : > { %2752 = vmatpush.bf16.msra.mxu1 %v4019_v43  ;;  %v4048_v43 = vld [vmem:[%s5778_s5 + $0x328] sm:$0xff]  ;;  %v4054_v6 = vld [vmem:[%s5778_s5 + $0x358] sm:$0xff] }
  0x6e   : > { %2560 = vmatmul.bf16.gmra.mxu2 %v4823_v14  ;;  %v1130_v38 = vunpack.c.l.b16 %v855_v61  ;;  %v1131_v24 = vunpack.c.h.b16 %v855_v61  ;;  %v527_v61 = vunpack.c.l.bf16 %v3357_v27 }
  0x6f   : > { %2589 = vmatmul.bf16.gmra.mxu3 %v4852_v34  ;;  %2774 = vmatpush.bf16.msrb.mxu2 %v4034_v22  ;;  %v4039_v22 = vld [vmem:[%s5778_s5 + $0x2e0] sm:$0xff] }
  0x70   : > { %2803 = vmatpush.bf16.msrb.mxu3 %v4042_v52  ;;  %2832 = vmatpush.bf16.msrb.mxu0 %v4050_v2  ;;  %v1138_v44 = vpack.c.b16 %v1130_v38, %v5050_v7  ;;  %v1139_v49 = vpack.c.b16 %v1131_v24, %v5052_v0  ;;  %v881_v52 = vsel %vm4660_vm5, %v4484_v9, 0.0  ;;  %v4055_v9 = vld [vmem:[%s5778_s5 + $0x360] sm:$0xff]  ;;  %v528_v38 = vunpack.c.h.bf16 %v3357_v27 }
  0x71   : > { %2861 = vmatpush.bf16.msrb.mxu1 %v4058_v50  ;;  %v4035_v27 = vld [vmem:[%s5778_s5 + $0x2c0] sm:$0xff] }
  0x72   : > { %2618 = vmatmul.bf16.gmra.mxu0 %v1136_v41  ;;  %2647 = vmatmul.bf16.gmra.mxu1 %v1137_v48  ;;  %v4057_v41 = vld [vmem:[%s5778_s5 + $0x370] sm:$0xff]  ;;  %v4031_v48 = vld [vmem:[%s5778_s5 + $0x2a0] sm:$0xff] }
  0x73   : > { %2775 = vmatpush.bf16.msrb.mxu2 %v4033_v53  ;;  %v4030_v53 = vld [vmem:[%s5778_s5 + $0x298] sm:$0xff] }
  0x74   : > { %2804 = vmatpush.bf16.msrb.mxu3 %v4041_v21  ;;  %2833 = vmatpush.bf16.msrb.mxu0 %v4049_v13  ;;  %v3358_v21 = vld [vmem:[%s4370_s20 + $0x38] sm:$0xff]  ;;  %v531_v13 = vmul.f32 %v527_v61, %v4359_v11 }
  0x75   : > { %2862 = vmatpush.bf16.msrb.mxu1 %v4057_v41  ;;  %v529_v24 = vunpack.c.l.bf16 %v3358_v21  ;;  %v532_v41 = vmul.f32 %v528_v38, %v4361_v12  ;;  %v5823_v38 = vrot.slane %v4570_v26, 7 }
  0x77   : > { %2776 = vmatpush.bf16.msrb.mxu2 %v4032_v18  ;;  %v530_v18 = vunpack.c.h.bf16 %v3358_v21 }
  0x78   : > { %2805 = vmatpush.bf16.msrb.mxu3 %v4040_v15  ;;  %2834 = vmatpush.bf16.msrb.mxu0 %v4048_v43  ;;  %v4028_v15 = vld [vmem:[%s5778_s5 + $0x288] sm:$0xff] }
  0x79   : > { %2863 = vmatpush.bf16.msrb.mxu1 %v4056_v25  ;;  %v533_v25 = vmul.f32 %v529_v24, %v4359_v11 }
  0x7b   : > { %2777 = vmatpush.bf16.msrb.mxu2 %v4031_v48  ;;  %v4036_v48 = vld [vmem:[%s5778_s5 + $0x2c8] sm:$0xff] }
  0x7c   : > { %2806 = vmatpush.bf16.msrb.mxu3 %v4039_v22  ;;  %2835 = vmatpush.bf16.msrb.mxu0 %v4047_v3  ;;  %v4045_v22 = vld [vmem:[%s5778_s5 + $0x310] sm:$0xff] }
  0x7d   : > { %2864 = vmatpush.bf16.msrb.mxu1 %v4055_v9  ;;  %v5151_v9 = vadd.f32 %v533_v25, %v4372_v16 }
  0x7e   : > { %2565 = vmatmul.bf16.gmra.mxu2 %v4905_v55 }
  0x7f   : > { %2594 = vmatmul.bf16.gmra.mxu3 %v4932_v28  ;;  %2778 = vmatpush.bf16.msrb.mxu2 %v4030_v53  ;;  %v5145_v53 = vadd.f32 %v532_v41, %v4374_v17  ;;  %v5792_v21 = vrot.slane %v5151_v9, 7  ;;  %v4066_v41 = vld [vmem:[%s5778_s5 + $0x3b8] sm:$0xff] }
  0x80   : > { %2836 = vmatpush.bf16.msrb.mxu0 %v4046_v63  ;;  %v4044_v63 = vld [vmem:[%s5778_s5 + $0x308] sm:$0xff] }
  0x81   : > { %2865 = vmatpush.bf16.msrb.mxu1 %v4054_v6  ;;  %v4052_v6 = vld [vmem:[%s5778_s5 + $0x348] sm:$0xff] }
  0x82   : > { %2623 = vmatmul.bf16.gmra.mxu0 %v1138_v44  ;;  %2652 = vmatmul.bf16.gmra.mxu1 %v1139_v49  ;;  %v884_v44 = vsel %vm4386_vm1, %v4608_v10, 0.0  ;;  %v885_v49 = vsel %vm4386_vm1, %v4613_v58, 0.0 }
  0x83   : > { %v928_v43 = vpack.c.bf16 %v885_v49, %v884_v44  ;;  %v5824_v44 = vrot.slane %v4581_v31, 7 }
  0x84   : > { %2837 = vmatpush.bf16.msrb.mxu0 %v4045_v22 }
  0x85   : > { %v1164_v3 = vunpack.c.l.b16 %v928_v43 }
  0x88   : > { %2838 = vmatpush.bf16.msrb.mxu0 %v4044_v63 }
  0x8e   : > { %2666 = vmatmul.bf16.vlgmr.msra.gmra.mxu2 %v4729_v36  ;;  %v4038_v36 = vld [vmem:[%s5778_s5 + $0x2d8] sm:$0xff] }
  0x8f   : > { %2695 = vmatmul.bf16.vlgmr.msra.gmra.mxu3 %v4731_v37  ;;  %v926_v37 = vpack.c.bf16 %v881_v52, %v880_v19  ;;  %v534_v19 = vmul.f32 %v530_v18, %v4361_v12  ;;  %v5142_v52 = vadd.f32 %v531_v13, %v4372_v16  ;;  %v4043_v18 = vld [vmem:[%s5778_s5 + $0x300] sm:$0xff] }
  0x90   : > { %2807 = vmatpush.bf16.msrb.mxu3 %v4038_v36  ;;  %v4053_v36 = vld [vmem:[%s5778_s5 + $0x350] sm:$0xff]  ;;  %2839 = vmatpush.bf16.msrb.mxu0 %v4043_v18 }
  0x91   : > { %v1161_v8 = vunpack.c.h.b16 %v926_v37  ;;  %2866 = vmatpush.bf16.msrb.mxu1 %v4053_v36 }
  0x92   : > { %2724 = vmatmul.bf16.vlgmr.msra.gmra.mxu0 %v4910_v59  ;;  %2753 = vmatmul.bf16.vlgmr.msra.gmra.mxu1 %v4912_v1  ;;  %v1160_v59 = vunpack.c.l.b16 %v926_v37  ;;  %v4029_v1 = vld [vmem:[%s5778_s5 + $0x290] sm:$0xff]  ;;  %v1165_v37 = vunpack.c.h.b16 %v928_v43 }
  0x93   : > { %2779 = vmatpush.bf16.msrb.mxu2 %v4029_v1  ;;  %v1175_v50 = vpack.c.b16 %v4512_v35, %v1161_v8  ;;  %v4027_v8 = vld [vmem:[%s5778_s5 + $0x280] sm:$0xff]  ;;  %v862_v1 = vrot.slane %v5142_v52, 7 }
  0x94   : > { %v1174_v2 = vpack.c.b16 %v4510_v32, %v1160_v59  ;;  %2808 = vmatpush.bf16.msrb.mxu3 %v4037_v39  ;;  %v5154_v59 = vadd.f32 %v534_v19, %v4374_v17  ;;  %v864_v39 = vrot.slane %v5145_v53, 7 }
  0x95   : > { %v5177_v24 = vsel %vm692_vm0, %v5823_v38, %v862_v1  ;;  %2867 = vmatpush.bf16.msrb.mxu1 %v4052_v6  ;;  %v867_v31 = vsel %vm692_vm0, %v862_v1, %v5792_v21 }
  0x96   : > { %v5791_v61 = vrot.slane %v5154_v59, 7  ;;  %v5182_v49 = vsel %vm692_vm0, %v5824_v44, %v864_v39  ;;  %v888_v25 = vsel %vm4591_vm4, %v5177_v24, 0.0 }
  0x97   : > { %2780 = vmatpush.bf16.msrb.mxu2 %v4028_v15  ;;  %v5190_v15 = vld [vmem:[%s5779_s6] ss:$0 sm:$0xff]  ;;  %v889_v19 = vsel %vm4591_vm4, %v5182_v49, 0.0 }
  0x98   : > { %2809 = vmatpush.bf16.msrb.mxu3 %v4036_v48  ;;  %v4051_v48 = vld [vmem:[%s5778_s5 + $0x340] sm:$0xff]  ;;  %v869_v43 = vsel %vm692_vm0, %v864_v39, %v5791_v61  ;;  %v930_v39 = vpack.c.bf16 %v889_v19, %v888_v25 }
  0x99   : > { %2868 = vmatpush.bf16.msrb.mxu1 %v4051_v48  ;;  %v5219_v63 = vpack.c.bf16 %v869_v43, %v867_v31  ;;  %v4065_v31 = vld [vmem:[%s5778_s5 + $0x3b0] sm:$0xff]  ;;  %v4082_v48 = vld [vmem:[%s5778_s5 + $0x438] sm:$0xff] }
  0x9a   : > { %v1168_v44 = vunpack.c.l.b16 %v930_v39  ;;  %2948 = vmatpush.bf16.msra.mxu0 %v4082_v48  ;;  %v5827_v48 = vld [vmem:[#allocation2_spill] sm:$0xff] }
  0x9b   : > { %2781 = vmatpush.bf16.msrb.mxu2 %v4027_v8  ;;  %v4074_v8 = vld [vmem:[%s5778_s5 + $0x3f8] sm:$0xff]  ;;  %v5794_v18 = vunpack.c.l.b16 %v5219_v63 }
  0x9c   : > { %2810 = vmatpush.bf16.msrb.mxu3 %v4035_v27 }
  0x9d   : > { %v1178_v61 = vpack.c.b16 %v5794_v18, %v1168_v44  ;;  %v4064_v44 = vld [vmem:[%s5778_s5 + $0x3a8] sm:$0xff]  ;;  %v539_v18 = vld [vmem:[%s430_s23] sm:$0xff] }
  0x9e   : > { %2671 = vmatmul.bf16.gmra.mxu2 %v1174_v2  ;;  %v1176_v2 = vpack.c.b16 %v4656_v33, %v1164_v3 }
  0x9f   : > { %2700 = vmatmul.bf16.gmra.mxu3 %v1175_v50  ;;  %v1177_v50 = vpack.c.b16 %v4666_v62, %v1165_v37  ;;  %2890 = vmatpush.bf16.msra.mxu2 %v4066_v41  ;;  %v4073_v41 = vld [vmem:[%s5778_s5 + $0x3f0] sm:$0xff] }
  0xa0   : > { %2919 = vmatpush.bf16.msra.mxu3 %v4074_v8 }
  0xa2   : > { %2729 = vmatmul.bf16.gmra.mxu0 %v4823_v14  ;;  %2758 = vmatmul.bf16.gmra.mxu1 %v4852_v34 }
  0xa3   : > { %2891 = vmatpush.bf16.msra.mxu2 %v4065_v31 }
  0xa4   : > { %2920 = vmatpush.bf16.msra.mxu3 %v4073_v41 }
  0xa7   : > { %2892 = vmatpush.bf16.msra.mxu2 %v4064_v44 }
  0xae   : > { %2676 = vmatmul.bf16.gmra.mxu2 %v1176_v2  ;;  %v932_v2 = vpack.c.bf16 %v5145_v53, %v5142_v52 }
  0xaf   : > { %v2493_v13 = vpop.f32.mrf.mxu0  ;;  %2705 = vmatmul.bf16.gmra.mxu3 %v1177_v50  ;;  %v2522_v26 = vpop.f32.mrf.mxu1  ;;  %v933_v50 = vpack.c.bf16 %v5154_v59, %v5151_v9 }
  0xb0   : > { %v2494_v22 = vadd.f32 %v5190_v15, %v2493_v13  ;;  %v1169_v13 = vunpack.c.h.b16 %v930_v39  ;;  %v1190_v43 = vunpack.c.l.b16 %v932_v2  ;;  %v1191_v8 = vunpack.c.h.b16 %v932_v2 }
  0xb1   : > { %v2503_v3 = vpop.f32.mrf.mxu2 }
  0xb2   : > { %v5211_v36 = vadd.f32 %v2522_v26, %v2494_v22  ;;  %2734 = vmatmul.bf16.gmra.mxu0 %v4905_v55  ;;  %v2532_v37 = vpop.f32.mrf.mxu3  ;;  %2763 = vmatmul.bf16.gmra.mxu1 %v4932_v28  ;;  %v2504_v1 = vadd.f32 %v5190_v15, %v2503_v3  ;;  %v5793_v26 = vunpack.c.h.b16 %v5219_v63 }
  0xb4   : > { %v5221_v27 = vadd.f32 %v2532_v37, %v2504_v1  ;;  %v1192_v37 = vunpack.c.l.b16 %v933_v50  ;;  %v1193_v1 = vunpack.c.h.b16 %v933_v50  ;;  %v4090_v50 = vld [vmem:[%s5778_s5 + $0x478] sm:$0xff] }
  0xb5   : > { %2977 = vmatpush.bf16.msra.mxu1 %v4090_v50 }
  0xb6   : > { %v5248_v31 = vpack.c.b16 %v1192_v37, %v1190_v43 }
  0xb7   : > { %v2495_v6 = vpop.f32.mrf.mxu0  ;;  %v2524_v38 = vpop.f32.mrf.mxu1 }
  0xb8   : > { %v2496_v22 = vadd.f32 %v5190_v15, %v2495_v6  ;;  %v1179_v6 = vpack.c.b16 %v5793_v26, %v1169_v13  ;;  %5825 = vst [vmem:[#allocation7_spill] sm:$0xff] %v5248_v31 }
  0xb9   : > { %v2505_v19 = vpop.f32.mrf.mxu2 }
  0xba   : > { %v5239_v25 = vadd.f32 %v2524_v38, %v2496_v22  ;;  %v2534_v3 = vpop.f32.mrf.mxu3  ;;  %v2506_v39 = vadd.f32 %v5190_v15, %v2505_v19  ;;  %v5250_v38 = vpack.c.b16 %v1193_v1, %v1191_v8  ;;  %v946_v22 = vsel %vm692_vm0, %v5827_v48, %v4452_v57  ;;  %v4072_v57 = vld [vmem:[%s5778_s5 + $0x3e8] sm:$0xff]  ;;  %v4081_v8 = vld [vmem:[%s5778_s5 + $0x430] sm:$0xff] }
  0xbb   : > { %2921 = vmatpush.bf16.msra.mxu3 %v4072_v57  ;;  %2949 = vmatpush.bf16.msra.mxu0 %v4081_v8 }
  0xbc   : > { %v5246_v21 = vadd.f32 %v2534_v3, %v2506_v39  ;;  %5826 = vst [vmem:[#allocation8_spill] sm:$0xff] %v5250_v38 }
  0xbe   : > { %2681 = vmatmul.bf16.gmra.mxu2 %v1178_v61  ;;  %v5828_v61 = vld [vmem:[#allocation3_spill] sm:$0xff] }
  0xbf   : > { %v2498_v41 = vpop.f32.mrf.mxu0  ;;  %2710 = vmatmul.bf16.gmra.mxu3 %v1179_v6  ;;  %v2527_v2 = vpop.f32.mrf.mxu1  ;;  %v947_v43 = vsel %vm692_vm0, %v5827_v48, %v5828_v61  ;;  %v962_v6 = vsel %vm4476_vm3, %v946_v22, 0.0  ;;  %v4089_v48 = vld [vmem:[%s5778_s5 + $0x470] sm:$0xff]  ;;  %v4063_v22 = vld [vmem:[%s5778_s5 + $0x3a0] sm:$0xff] }
  0xc0   : > { %v2499_v13 = vadd.f32 %v5190_v15, %v2498_v41  ;;  %v963_v41 = vsel %vm4476_vm3, %v947_v43, 0.0  ;;  %v4071_v61 = vld [vmem:[%s5778_s5 + $0x3e0] sm:$0xff]  ;;  %2978 = vmatpush.bf16.msra.mxu1 %v4089_v48  ;;  %2893 = vmatpush.bf16.msra.mxu2 %v4063_v22  ;;  %v914_v22 = vsel %vm4857_vm8, %v4945_v42, 0.0 }
  0xc1   : > { %v2508_v3 = vpop.f32.mrf.mxu2  ;;  %v1010_v50 = vpack.c.bf16 %v963_v41, %v962_v6  ;;  %2922 = vmatpush.bf16.msra.mxu3 %v4071_v61 }
  0xc2   : > { %v5268_v19 = vadd.f32 %v2527_v2, %v2499_v13  ;;  %2739 = vmatmul.bf16.gmra.mxu0 %v5248_v31  ;;  %v2537_v37 = vpop.f32.mrf.mxu3  ;;  %2768 = vmatmul.bf16.gmra.mxu1 %v5250_v38  ;;  %v2509_v1 = vadd.f32 %v5190_v15, %v2508_v3  ;;  %v4080_v3 = vld [vmem:[%s5778_s5 + $0x428] sm:$0xff] }
  0xc3   : > { %v1247_v39 = vunpack.c.h.b16 %v1010_v50  ;;  %2950 = vmatpush.bf16.msra.mxu0 %v4080_v3  ;;  %v4079_v3 = vld [vmem:[%s5778_s5 + $0x420] sm:$0xff] }
  0xc4   : > { %v5284_v2 = vadd.f32 %v2537_v37, %v2509_v1  ;;  %v1246_v1 = vunpack.c.l.b16 %v1010_v50 }
  0xc5   : > { %v1263_v48 = vpack.c.b16 %v4512_v35, %v1247_v39  ;;  %v4062_v35 = vld [vmem:[%s5778_s5 + $0x398] sm:$0xff] }
  0xc6   : > { %2894 = vmatpush.bf16.msra.mxu2 %v4062_v35  ;;  %v892_v35 = vrot.slane %v5142_v52, 1  ;;  %v4078_v52 = vld [vmem:[%s5778_s5 + $0x418] sm:$0xff] }
  0xc7   : > { %v2500_v44 = vpop.f32.mrf.mxu0  ;;  %v2529_v13 = vpop.f32.mrf.mxu1  ;;  %2951 = vmatpush.bf16.msra.mxu0 %v4079_v3 }
  0xc8   : > { %v2501_v43 = vadd.f32 %v5190_v15, %v2500_v44  ;;  %v1262_v44 = vpack.c.b16 %v4510_v32, %v1246_v1  ;;  %v4088_v32 = vld [vmem:[%s5778_s5 + $0x468] sm:$0xff]  ;;  %v967_v1 = vsel %vm4660_vm5, %v4613_v58, 0.0  ;;  %v894_v58 = vrot.slane %v5145_v53, 1 }
  0xc9   : > { %v2510_v57 = vpop.f32.mrf.mxu2  ;;  %2979 = vmatpush.bf16.msra.mxu1 %v4088_v32 }
  0xca   : > { %v5302_v37 = vadd.f32 %v2529_v13, %v2501_v43  ;;  %v2539_v8 = vpop.f32.mrf.mxu3  ;;  %v2511_v6 = vadd.f32 %v5190_v15, %v2510_v57  ;;  %v915_v15 = vsel %vm4857_vm8, %v4952_v29, 0.0  ;;  %v4070_v43 = vld [vmem:[%s5778_s5 + $0x3d8] sm:$0xff] }
  0xcb   : > { %v937_v61 = vpack.c.bf16 %v915_v15, %v914_v22  ;;  %2923 = vmatpush.bf16.msra.mxu3 %v4070_v43  ;;  %v5348_v22 = vrot.slane %v5154_v59, 1  ;;  %2952 = vmatpush.bf16.msra.mxu0 %v4078_v52 }
  0xcc   : > { %v5307_v41 = vadd.f32 %v2539_v8, %v2511_v6  ;;  %v966_v8 = vsel %vm4660_vm5, %v4608_v10, 0.0 }
  0xcd   : > { %v1212_v6 = vunpack.c.l.b16 %v937_v61  ;;  %v1213_v10 = vunpack.c.h.b16 %v937_v61  ;;  %2980 = vmatpush.bf16.msra.mxu1 %v4087_v20  ;;  %v899_v43 = vsel %vm766_vm6, %v894_v58, %v5348_v22 }
  0xce   : > { %2782 = vmatmul.bf16.vlgmr.msrb.gmra.mxu2 %v4840_v4 }
  0xcf   : > { %v2609_v13 = vpop.f32.mrf.mxu0  ;;  %2811 = vmatmul.bf16.vlgmr.msrb.gmra.mxu3 %v4850_v30  ;;  %v5313_v50 = vpop.f32.mrf.mxu1  ;;  %v1224_v38 = vpack.c.b16 %v1212_v6, %v4989_v54  ;;  %v1225_v31 = vpack.c.b16 %v1213_v10, %v4992_v60  ;;  %v543_v6 = vunpack.c.l.bf16 %v539_v18  ;;  %v544_v10 = vunpack.c.h.bf16 %v539_v18  ;;  %v4086_v18 = vld [vmem:[%s5778_s5 + $0x458] sm:$0xff] }
  0xd1   : > { %v2551_v4 = vpop.f32.mrf.mxu2  ;;  %2981 = vmatpush.bf16.msra.mxu1 %v4086_v18 }
  0xd2   : > { %2840 = vmatmul.bf16.vlgmr.msrb.gmra.mxu0 %v1262_v44  ;;  %v2580_v30 = vpop.f32.mrf.mxu3  ;;  %2869 = vmatmul.bf16.vlgmr.msrb.gmra.mxu1 %v1263_v48  ;;  %v2552_v57 = vadd.f32 %v2551_v4, %v5211_v36  ;;  %v1012_v44 = vpack.c.bf16 %v967_v1, %v966_v8  ;;  %v5345_v48 = vrot.slane %v5151_v9, 1  ;;  %v4061_v4 = vld [vmem:[%s5778_s5 + $0x390] sm:$0xff] }
  0xd3   : > { %2895 = vmatpush.bf16.msra.mxu2 %v4061_v4 }
  0xd4   : > { %v2581_v39 = vadd.f32 %v2580_v30, %v2552_v57  ;;  %v4069_v30 = vld [vmem:[%s5778_s5 + $0x3d0] sm:$0xff]  ;;  %v900_v53 = vsel %vm766_vm6, %v5345_v48, %v5001_v56  ;;  %v897_v61 = vsel %vm766_vm6, %v892_v35, %v5345_v48  ;;  %v1251_v26 = vunpack.c.h.b16 %v1012_v44 }
  0xd5   : > { %v922_v3 = vsel %vm5013_vm10, %v900_v53, 0.0  ;;  %2924 = vmatpush.bf16.msra.mxu3 %v4069_v30  ;;  %v5381_v20 = vpack.c.bf16 %v899_v43, %v897_v61  ;;  %v5388_v53 = vsel %vm766_vm6, %v4995_v46, %v892_v35  ;;  %v540_v61 = vld [vmem:[%s430_s23 + $0x8] sm:$0xff] }
  0xd6   : > { %v2610_v36 = vadd.f32 %v2609_v13, %v2581_v39  ;;  %v901_v13 = vsel %vm766_vm6, %v5348_v22, %v5001_v56  ;;  %v1250_v39 = vunpack.c.l.b16 %v1012_v44  ;;  %v1265_v46 = vpack.c.b16 %v4666_v62, %v1251_v26 }
  0xd7   : > { %v2611_v15 = vpop.f32.mrf.mxu0  ;;  %v2640_v32 = vpop.f32.mrf.mxu1  ;;  %v923_v57 = vsel %vm5013_vm10, %v901_v13, 0.0  ;;  %v1218_v13 = vunpack.c.l.b16 %v5381_v20  ;;  %v1219_v30 = vunpack.c.h.b16 %v5381_v20  ;;  %v545_v62 = vunpack.c.l.bf16 %v540_v61 }
  0xd8   : > { %v941_v4 = vpack.c.bf16 %v923_v57, %v922_v3  ;;  %v1264_v3 = vpack.c.b16 %v4656_v33, %v1250_v39  ;;  %v4060_v33 = vld [vmem:[%s5778_s5 + $0x388] sm:$0xff]  ;;  %v5416_v26 = vadd.f32 %v5313_v50, %v2610_v36  ;;  %v970_v50 = vsel %vm4386_vm1, %v5177_v24, 0.0 }
  0xd9   : > { %v2553_v8 = vpop.f32.mrf.mxu2  ;;  %2896 = vmatpush.bf16.msra.mxu2 %v4060_v33  ;;  %v971_v36 = vsel %vm4386_vm1, %v5182_v49, 0.0  ;;  %v549_v24 = vmul.f32 %v545_v62, %v4359_v11 }
  0xda   : > { %v2582_v1 = vpop.f32.mrf.mxu3  ;;  %v2554_v56 = vadd.f32 %v2553_v8, %v5239_v25  ;;  %v1220_v44 = vunpack.c.l.b16 %v941_v4  ;;  %v1221_v52 = vunpack.c.h.b16 %v941_v4  ;;  %v5395_v25 = vsel %vm766_vm6, %v4998_v5, %v894_v58 }
  0xdb   : > { %v547_v58 = vmul.f32 %v543_v6, %v4359_v11  ;;  %v556_v6 = vstv %s555_s11  ;;  %v553_v62 = vadd.f32 %v549_v24, %v4372_v16 }
  0xdc   : > { %v2583_v43 = vadd.f32 %v2582_v1, %v2554_v56  ;;  %v5401_v35 = vpack.c.b16 %v1220_v44, %v1218_v13  ;;  %v5405_v57 = vpack.c.b16 %v1221_v52, %v1219_v30  ;;  %v548_v1 = vmul.f32 %v544_v10, %v4361_v12  ;;  %v4068_v52 = vld [vmem:[%s5778_s5 + $0x3c8] sm:$0xff] }
  0xdd   : > { %2925 = vmatpush.bf16.msra.mxu3 %v4068_v52  ;;  %v551_v10 = vadd.f32 %v547_v58, %v4372_v16  ;;  %vm5445_vm11 = vcmp.eq.s32.totalorder %v556_v6, 1  ;;  %v4076_v58 = vld [vmem:[%s5778_s5 + $0x408] sm:$0xff] }
  0xde   : > { %v2612_v56 = vadd.f32 %v2611_v15, %v2583_v43  ;;  %2787 = vmatmul.bf16.gmra.mxu2 %v1224_v38  ;;  %v918_v38 = vsel %vm4936_vm9, %v5388_v53, 0.0  ;;  %v546_v15 = vunpack.c.h.bf16 %v540_v61 }
  0xdf   : > { %v2614_v8 = vpop.f32.mrf.mxu0  ;;  %2816 = vmatmul.bf16.gmra.mxu3 %v1225_v31  ;;  %v2643_v5 = vpop.f32.mrf.mxu1  ;;  %v919_v31 = vsel %vm4936_vm9, %v5395_v25, 0.0  ;;  %v5465_v16 = vsel %vm5445_vm11, %v551_v10, 0.0  ;;  %v5832_v10 = vunpack.c.l.b16 %v5219_v63 }
  0xe0   : > { %v5426_v39 = vadd.f32 %v2640_v32, %v2612_v56  ;;  %v4077_v32 = vld [vmem:[%s5778_s5 + $0x410] sm:$0xff]  ;;  %v939_v43 = vpack.c.bf16 %v919_v31, %v918_v38  ;;  %v550_v23 = vmul.f32 %v546_v15, %v4361_v12  ;;  %v4059_v31 = vld [vmem:[%s5778_s5 + $0x380] sm:$0xff]  ;;  %v948_v6 = vrot.slane %v5465_v16, 7 }
  0xe1   : > { %v2556_v4 = vpop.f32.mrf.mxu2  ;;  %2953 = vmatpush.bf16.msra.mxu0 %v4077_v32  ;;  %v4085_v12 = vld [vmem:[%s5778_s5 + $0x450] sm:$0xff]  ;;  %v4067_v15 = vld [vmem:[%s5778_s5 + $0x3c0] sm:$0xff]  ;;  %2897 = vmatpush.bf16.msra.mxu2 %v4059_v31 }
  0xe2   : > { %2845 = vmatmul.bf16.gmra.mxu0 %v1264_v3  ;;  %v2585_v44 = vpop.f32.mrf.mxu3  ;;  %2874 = vmatmul.bf16.gmra.mxu1 %v1265_v46  ;;  %v2557_v61 = vadd.f32 %v2556_v4, %v5268_v19  ;;  %v552_v3 = vadd.f32 %v548_v1, %v4374_v17  ;;  %v1014_v46 = vpack.c.bf16 %v971_v36, %v970_v50  ;;  %v1216_v38 = vunpack.c.l.b16 %v939_v43  ;;  %v4083_v31 = vld [vmem:[%s5778_s5 + $0x440] sm:$0xff] }
  0xe3   : > { %v1217_v11 = vunpack.c.h.b16 %v939_v43  ;;  %2982 = vmatpush.bf16.msra.mxu1 %v4085_v12  ;;  %2926 = vmatpush.bf16.msra.mxu3 %v4067_v15  ;;  %v5478_v43 = vsel %vm5445_vm11, %v553_v62, 0.0  ;;  %v5834_v15 = vrot.slane %v5151_v9, 7 }
  0xe4   : > { %v2586_v49 = vadd.f32 %v2585_v44, %v2557_v61  ;;  %v5469_v1 = vsel %vm5445_vm11, %v552_v3, 0.0  ;;  %v1254_v44 = vunpack.c.l.b16 %v1014_v46  ;;  %v1226_v32 = vpack.c.b16 %v1216_v38, %v5050_v7 }
  0xe5   : > { %2954 = vmatpush.bf16.msra.mxu0 %v4076_v58  ;;  %v1227_v61 = vpack.c.b16 %v1217_v11, %v5052_v0  ;;  %v952_v56 = vrot.slane %v5478_v43, 7 }
  0xe6   : > { %v2615_v18 = vadd.f32 %v2614_v8, %v2586_v49  ;;  %v554_v8 = vadd.f32 %v550_v23, %v4374_v17  ;;  %v1255_v17 = vunpack.c.h.b16 %v1014_v46  ;;  %v4075_v49 = vld [vmem:[%s5778_s5 + $0x400] sm:$0xff]  ;;  %v1266_v3 = vpack.c.b16 %v5832_v10, %v1254_v44 }
  0xe7   : > { %v2616_v19 = vpop.f32.mrf.mxu0  ;;  %v2645_v33 = vpop.f32.mrf.mxu1  ;;  %v5833_v46 = vunpack.c.h.b16 %v5219_v63  ;;  %v5835_v63 = vrot.slane %v5154_v59, 7  ;;  %v953_v44 = vsel %vm692_vm0, %v948_v6, %v952_v56 }
  0xe8   : > { %v5471_v50 = vadd.f32 %v2643_v5, %v2615_v18  ;;  %v4084_v5 = vld [vmem:[%s5778_s5 + $0x448] sm:$0xff]  ;;  %v5485_v24 = vsel %vm5445_vm11, %v554_v8, 0.0  ;;  %v949_v8 = vsel %vm692_vm0, %v5834_v15, %v948_v6 }
  0xe9   : > { %v2558_v36 = vpop.f32.mrf.mxu2  ;;  %2983 = vmatpush.bf16.msra.mxu1 %v4084_v5  ;;  %v1267_v18 = vpack.c.b16 %v5833_v46, %v1255_v17  ;;  %v954_v12 = vrot.slane %v5485_v24, 7  ;;  %2955 = vmatpush.bf16.msra.mxu0 %v4075_v49 }
  0xea   : > { %v2587_v4 = vpop.f32.mrf.mxu3  ;;  %v2559_v52 = vadd.f32 %v2558_v36, %v5302_v37  ;;  %v950_v37 = vrot.slane %v5469_v1, 7 }
  0xec   : > { %v2588_v23 = vadd.f32 %v2587_v4, %v2559_v52  ;;  %v951_v58 = vsel %vm692_vm0, %v5835_v63, %v950_v37  ;;  %v955_v9 = vsel %vm692_vm0, %v950_v37, %v954_v12  ;;  %v974_v52 = vsel %vm4591_vm4, %v949_v8, 0.0 }
  0xed   : > { %2984 = vmatpush.bf16.msra.mxu1 %v4083_v31  ;;  %v975_v59 = vsel %vm4591_vm4, %v951_v58, 0.0 }
  0xee   : > { %v2617_v38 = vadd.f32 %v2616_v19, %v2588_v23  ;;  %2792 = vmatmul.bf16.gmra.mxu2 %v1226_v32 }
  0xef   : > { %v2619_v11 = vpop.f32.mrf.mxu0  ;;  %2821 = vmatmul.bf16.gmra.mxu3 %v1227_v61  ;;  %v2648_v62 = vpop.f32.mrf.mxu1  ;;  %v1016_v61 = vpack.c.bf16 %v975_v59, %v974_v52 }
  0xf0   : > { %v5507_v19 = vadd.f32 %v2645_v33, %v2617_v38  ;;  %v1017_v33 = vpack.c.bf16 %v955_v9, %v953_v44 }
  0xf1   : > { %v2561_v36 = vpop.f32.mrf.mxu2  ;;  %v1258_v46 = vunpack.c.l.b16 %v1016_v61 }
  0xf2   : > { %2850 = vmatmul.bf16.gmra.mxu0 %v1266_v3  ;;  %v2590_v4 = vpop.f32.mrf.mxu3  ;;  %2879 = vmatmul.bf16.gmra.mxu1 %v1267_v18  ;;  %v2562_v17 = vadd.f32 %v2561_v36, %v5221_v27  ;;  %v1260_v27 = vunpack.c.l.b16 %v1017_v33  ;;  %v1259_v18 = vunpack.c.h.b16 %v1016_v61  ;;  %v1261_v37 = vunpack.c.h.b16 %v1017_v33 }
  0xf3   : > { %v997_v36 = vsel %vm4743_vm7, %v4952_v29, 0.0  ;;  %v980_v29 = vrot.slane %v5469_v1, 1 }
  0xf4   : > { %v2591_v32 = vadd.f32 %v2590_v4, %v2562_v17  ;;  %v1268_v12 = vpack.c.b16 %v1260_v27, %v1258_v46  ;;  %v1269_v40 = vpack.c.b16 %v1261_v37, %v1259_v18 }
  0xf5   : > { %v981_v27 = vsel %vm766_vm6, %v5348_v22, %v980_v29  ;;  %v1001_v22 = vsel %vm4857_vm8, %v5395_v25, 0.0 }
  0xf6   : > { %v2620_v5 = vadd.f32 %v2619_v11, %v2591_v32 }
  0xf7   : > { %v2621_v23 = vpop.f32.mrf.mxu0  ;;  %v2650_v49 = vpop.f32.mrf.mxu1 }
  0xf8   : > { %v5516_v10 = vadd.f32 %v2648_v62, %v2620_v5 }
  0xf9   : > { %v2563_v3 = vpop.f32.mrf.mxu2 }
  0xfa   : > { %v2592_v6 = vpop.f32.mrf.mxu3  ;;  %v2564_v56 = vadd.f32 %v2563_v3, %v5246_v21  ;;  %v996_v21 = vsel %vm4743_vm7, %v4945_v42, 0.0 }
  0xfb   : > { %v1021_v44 = vpack.c.bf16 %v997_v36, %v996_v21 }
  0xfc   : > { %v2593_v38 = vadd.f32 %v2592_v6, %v2564_v56  ;;  %v1000_v56 = vsel %vm4857_vm8, %v5388_v53, 0.0 }
  0xfd   : > { %v1298_v59 = vunpack.c.l.b16 %v1021_v44  ;;  %v1299_v32 = vunpack.c.h.b16 %v1021_v44 }
  0xfe   : > { %v2622_v31 = vadd.f32 %v2621_v23, %v2593_v38  ;;  %2797 = vmatmul.bf16.gmra.mxu2 %v5401_v35  ;;  %v978_v23 = vrot.slane %v5465_v16, 1 }
  0xff   : > { %v2624_v15 = vpop.f32.mrf.mxu0  ;;  %2826 = vmatmul.bf16.gmra.mxu3 %v5405_v57  ;;  %v2653_v11 = vpop.f32.mrf.mxu1 }
 0x100   : > { %v5521_v62 = vadd.f32 %v2650_v49, %v2622_v31  ;;  %v1313_v49 = vpack.c.b16 %v1299_v32, %v4992_v60  ;;  %v1005_v60 = vsel %vm4936_vm9, %v981_v27, 0.0  ;;  %v1023_v31 = vpack.c.bf16 %v1001_v22, %v1000_v56 }
 0x101   : > { %v2566_v8 = vpop.f32.mrf.mxu2 }
 0x102   : > { %2855 = vmatmul.bf16.gmra.mxu0 %v1268_v12  ;;  %v2595_v63 = vpop.f32.mrf.mxu3  ;;  %2884 = vmatmul.bf16.gmra.mxu1 %v1269_v40  ;;  %v2567_v4 = vadd.f32 %v2566_v8, %v5284_v2  ;;  %v1312_v2 = vpack.c.b16 %v1298_v59, %v4989_v54  ;;  %v1302_v21 = vunpack.c.l.b16 %v1023_v31  ;;  %v1303_v45 = vunpack.c.h.b16 %v1023_v31 }
 0x104   : > { %v2596_v35 = vadd.f32 %v2595_v63, %v2567_v4  ;;  %v1314_v4 = vpack.c.b16 %v1302_v21, %v5050_v7 }
 0x106   : > { %v2625_v57 = vadd.f32 %v2624_v15, %v2596_v35 }
 0x107   : > { %v2626_v17 = vpop.f32.mrf.mxu0  ;;  %v2655_v9 = vpop.f32.mrf.mxu1 }
 0x108   : > { %v5530_v52 = vadd.f32 %v2653_v11, %v2625_v57 }
 0x109   : > { %v2568_v61 = vpop.f32.mrf.mxu2 }
 0x10a   : > { %v2597_v33 = vpop.f32.mrf.mxu3  ;;  %v2569_v5 = vadd.f32 %v2568_v61, %v5307_v41  ;;  %v979_v41 = vsel %vm766_vm6, %v5345_v48, %v978_v23 }
 0x10b   : > { %v1004_v54 = vsel %vm4936_vm9, %v979_v41, 0.0  ;;  %v5839_v41 = vld [vmem:[#allocation6_spill] sm:$0xff] }
 0x10c   : > { %v2598_v42 = vadd.f32 %v2597_v33, %v2569_v5  ;;  %v982_v5 = vrot.slane %v5478_v43, 1 }
 0x10e   : > { %v2627_v3 = vadd.f32 %v2626_v17, %v2598_v42  ;;  %2898 = vmatmul.bf16.vlgmr.msra.gmra.mxu2 %v4823_v14  ;;  %v1025_v14 = vpack.c.bf16 %v1005_v60, %v1004_v54  ;;  %v984_v42 = vrot.slane %v5485_v24, 1  ;;  %v986_v27 = vsel %vm766_vm6, %v982_v5, %v5839_v41 }
 0x10f   : > { %v2725_v6 = vpop.f32.mrf.mxu0  ;;  %2927 = vmatmul.bf16.vlgmr.msra.gmra.mxu3 %v4852_v34  ;;  %v2754_v46 = vpop.f32.mrf.mxu1 }
 0x110   : > { %v5551_v18 = vadd.f32 %v2655_v9, %v2627_v3  ;;  %v1306_v38 = vunpack.c.l.b16 %v1025_v14  ;;  %v1307_v40 = vunpack.c.h.b16 %v1025_v14  ;;  %v987_v54 = vsel %vm766_vm6, %v984_v42, %v5839_v41 }
 0x111   : > { %v2667_v34 = vpop.f32.mrf.mxu2  ;;  %v983_v14 = vsel %vm766_vm6, %v978_v23, %v982_v5  ;;  %v1009_v56 = vsel %vm5013_vm10, %v987_v54, 0.0 }
 0x112   : > { %2956 = vmatmul.bf16.vlgmr.msra.gmra.mxu0 %v1312_v2  ;;  %v2696_v37 = vpop.f32.mrf.mxu3  ;;  %2985 = vmatmul.bf16.vlgmr.msra.gmra.mxu1 %v1313_v49  ;;  %v2668_v48 = vadd.f32 %v2667_v34, %v5416_v26  ;;  %v1316_v12 = vpack.c.b16 %v1306_v38, %v1218_v13  ;;  %v1317_v26 = vpack.c.b16 %v1307_v40, %v1219_v30 }
 0x113   : > { %v1315_v13 = vpack.c.b16 %v1303_v45, %v5052_v0  ;;  %v1019_v30 = vpack.c.bf16 %v5485_v24, %v5478_v43  ;;  %v1018_v24 = vpack.c.bf16 %v5469_v1, %v5465_v16 }
 0x114   : > { %v2697_v47 = vadd.f32 %v2696_v37, %v2668_v48  ;;  %v985_v37 = vsel %vm766_vm6, %v980_v29, %v984_v42  ;;  %v1008_v48 = vsel %vm5013_vm10, %v986_v27, 0.0 }
 0x115   : > { %v1280_v38 = vunpack.c.l.b16 %v1018_v24  ;;  %v1282_v23 = vunpack.c.l.b16 %v1019_v30 }
 0x116   : > { %v2726_v15 = vadd.f32 %v2725_v6, %v2697_v47  ;;  %v5837_v6 = vld [vmem:[#allocation7_spill] sm:$0xff]  ;;  %v1026_v47 = vpack.c.bf16 %v985_v37, %v983_v14 }
 0x117   : > { %v2727_v11 = vpop.f32.mrf.mxu0  ;;  %v2756_v8 = vpop.f32.mrf.mxu1  ;;  %v1284_v21 = vpack.c.b16 %v1282_v23, %v1280_v38 }
 0x118   : > { %v5564_v63 = vadd.f32 %v2754_v46, %v2726_v15  ;;  %v1281_v15 = vunpack.c.h.b16 %v1018_v24 }
 0x119   : > { %v2669_v53 = vpop.f32.mrf.mxu2 }
 0x11a   : > { %v2698_v58 = vpop.f32.mrf.mxu3  ;;  %v2670_v25 = vadd.f32 %v2669_v53, %v5426_v39  ;;  %v1309_v53 = vunpack.c.h.b16 %v1026_v47 }
 0x11c   : > { %v2699_v36 = vadd.f32 %v2698_v58, %v2670_v25 }
 0x11e   : > { %v2728_v35 = vadd.f32 %v2727_v11, %v2699_v36  ;;  %2903 = vmatmul.bf16.gmra.mxu2 %v4905_v55 }
 0x11f   : > { %v2730_v44 = vpop.f32.mrf.mxu0  ;;  %2932 = vmatmul.bf16.gmra.mxu3 %v4932_v28  ;;  %v2759_v20 = vpop.f32.mrf.mxu1 }
 0x120   : > { %v5573_v39 = vadd.f32 %v2756_v8, %v2728_v35  ;;  %v1308_v8 = vunpack.c.l.b16 %v1026_v47 }
 0x121   : > { %v2672_v57 = vpop.f32.mrf.mxu2 }
 0x122   : > { %2961 = vmatmul.bf16.gmra.mxu0 %v1314_v4  ;;  %v2701_v17 = vpop.f32.mrf.mxu3  ;;  %2990 = vmatmul.bf16.gmra.mxu1 %v1315_v13  ;;  %v2673_v7 = vadd.f32 %v2672_v57, %v5471_v50  ;;  %v5838_v50 = vld [vmem:[#allocation8_spill] sm:$0xff] }
 0x124   : > { %v2702_v9 = vadd.f32 %v2701_v17, %v2673_v7 }
 0x126   : > { %v2731_v0 = vadd.f32 %v2730_v44, %v2702_v9 }
 0x127   : > { %v2732_v59 = vpop.f32.mrf.mxu0  ;;  %v2761_v32 = vpop.f32.mrf.mxu1 }
 0x128   : > { %v5576_v61 = vadd.f32 %v2759_v20, %v2731_v0 }
 0x129   : > { %v2674_v55 = vpop.f32.mrf.mxu2 }
 0x12a   : > { %v2703_v28 = vpop.f32.mrf.mxu3  ;;  %v2675_v33 = vadd.f32 %v2674_v55, %v5507_v19 }
 0x12c   : > { %v2704_v2 = vadd.f32 %v2703_v28, %v2675_v33 }
 0x12e   : > { %v2733_v49 = vadd.f32 %v2732_v59, %v2704_v2  ;;  %2908 = vmatmul.bf16.gmra.mxu2 %v5837_v6 }
 0x12f   : > { %v2735_v3 = vpop.f32.mrf.mxu0  ;;  %2937 = vmatmul.bf16.gmra.mxu3 %v5838_v50  ;;  %v2764_v46 = vpop.f32.mrf.mxu1 }
 0x130   : > { %v5587_v60 = vadd.f32 %v2761_v32, %v2733_v49 }
 0x131   : > { %v2677_v43 = vpop.f32.mrf.mxu2 }
 0x132   : > { %2966 = vmatmul.bf16.gmra.mxu0 %v1316_v12  ;;  %v2706_v19 = vpop.f32.mrf.mxu3  ;;  %2995 = vmatmul.bf16.gmra.mxu1 %v1317_v26  ;;  %v2678_v34 = vadd.f32 %v2677_v43, %v5516_v10  ;;  %v1027_v12 = vpack.c.bf16 %v1009_v56, %v1008_v48  ;;  %v1283_v10 = vunpack.c.h.b16 %v1019_v30 }
 0x134   : > { %v2707_v22 = vadd.f32 %v2706_v19, %v2678_v34  ;;  %v1310_v26 = vunpack.c.l.b16 %v1027_v12  ;;  %v1311_v58 = vunpack.c.h.b16 %v1027_v12  ;;  %v1285_v45 = vpack.c.b16 %v1283_v10, %v1281_v15 }
 0x136   : > { %v2736_v40 = vadd.f32 %v2735_v3, %v2707_v22  ;;  %v1318_v36 = vpack.c.b16 %v1310_v26, %v1308_v8  ;;  %v1319_v4 = vpack.c.b16 %v1311_v58, %v1309_v53 }
 0x137   : > { %v2737_v16 = vpop.f32.mrf.mxu0  ;;  %v2766_v31 = vpop.f32.mrf.mxu1 }
 0x138   : > { %v5602_v11 = vadd.f32 %v2764_v46, %v2736_v40 }
 0x139   : > { %v2679_v1 = vpop.f32.mrf.mxu2 }
 0x13a   : > { %v2708_v29 = vpop.f32.mrf.mxu3  ;;  %v2680_v51 = vadd.f32 %v2679_v1, %v5521_v62 }
 0x13c   : > { %v2709_v25 = vadd.f32 %v2708_v29, %v2680_v51 }
 0x13e   : > { %v2738_v13 = vadd.f32 %v2737_v16, %v2709_v25  ;;  %2913 = vmatmul.bf16.gmra.mxu2 %v1284_v21 }
 0x13f   : > { %v2740_v35 = vpop.f32.mrf.mxu0  ;;  %2942 = vmatmul.bf16.gmra.mxu3 %v1285_v45  ;;  %v2769_v44 = vpop.f32.mrf.mxu1 }
 0x140   : > { %v5605_v20 = vadd.f32 %v2766_v31, %v2738_v13 }
 0x141   : > { %v2682_v30 = vpop.f32.mrf.mxu2 }
 0x142   : > { %2971 = vmatmul.bf16.gmra.mxu0 %v1318_v36  ;;  %v2711_v57 = vpop.f32.mrf.mxu3  ;;  %3000 = vmatmul.bf16.gmra.mxu1 %v1319_v4  ;;  %v2683_v17 = vadd.f32 %v2682_v30, %v5530_v52 }
 0x144   : > { %v2712_v7 = vadd.f32 %v2711_v57, %v2683_v17 }
 0x146   : > { %v2741_v62 = vadd.f32 %v2740_v35, %v2712_v7 }
 0x147   : > { %v2742_v9 = vpop.f32.mrf.mxu0  ;;  %v2771_v0 = vpop.f32.mrf.mxu1 }
 0x148   : > { %v2770_v59 = vadd.f32 %v2769_v44, %v2741_v62 }
 0x149   : > { %v2684_v32 = vpop.f32.mrf.mxu2 }
 0x14a   : > { %v2713_v55 = vpop.f32.mrf.mxu3  ;;  %v2685_v28 = vadd.f32 %v2684_v32, %v5551_v18 }
 0x14c   : > { %v2714_v33 = vadd.f32 %v2713_v55, %v2685_v28 }
 0x14e   : > { %v2743_v5 = vadd.f32 %v2742_v9, %v2714_v33 }
 0x14f   : > { %v2841_v42 = vpop.f32.mrf.mxu0  ;;  %v2870_v2 = vpop.f32.mrf.mxu1 }
 0x150   : > { %v5609_v49 = vadd.f32 %v2771_v0, %v2743_v5 }
 0x151   : > { %v2783_v3 = vpop.f32.mrf.mxu2 }
 0x152   : > { %v2812_v6 = vpop.f32.mrf.mxu3  ;;  %v2784_v50 = vadd.f32 %v2783_v3, %v5564_v63 }
 0x154   : > { %v2813_v52 = vadd.f32 %v2812_v6, %v2784_v50 }
 0x156   : > { %v2842_v46 = vadd.f32 %v2841_v42, %v2813_v52 }
 0x157   : > { %v2843_v41 = vpop.f32.mrf.mxu0  ;;  %v2872_v27 = vpop.f32.mrf.mxu1 }
 0x158   : > { %v2871_v54 = vadd.f32 %v2870_v2, %v2842_v46 }
 0x159   : > { %v2785_v43 = vpop.f32.mrf.mxu2 }
 0x15a   : > { %v2814_v19 = vpop.f32.mrf.mxu3  ;;  %v2786_v57 = vadd.f32 %v2785_v43, %v5573_v39 }
 0x15c   : > { %v2815_v62 = vadd.f32 %v2814_v19, %v2786_v57 }
 0x15e   : > { %v2844_v32 = vadd.f32 %v2843_v41, %v2815_v62 }
 0x15f   : > { %v2846_v24 = vpop.f32.mrf.mxu0  ;;  %v2875_v14 = vpop.f32.mrf.mxu1 }
 0x160   : > { %v2873_v2 = vadd.f32 %v2872_v27, %v2844_v32 }
 0x161   : > { %v2788_v18 = vpop.f32.mrf.mxu2 }
 0x162   : > { %v2817_v34 = vpop.f32.mrf.mxu3  ;;  %v2789_v37 = vadd.f32 %v2788_v18, %v5576_v61 }
 0x164   : > { %v2818_v48 = vadd.f32 %v2817_v34, %v2789_v37 }
 0x166   : > { %v2847_v56 = vadd.f32 %v2846_v24, %v2818_v48 }
 0x167   : > { %v2848_v22 = vpop.f32.mrf.mxu0  ;;  %v5613_v38 = vpop.f32.mrf.mxu1 }
 0x168   : > { %v2876_v47 = vadd.f32 %v2875_v14, %v2847_v56 }
 0x169   : > { %v2790_v63 = vpop.f32.mrf.mxu2 }
 0x16a   : > { %v2819_v12 = vpop.f32.mrf.mxu3  ;;  %v2791_v39 = vadd.f32 %v2790_v63, %v5587_v60 }
 0x16c   : > { %v2820_v41 = vadd.f32 %v2819_v12, %v2791_v39 }
 0x16e   : > { %v2849_v56 = vadd.f32 %v2848_v22, %v2820_v41 }
 0x16f   : > { %v2851_v40 = vpop.f32.mrf.mxu0  ;;  %v2880_v16 = vpop.f32.mrf.mxu1 }
 0x171   : > { %v2793_v31 = vpop.f32.mrf.mxu2 }
 0x172   : > { %v2822_v23 = vpop.f32.mrf.mxu3  ;;  %v2794_v15 = vadd.f32 %v2793_v31, %v5602_v11  ;;  %v2878_v31 = vadd.f32 %v5613_v38, %v2849_v56 }
 0x174   : > { %v2823_v10 = vadd.f32 %v2822_v23, %v2794_v15 }
 0x176   : > { %v2852_v1 = vadd.f32 %v2851_v40, %v2823_v10 }
 0x177   : > { %v5616_v29 = vpop.f32.mrf.mxu0  ;;  %v5618_v8 = vpop.f32.mrf.mxu1 }
 0x178   : > { %v5620_v61 = vadd.f32 %v2880_v16, %v2852_v1 }
 0x179   : > { %v5622_v26 = vpop.f32.mrf.mxu2 }
 0x17a   : > { %v5624_v53 = vpop.f32.mrf.mxu3 }
 0x17f   : > { %v2856_v58 = vpop.f32.mrf.mxu0  ;;  %v2885_v51 = vpop.f32.mrf.mxu1 }
 0x181   : > { %v2798_v21 = vpop.f32.mrf.mxu2 }
 0x182   : > { %v2827_v45 = vpop.f32.mrf.mxu3  ;;  %v2799_v25 = vadd.f32 %v2798_v21, %v2770_v59 }
 0x184   : > { %v2828_v36 = vadd.f32 %v2827_v45, %v2799_v25  ;;  %v2796_v45 = vadd.f32 %v5622_v26, %v5605_v20 }
 0x186   : > { %v2857_v4 = vadd.f32 %v2856_v58, %v2828_v36 }
 0x187   : > { %v5626_v11 = vpop.f32.mrf.mxu0  ;;  %v5628_v13 = vpop.f32.mrf.mxu1 }
 0x188   : > { %v5630_v35 = vadd.f32 %v2885_v51, %v2857_v4 }
 0x189   : > { %v5632_v44 = vpop.f32.mrf.mxu2 }
 0x18a   : > { %v5634_v30 = vpop.f32.mrf.mxu3 }
 0x18f   : > { %v2957_v17 = vpop.f32.mrf.mxu0  ;;  %v2986_v7 = vpop.f32.mrf.mxu1 }
 0x191   : > { %v2899_v9 = vpop.f32.mrf.mxu2 }
 0x192   : > { %v2928_v0 = vpop.f32.mrf.mxu3  ;;  %v2900_v59 = vadd.f32 %v2899_v9, %v2871_v54 }
 0x194   : > { %v2929_v55 = vadd.f32 %v2928_v0, %v2900_v59 }
 0x196   : > { %v2958_v28 = vadd.f32 %v2957_v17, %v2929_v55 }
 0x197   : > { %v2959_v33 = vpop.f32.mrf.mxu0  ;;  %v2988_v5 = vpop.f32.mrf.mxu1 }
 0x198   : > { %v5637_v42 = vadd.f32 %v2986_v7, %v2958_v28  ;;  %v2825_v7 = vadd.f32 %v5624_v53, %v2796_v45 }
 0x199   : > { %v2901_v3 = vpop.f32.mrf.mxu2 }
 0x19a   : > { %v2930_v6 = vpop.f32.mrf.mxu3  ;;  %v3935_v50 = vmul.f32 -1.442695, %v5637_v42  ;;  %v2902_v52 = vadd.f32 %v2901_v3, %v2873_v2  ;;  %v2854_v28 = vadd.f32 %v5616_v29, %v2825_v7 }
 0x19c   : > { %4172 = vpow2.f32 %v3935_v50  ;;  %v2931_v46 = vadd.f32 %v2930_v6, %v2902_v52 }
 0x19e   : > { %v2960_v43 = vadd.f32 %v2959_v33, %v2931_v46 }
 0x19f   : > { %v2962_v19 = vpop.f32.mrf.mxu0  ;;  %v2991_v54 = vpop.f32.mrf.mxu1 }
 0x1a0   : > { %v5641_v24 = vadd.f32 %v2988_v5, %v2960_v43  ;;  %v2801_v43 = vadd.f32 %v5632_v44, %v5609_v49 }
 0x1a1   : > { %v2904_v14 = vpop.f32.mrf.mxu2 }
 0x1a2   : > { %v2933_v18 = vpop.f32.mrf.mxu3  ;;  %v4173_v34 = vpop.eup %4172  ;;  %v3936_v27 = vmul.f32 -1.442695, %v5641_v24  ;;  %v2905_v37 = vadd.f32 %v2904_v14, %v2876_v47 }
 0x1a3   : > { %v5644_v48 = vadd.f32 1.0, %v4173_v34 }
 0x1a4   : > { %4174 = vpow2.f32 %v3936_v27  ;;  %v2934_v40 = vadd.f32 %v2933_v18, %v2905_v37 }
 0x1a5   : > { %4176 = vrcp.f32 %v5644_v48  ;;  %v3049_v33 = vand.u32 2147483648, %v5644_v48  ;;  %vm3043_vm13 = vweird.f32 %v5644_v48 }
 0x1a6   : > { %v2963_v60 = vadd.f32 %v2962_v19, %v2934_v40 }
 0x1a7   : > { %v2964_v63 = vpop.f32.mrf.mxu0  ;;  %v2993_v16 = vpop.f32.mrf.mxu1  ;;  %v3050_v19 = vor.u32 1.1754944e-38, %v3049_v33 }
 0x1a8   : > { %v5647_v12 = vadd.f32 %v2991_v54, %v2963_v60  ;;  %v2883_v54 = vadd.f32 %v5618_v8, %v2854_v28 }
 0x1a9   : > { %v2906_v23 = vpop.f32.mrf.mxu2 }
 0x1aa   : > { %v2935_v15 = vpop.f32.mrf.mxu3  ;;  %v4175_v10 = vpop.eup %4174  ;;  %v3937_v47 = vmul.f32 -1.442695, %v5647_v12  ;;  %v2907_v1 = vadd.f32 %v2906_v23, %v2878_v31 }
 0x1ab   : > { %v4177_v58 = vpop.eup %4176  ;;  %v5651_v22 = vadd.f32 1.0, %v4175_v10 }
 0x1ac   : > { %v3039_v51 = vmul.f32 %v4177_v58, %v5644_v48  ;;  %4178 = vpow2.f32 %v3937_v47  ;;  %v2936_v21 = vadd.f32 %v2935_v15, %v2907_v1  ;;  %vm3044_vm12 = vweird.f32 %v4177_v58 }
 0x1ad   : > { %4180 = vrcp.f32 %v5651_v22  ;;  %vm5678_vm14 = vmor %vm3043_vm13, %vm3044_vm12  ;;  %v3062_v6 = vand.u32 2147483647, %v5651_v22  ;;  %v3064_v29 = vand.u32 2147483648, %v5651_v22  ;;  %vm3058_vm1 = vweird.f32 %v5651_v22 }
 0x1ae   : > { %v3040_v25 = vsub.f32 1.0, %v3039_v51  ;;  %v2965_v38 = vadd.f32 %v2964_v63, %v2936_v21 }
 0x1af   : > { %v2967_v36 = vpop.f32.mrf.mxu0  ;;  %v2996_v17 = vpop.f32.mrf.mxu1  ;;  %v3065_v49 = vor.u32 1.1754944e-38, %v3064_v29  ;;  %vm3063_vm3 = vcmp.eq.f32.partialorder %v3062_v6, 8.507059e+37 }
 0x1b0   : > { %v3041_v4 = vmul.f32 %v4177_v58, %v3040_v25  ;;  %v5658_v57 = vadd.f32 %v2993_v16, %v2965_v38  ;;  %v2830_v16 = vadd.f32 %v5634_v30, %v2801_v43 }
 0x1b1   : > { %v2909_v62 = vpop.f32.mrf.mxu2 }
 0x1b2   : > { %v2938_v9 = vpop.f32.mrf.mxu3  ;;  %v4179_v20 = vpop.eup %4178  ;;  %v3938_v26 = vmul.f32 -1.442695, %v5658_v57  ;;  %v2910_v0 = vadd.f32 %v2909_v62, %v5620_v61  ;;  %v3042_v55 = vadd.f32 %v4177_v58, %v3041_v4  ;;  %v3047_v61 = vand.u32 2147483647, %v5644_v48 }
 0x1b3   : > { %v4181_v59 = vpop.eup %4180  ;;  %v5667_v32 = vadd.f32 1.0, %v4179_v20  ;;  %v2859_v21 = vadd.f32 %v5626_v11, %v2830_v16 }
 0x1b4   : > { %v3054_v53 = vmul.f32 %v4181_v59, %v5651_v22  ;;  %4182 = vpow2.f32 %v3938_v26  ;;  %v2939_v2 = vadd.f32 %v2938_v9, %v2910_v0  ;;  %v3046_v50 = vsel %vm5678_vm14, %v4177_v58, %v3042_v55 }
 0x1b5   : > { %4184 = vrcp.f32 %v5667_v32  ;;  %vm3059_vm15 = vweird.f32 %v4181_v59  ;;  %vm3048_vm0 = vcmp.eq.f32.partialorder %v3047_v61, 8.507059e+37  ;;  %vm3073_vm5 = vweird.f32 %v5667_v32 }
 0x1b6   : > { %v3055_v5 = vsub.f32 1.0, %v3054_v53  ;;  %v2968_v39 = vadd.f32 %v2967_v36, %v2939_v2  ;;  %v3051_v48 = vsel %vm3048_vm0, %v3050_v19, %v3046_v50  ;;  %vm3060_vm2 = vmor %vm3058_vm1, %vm3059_vm15  ;;  %v3077_v7 = vand.u32 2147483647, %v5667_v32 }
 0x1b7   : > { %v2969_v46 = vpop.f32.mrf.mxu0  ;;  %v2998_v56 = vpop.f32.mrf.mxu1  ;;  %v3158_v23 = vmul.f32 %v3051_v48, %v5637_v42  ;;  %v3079_v11 = vand.u32 2147483648, %v5667_v32 }
 0x1b8   : > { %v3056_v52 = vmul.f32 %v4181_v59, %v3055_v5  ;;  %v5692_v27 = vadd.f32 %v2996_v17, %v2968_v39  ;;  %vm3078_vm8 = vcmp.eq.f32.partialorder %v3077_v7, 8.507059e+37 }
 0x1b9   : > { %v2911_v41 = vpop.f32.mrf.mxu2  ;;  %v3080_v61 = vor.u32 1.1754944e-38, %v3079_v11 }
 0x1ba   : > { %v2940_v14 = vpop.f32.mrf.mxu3  ;;  %v4183_v18 = vpop.eup %4182  ;;  %v3057_v34 = vadd.f32 %v4181_v59, %v3056_v52  ;;  %v2912_v40 = vadd.f32 %v2911_v41, %v2883_v54  ;;  %v3939_v63 = vmul.f32 -1.442695, %v5692_v27 }
 0x1bb   : > { %v5694_v37 = vpop.eup %4184  ;;  %v5697_v44 = vadd.f32 1.0, %v4183_v18 }
 0x1bc   : > { %v3061_v8 = vsel %vm3060_vm2, %v4181_v59, %v3057_v34  ;;  %v3069_v60 = vmul.f32 %v5694_v37, %v5667_v32  ;;  %v2941_v47 = vadd.f32 %v2940_v14, %v2912_v40  ;;  %vm3074_vm4 = vweird.f32 %v5694_v37 }
 0x1bd   : > { %v3066_v31 = vsel %vm3063_vm3, %v3065_v49, %v3061_v8  ;;  %4186 = vrcp.f32 %v5697_v44  ;;  %vm5727_vm6 = vmor %vm3073_vm5, %vm3074_vm4  ;;  %v2888_v59 = vadd.f32 %v5628_v13, %v2859_v21  ;;  %v3092_v53 = vand.u32 2147483647, %v5697_v44 }
 0x1be   : > { %v3159_v15 = vmul.f32 %v3066_v31, %v5641_v24  ;;  %v3070_v10 = vsub.f32 1.0, %v3069_v60  ;;  %4188 = vpow2.f32 %v3939_v63  ;;  %v2970_v30 = vadd.f32 %v2969_v46, %v2941_v47 }
 0x1bf   : > { %v2972_v38 = vpop.f32.mrf.mxu0  ;;  %v3001_v9 = vpop.f32.mrf.mxu1  ;;  %v3094_v32 = vand.u32 2147483648, %v5697_v44  ;;  %vm3088_vm9 = vweird.f32 %v5697_v44  ;;  %vm3093_vm11 = vcmp.eq.f32.partialorder %v3092_v53, 8.507059e+37 }
 0x1c0   : > { %v4094_v1 = vpack.c.bf16 %v3159_v15, %v3158_v23  ;;  %v3071_v58 = vmul.f32 %v5694_v37, %v3070_v10  ;;  %v5718_v25 = vadd.f32 %v2998_v56, %v2970_v30 }
 0x1c1   : > { %v2914_v22 = vpop.f32.mrf.mxu2  ;;  %v3095_v29 = vor.u32 1.1754944e-38, %v3094_v32 }
 0x1c2   : > { %v2943_v51 = vpop.f32.mrf.mxu3  ;;  %4095 = vst [vmem:[%s5710_s22] sm:$0xff] %v4094_v1   ;;  %v2915_v42 = vadd.f32 %v2914_v22, %v5630_v35  ;;  %v3072_v45 = vadd.f32 %v5694_v37, %v3071_v58  ;;  %v3940_v35 = vmul.f32 -1.442695, %v5718_v25 }
 0x1c3   : > { %v4187_v24 = vpop.eup %4186 }
 0x1c4   : > { %v4189_v36 = vpop.eup %4188  ;;  %v3084_v4 = vmul.f32 %v4187_v24, %v5697_v44  ;;  %v2944_v17 = vadd.f32 %v2943_v51, %v2915_v42  ;;  %v3076_v55 = vsel %vm5727_vm6, %v5694_v37, %v3072_v45  ;;  %vm3089_vm7 = vweird.f32 %v4187_v24 }
 0x1c5   : > { %v5724_v62 = vadd.f32 1.0, %v4189_v36  ;;  %v3081_v6 = vsel %vm3078_vm8, %v3080_v61, %v3076_v55  ;;  %vm3090_vm10 = vmor %vm3088_vm9, %vm3089_vm7 }
 0x1c6   : > { %v3085_v26 = vsub.f32 1.0, %v3084_v4  ;;  %v2973_v0 = vadd.f32 %v2972_v38, %v2944_v17  ;;  %v3160_v41 = vmul.f32 %v3081_v6, %v5647_v12 }
 0x1c7   : > { %4190 = vrcp.f32 %v5724_v62  ;;  %v2974_v19 = vpop.f32.mrf.mxu0  ;;  %v3003_v48 = vpop.f32.mrf.mxu1  ;;  %v3109_v31 = vand.u32 2147483648, %v5724_v62  ;;  %vm3103_vm13 = vweird.f32 %v5724_v62  ;;  %v3107_v15 = vand.u32 2147483647, %v5724_v62 }
 0x1c8   : > { %v3086_v28 = vmul.f32 %v4187_v24, %v3085_v26  ;;  %4192 = vpow2.f32 %v3940_v35  ;;  %v5738_v33 = vadd.f32 %v3001_v9, %v2973_v0 }
 0x1c9   : > { %v2916_v5 = vpop.f32.mrf.mxu2  ;;  %v3110_v42 = vor.u32 1.1754944e-38, %v3109_v31  ;;  %vm3108_vm0 = vcmp.eq.f32.partialorder %v3107_v15, 8.507059e+37 }
 0x1ca   : > { %v3087_v2 = vadd.f32 %v4187_v24, %v3086_v28  ;;  %v3941_v13 = vmul.f32 -1.442695, %v5738_v33  ;;  %v2917_v3 = vadd.f32 %v2916_v5, %v2888_v59  ;;  %v2945_v50 = vpop.f32.mrf.mxu3 }
 0x1cc   : > { %v3091_v52 = vsel %vm3090_vm10, %v4187_v24, %v3087_v2  ;;  %4194 = vpow2.f32 %v3941_v13  ;;  %v2946_v39 = vadd.f32 %v2945_v50, %v2917_v3 }
 0x1cd   : > { %v4191_v46 = vpop.eup %4190  ;;  %v3096_v43 = vsel %vm3093_vm11, %v3095_v29, %v3091_v52 }
 0x1ce   : > { %v4193_v54 = vpop.eup %4192  ;;  %v3161_v14 = vmul.f32 %v3096_v43, %v5658_v57  ;;  %v3099_v18 = vmul.f32 %v4191_v46, %v5724_v62  ;;  %v2975_v34 = vadd.f32 %v2974_v19, %v2946_v39  ;;  %vm3104_vm12 = vweird.f32 %v4191_v46 }
 0x1cf   : > { %v3035_v37 = vadd.f32 1.0, %v4193_v54  ;;  %vm3105_vm14 = vmor %vm3103_vm13, %vm3104_vm12 }
 0x1d0   : > { %v4099_v49 = vpack.c.bf16 %v3161_v14, %v3160_v41  ;;  %v3100_v44 = vsub.f32 1.0, %v3099_v18  ;;  %v5745_v56 = vadd.f32 %v3003_v48, %v2975_v34 }
 0x1d1   : > { %4196 = vrcp.f32 %v3035_v37  ;;  %v3122_v1 = vand.u32 2147483647, %v3035_v37  ;;  %v3124_v58 = vand.u32 2147483648, %v3035_v37  ;;  %vm3118_vm1 = vweird.f32 %v3035_v37 }
 0x1d2   : > { %v4195_v40 = vpop.eup %4194  ;;  %4111 = vst [vmem:[%s5710_s22 + $0x8] sm:$0xff] %v4099_v49   ;;  %v3942_v8 = vmul.f32 -1.442695, %v5745_v56  ;;  %v3101_v63 = vmul.f32 %v4191_v46, %v3100_v44 }
 0x1d3   : > { %v3036_v60 = vadd.f32 1.0, %v4195_v40  ;;  %v3125_v36 = vor.u32 1.1754944e-38, %v3124_v58  ;;  %vm3123_vm3 = vcmp.eq.f32.partialorder %v3122_v1, 8.507059e+37 }
 0x1d4   : > { %4198 = vpow2.f32 %v3942_v8  ;;  %v3102_v57 = vadd.f32 %v4191_v46, %v3101_v63 }
 0x1d5   : > { %4200 = vrcp.f32 %v3036_v60  ;;  %v3139_v0 = vand.u32 2147483648, %v3036_v60  ;;  %vm3133_vm5 = vweird.f32 %v3036_v60  ;;  %v3137_v59 = vand.u32 2147483647, %v3036_v60 }
 0x1d6   : > { %v3106_v22 = vsel %vm3105_vm14, %v4191_v46, %v3102_v57 }
 0x1d7   : > { %v4197_v12 = vpop.eup %4196  ;;  %v3111_v38 = vsel %vm3108_vm0, %v3110_v42, %v3106_v22  ;;  %vm3138_vm8 = vcmp.eq.f32.partialorder %v3137_v59, 8.507059e+37 }
 0x1d8   : > { %v3114_v16 = vmul.f32 %v4197_v12, %v3035_v37  ;;  %vm3119_vm15 = vweird.f32 %v4197_v12  ;;  %v3162_v11 = vmul.f32 %v3111_v38, %v5692_v27  ;;  %v3140_v27 = vor.u32 1.1754944e-38, %v3139_v0 }
 0x1d9   : > { %vm3120_vm2 = vmor %vm3118_vm1, %vm3119_vm15 }
 0x1da   : > { %v4199_v23 = vpop.eup %4198  ;;  %v3115_v10 = vsub.f32 1.0, %v3114_v16 }
 0x1db   : > { %v4201_v47 = vpop.eup %4200  ;;  %v3037_v30 = vadd.f32 1.0, %v4199_v23 }
 0x1dc   : > { %v3116_v51 = vmul.f32 %v4197_v12, %v3115_v10  ;;  %v3129_v21 = vmul.f32 %v4201_v47, %v3036_v60  ;;  %vm3134_vm4 = vweird.f32 %v4201_v47 }
 0x1dd   : > { %4202 = vrcp.f32 %v3037_v30  ;;  %vm3135_vm6 = vmor %vm3133_vm5, %vm3134_vm4  ;;  %v3154_v53 = vand.u32 2147483648, %v3037_v30  ;;  %v3152_v61 = vand.u32 2147483647, %v3037_v30  ;;  %vm3148_vm9 = vweird.f32 %v3037_v30 }
 0x1de   : > { %v3117_v24 = vadd.f32 %v4197_v12, %v3116_v51  ;;  %v3130_v45 = vsub.f32 1.0, %v3129_v21 }
 0x1df   : > { %v3155_v2 = vor.u32 1.1754944e-38, %v3154_v53  ;;  %vm3153_vm11 = vcmp.eq.f32.partialorder %v3152_v61, 8.507059e+37 }
 0x1e0   : > { %v3121_v4 = vsel %vm3120_vm2, %v4197_v12, %v3117_v24  ;;  %v3131_v17 = vmul.f32 %v4201_v47, %v3130_v45 }
 0x1e1   : > { %v3126_v7 = vsel %vm3123_vm3, %v3125_v36, %v3121_v4 }
 0x1e2   : > { %v3163_v62 = vmul.f32 %v3126_v7, %v5718_v25  ;;  %v3132_v20 = vadd.f32 %v4201_v47, %v3131_v17 }
 0x1e3   : > { %v4203_v35 = vpop.eup %4202 }
 0x1e4   : > { %v4104_v9 = vpack.c.bf16 %v3163_v62, %v3162_v11  ;;  %v3144_v26 = vmul.f32 %v4203_v35, %v3037_v30  ;;  %v3136_v32 = vsel %vm3135_vm6, %v4201_v47, %v3132_v20  ;;  %vm3149_vm7 = vweird.f32 %v4203_v35 }
 0x1e5   : > { %v3141_v5 = vsel %vm3138_vm8, %v3140_v27, %v3136_v32  ;;  %vm3150_vm10 = vmor %vm3148_vm9, %vm3149_vm7 }
 0x1e6   : > { %4112 = vst [vmem:[%s5710_s22 + $0x10] sm:$0xff] %v4104_v9   ;;  %v3145_v55 = vsub.f32 1.0, %v3144_v26  ;;  %v3164_v6 = vmul.f32 %v3141_v5, %v5738_v33 }
 0x1e8   : > { %v3146_v28 = vmul.f32 %v4203_v35, %v3145_v55 }
 0x1ea   : > { %v3147_v25 = vadd.f32 %v4203_v35, %v3146_v28 }
 0x1ec   : > { %v3151_v13 = vsel %vm3150_vm10, %v4203_v35, %v3147_v25 }
 0x1ed   : > { %v3156_v3 = vsel %vm3153_vm11, %v3155_v2, %v3151_v13 }
 0x1ee   : > { %v3165_v29 = vmul.f32 %v3156_v3, %v5745_v56 }
 0x1f0   : > { %v4109_v50 = vpack.c.bf16 %v3165_v29, %v3164_v6 }
 0x1f2   : > { %4113 = vst [vmem:[%s5710_s22 + $0x18] sm:$0xff] %v4109_v50  }
 0x1f3 PF: > { %s17_s28 = sadd.s32 1, %s4242_s28   ;;  %s5845_s24 = smov %s4234_s26 }
 0x1f4   : > { %p14_p13 = scmp.ge.s32.totalorder %s17_s28, 6   ;;  %s5846_s25 = smov %s4238_s27 }
 0x1f5   : > { %s5847_s26 = smov %s5850_s29  ;;  %s5848_s27 = smov %s5854_s30 }
 0x1f6   :  { %16 = sbr.rel (!%p14_p13) target bundleno = 3 (0x3), region = 87 }

</bundles_post_ra>
